<compile_context>
chip_gen: v7x
topology: tpu7x:2x2x1
jax: 0.10.0
libtpu: 0.0.40
codegen_flags: <defaults>
</compile_context>

<pallas_src>
import functools

import jax
import jax.numpy as jnp
from jax.experimental import pallas as pl
from jax.experimental.pallas import tpu as pltpu

# ----------------------------------------------------------------------------
# Config (scaled-down synthetic sizes; torch uses 512/1024-wide layers)
# ----------------------------------------------------------------------------
END_LAYER = 2
STRIDE = 2 ** (END_LAYER + 1)                 # = 8, as in the torch module
ROI_OUT = (256 // STRIDE, 128 // STRIDE)      # = (32, 16)
SAMPLING_RATIO = 2
BACKBONE_CH = (128, 128, 128)                 # torch backbone.out_channels=512 (scaled
ID_CH = 128                                   # down, kept 128-lane dense for v5e stores)
IMG_CH_PAD = 8                                # RGB zero-padded to 8 channels
KSIZE = 3
ROW_TILE = 8                                  # output-row tile per conv grid step

COMPUTE_DTYPE = jnp.bfloat16                  # MXU-native operands; accumulation is f32
VMEM_LIMIT_BYTES = 48 * 1024 * 1024           # fits v5e/v6e (128 MiB) and v7x (64 MiB)


def _cparams(dim_sem):
    return pltpu.CompilerParams(dimension_semantics=dim_sem,
                                vmem_limit_bytes=VMEM_LIMIT_BYTES)


# ----------------------------------------------------------------------------
# Direct 3x3 'same' conv: tap-concat patches tile -> one MXU matmul per row tile
# ----------------------------------------------------------------------------
def _conv_kernel(x_ref, w_ref, b_ref, o_ref, *, s, cin, Tr, Wo, relu):
    # x_ref: s==1 -> (1, Hp, Wp, cin) padded NHWC block
    #        s==2 -> (1, Hp/2, 2, Wp/2, 2*cin) contiguous parity view
    # w_ref: (9*cin, cout) bf16 (tap-major rows), b_ref: (1, cout) f32
    # o_ref: (1, Tr, Wo, cout)
    r0 = pl.multiple_of(pl.program_id(1) * Tr, Tr)
    taps = []
    for di in range(KSIZE):
        for dj in range(KSIZE):
            if s == 1:
                win = x_ref[0, pl.ds(r0 + di, Tr), pl.ds(dj, Wo), :]
            else:  # stride 2: y = 2r+di, x = 2w+dj folded into the parity view
                win = x_ref[0, pl.ds(r0 + di // 2, Tr), di % 2,
                            pl.ds(dj // 2, Wo), pl.ds((dj % 2) * cin, cin)]
            taps.append(win)                                     # (Tr, Wo, cin)
    patches = jnp.concatenate(taps, axis=-1).reshape(Tr * Wo, KSIZE * KSIZE * cin)
    y = jnp.dot(patches, w_ref[...], preferred_element_type=jnp.float32) + b_ref[...]
    if relu:
        y = jnp.maximum(y, 0.0)
    o_ref[0] = y.reshape(Tr, Wo, -1).astype(o_ref.dtype)


def conv2d(x, w_flat, bias, *, stride, relu=True, out_dtype=COMPUTE_DTYPE,
           row_tile=ROW_TILE):
    """Direct 3x3 'same' conv (pad=1), stride in {1, 2}. x: (B,H,W,Cin) NHWC."""
    kkcin, cout = w_flat.shape
    cin = kkcin // (KSIZE * KSIZE)
    B, H, W, C = x.shape
    assert C == cin, (C, cin)
    s = stride
    assert s in (1, 2)
    Ho = (H + 2 - KSIZE) // s + 1
    Wo = (W + 2 - KSIZE) // s + 1
    Tr = row_tile if Ho % row_tile == 0 else Ho

    if s == 1:
        Hp, Wp = Ho + 2, Wo + 2
        xv = jnp.pad(x, ((0, 0), (1, Hp - H - 1), (1, Wp - W - 1), (0, 0)))
        in_block = (1, Hp, Wp, cin)
        in_map = lambda b, t: (b, 0, 0, 0)
    else:
        Hp, Wp = 2 * Ho + 2, 2 * Wo + 2
        xv = jnp.pad(x, ((0, 0), (1, Hp - H - 1), (1, Wp - W - 1), (0, 0)))
        # contiguous (bitcast) parity view: [b, y//2, y%2, x//2, (x%2)*cin + c]
        xv = xv.reshape(B, Hp // 2, 2, Wp // 2, 2 * cin)
        in_block = (1, Hp // 2, 2, Wp // 2, 2 * cin)
        in_map = lambda b, t: (b, 0, 0, 0, 0)

    kern = functools.partial(_conv_kernel, s=s, cin=cin, Tr=Tr, Wo=Wo, relu=relu)
    return pl.pallas_call(
        kern,
        out_shape=jax.ShapeDtypeStruct((B, Ho, Wo, cout), out_dtype),
        grid_spec=pltpu.PrefetchScalarGridSpec(
            num_scalar_prefetch=0,
            grid=(B, Ho // Tr),
            in_specs=[
                pl.BlockSpec(in_block, in_map),
                pl.BlockSpec((kkcin, cout), lambda b, t: (0, 0)),
                pl.BlockSpec((1, cout), lambda b, t: (0, 0)),
            ],
            out_specs=pl.BlockSpec((1, Tr, Wo, cout), lambda b, t: (b, t, 0, 0)),
        ),
        compiler_params=_cparams(("parallel", "parallel")),
    )(xv, w_flat, bias)


# ----------------------------------------------------------------------------
# id_net conv (stride 1) fused with global-average-pool + L2 normalize
# ----------------------------------------------------------------------------
def _conv_gap_l2_kernel(x_ref, w_ref, b_ref, o_ref, acc_ref, *, Tr, Wo, inv_hw):
    t = pl.program_id(1)

    @pl.when(t == 0)
    def _():
        acc_ref[...] = jnp.zeros_like(acc_ref)

    cin = x_ref.shape[-1]
    r0 = pl.multiple_of(t * Tr, Tr)
    taps = [x_ref[0, pl.ds(r0 + di, Tr), pl.ds(dj, Wo), :]
            for di in range(KSIZE) for dj in range(KSIZE)]
    patches = jnp.concatenate(taps, axis=-1).reshape(Tr * Wo, KSIZE * KSIZE * cin)
    y = jnp.dot(patches, w_ref[...], preferred_element_type=jnp.float32) + b_ref[...]
    y = jnp.maximum(y, 0.0)                                  # ReLU
    acc_ref[...] += jnp.sum(y, axis=0, keepdims=True)        # partial GAP sum (1, C)

    @pl.when(t == pl.num_programs(1) - 1)
    def _():
        mean = acc_ref[...] * inv_hw                         # global average pool
        ssq = jnp.sum(mean * mean, axis=-1, keepdims=True)
        # F.normalize: x / max(||x||, 1e-12) == x * rsqrt(max(||x||^2, 1e-24))
        o_ref[0] = mean * jax.lax.rsqrt(jnp.maximum(ssq, 1e-24))


def id_conv_gap_l2(x, w_flat, bias, *, row_tile=ROW_TILE):
    """stride-1 3x3 conv + ReLU, fused GAP + L2 normalize. x: (R,H,W,Cin) bf16."""
    kkcin, cout = w_flat.shape
    cin = kkcin // (KSIZE * KSIZE)
    R, H, W, C = x.shape
    assert C == cin, (C, cin)
    Ho, Wo = H, W
    Tr = row_tile if Ho % row_tile == 0 else Ho
    xp = jnp.pad(x, ((0, 0), (1, 1), (1, 1), (0, 0)))

    kern = functools.partial(_conv_gap_l2_kernel, Tr=Tr, Wo=Wo,
                             inv_hw=1.0 / (Ho * Wo))
    out = pl.pallas_call(
        kern,
        out_shape=jax.ShapeDtypeStruct((R, 1, cout), jnp.float32),
        grid_spec=pltpu.PrefetchScalarGridSpec(
            num_scalar_prefetch=0,
            grid=(R, Ho // Tr),
            in_specs=[
                pl.BlockSpec((1, Ho + 2, Wo + 2, cin), lambda r, t: (r, 0, 0, 0)),
                pl.BlockSpec((kkcin, cout), lambda r, t: (0, 0)),
                pl.BlockSpec((1, cout), lambda r, t: (0, 0)),
            ],
            out_specs=pl.BlockSpec((1, 1, cout), lambda r, t: (r, 0, 0)),
            scratch_shapes=[pltpu.VMEM((1, cout), jnp.float32)],
        ),
        compiler_params=_cparams(("parallel", "arbitrary")),
    )(xp, w_flat, bias)
    return out.reshape(R, cout)


# ----------------------------------------------------------------------------
# Separable RoIAlign: per RoI, contract H with wy (2-D MXU matmul), then
# contract W with wx (batched einsum). Feature block picked by scalar-prefetched
# batch index. wy/wx stay f32 for parity with torchvision.
# ----------------------------------------------------------------------------
def _roi_align_kernel(bidx_ref, wy_ref, wx_ref, f_ref, o_ref, t_ref,
                      *, out_h, out_w, H, W, C):
    del bidx_ref                                           # consumed by index_maps
    f = f_ref[0].astype(jnp.float32)                       # (H, W*C)
    t1 = jnp.dot(wy_ref[0], f, preferred_element_type=jnp.float32)   # (out_h, W*C)
    for x in range(W):                                     # relayout lanes -> (W, C)
        t_ref[:, x, :] = t1[:, x * C:(x + 1) * C]
    wxb = jnp.broadcast_to(wx_ref[0][None], (out_h, out_w, W))
    out = jnp.einsum('pqx,pxc->pqc', wxb, t_ref[...],
                     preferred_element_type=jnp.float32)   # (out_h, out_w, C)
    o_ref[0] = out.astype(o_ref.dtype)


def _bilinear_pool_weights(lo, bin_sz, n_out, sr, in_size):
    """(R,) start coord / bin size -> (R, n_out, in_size) interp+avg-pool weights."""
    p = jnp.arange(n_out, dtype=jnp.float32)
    ii = (jnp.arange(sr, dtype=jnp.float32) + 0.5) / sr
    coords = (lo[:, None, None]
              + (p[None, :, None] + ii[None, None, :]) * bin_sz[:, None, None])
    valid = (coords >= -1.0) & (coords <= in_size)         # torchvision range rule
    cc = jnp.clip(coords, 0.0, in_size - 1)
    g = jnp.arange(in_size, dtype=jnp.float32)
    w = jnp.maximum(0.0, 1.0 - jnp.abs(cc[..., None] - g))  # bilinear tent weights
    w = jnp.where(valid[..., None], w, 0.0)
    return w.mean(axis=2)                                   # mean over sampling_ratio


def roi_align(feat, boxes, batch_idx, out_size, spatial_scale, sampling_ratio):
    """aligned=True torchvision RoIAlign. feat: (B,H,W,C); boxes: (R,4) xyxy."""
    out_h, out_w = out_size
    B, H, W, C = feat.shape
    R = boxes.shape[0]

    x1 = boxes[:, 0] * spatial_scale - 0.5
    y1 = boxes[:, 1] * spatial_scale - 0.5
    x2 = boxes[:, 2] * spatial_scale - 0.5
    y2 = boxes[:, 3] * spatial_scale - 0.5
    wy = _bilinear_pool_weights(y1, (y2 - y1) / out_h, out_h, sampling_ratio, H)
    wx = _bilinear_pool_weights(x1, (x2 - x1) / out_w, out_w, sampling_ratio, W)

    f2d = feat.reshape(B, H, W * C)                        # contiguous (free) view

    out = pl.pallas_call(
        functools.partial(_roi_align_kernel, out_h=out_h, out_w=out_w,
                          H=H, W=W, C=C),
        out_shape=jax.ShapeDtypeStruct((R, out_h, out_w, C), feat.dtype),
        grid_spec=pltpu.PrefetchScalarGridSpec(
            num_scalar_prefetch=1,
            grid=(R,),
            in_specs=[
                pl.BlockSpec((1, out_h, H), lambda r, b: (r, 0, 0)),
                pl.BlockSpec((1, out_w, W), lambda r, b: (r, 0, 0)),
                pl.BlockSpec((1, H, W * C), lambda r, b: (b[r], 0, 0)),
            ],
            out_specs=pl.BlockSpec((1, out_h, out_w, C), lambda r, b: (r, 0, 0, 0)),
            scratch_shapes=[pltpu.VMEM((out_h, W, C), jnp.float32)],
        ),
        compiler_params=_cparams(("parallel",)),
    )(batch_idx, wy, wx, f2d)
    return out


# ----------------------------------------------------------------------------
# Parameters (deterministic, synthetic); normalization folded into conv1
# ----------------------------------------------------------------------------
def init_params(key):
    ks = jax.random.split(key, 4)

    def he(k, cin, cout):
        return (jax.random.normal(k, (KSIZE, KSIZE, cin, cout), jnp.float32)
                * jnp.sqrt(2.0 / (KSIZE * KSIZE * cin)))

    def flat(w):  # (3,3,cin,cout) -> (9*cin, cout) bf16, tap-major rows
        kh, kw, cin, cout = w.shape
        return w.reshape(kh * kw * cin, cout).astype(COMPUTE_DTYPE)

    c1, c2, c3 = BACKBONE_CH

    # layer 1: fold (x - mean) / std and the 3->IMG_CH_PAD zero pad into w/b
    mean = jnp.array([0.485, 0.456, 0.406], jnp.float32)
    std = jnp.array([0.229, 0.224, 0.225], jnp.float32)
    w1 = he(ks[0], 3, c1)
    w1_eff = w1 / std[None, None, :, None]
    b1_eff = -(w1 * (mean / std)[None, None, :, None]).sum(axis=(0, 1, 2))
    w1_eff = jnp.pad(w1_eff, ((0, 0), (0, 0), (0, IMG_CH_PAD - 3), (0, 0)))

    return {
        "bb_w1": flat(w1_eff),            "bb_b1": b1_eff.reshape(1, c1),
        "bb_w2": flat(he(ks[1], c1, c2)), "bb_b2": jnp.zeros((1, c2), jnp.float32),
        "bb_w3": flat(he(ks[2], c2, c3)), "bb_b3": jnp.zeros((1, c3), jnp.float32),
        "id_w1": flat(he(ks[3], c3, ID_CH)), "id_b1": jnp.zeros((1, ID_CH), jnp.float32),
    }


# ----------------------------------------------------------------------------
# PersonSearch.forward(query=True)
# ----------------------------------------------------------------------------
def person_search_query(images_nchw, boxes_list, params):
    """images_nchw: (B,3,H,W) float32; boxes_list: list of (Ni,4) xyxy boxes."""
    x = jnp.transpose(images_nchw, (0, 2, 3, 1))             # NCHW -> NHWC
    # (x - mean) / std normalization is folded into bb_w1 / bb_b1 (affine-linear).
    x = jnp.pad(x, ((0, 0), (0, 0), (0, 0), (0, IMG_CH_PAD - 3)))
    x = x.astype(COMPUTE_DTYPE)

    # backbone (base_net end_layer=2): total stride 8
    f = conv2d(x, params["bb_w1"], params["bb_b1"], stride=2, relu=True)
    f = conv2d(f, params["bb_w2"], params["bb_b2"], stride=2, relu=True)
    f = conv2d(f, params["bb_w3"], params["bb_b3"], stride=2, relu=True)

    # RoIAlign over per-image target boxes; boxes are concatenated per image in
    # order, i.e. already sorted by batch index so consecutive RoI grid steps
    # reuse the resident feature block (no re-DMA).
    boxes = jnp.concatenate(boxes_list, axis=0)
    batch_idx = jnp.concatenate(
        [jnp.full((b.shape[0],), i, jnp.int32) for i, b in enumerate(boxes_list)],
        axis=0)
    roi_feats = roi_align(f, boxes, batch_idx, ROI_OUT, 1.0 / STRIDE,
                          SAMPLING_RATIO)                     # (R, 32, 16, Cbb)

    # id_net (start_layer=3, last_stride=1) + fused global pool + F.normalize
    return id_conv_gap_l2(roi_feats, params["id_w1"], params["id_b1"])  # (R, ID_CH)


if __name__ == "__main__":
    key = jax.random.PRNGKey(0)
    k_img, k_param = jax.random.split(key)

    images = jax.random.uniform(k_img, (2, 3, 64, 64), jnp.float32)
    boxes0 = jnp.array([[4., 8., 36., 56.],
                        [20., 4., 60., 60.]], jnp.float32)
    boxes1 = jnp.array([[8., 8., 48., 48.]], jnp.float32)
    params = init_params(k_param)

    fwd = jax.jit(person_search_query)
    out = fwd(images, [boxes0, boxes1], params)
    out = jax.block_until_ready(out)
    assert out.shape == (3, ID_CH), out.shape
    assert bool(jnp.all(jnp.isfinite(out)))
    print("KERNEL_OK")
</pallas_src>

<mosaic_0001>
module attributes {stable_mosaic.version = 11 : i64} {
  func.func @_conv_kernel(%arg0: i32, %arg1: i32, %arg2: memref<1x33x2x33x16xbf16, #tpu.memory_space<vmem>>, %arg3: memref<72x128xbf16, #tpu.memory_space<vmem>>, %arg4: memref<1x128xf32, #tpu.memory_space<vmem>>, %arg5: memref<1x8x32x128xbf16, #tpu.memory_space<vmem>>) attributes {dimension_semantics = [#tpu.dimension_semantics<parallel>, #tpu.dimension_semantics<parallel>], iteration_bounds = array<i64: 2, 4>, scalar_prefetch = 0 : i64, scratch_operands = 0 : i64, tpu.core_type = #tpu.core_type<tc>, window_params = [{transform_indices = @transform_0, window_bounds = array<i64: 1, 33, 2, 33, 16>}, {pipeline_mode = #tpu.pipeline_mode<synchronous>, transform_indices = @transform_1, window_bounds = array<i64: 72, 128>}, {pipeline_mode = #tpu.pipeline_mode<synchronous>, transform_indices = @transform_2, window_bounds = array<i64: 1, 128>}, {transform_indices = @transform_3, window_bounds = array<i64: 1, 8, 32, 128>}]} {
    %c8_i32 = arith.constant 8 : i32
    %0 = arith.muli %arg1, %c8_i32 : i32
    %1 = tpu.assume_multiple %0, 8 : i32
    %c0_i32 = arith.constant 0 : i32
    %2 = arith.addi %1, %c0_i32 : i32
    %c0 = arith.constant 0 : index
    %3 = arith.index_cast %2 : i32 to index
    %c0_0 = arith.constant 0 : index
    %c0_1 = arith.constant 0 : index
    %c0_2 = arith.constant 0 : index
    %4 = vector.load %arg2[%c0, %3, %c0_0, %c0_1, %c0_2] : memref<1x33x2x33x16xbf16, #tpu.memory_space<vmem>>, vector<1x8x1x32x8xbf16>
    %5 = vector.shape_cast %4 : vector<1x8x1x32x8xbf16> to vector<8x32x8xbf16>
    %c0_i32_3 = arith.constant 0 : i32
    %6 = arith.addi %1, %c0_i32_3 : i32
    %c0_4 = arith.constant 0 : index
    %7 = arith.index_cast %6 : i32 to index
    %c0_5 = arith.constant 0 : index
    %c0_6 = arith.constant 0 : index
    %c8 = arith.constant 8 : index
    %8 = vector.load %arg2[%c0_4, %7, %c0_5, %c0_6, %c8] : memref<1x33x2x33x16xbf16, #tpu.memory_space<vmem>>, vector<1x8x1x32x8xbf16>
    %9 = vector.shape_cast %8 : vector<1x8x1x32x8xbf16> to vector<8x32x8xbf16>
    %c0_i32_7 = arith.constant 0 : i32
    %10 = arith.addi %1, %c0_i32_7 : i32
    %c0_8 = arith.constant 0 : index
    %11 = arith.index_cast %10 : i32 to index
    %c0_9 = arith.constant 0 : index
    %c1 = arith.constant 1 : index
    %c0_10 = arith.constant 0 : index
    %12 = vector.load %arg2[%c0_8, %11, %c0_9, %c1, %c0_10] : memref<1x33x2x33x16xbf16, #tpu.memory_space<vmem>>, vector<1x8x1x32x8xbf16>
    %13 = vector.shape_cast %12 : vector<1x8x1x32x8xbf16> to vector<8x32x8xbf16>
    %c0_i32_11 = arith.constant 0 : i32
    %14 = arith.addi %1, %c0_i32_11 : i32
    %c0_12 = arith.constant 0 : index
    %15 = arith.index_cast %14 : i32 to index
    %c1_13 = arith.constant 1 : index
    %c0_14 = arith.constant 0 : index
    %c0_15 = arith.constant 0 : index
    %16 = vector.load %arg2[%c0_12, %15, %c1_13, %c0_14, %c0_15] : memref<1x33x2x33x16xbf16, #tpu.memory_space<vmem>>, vector<1x8x1x32x8xbf16>
    %17 = vector.shape_cast %16 : vector<1x8x1x32x8xbf16> to vector<8x32x8xbf16>
    %c0_i32_16 = arith.constant 0 : i32
    %18 = arith.addi %1, %c0_i32_16 : i32
    %c0_17 = arith.constant 0 : index
    %19 = arith.index_cast %18 : i32 to index
    %c1_18 = arith.constant 1 : index
    %c0_19 = arith.constant 0 : index
    %c8_20 = arith.constant 8 : index
    %20 = vector.load %arg2[%c0_17, %19, %c1_18, %c0_19, %c8_20] : memref<1x33x2x33x16xbf16, #tpu.memory_space<vmem>>, vector<1x8x1x32x8xbf16>
    %21 = vector.shape_cast %20 : vector<1x8x1x32x8xbf16> to vector<8x32x8xbf16>
    %c0_i32_21 = arith.constant 0 : i32
    %22 = arith.addi %1, %c0_i32_21 : i32
    %c0_22 = arith.constant 0 : index
    %23 = arith.index_cast %22 : i32 to index
    %c1_23 = arith.constant 1 : index
    %c1_24 = arith.constant 1 : index
    %c0_25 = arith.constant 0 : index
    %24 = vector.load %arg2[%c0_22, %23, %c1_23, %c1_24, %c0_25] : memref<1x33x2x33x16xbf16, #tpu.memory_space<vmem>>, vector<1x8x1x32x8xbf16>
    %25 = vector.shape_cast %24 : vector<1x8x1x32x8xbf16> to vector<8x32x8xbf16>
    %c1_i32 = arith.constant 1 : i32
    %26 = arith.addi %1, %c1_i32 : i32
    %c0_26 = arith.constant 0 : index
    %27 = arith.index_cast %26 : i32 to index
    %c0_27 = arith.constant 0 : index
    %c0_28 = arith.constant 0 : index
    %c0_29 = arith.constant 0 : index
    %28 = vector.load %arg2[%c0_26, %27, %c0_27, %c0_28, %c0_29] : memref<1x33x2x33x16xbf16, #tpu.memory_space<vmem>>, vector<1x8x1x32x8xbf16>
    %29 = vector.shape_cast %28 : vector<1x8x1x32x8xbf16> to vector<8x32x8xbf16>
    %c1_i32_30 = arith.constant 1 : i32
    %30 = arith.addi %1, %c1_i32_30 : i32
    %c0_31 = arith.constant 0 : index
    %31 = arith.index_cast %30 : i32 to index
    %c0_32 = arith.constant 0 : index
    %c0_33 = arith.constant 0 : index
    %c8_34 = arith.constant 8 : index
    %32 = vector.load %arg2[%c0_31, %31, %c0_32, %c0_33, %c8_34] : memref<1x33x2x33x16xbf16, #tpu.memory_space<vmem>>, vector<1x8x1x32x8xbf16>
    %33 = vector.shape_cast %32 : vector<1x8x1x32x8xbf16> to vector<8x32x8xbf16>
    %c1_i32_35 = arith.constant 1 : i32
    %34 = arith.addi %1, %c1_i32_35 : i32
    %c0_36 = arith.constant 0 : index
    %35 = arith.index_cast %34 : i32 to index
    %c0_37 = arith.constant 0 : index
    %c1_38 = arith.constant 1 : index
    %c0_39 = arith.constant 0 : index
    %36 = vector.load %arg2[%c0_36, %35, %c0_37, %c1_38, %c0_39] : memref<1x33x2x33x16xbf16, #tpu.memory_space<vmem>>, vector<1x8x1x32x8xbf16>
    %37 = vector.shape_cast %36 : vector<1x8x1x32x8xbf16> to vector<8x32x8xbf16>
    %38 = tpu.concatenate %5, %9, %13, %17, %21, %25, %29, %33, %37 in 2 : vector<8x32x8xbf16>, vector<8x32x8xbf16>, vector<8x32x8xbf16>, vector<8x32x8xbf16>, vector<8x32x8xbf16>, vector<8x32x8xbf16>, vector<8x32x8xbf16>, vector<8x32x8xbf16>, vector<8x32x8xbf16> -> vector<8x32x72xbf16>
    %39 = vector.shape_cast %38 : vector<8x32x72xbf16> to vector<256x72xbf16>
    %c0_40 = arith.constant 0 : index
    %c0_41 = arith.constant 0 : index
    %40 = vector.load %arg3[%c0_40, %c0_41] : memref<72x128xbf16, #tpu.memory_space<vmem>>, vector<72x128xbf16>
    %cst = arith.constant dense<0.000000e+00> : vector<256x128xf32>
    %41 = tpu.matmul %39, %40, %cst {dimension_numbers = #tpu.dot_dimension_numbers<[1], [0], [0], [1], [0, 0, 1, 1], [], []>} : vector<256x72xbf16>, vector<72x128xbf16>, vector<256x128xf32> -> vector<256x128xf32>
    %c0_42 = arith.constant 0 : index
    %c0_43 = arith.constant 0 : index
    %42 = vector.load %arg4[%c0_42, %c0_43] : memref<1x128xf32, #tpu.memory_space<vmem>>, vector<1x128xf32>
    %43 = vector.broadcast %42 : vector<1x128xf32> to vector<256x128xf32>
    %44 = arith.addf %41, %43 : vector<256x128xf32>
    %cst_44 = arith.constant 0.000000e+00 : f32
    %45 = vector.broadcast %cst_44 : f32 to vector<256x128xf32>
    %46 = arith.maximumf %44, %45 : vector<256x128xf32>
    %47 = vector.shape_cast %46 : vector<256x128xf32> to vector<8x32x128xf32>
    %48 = arith.truncf %47 : vector<8x32x128xf32> to vector<8x32x128xbf16>
    %c0_45 = arith.constant 0 : index
    %c0_46 = arith.constant 0 : index
    %c0_47 = arith.constant 0 : index
    %c0_48 = arith.constant 0 : index
    %49 = vector.load %arg5[%c0_45, %c0_46, %c0_47, %c0_48] : memref<1x8x32x128xbf16, #tpu.memory_space<vmem>>, vector<1x8x32x128xbf16>
    %50 = vector.shape_cast %49 : vector<1x8x32x128xbf16> to vector<8x32x128xbf16>
    %51 = vector.shape_cast %48 : vector<8x32x128xbf16> to vector<1x8x32x128xbf16>
    tpu.vector_store %arg5[%c0_45, %c0_46, %c0_47, %c0_48], %51 {strides = array<i32>} : memref<1x8x32x128xbf16, #tpu.memory_space<vmem>>, vector<1x8x32x128xbf16>,
    return
  }
  func.func @transform_0(%arg0: i32, %arg1: i32) -> (i32, i32, i32, i32, i32) {
    %c0_i32 = arith.constant 0 : i32
    %c0_i32_0 = arith.constant 0 : i32
    %c0_i32_1 = arith.constant 0 : i32
    %c0_i32_2 = arith.constant 0 : i32
    %c0_i32_3 = arith.constant 0 : i32
    return %arg0, %c0_i32, %c0_i32_0, %c0_i32_1, %c0_i32_2 : i32, i32, i32, i32, i32
  }
  func.func @transform_1(%arg0: i32, %arg1: i32) -> (i32, i32) {
    %c0_i32 = arith.constant 0 : i32
    %c0_i32_0 = arith.constant 0 : i32
    %c0_i32_1 = arith.constant 0 : i32
    return %c0_i32, %c0_i32_0 : i32, i32
  }
  func.func @transform_2(%arg0: i32, %arg1: i32) -> (i32, i32) {
    %c0_i32 = arith.constant 0 : i32
    %c0_i32_0 = arith.constant 0 : i32
    %c0_i32_1 = arith.constant 0 : i32
    return %c0_i32, %c0_i32_0 : i32, i32
  }
  func.func @transform_3(%arg0: i32, %arg1: i32) -> (i32, i32, i32, i32) {
    %c0_i32 = arith.constant 0 : i32
    %c0_i32_0 = arith.constant 0 : i32
    %c0_i32_1 = arith.constant 0 : i32
    return %arg0, %arg1, %c0_i32, %c0_i32_0 : i32, i32, i32, i32
  }
}

module attributes {stable_mosaic.version = 11 : i64} {
  func.func @_conv_kernel(%arg0: i32, %arg1: i32, %arg2: memref<1x17x2x17x256xbf16, #tpu.memory_space<vmem>>, %arg3: memref<1152x128xbf16, #tpu.memory_space<vmem>>, %arg4: memref<1x128xf32, #tpu.memory_space<vmem>>, %arg5: memref<1x8x16x128xbf16, #tpu.memory_space<vmem>>) attributes {dimension_semantics = [#tpu.dimension_semantics<parallel>, #tpu.dimension_semantics<parallel>], iteration_bounds = array<i64: 2, 2>, scalar_prefetch = 0 : i64, scratch_operands = 0 : i64, tpu.core_type = #tpu.core_type<tc>, window_params = [{transform_indices = @transform_0, window_bounds = array<i64: 1, 17, 2, 17, 256>}, {pipeline_mode = #tpu.pipeline_mode<synchronous>, transform_indices = @transform_1, window_bounds = array<i64: 1152, 128>}, {pipeline_mode = #tpu.pipeline_mode<synchronous>, transform_indices = @transform_2, window_bounds = array<i64: 1, 128>}, {transform_indices = @transform_3, window_bounds = array<i64: 1, 8, 16, 128>}]} {
    %c8_i32 = arith.constant 8 : i32
    %0 = arith.muli %arg1, %c8_i32 : i32
    %1 = tpu.assume_multiple %0, 8 : i32
    %c0_i32 = arith.constant 0 : i32
    %2 = arith.addi %1, %c0_i32 : i32
    %c0 = arith.constant 0 : index
    %3 = arith.index_cast %2 : i32 to index
    %c0_0 = arith.constant 0 : index
    %c0_1 = arith.constant 0 : index
    %c0_2 = arith.constant 0 : index
    %4 = vector.load %arg2[%c0, %3, %c0_0, %c0_1, %c0_2] : memref<1x17x2x17x256xbf16, #tpu.memory_space<vmem>>, vector<1x8x1x16x128xbf16>
    %5 = vector.shape_cast %4 : vector<1x8x1x16x128xbf16> to vector<8x16x128xbf16>
    %c0_i32_3 = arith.constant 0 : i32
    %6 = arith.addi %1, %c0_i32_3 : i32
    %c0_4 = arith.constant 0 : index
    %7 = arith.index_cast %6 : i32 to index
    %c0_5 = arith.constant 0 : index
    %c0_6 = arith.constant 0 : index
    %c128 = arith.constant 128 : index
    %8 = vector.load %arg2[%c0_4, %7, %c0_5, %c0_6, %c128] : memref<1x17x2x17x256xbf16, #tpu.memory_space<vmem>>, vector<1x8x1x16x128xbf16>
    %9 = vector.shape_cast %8 : vector<1x8x1x16x128xbf16> to vector<8x16x128xbf16>
    %c0_i32_7 = arith.constant 0 : i32
    %10 = arith.addi %1, %c0_i32_7 : i32
    %c0_8 = arith.constant 0 : index
    %11 = arith.index_cast %10 : i32 to index
    %c0_9 = arith.constant 0 : index
    %c1 = arith.constant 1 : index
    %c0_10 = arith.constant 0 : index
    %12 = vector.load %arg2[%c0_8, %11, %c0_9, %c1, %c0_10] : memref<1x17x2x17x256xbf16, #tpu.memory_space<vmem>>, vector<1x8x1x16x128xbf16>
    %13 = vector.shape_cast %12 : vector<1x8x1x16x128xbf16> to vector<8x16x128xbf16>
    %c0_i32_11 = arith.constant 0 : i32
    %14 = arith.addi %1, %c0_i32_11 : i32
    %c0_12 = arith.constant 0 : index
    %15 = arith.index_cast %14 : i32 to index
    %c1_13 = arith.constant 1 : index
    %c0_14 = arith.constant 0 : index
    %c0_15 = arith.constant 0 : index
    %16 = vector.load %arg2[%c0_12, %15, %c1_13, %c0_14, %c0_15] : memref<1x17x2x17x256xbf16, #tpu.memory_space<vmem>>, vector<1x8x1x16x128xbf16>
    %17 = vector.shape_cast %16 : vector<1x8x1x16x128xbf16> to vector<8x16x128xbf16>
    %c0_i32_16 = arith.constant 0 : i32
    %18 = arith.addi %1, %c0_i32_16 : i32
    %c0_17 = arith.constant 0 : index
    %19 = arith.index_cast %18 : i32 to index
    %c1_18 = arith.constant 1 : index
    %c0_19 = arith.constant 0 : index
    %c128_20 = arith.constant 128 : index
    %20 = vector.load %arg2[%c0_17, %19, %c1_18, %c0_19, %c128_20] : memref<1x17x2x17x256xbf16, #tpu.memory_space<vmem>>, vector<1x8x1x16x128xbf16>
    %21 = vector.shape_cast %20 : vector<1x8x1x16x128xbf16> to vector<8x16x128xbf16>
    %c0_i32_21 = arith.constant 0 : i32
    %22 = arith.addi %1, %c0_i32_21 : i32
    %c0_22 = arith.constant 0 : index
    %23 = arith.index_cast %22 : i32 to index
    %c1_23 = arith.constant 1 : index
    %c1_24 = arith.constant 1 : index
    %c0_25 = arith.constant 0 : index
    %24 = vector.load %arg2[%c0_22, %23, %c1_23, %c1_24, %c0_25] : memref<1x17x2x17x256xbf16, #tpu.memory_space<vmem>>, vector<1x8x1x16x128xbf16>
    %25 = vector.shape_cast %24 : vector<1x8x1x16x128xbf16> to vector<8x16x128xbf16>
    %c1_i32 = arith.constant 1 : i32
    %26 = arith.addi %1, %c1_i32 : i32
    %c0_26 = arith.constant 0 : index
    %27 = arith.index_cast %26 : i32 to index
    %c0_27 = arith.constant 0 : index
    %c0_28 = arith.constant 0 : index
    %c0_29 = arith.constant 0 : index
    %28 = vector.load %arg2[%c0_26, %27, %c0_27, %c0_28, %c0_29] : memref<1x17x2x17x256xbf16, #tpu.memory_space<vmem>>, vector<1x8x1x16x128xbf16>
    %29 = vector.shape_cast %28 : vector<1x8x1x16x128xbf16> to vector<8x16x128xbf16>
    %c1_i32_30 = arith.constant 1 : i32
    %30 = arith.addi %1, %c1_i32_30 : i32
    %c0_31 = arith.constant 0 : index
    %31 = arith.index_cast %30 : i32 to index
    %c0_32 = arith.constant 0 : index
    %c0_33 = arith.constant 0 : index
    %c128_34 = arith.constant 128 : index
    %32 = vector.load %arg2[%c0_31, %31, %c0_32, %c0_33, %c128_34] : memref<1x17x2x17x256xbf16, #tpu.memory_space<vmem>>, vector<1x8x1x16x128xbf16>
    %33 = vector.shape_cast %32 : vector<1x8x1x16x128xbf16> to vector<8x16x128xbf16>
    %c1_i32_35 = arith.constant 1 : i32
    %34 = arith.addi %1, %c1_i32_35 : i32
    %c0_36 = arith.constant 0 : index
    %35 = arith.index_cast %34 : i32 to index
    %c0_37 = arith.constant 0 : index
    %c1_38 = arith.constant 1 : index
    %c0_39 = arith.constant 0 : index
    %36 = vector.load %arg2[%c0_36, %35, %c0_37, %c1_38, %c0_39] : memref<1x17x2x17x256xbf16, #tpu.memory_space<vmem>>, vector<1x8x1x16x128xbf16>
    %37 = vector.shape_cast %36 : vector<1x8x1x16x128xbf16> to vector<8x16x128xbf16>
    %38 = tpu.concatenate %5, %9, %13, %17, %21, %25, %29, %33, %37 in 2 : vector<8x16x128xbf16>, vector<8x16x128xbf16>, vector<8x16x128xbf16>, vector<8x16x128xbf16>, vector<8x16x128xbf16>, vector<8x16x128xbf16>, vector<8x16x128xbf16>, vector<8x16x128xbf16>, vector<8x16x128xbf16> -> vector<8x16x1152xbf16>
    %39 = vector.shape_cast %38 : vector<8x16x1152xbf16> to vector<128x1152xbf16>
    %c0_40 = arith.constant 0 : index
    %c0_41 = arith.constant 0 : index
    %40 = vector.load %arg3[%c0_40, %c0_41] : memref<1152x128xbf16, #tpu.memory_space<vmem>>, vector<1152x128xbf16>
    %cst = arith.constant dense<0.000000e+00> : vector<128x128xf32>
    %41 = tpu.matmul %39, %40, %cst {dimension_numbers = #tpu.dot_dimension_numbers<[1], [0], [0], [1], [0, 0, 1, 1], [], []>} : vector<128x1152xbf16>, vector<1152x128xbf16>, vector<128x128xf32> -> vector<128x128xf32>
    %c0_42 = arith.constant 0 : index
    %c0_43 = arith.constant 0 : index
    %42 = vector.load %arg4[%c0_42, %c0_43] : memref<1x128xf32, #tpu.memory_space<vmem>>, vector<1x128xf32>
    %43 = vector.broadcast %42 : vector<1x128xf32> to vector<128x128xf32>
    %44 = arith.addf %41, %43 : vector<128x128xf32>
    %cst_44 = arith.constant 0.000000e+00 : f32
    %45 = vector.broadcast %cst_44 : f32 to vector<128x128xf32>
    %46 = arith.maximumf %44, %45 : vector<128x128xf32>
    %47 = vector.shape_cast %46 : vector<128x128xf32> to vector<8x16x128xf32>
    %48 = arith.truncf %47 : vector<8x16x128xf32> to vector<8x16x128xbf16>
    %c0_45 = arith.constant 0 : index
    %c0_46 = arith.constant 0 : index
    %c0_47 = arith.constant 0 : index
    %c0_48 = arith.constant 0 : index
    %49 = vector.load %arg5[%c0_45, %c0_46, %c0_47, %c0_48] : memref<1x8x16x128xbf16, #tpu.memory_space<vmem>>, vector<1x8x16x128xbf16>
    %50 = vector.shape_cast %49 : vector<1x8x16x128xbf16> to vector<8x16x128xbf16>
    %51 = vector.shape_cast %48 : vector<8x16x128xbf16> to vector<1x8x16x128xbf16>
    tpu.vector_store %arg5[%c0_45, %c0_46, %c0_47, %c0_48], %51 {strides = array<i32>} : memref<1x8x16x128xbf16, #tpu.memory_space<vmem>>, vector<1x8x16x128xbf16>,
    return
  }
  func.func @transform_0(%arg0: i32, %arg1: i32) -> (i32, i32, i32, i32, i32) {
    %c0_i32 = arith.constant 0 : i32
    %c0_i32_0 = arith.constant 0 : i32
    %c0_i32_1 = arith.constant 0 : i32
    %c0_i32_2 = arith.constant 0 : i32
    %c0_i32_3 = arith.constant 0 : i32
    return %arg0, %c0_i32, %c0_i32_0, %c0_i32_1, %c0_i32_2 : i32, i32, i32, i32, i32
  }
  func.func @transform_1(%arg0: i32, %arg1: i32) -> (i32, i32) {
    %c0_i32 = arith.constant 0 : i32
    %c0_i32_0 = arith.constant 0 : i32
    %c0_i32_1 = arith.constant 0 : i32
    return %c0_i32, %c0_i32_0 : i32, i32
  }
  func.func @transform_2(%arg0: i32, %arg1: i32) -> (i32, i32) {
    %c0_i32 = arith.constant 0 : i32
    %c0_i32_0 = arith.constant 0 : i32
    %c0_i32_1 = arith.constant 0 : i32
    return %c0_i32, %c0_i32_0 : i32, i32
  }
  func.func @transform_3(%arg0: i32, %arg1: i32) -> (i32, i32, i32, i32) {
    %c0_i32 = arith.constant 0 : i32
    %c0_i32_0 = arith.constant 0 : i32
    %c0_i32_1 = arith.constant 0 : i32
    return %arg0, %arg1, %c0_i32, %c0_i32_0 : i32, i32, i32, i32
  }
}

module attributes {stable_mosaic.version = 11 : i64} {
  func.func @_conv_kernel(%arg0: i32, %arg1: i32, %arg2: memref<1x9x2x9x256xbf16, #tpu.memory_space<vmem>>, %arg3: memref<1152x128xbf16, #tpu.memory_space<vmem>>, %arg4: memref<1x128xf32, #tpu.memory_space<vmem>>, %arg5: memref<1x8x8x128xbf16, #tpu.memory_space<vmem>>) attributes {dimension_semantics = [#tpu.dimension_semantics<parallel>, #tpu.dimension_semantics<parallel>], iteration_bounds = array<i64: 2, 1>, scalar_prefetch = 0 : i64, scratch_operands = 0 : i64, tpu.core_type = #tpu.core_type<tc>, window_params = [{transform_indices = @transform_0, window_bounds = array<i64: 1, 9, 2, 9, 256>}, {pipeline_mode = #tpu.pipeline_mode<synchronous>, transform_indices = @transform_1, window_bounds = array<i64: 1152, 128>}, {pipeline_mode = #tpu.pipeline_mode<synchronous>, transform_indices = @transform_2, window_bounds = array<i64: 1, 128>}, {transform_indices = @transform_3, window_bounds = array<i64: 1, 8, 8, 128>}]} {
    %c8_i32 = arith.constant 8 : i32
    %0 = arith.muli %arg1, %c8_i32 : i32
    %1 = tpu.assume_multiple %0, 8 : i32
    %c0_i32 = arith.constant 0 : i32
    %2 = arith.addi %1, %c0_i32 : i32
    %c0 = arith.constant 0 : index
    %3 = arith.index_cast %2 : i32 to index
    %c0_0 = arith.constant 0 : index
    %c0_1 = arith.constant 0 : index
    %c0_2 = arith.constant 0 : index
    %4 = vector.load %arg2[%c0, %3, %c0_0, %c0_1, %c0_2] : memref<1x9x2x9x256xbf16, #tpu.memory_space<vmem>>, vector<1x8x1x8x128xbf16>
    %5 = vector.shape_cast %4 : vector<1x8x1x8x128xbf16> to vector<8x8x128xbf16>
    %c0_i32_3 = arith.constant 0 : i32
    %6 = arith.addi %1, %c0_i32_3 : i32
    %c0_4 = arith.constant 0 : index
    %7 = arith.index_cast %6 : i32 to index
    %c0_5 = arith.constant 0 : index
    %c0_6 = arith.constant 0 : index
    %c128 = arith.constant 128 : index
    %8 = vector.load %arg2[%c0_4, %7, %c0_5, %c0_6, %c128] : memref<1x9x2x9x256xbf16, #tpu.memory_space<vmem>>, vector<1x8x1x8x128xbf16>
    %9 = vector.shape_cast %8 : vector<1x8x1x8x128xbf16> to vector<8x8x128xbf16>
    %c0_i32_7 = arith.constant 0 : i32
    %10 = arith.addi %1, %c0_i32_7 : i32
    %c0_8 = arith.constant 0 : index
    %11 = arith.index_cast %10 : i32 to index
    %c0_9 = arith.constant 0 : index
    %c1 = arith.constant 1 : index
    %c0_10 = arith.constant 0 : index
    %12 = vector.load %arg2[%c0_8, %11, %c0_9, %c1, %c0_10] : memref<1x9x2x9x256xbf16, #tpu.memory_space<vmem>>, vector<1x8x1x8x128xbf16>
    %13 = vector.shape_cast %12 : vector<1x8x1x8x128xbf16> to vector<8x8x128xbf16>
    %c0_i32_11 = arith.constant 0 : i32
    %14 = arith.addi %1, %c0_i32_11 : i32
    %c0_12 = arith.constant 0 : index
    %15 = arith.index_cast %14 : i32 to index
    %c1_13 = arith.constant 1 : index
    %c0_14 = arith.constant 0 : index
    %c0_15 = arith.constant 0 : index
    %16 = vector.load %arg2[%c0_12, %15, %c1_13, %c0_14, %c0_15] : memref<1x9x2x9x256xbf16, #tpu.memory_space<vmem>>, vector<1x8x1x8x128xbf16>
    %17 = vector.shape_cast %16 : vector<1x8x1x8x128xbf16> to vector<8x8x128xbf16>
    %c0_i32_16 = arith.constant 0 : i32
    %18 = arith.addi %1, %c0_i32_16 : i32
    %c0_17 = arith.constant 0 : index
    %19 = arith.index_cast %18 : i32 to index
    %c1_18 = arith.constant 1 : index
    %c0_19 = arith.constant 0 : index
    %c128_20 = arith.constant 128 : index
    %20 = vector.load %arg2[%c0_17, %19, %c1_18, %c0_19, %c128_20] : memref<1x9x2x9x256xbf16, #tpu.memory_space<vmem>>, vector<1x8x1x8x128xbf16>
    %21 = vector.shape_cast %20 : vector<1x8x1x8x128xbf16> to vector<8x8x128xbf16>
    %c0_i32_21 = arith.constant 0 : i32
    %22 = arith.addi %1, %c0_i32_21 : i32
    %c0_22 = arith.constant 0 : index
    %23 = arith.index_cast %22 : i32 to index
    %c1_23 = arith.constant 1 : index
    %c1_24 = arith.constant 1 : index
    %c0_25 = arith.constant 0 : index
    %24 = vector.load %arg2[%c0_22, %23, %c1_23, %c1_24, %c0_25] : memref<1x9x2x9x256xbf16, #tpu.memory_space<vmem>>, vector<1x8x1x8x128xbf16>
    %25 = vector.shape_cast %24 : vector<1x8x1x8x128xbf16> to vector<8x8x128xbf16>
    %c1_i32 = arith.constant 1 : i32
    %26 = arith.addi %1, %c1_i32 : i32
    %c0_26 = arith.constant 0 : index
    %27 = arith.index_cast %26 : i32 to index
    %c0_27 = arith.constant 0 : index
    %c0_28 = arith.constant 0 : index
    %c0_29 = arith.constant 0 : index
    %28 = vector.load %arg2[%c0_26, %27, %c0_27, %c0_28, %c0_29] : memref<1x9x2x9x256xbf16, #tpu.memory_space<vmem>>, vector<1x8x1x8x128xbf16>
    %29 = vector.shape_cast %28 : vector<1x8x1x8x128xbf16> to vector<8x8x128xbf16>
    %c1_i32_30 = arith.constant 1 : i32
    %30 = arith.addi %1, %c1_i32_30 : i32
    %c0_31 = arith.constant 0 : index
    %31 = arith.index_cast %30 : i32 to index
    %c0_32 = arith.constant 0 : index
    %c0_33 = arith.constant 0 : index
    %c128_34 = arith.constant 128 : index
    %32 = vector.load %arg2[%c0_31, %31, %c0_32, %c0_33, %c128_34] : memref<1x9x2x9x256xbf16, #tpu.memory_space<vmem>>, vector<1x8x1x8x128xbf16>
    %33 = vector.shape_cast %32 : vector<1x8x1x8x128xbf16> to vector<8x8x128xbf16>
    %c1_i32_35 = arith.constant 1 : i32
    %34 = arith.addi %1, %c1_i32_35 : i32
    %c0_36 = arith.constant 0 : index
    %35 = arith.index_cast %34 : i32 to index
    %c0_37 = arith.constant 0 : index
    %c1_38 = arith.constant 1 : index
    %c0_39 = arith.constant 0 : index
    %36 = vector.load %arg2[%c0_36, %35, %c0_37, %c1_38, %c0_39] : memref<1x9x2x9x256xbf16, #tpu.memory_space<vmem>>, vector<1x8x1x8x128xbf16>
    %37 = vector.shape_cast %36 : vector<1x8x1x8x128xbf16> to vector<8x8x128xbf16>
    %38 = tpu.concatenate %5, %9, %13, %17, %21, %25, %29, %33, %37 in 2 : vector<8x8x128xbf16>, vector<8x8x128xbf16>, vector<8x8x128xbf16>, vector<8x8x128xbf16>, vector<8x8x128xbf16>, vector<8x8x128xbf16>, vector<8x8x128xbf16>, vector<8x8x128xbf16>, vector<8x8x128xbf16> -> vector<8x8x1152xbf16>
    %39 = vector.shape_cast %38 : vector<8x8x1152xbf16> to vector<64x1152xbf16>
    %c0_40 = arith.constant 0 : index
    %c0_41 = arith.constant 0 : index
    %40 = vector.load %arg3[%c0_40, %c0_41] : memref<1152x128xbf16, #tpu.memory_space<vmem>>, vector<1152x128xbf16>
    %cst = arith.constant dense<0.000000e+00> : vector<64x128xf32>
    %41 = tpu.matmul %39, %40, %cst {dimension_numbers = #tpu.dot_dimension_numbers<[1], [0], [0], [1], [0, 0, 1, 1], [], []>} : vector<64x1152xbf16>, vector<1152x128xbf16>, vector<64x128xf32> -> vector<64x128xf32>
    %c0_42 = arith.constant 0 : index
    %c0_43 = arith.constant 0 : index
    %42 = vector.load %arg4[%c0_42, %c0_43] : memref<1x128xf32, #tpu.memory_space<vmem>>, vector<1x128xf32>
    %43 = vector.broadcast %42 : vector<1x128xf32> to vector<64x128xf32>
    %44 = arith.addf %41, %43 : vector<64x128xf32>
    %cst_44 = arith.constant 0.000000e+00 : f32
    %45 = vector.broadcast %cst_44 : f32 to vector<64x128xf32>
    %46 = arith.maximumf %44, %45 : vector<64x128xf32>
    %47 = vector.shape_cast %46 : vector<64x128xf32> to vector<8x8x128xf32>
    %48 = arith.truncf %47 : vector<8x8x128xf32> to vector<8x8x128xbf16>
    %c0_45 = arith.constant 0 : index
    %c0_46 = arith.constant 0 : index
    %c0_47 = arith.constant 0 : index
    %c0_48 = arith.constant 0 : index
    %49 = vector.load %arg5[%c0_45, %c0_46, %c0_47, %c0_48] : memref<1x8x8x128xbf16, #tpu.memory_space<vmem>>, vector<1x8x8x128xbf16>
    %50 = vector.shape_cast %49 : vector<1x8x8x128xbf16> to vector<8x8x128xbf16>
    %51 = vector.shape_cast %48 : vector<8x8x128xbf16> to vector<1x8x8x128xbf16>
    tpu.vector_store %arg5[%c0_45, %c0_46, %c0_47, %c0_48], %51 {strides = array<i32>} : memref<1x8x8x128xbf16, #tpu.memory_space<vmem>>, vector<1x8x8x128xbf16>,
    return
  }
  func.func @transform_0(%arg0: i32, %arg1: i32) -> (i32, i32, i32, i32, i32) {
    %c0_i32 = arith.constant 0 : i32
    %c0_i32_0 = arith.constant 0 : i32
    %c0_i32_1 = arith.constant 0 : i32
    %c0_i32_2 = arith.constant 0 : i32
    %c0_i32_3 = arith.constant 0 : i32
    return %arg0, %c0_i32, %c0_i32_0, %c0_i32_1, %c0_i32_2 : i32, i32, i32, i32, i32
  }
  func.func @transform_1(%arg0: i32, %arg1: i32) -> (i32, i32) {
    %c0_i32 = arith.constant 0 : i32
    %c0_i32_0 = arith.constant 0 : i32
    %c0_i32_1 = arith.constant 0 : i32
    return %c0_i32, %c0_i32_0 : i32, i32
  }
  func.func @transform_2(%arg0: i32, %arg1: i32) -> (i32, i32) {
    %c0_i32 = arith.constant 0 : i32
    %c0_i32_0 = arith.constant 0 : i32
    %c0_i32_1 = arith.constant 0 : i32
    return %c0_i32, %c0_i32_0 : i32, i32
  }
  func.func @transform_3(%arg0: i32, %arg1: i32) -> (i32, i32, i32, i32) {
    %c0_i32 = arith.constant 0 : i32
    %c0_i32_0 = arith.constant 0 : i32
    %c0_i32_1 = arith.constant 0 : i32
    return %arg0, %arg1, %c0_i32, %c0_i32_0 : i32, i32, i32, i32
  }
}

module attributes {stable_mosaic.version = 11 : i64} {
  func.func @_roi_align_kernel(%arg0: i32, %arg1: memref<3xi32, #tpu.memory_space<smem>>, %arg2: memref<1x32x8xf32, #tpu.memory_space<vmem>>, %arg3: memref<1x16x8xf32, #tpu.memory_space<vmem>>, %arg4: memref<1x8x1024xbf16, #tpu.memory_space<vmem>>, %arg5: memref<1x32x16x128xbf16, #tpu.memory_space<vmem>>, %arg6: memref<32x8x128xf32, #tpu.memory_space<vmem>>) attributes {dimension_semantics = [#tpu.dimension_semantics<parallel>], iteration_bounds = array<i64: 3>, scalar_prefetch = 1 : i64, scratch_operands = 1 : i64, tpu.core_type = #tpu.core_type<tc>, window_params = [{transform_indices = @transform_0, window_bounds = array<i64: 1, 32, 8>}, {transform_indices = @transform_1, window_bounds = array<i64: 1, 16, 8>}, {transform_indices = @transform_2, window_bounds = array<i64: 1, 8, 1024>}, {transform_indices = @transform_3, window_bounds = array<i64: 1, 32, 16, 128>}]} {
    %c0 = arith.constant 0 : index
    %c0_0 = arith.constant 0 : index
    %c0_1 = arith.constant 0 : index
    %0 = vector.load %arg4[%c0, %c0_0, %c0_1] : memref<1x8x1024xbf16, #tpu.memory_space<vmem>>, vector<1x8x1024xbf16>
    %1 = vector.shape_cast %0 : vector<1x8x1024xbf16> to vector<8x1024xbf16>
    %2 = arith.extf %1 : vector<8x1024xbf16> to vector<8x1024xf32>
    %c0_2 = arith.constant 0 : index
    %c0_3 = arith.constant 0 : index
    %c0_4 = arith.constant 0 : index
    %3 = vector.load %arg2[%c0_2, %c0_3, %c0_4] : memref<1x32x8xf32, #tpu.memory_space<vmem>>, vector<1x32x8xf32>
    %4 = vector.shape_cast %3 : vector<1x32x8xf32> to vector<32x8xf32>
    %cst = arith.constant dense<0.000000e+00> : vector<32x1024xf32>
    %5 = tpu.matmul %4, %2, %cst {dimension_numbers = #tpu.dot_dimension_numbers<[1], [0], [0], [1], [0, 0, 1, 1], [], []>} : vector<32x8xf32>, vector<8x1024xf32>, vector<32x1024xf32> -> vector<32x1024xf32>
    %6 = vector.extract_strided_slice %5 {offsets = [0, 0], sizes = [32, 128], strides = [1, 1]} : vector<32x1024xf32> to vector<32x128xf32>
    %c0_5 = arith.constant 0 : index
    %c0_6 = arith.constant 0 : index
    %c0_7 = arith.constant 0 : index
    %7 = vector.load %arg6[%c0_5, %c0_6, %c0_7] : memref<32x8x128xf32, #tpu.memory_space<vmem>>, vector<32x1x128xf32>
    %8 = vector.shape_cast %7 : vector<32x1x128xf32> to vector<32x128xf32>
    %9 = vector.shape_cast %6 : vector<32x128xf32> to vector<32x1x128xf32>
    tpu.vector_store %arg6[%c0_5, %c0_6, %c0_7], %9 {strides = array<i32>} : memref<32x8x128xf32, #tpu.memory_space<vmem>>, vector<32x1x128xf32>,
    %10 = vector.extract_strided_slice %5 {offsets = [0, 128], sizes = [32, 128], strides = [1, 1]} : vector<32x1024xf32> to vector<32x128xf32>
    %c0_8 = arith.constant 0 : index
    %c1 = arith.constant 1 : index
    %c0_9 = arith.constant 0 : index
    %11 = vector.load %arg6[%c0_8, %c1, %c0_9] : memref<32x8x128xf32, #tpu.memory_space<vmem>>, vector<32x1x128xf32>
    %12 = vector.shape_cast %11 : vector<32x1x128xf32> to vector<32x128xf32>
    %13 = vector.shape_cast %10 : vector<32x128xf32> to vector<32x1x128xf32>
    tpu.vector_store %arg6[%c0_8, %c1, %c0_9], %13 {strides = array<i32>} : memref<32x8x128xf32, #tpu.memory_space<vmem>>, vector<32x1x128xf32>,
    %14 = vector.extract_strided_slice %5 {offsets = [0, 256], sizes = [32, 128], strides = [1, 1]} : vector<32x1024xf32> to vector<32x128xf32>
    %c0_10 = arith.constant 0 : index
    %c2 = arith.constant 2 : index
    %c0_11 = arith.constant 0 : index
    %15 = vector.load %arg6[%c0_10, %c2, %c0_11] : memref<32x8x128xf32, #tpu.memory_space<vmem>>, vector<32x1x128xf32>
    %16 = vector.shape_cast %15 : vector<32x1x128xf32> to vector<32x128xf32>
    %17 = vector.shape_cast %14 : vector<32x128xf32> to vector<32x1x128xf32>
    tpu.vector_store %arg6[%c0_10, %c2, %c0_11], %17 {strides = array<i32>} : memref<32x8x128xf32, #tpu.memory_space<vmem>>, vector<32x1x128xf32>,
    %18 = vector.extract_strided_slice %5 {offsets = [0, 384], sizes = [32, 128], strides = [1, 1]} : vector<32x1024xf32> to vector<32x128xf32>
    %c0_12 = arith.constant 0 : index
    %c3 = arith.constant 3 : index
    %c0_13 = arith.constant 0 : index
    %19 = vector.load %arg6[%c0_12, %c3, %c0_13] : memref<32x8x128xf32, #tpu.memory_space<vmem>>, vector<32x1x128xf32>
    %20 = vector.shape_cast %19 : vector<32x1x128xf32> to vector<32x128xf32>
    %21 = vector.shape_cast %18 : vector<32x128xf32> to vector<32x1x128xf32>
    tpu.vector_store %arg6[%c0_12, %c3, %c0_13], %21 {strides = array<i32>} : memref<32x8x128xf32, #tpu.memory_space<vmem>>, vector<32x1x128xf32>,
    %22 = vector.extract_strided_slice %5 {offsets = [0, 512], sizes = [32, 128], strides = [1, 1]} : vector<32x1024xf32> to vector<32x128xf32>
    %c0_14 = arith.constant 0 : index
    %c4 = arith.constant 4 : index
    %c0_15 = arith.constant 0 : index
    %23 = vector.load %arg6[%c0_14, %c4, %c0_15] : memref<32x8x128xf32, #tpu.memory_space<vmem>>, vector<32x1x128xf32>
    %24 = vector.shape_cast %23 : vector<32x1x128xf32> to vector<32x128xf32>
    %25 = vector.shape_cast %22 : vector<32x128xf32> to vector<32x1x128xf32>
    tpu.vector_store %arg6[%c0_14, %c4, %c0_15], %25 {strides = array<i32>} : memref<32x8x128xf32, #tpu.memory_space<vmem>>, vector<32x1x128xf32>,
    %26 = vector.extract_strided_slice %5 {offsets = [0, 640], sizes = [32, 128], strides = [1, 1]} : vector<32x1024xf32> to vector<32x128xf32>
    %c0_16 = arith.constant 0 : index
    %c5 = arith.constant 5 : index
    %c0_17 = arith.constant 0 : index
    %27 = vector.load %arg6[%c0_16, %c5, %c0_17] : memref<32x8x128xf32, #tpu.memory_space<vmem>>, vector<32x1x128xf32>
    %28 = vector.shape_cast %27 : vector<32x1x128xf32> to vector<32x128xf32>
    %29 = vector.shape_cast %26 : vector<32x128xf32> to vector<32x1x128xf32>
    tpu.vector_store %arg6[%c0_16, %c5, %c0_17], %29 {strides = array<i32>} : memref<32x8x128xf32, #tpu.memory_space<vmem>>, vector<32x1x128xf32>,
    %30 = vector.extract_strided_slice %5 {offsets = [0, 768], sizes = [32, 128], strides = [1, 1]} : vector<32x1024xf32> to vector<32x128xf32>
    %c0_18 = arith.constant 0 : index
    %c6 = arith.constant 6 : index
    %c0_19 = arith.constant 0 : index
    %31 = vector.load %arg6[%c0_18, %c6, %c0_19] : memref<32x8x128xf32, #tpu.memory_space<vmem>>, vector<32x1x128xf32>
    %32 = vector.shape_cast %31 : vector<32x1x128xf32> to vector<32x128xf32>
    %33 = vector.shape_cast %30 : vector<32x128xf32> to vector<32x1x128xf32>
    tpu.vector_store %arg6[%c0_18, %c6, %c0_19], %33 {strides = array<i32>} : memref<32x8x128xf32, #tpu.memory_space<vmem>>, vector<32x1x128xf32>,
    %34 = vector.extract_strided_slice %5 {offsets = [0, 896], sizes = [32, 128], strides = [1, 1]} : vector<32x1024xf32> to vector<32x128xf32>
    %c0_20 = arith.constant 0 : index
    %c7 = arith.constant 7 : index
    %c0_21 = arith.constant 0 : index
    %35 = vector.load %arg6[%c0_20, %c7, %c0_21] : memref<32x8x128xf32, #tpu.memory_space<vmem>>, vector<32x1x128xf32>
    %36 = vector.shape_cast %35 : vector<32x1x128xf32> to vector<32x128xf32>
    %37 = vector.shape_cast %34 : vector<32x128xf32> to vector<32x1x128xf32>
    tpu.vector_store %arg6[%c0_20, %c7, %c0_21], %37 {strides = array<i32>} : memref<32x8x128xf32, #tpu.memory_space<vmem>>, vector<32x1x128xf32>,
    %c0_22 = arith.constant 0 : index
    %c0_23 = arith.constant 0 : index
    %c0_24 = arith.constant 0 : index
    %38 = vector.load %arg3[%c0_22, %c0_23, %c0_24] : memref<1x16x8xf32, #tpu.memory_space<vmem>>, vector<1x16x8xf32>
    %39 = vector.shape_cast %38 : vector<1x16x8xf32> to vector<16x8xf32>
    %40 = vector.shape_cast %39 : vector<16x8xf32> to vector<1x16x8xf32>
    %41 = vector.shape_cast %40 : vector<1x16x8xf32> to vector<1x16x8xf32>
    %42 = vector.broadcast %41 : vector<1x16x8xf32> to vector<32x16x8xf32>
    %c0_25 = arith.constant 0 : index
    %c0_26 = arith.constant 0 : index
    %c0_27 = arith.constant 0 : index
    %43 = vector.load %arg6[%c0_25, %c0_26, %c0_27] : memref<32x8x128xf32, #tpu.memory_space<vmem>>, vector<32x8x128xf32>
    "tpu.trace_start"() <{level = 10 : i32, message = "pqx,pxc->pqc"}> : () -> ()
    %cst_28 = arith.constant dense<0.000000e+00> : vector<32x16x128xf32>
    %44 = tpu.matmul %42, %43, %cst_28 {dimension_numbers = #tpu.dot_dimension_numbers<[2], [1], [1], [2], [0, 0, 0, 1, 1, 2], [0], [0]>} : vector<32x16x8xf32>, vector<32x8x128xf32>, vector<32x16x128xf32> -> vector<32x16x128xf32>
    "tpu.trace_stop"() : () -> ()
    %45 = arith.truncf %44 : vector<32x16x128xf32> to vector<32x16x128xbf16>
    %c0_29 = arith.constant 0 : index
    %c0_30 = arith.constant 0 : index
    %c0_31 = arith.constant 0 : index
    %c0_32 = arith.constant 0 : index
    %46 = vector.load %arg5[%c0_29, %c0_30, %c0_31, %c0_32] : memref<1x32x16x128xbf16, #tpu.memory_space<vmem>>, vector<1x32x16x128xbf16>
    %47 = vector.shape_cast %46 : vector<1x32x16x128xbf16> to vector<32x16x128xbf16>
    %48 = vector.shape_cast %45 : vector<32x16x128xbf16> to vector<1x32x16x128xbf16>
    tpu.vector_store %arg5[%c0_29, %c0_30, %c0_31, %c0_32], %48 {strides = array<i32>} : memref<1x32x16x128xbf16, #tpu.memory_space<vmem>>, vector<1x32x16x128xbf16>,
    return
  }
  func.func @transform_0(%arg0: i32, %arg1: memref<3xi32, #tpu.memory_space<smem>>) -> (i32, i32, i32) {
    %c0_i32 = arith.constant 0 : i32
    %c0_i32_0 = arith.constant 0 : i32
    %c0_i32_1 = arith.constant 0 : i32
    return %arg0, %c0_i32, %c0_i32_0 : i32, i32, i32
  }
  func.func @transform_1(%arg0: i32, %arg1: memref<3xi32, #tpu.memory_space<smem>>) -> (i32, i32, i32) {
    %c0_i32 = arith.constant 0 : i32
    %c0_i32_0 = arith.constant 0 : i32
    %c0_i32_1 = arith.constant 0 : i32
    return %arg0, %c0_i32, %c0_i32_0 : i32, i32, i32
  }
  func.func @transform_2(%arg0: i32, %arg1: memref<3xi32, #tpu.memory_space<smem>>) -> (i32, i32, i32) {
    %0 = arith.index_cast %arg0 : i32 to index
    %1 = memref.load %arg1[%0] : memref<3xi32, #tpu.memory_space<smem>>
    %c0_i32 = arith.constant 0 : i32
    %c0_i32_0 = arith.constant 0 : i32
    %c0_i32_1 = arith.constant 0 : i32
    return %1, %c0_i32, %c0_i32_0 : i32, i32, i32
  }
  func.func @transform_3(%arg0: i32, %arg1: memref<3xi32, #tpu.memory_space<smem>>) -> (i32, i32, i32, i32) {
    %c0_i32 = arith.constant 0 : i32
    %c0_i32_0 = arith.constant 0 : i32
    %c0_i32_1 = arith.constant 0 : i32
    %c0_i32_2 = arith.constant 0 : i32
    return %arg0, %c0_i32, %c0_i32_0, %c0_i32_1 : i32, i32, i32, i32
  }
}

module attributes {stable_mosaic.version = 11 : i64} {
  func.func @_conv_gap_l2_kernel(%arg0: i32, %arg1: i32, %arg2: memref<1x34x18x128xbf16, #tpu.memory_space<vmem>>, %arg3: memref<1152x128xbf16, #tpu.memory_space<vmem>>, %arg4: memref<1x128xf32, #tpu.memory_space<vmem>>, %arg5: memref<1x1x128xf32, #tpu.memory_space<vmem>>, %arg6: memref<1x128xf32, #tpu.memory_space<vmem>>) attributes {dimension_semantics = [#tpu.dimension_semantics<parallel>, #tpu.dimension_semantics<arbitrary>], iteration_bounds = array<i64: 3, 4>, scalar_prefetch = 0 : i64, scratch_operands = 1 : i64, tpu.core_type = #tpu.core_type<tc>, window_params = [{transform_indices = @transform_0, window_bounds = array<i64: 1, 34, 18, 128>}, {pipeline_mode = #tpu.pipeline_mode<synchronous>, transform_indices = @transform_1, window_bounds = array<i64: 1152, 128>}, {pipeline_mode = #tpu.pipeline_mode<synchronous>, transform_indices = @transform_2, window_bounds = array<i64: 1, 128>}, {transform_indices = @transform_3, window_bounds = array<i64: 1, 1, 128>}]} {
    %c0_i32 = arith.constant 0 : i32
    %0 = arith.cmpi eq, %arg1, %c0_i32 : i32
    %1 = arith.extui %0 : i1 to i32
    %c0_i32_0 = arith.constant 0 : i32
    %2 = arith.cmpi ne, %1, %c0_i32_0 : i32
    scf.if %2 {
      %cst_43 = arith.constant 0.000000e+00 : f32
      %58 = vector.broadcast %cst_43 : f32 to vector<1x128xf32>
      %c0_44 = arith.constant 0 : index
      %c0_45 = arith.constant 0 : index
      %59 = vector.load %arg6[%c0_44, %c0_45] : memref<1x128xf32, #tpu.memory_space<vmem>>, vector<1x128xf32>
      tpu.vector_store %arg6[%c0_44, %c0_45], %58 {strides = array<i32>} : memref<1x128xf32, #tpu.memory_space<vmem>>, vector<1x128xf32>,
    } else {
    }
    %c8_i32 = arith.constant 8 : i32
    %3 = arith.muli %arg1, %c8_i32 : i32
    %4 = tpu.assume_multiple %3, 8 : i32
    %c0_i32_1 = arith.constant 0 : i32
    %5 = arith.addi %4, %c0_i32_1 : i32
    %c0 = arith.constant 0 : index
    %6 = arith.index_cast %5 : i32 to index
    %c0_2 = arith.constant 0 : index
    %c0_3 = arith.constant 0 : index
    %7 = vector.load %arg2[%c0, %6, %c0_2, %c0_3] : memref<1x34x18x128xbf16, #tpu.memory_space<vmem>>, vector<1x8x16x128xbf16>
    %8 = vector.shape_cast %7 : vector<1x8x16x128xbf16> to vector<8x16x128xbf16>
    %c0_i32_4 = arith.constant 0 : i32
    %9 = arith.addi %4, %c0_i32_4 : i32
    %c0_5 = arith.constant 0 : index
    %10 = arith.index_cast %9 : i32 to index
    %c1 = arith.constant 1 : index
    %c0_6 = arith.constant 0 : index
    %11 = vector.load %arg2[%c0_5, %10, %c1, %c0_6] : memref<1x34x18x128xbf16, #tpu.memory_space<vmem>>, vector<1x8x16x128xbf16>
    %12 = vector.shape_cast %11 : vector<1x8x16x128xbf16> to vector<8x16x128xbf16>
    %c0_i32_7 = arith.constant 0 : i32
    %13 = arith.addi %4, %c0_i32_7 : i32
    %c0_8 = arith.constant 0 : index
    %14 = arith.index_cast %13 : i32 to index
    %c2 = arith.constant 2 : index
    %c0_9 = arith.constant 0 : index
    %15 = vector.load %arg2[%c0_8, %14, %c2, %c0_9] : memref<1x34x18x128xbf16, #tpu.memory_space<vmem>>, vector<1x8x16x128xbf16>
    %16 = vector.shape_cast %15 : vector<1x8x16x128xbf16> to vector<8x16x128xbf16>
    %c1_i32 = arith.constant 1 : i32
    %17 = arith.addi %4, %c1_i32 : i32
    %c0_10 = arith.constant 0 : index
    %18 = arith.index_cast %17 : i32 to index
    %c0_11 = arith.constant 0 : index
    %c0_12 = arith.constant 0 : index
    %19 = vector.load %arg2[%c0_10, %18, %c0_11, %c0_12] : memref<1x34x18x128xbf16, #tpu.memory_space<vmem>>, vector<1x8x16x128xbf16>
    %20 = vector.shape_cast %19 : vector<1x8x16x128xbf16> to vector<8x16x128xbf16>
    %c1_i32_13 = arith.constant 1 : i32
    %21 = arith.addi %4, %c1_i32_13 : i32
    %c0_14 = arith.constant 0 : index
    %22 = arith.index_cast %21 : i32 to index
    %c1_15 = arith.constant 1 : index
    %c0_16 = arith.constant 0 : index
    %23 = vector.load %arg2[%c0_14, %22, %c1_15, %c0_16] : memref<1x34x18x128xbf16, #tpu.memory_space<vmem>>, vector<1x8x16x128xbf16>
    %24 = vector.shape_cast %23 : vector<1x8x16x128xbf16> to vector<8x16x128xbf16>
    %c1_i32_17 = arith.constant 1 : i32
    %25 = arith.addi %4, %c1_i32_17 : i32
    %c0_18 = arith.constant 0 : index
    %26 = arith.index_cast %25 : i32 to index
    %c2_19 = arith.constant 2 : index
    %c0_20 = arith.constant 0 : index
    %27 = vector.load %arg2[%c0_18, %26, %c2_19, %c0_20] : memref<1x34x18x128xbf16, #tpu.memory_space<vmem>>, vector<1x8x16x128xbf16>
    %28 = vector.shape_cast %27 : vector<1x8x16x128xbf16> to vector<8x16x128xbf16>
    %c2_i32 = arith.constant 2 : i32
    %29 = arith.addi %4, %c2_i32 : i32
    %c0_21 = arith.constant 0 : index
    %30 = arith.index_cast %29 : i32 to index
    %c0_22 = arith.constant 0 : index
    %c0_23 = arith.constant 0 : index
    %31 = vector.load %arg2[%c0_21, %30, %c0_22, %c0_23] : memref<1x34x18x128xbf16, #tpu.memory_space<vmem>>, vector<1x8x16x128xbf16>
    %32 = vector.shape_cast %31 : vector<1x8x16x128xbf16> to vector<8x16x128xbf16>
    %c2_i32_24 = arith.constant 2 : i32
    %33 = arith.addi %4, %c2_i32_24 : i32
    %c0_25 = arith.constant 0 : index
    %34 = arith.index_cast %33 : i32 to index
    %c1_26 = arith.constant 1 : index
    %c0_27 = arith.constant 0 : index
    %35 = vector.load %arg2[%c0_25, %34, %c1_26, %c0_27] : memref<1x34x18x128xbf16, #tpu.memory_space<vmem>>, vector<1x8x16x128xbf16>
    %36 = vector.shape_cast %35 : vector<1x8x16x128xbf16> to vector<8x16x128xbf16>
    %c2_i32_28 = arith.constant 2 : i32
    %37 = arith.addi %4, %c2_i32_28 : i32
    %c0_29 = arith.constant 0 : index
    %38 = arith.index_cast %37 : i32 to index
    %c2_30 = arith.constant 2 : index
    %c0_31 = arith.constant 0 : index
    %39 = vector.load %arg2[%c0_29, %38, %c2_30, %c0_31] : memref<1x34x18x128xbf16, #tpu.memory_space<vmem>>, vector<1x8x16x128xbf16>
    %40 = vector.shape_cast %39 : vector<1x8x16x128xbf16> to vector<8x16x128xbf16>
    %41 = tpu.concatenate %8, %12, %16, %20, %24, %28, %32, %36, %40 in 2 : vector<8x16x128xbf16>, vector<8x16x128xbf16>, vector<8x16x128xbf16>, vector<8x16x128xbf16>, vector<8x16x128xbf16>, vector<8x16x128xbf16>, vector<8x16x128xbf16>, vector<8x16x128xbf16>, vector<8x16x128xbf16> -> vector<8x16x1152xbf16>
    %42 = vector.shape_cast %41 : vector<8x16x1152xbf16> to vector<128x1152xbf16>
    %c0_32 = arith.constant 0 : index
    %c0_33 = arith.constant 0 : index
    %43 = vector.load %arg3[%c0_32, %c0_33] : memref<1152x128xbf16, #tpu.memory_space<vmem>>, vector<1152x128xbf16>
    %cst = arith.constant dense<0.000000e+00> : vector<128x128xf32>
    %44 = tpu.matmul %42, %43, %cst {dimension_numbers = #tpu.dot_dimension_numbers<[1], [0], [0], [1], [0, 0, 1, 1], [], []>} : vector<128x1152xbf16>, vector<1152x128xbf16>, vector<128x128xf32> -> vector<128x128xf32>
    %c0_34 = arith.constant 0 : index
    %c0_35 = arith.constant 0 : index
    %45 = vector.load %arg4[%c0_34, %c0_35] : memref<1x128xf32, #tpu.memory_space<vmem>>, vector<1x128xf32>
    %46 = vector.broadcast %45 : vector<1x128xf32> to vector<128x128xf32>
    %47 = arith.addf %44, %46 : vector<128x128xf32>
    %cst_36 = arith.constant 0.000000e+00 : f32
    %48 = vector.broadcast %cst_36 : f32 to vector<128x128xf32>
    %49 = arith.maximumf %47, %48 : vector<128x128xf32>
    %c0_37 = arith.constant 0 : index
    %c0_38 = arith.constant 0 : index
    %50 = vector.load %arg6[%c0_37, %c0_38] : memref<1x128xf32, #tpu.memory_space<vmem>>, vector<1x128xf32>
    %cst_39 = arith.constant dense<0.000000e+00> : vector<128xf32>
    %51 = vector.multi_reduction <add>, %49, %cst_39 [0] : vector<128x128xf32> to vector<128xf32>
    %52 = vector.shape_cast %51 : vector<128xf32> to vector<1x128xf32>
    %53 = arith.addf %50, %52 : vector<1x128xf32>
    %c0_40 = arith.constant 0 : index
    %c0_41 = arith.constant 0 : index
    %54 = vector.load %arg6[%c0_40, %c0_41] : memref<1x128xf32, #tpu.memory_space<vmem>>, vector<1x128xf32>
    tpu.vector_store %arg6[%c0_40, %c0_41], %53 {strides = array<i32>} : memref<1x128xf32, #tpu.memory_space<vmem>>, vector<1x128xf32>,
    %c3_i32 = arith.constant 3 : i32
    %55 = arith.cmpi eq, %arg1, %c3_i32 : i32
    %56 = arith.extui %55 : i1 to i32
    %c0_i32_42 = arith.constant 0 : i32
    %57 = arith.cmpi ne, %56, %c0_i32_42 : i32
    scf.if %57 {
      %c0_43 = arith.constant 0 : index
      %c0_44 = arith.constant 0 : index
      %58 = vector.load %arg6[%c0_43, %c0_44] : memref<1x128xf32, #tpu.memory_space<vmem>>, vector<1x128xf32>
      %cst_45 = arith.constant 0.001953125 : f32
      %59 = vector.broadcast %cst_45 : f32 to vector<1x128xf32>
      %60 = arith.mulf %58, %59 : vector<1x128xf32>
      %61 = arith.mulf %60, %60 : vector<1x128xf32>
      %cst_46 = arith.constant dense<0.000000e+00> : vector<1xf32>
      %62 = vector.multi_reduction <add>, %61, %cst_46 [1] : vector<1x128xf32> to vector<1xf32>
      %63 = vector.shape_cast %62 : vector<1xf32> to vector<1x1xf32>
      %cst_47 = arith.constant 1.000000e-24 : f32
      %64 = vector.broadcast %cst_47 : f32 to vector<1x1xf32>
      %65 = arith.maximumf %63, %64 : vector<1x1xf32>
      %66 = math.rsqrt %65 : vector<1x1xf32>
      %67 = vector.broadcast %66 : vector<1x1xf32> to vector<1x128xf32>
      %68 = arith.mulf %60, %67 : vector<1x128xf32>
      %c0_48 = arith.constant 0 : index
      %c0_49 = arith.constant 0 : index
      %c0_50 = arith.constant 0 : index
      %69 = vector.load %arg5[%c0_48, %c0_49, %c0_50] : memref<1x1x128xf32, #tpu.memory_space<vmem>>, vector<1x1x128xf32>
      %70 = vector.shape_cast %69 : vector<1x1x128xf32> to vector<1x128xf32>
      %71 = vector.shape_cast %68 : vector<1x128xf32> to vector<1x1x128xf32>
      tpu.vector_store %arg5[%c0_48, %c0_49, %c0_50], %71 {strides = array<i32>} : memref<1x1x128xf32, #tpu.memory_space<vmem>>, vector<1x1x128xf32>,
    } else {
    }
    return
  }
  func.func @transform_0(%arg0: i32, %arg1: i32) -> (i32, i32, i32, i32) {
    %c0_i32 = arith.constant 0 : i32
    %c0_i32_0 = arith.constant 0 : i32
    %c0_i32_1 = arith.constant 0 : i32
    %c0_i32_2 = arith.constant 0 : i32
    return %arg0, %c0_i32, %c0_i32_0, %c0_i32_1 : i32, i32, i32, i32
  }
  func.func @transform_1(%arg0: i32, %arg1: i32) -> (i32, i32) {
    %c0_i32 = arith.constant 0 : i32
    %c0_i32_0 = arith.constant 0 : i32
    %c0_i32_1 = arith.constant 0 : i32
    return %c0_i32, %c0_i32_0 : i32, i32
  }
  func.func @transform_2(%arg0: i32, %arg1: i32) -> (i32, i32) {
    %c0_i32 = arith.constant 0 : i32
    %c0_i32_0 = arith.constant 0 : i32
    %c0_i32_1 = arith.constant 0 : i32
    return %c0_i32, %c0_i32_0 : i32, i32
  }
  func.func @transform_3(%arg0: i32, %arg1: i32) -> (i32, i32, i32) {
    %c0_i32 = arith.constant 0 : i32
    %c0_i32_0 = arith.constant 0 : i32
    %c0_i32_1 = arith.constant 0 : i32
    return %arg0, %c0_i32, %c0_i32_0 : i32, i32, i32
  }
}

</mosaic_0001>

<bundles_post_ra>
// kernel: person_search_query.5
= control target key start
LH: loop header
LB: loop body
LE: loop exit
PB: predicated region body
PF: predicated region fallthrough
CT: control target
= control target key end

     0   :  { %s2635_s12 = smov 0   ;;  %s2637_s13 = smov 0   ;;  %s3175_s0 = inlined_call_operand.vmem [shape: bf16[2,33,2,33,16], index: 0, kind: input, shape index: {}]   ;;  %s3176_s1 = inlined_call_operand.vmem [shape: bf16[72,128], index: 1, kind: input, shape index: {}]   ;;  %s3177_s2 = inlined_call_operand.vmem [shape: f32[1,128], index: 2, kind: input, shape index: {}]   ;;  %s3178_s3 = inlined_call_operand.vmem [shape: bf16[2,32,32,128], index: 3, kind: output, shape index: {}]  }
   0x1   :  { %s2639_s14 = smov 0   ;;  %s2641_s15 = smov 0  }
   0x2   :  { %s2643_s16 = smov 0  }
   0x3 LB: > { %s22_s17 = sadd.s32 1, %s2600_s14  ;;  %s25_s18 = sadd.s32 1, %s2604_s15  ;;  %s2608_s16 = sphi %s2643_s16, %s13_s16   ;;  %s2604_s15 = sphi %s2641_s15, %s3182_s15   ;;  %s2600_s14 = sphi %s2639_s14, %s3181_s14   ;;  %s2596_s13 = sphi %s2637_s13, %s3180_s13   ;;  %s2592_s12 = sphi %s2635_s12, %s3179_s12  }
   0x4   : > { %p23_p0 = scmp.ge.s32.totalorder %s22_s17, 4  ;;  %p2017_p1 = scmp.ge.s32.totalorder %s2608_s16, 1 }
   0x5   : > { %p151_p2 = scmp.lt.s32.totalorder %s2608_s16, 9 }
   0x6   : > { %s3184_s17 = smov (%p23_p0, %s22_s17), 0  ;;  %s3186_s18 = smov (!%p23_p0, %s25_s18), %s2604_s15 }
   0x7   : > { %p152_p3 = pnand %p2017_p1, %p151_p2  ;;  %p27_p4 = scmp.ge.s32.totalorder %s3186_s18, 2 }
   0x8   : > { %p180_p5 = scmp.lt.s32.totalorder (!%p152_p3), %s2596_s13, 1  ;;  %s2237_s19 = smul.u32 (!%p152_p3), 320, %s2592_s12  ;;  %vm432_vm0 = vsmask.f32 (!%p152_p3), 7424  ;;  %vm1556_vm1 = vcmask (!%p152_p3), 1043456   ;;  %vm1281_vm2 = vcmask (!%p152_p3), 130048  }
   0x9   : > { %s3188_s18 = smov (%p27_p4, %s3186_s18), 0  ;;  %155 = sbr.rel (%p152_p3) target bundleno = 517 (0x205), region = 32 }
   0xa   : > { %s2610_s25 = smov (!%p152_p3), 24   ;;  %s2611_s26 = smov (!%p152_p3), 16   ;;  %vm1314_vm3 = vcmask (!%p152_p3), 195584   ;;  %vm1347_vm4 = vcmask (!%p152_p3), 261120   ;;  %vm1364_vm5 = vcmask (!%p152_p3), 326656   ;;  %vm1397_vm6 = vcmask (!%p152_p3), 392192  }
   0xb   : > { %s2612_s27 = smov (!%p152_p3), 40   ;;  %s2613_s28 = smov (!%p152_p3), 48   ;;  %vm1430_vm7 = vcmask (!%p152_p3), 457728   ;;  %vm1447_vm8 = vcmask (!%p152_p3), 523264   ;;  %vm1523_vm9 = vcmask (!%p152_p3), 588800  }
   0xc   : > { %s2614_s29 = smov (!%p152_p3), 64  }
  0x10   : > { %s3190_s13 = smov (!%p180_p5, %s2596_s13), 1 }
  0x11   : > { %s2440_s20 = smul.u32 1320, %s3190_s13  ;;  %s2021_s22 = sshll.u32 %s3190_s13, 7 }
  0x13   : > { %s184_s23 = scalar_lea.vmem %s3175_s0, %s2440_s20  ;;  %s2019_s20 = sshll.u32 %s2592_s12, 3 }
  0x14   : > { %s2674_s24 = scalar_lea.vmem %s184_s23, %s2237_s19  ;;  %p188_p6 = scmp.lt.s32.totalorder %s2019_s20, 31 }
  0x15   : > { %v2486_v0 = vld [vmem:[%s2674_s24 + $0xb4] sm:$0xff]   ;;  %v2488_v3 = vld [vmem:[%s2674_s24 + $0xbc] sm:$0xff]   ;;  %v2490_v6 = vld [vmem:[%s2674_s24 + $0x8] sm:$0xff]  }
  0x16   : > { %v2487_v1 = vld [vmem:[%s2674_s24 + $0x14] sm:$0xff]   ;;  %721 = vrot.lane.b32.xlu1 %v2486_v0, %s2610_s25  ;;  %v844_v2 = vshll.u32 %v2486_v0, 16  ;;  %v2489_v5 = vld [vmem:[%s2674_s24 + $0x1c] sm:$0xff]   ;;  %v2491_v7 = vld [vmem:[%s2674_s24 + $0x10] ss:$0 sps:$4 sm:$0x11]  }
  0x17   : > { %705 = vrot.lane.b32.xlu0 %v2487_v1, %s2610_s25  ;;  %v764_v4 = vshll.u32 %v2487_v1, 16  ;;  %v2492_v8 = vld [vmem:[%s2674_s24] sm:$0xff]   ;;  %v842_v9 = vshrl.u32 %v2486_v0, 16  ;;  %v441_v10 = vshll.u32 %v2490_v6, 16  ;;  %v445_v11 = vshrl.u32 %v2490_v6, 16  ;;  %v2493_v13 = vld [vmem:[%s2674_s24 + $0xa8] sm:$0xff]  }
  0x18   : > { %v449_v12 = vshll.u32 %v2491_v7, 16  ;;  %v434_v14 = vshrl.u32 %v2492_v8, 16  ;;  %v436_v15 = vshll.u32 %v2492_v8, 16  ;;  %v2494_v18 = vld [vmem:[%s2674_s24 + $0xb0] ss:$0 sps:$4 sm:$0x11]  }
  0x19   : > { %v443_v16 = vrot.slane %v441_v10, 1  ;;  %v521_v19 = vshll.u32 %v2493_v13, 16  ;;  %v525_v21 = vshrl.u32 %v2493_v13, 16  ;;  %v2690_v22 = vld [vmem:[%s2674_s24 + $0xa0] sm:$0xff]   ;;  %v846_v23 = vrot.slane %v844_v2, 1  ;;  %v2498_v52 = vld [vmem:[%s2674_s24 + $0xc8] sm:$0xff]  }
  0x1a   : > { %723 = vrot.lane.b32.xlu1 %v2488_v3, %s2610_s25  ;;  %v451_v17 = vrot.slane %v449_v12, 1  ;;  %v438_v20 = vrot.slane %v436_v15, 1  ;;  %v529_v26 = vshll.u32 %v2494_v18, 16  ;;  %v849_v27 = vshll.u32 %v2488_v3, 16  ;;  %v2499_v56 = vld [vmem:[%s2674_s24 + $0x28] sm:$0xff]   ;;  %v2500_v61 = vld [vmem:[%s2674_s24 + $0xd0] sm:$0xff]  }
  0x1b   : > { %707 = vrot.lane.b32.xlu0 %v2489_v5, %s2610_s25  ;;  %v447_v24 = vor.u32 %v445_v11, %v443_v16  ;;  %v523_v25 = vrot.slane %v521_v19, 1  ;;  %v514_v29 = vshrl.u32 %v2690_v22, 16  ;;  %v516_v30 = vshll.u32 %v2690_v22, 16  ;;  %v2496_v31 = vld [vmem:[%s2674_s24 + $0xc4] ss:$0 sps:$4 sm:$0x11]  }
  0x1c   : > { %v439_v28 = vor.u32 %v438_v20, %v434_v14  ;;  %v531_v34 = vrot.slane %v529_v26, 1  ;;  %v851_v35 = vrot.slane %v849_v27, 1  ;;  %v762_v38 = vshrl.u32 %v2487_v1, 16  ;;  %v2497_v40 = vld [vmem:[%s2674_s24 + $0x24] ss:$0 sps:$4 sm:$0x11]  }
  0x1d   : > { %v452_v32 = vsel %vm432_vm0, %v447_v24, %v451_v17  ;;  %v527_v33 = vor.u32 %v525_v21, %v523_v25  ;;  %v518_v37 = vrot.slane %v516_v30, 1  ;;  %v766_v39 = vrot.slane %v764_v4, 1  ;;  %v2501_v0 = vld [vmem:[%s2674_s24 + $0x30] sm:$0xff]   ;;  %v2502_v2 = vld [vmem:[%s2674_s24 + $0xd8] ss:$0 sps:$4 sm:$0x11]  }
  0x1e   : > { %595 = vrot.lane.b32.xlu1 %v452_v32, %s2611_s26  ;;  %v444_v36 = vsel %vm432_vm0, %v439_v28, %v443_v16  ;;  %v847_v42 = vor.u32 %v846_v23, %v842_v9  ;;  %v769_v43 = vshll.u32 %v2489_v5, 16  ;;  %v853_v44 = vshrl.u32 %v2488_v3, 16  ;;  %v2503_v3 = vld [vmem:[%s2674_s24 + $0x38] ss:$0 sps:$4 sm:$0x11]   ;;  %v2504_v6 = vld [vmem:[%s2674_s24 + $0xc8] sm:$0xff]  }
  0x1f   : > { %593 = vrot.lane.b32.xlu0 %v444_v36, %s2611_s26  ;;  %v532_v41 = vsel %vm432_vm0, %v527_v33, %v531_v34  ;;  %v519_v45 = vor.u32 %v518_v37, %v514_v29  ;;  %v767_v46 = vor.u32 %v766_v39, %v762_v38  ;;  %v857_v47 = vshll.u32 %v2496_v31, 16  ;;  %v2506_v11 = vld [vmem:[%s2674_s24 + $0x28] sm:$0xff]   ;;  %v2505_v13 = vld [vmem:[%s2674_s24 + $0xd0] sm:$0xff]   ;;  %v2508_v33 = vld [vmem:[%s2674_s24 + $0xd8] ss:$0 sps:$4 sm:$0x11]  }
  0x20   : > { %v773_v48 = vshrl.u32 %v2489_v5, 16  ;;  %v771_v49 = vrot.slane %v769_v43, 1  ;;  %v777_v50 = vshll.u32 %v2497_v40, 16  ;;  %v852_v53 = vsel %vm432_vm0, %v847_v42, %v851_v35  ;;  %v2507_v23 = vld [vmem:[%s2674_s24 + $0x30] sm:$0xff]   ;;  %s3192_s20 = smov (!%p188_p6, %s2019_s20), 31 }
  0x21   : > { %v524_v51 = vsel %vm432_vm0, %v519_v45, %v523_v25  ;;  %v855_v54 = vor.u32 %v853_v44, %v851_v35  ;;  %v859_v55 = vrot.slane %v857_v47, 1  ;;  %v1172_v60 = vshll.u32 %v2498_v52, 16  ;;  %v2509_v38 = vld [vmem:[%s2674_s24 + $0x38] ss:$0 sps:$4 sm:$0x11]   ;;  %s2020_s21 = sshll.u32 %s3192_s20, 2 }
  0x22   : > { %611 = vrot.lane.b32.xlu1 %v532_v41, %s2611_s26  ;;  %v772_v57 = vsel %vm432_vm0, %v767_v46, %v771_v49  ;;  %v775_v58 = vor.u32 %v773_v48, %v771_v49  ;;  %v779_v59 = vrot.slane %v777_v50, 1  ;;  %v1092_v63 = vshll.u32 %v2499_v56, 16  ;;  %v2510_v49 = vld [vmem:[%s2674_s24 + $0xdc] sm:$0xff]  }
  0x23   : > { %609 = vrot.lane.b32.xlu0 %v524_v51, %s2611_s26  ;;  %v860_v62 = vsel %vm432_vm0, %v855_v54, %v859_v55  ;;  %v1170_v4 = vshrl.u32 %v2498_v52, 16  ;;  %v1177_v5 = vshll.u32 %v2500_v61, 16  ;;  %v1174_v7 = vrot.slane %v1172_v60, 1  ;;  %v2513_v60 = vld [vmem:[%s2674_s24 + $0x44] sm:$0xff]  }
  0x24   : > { %v780_v1 = vsel %vm432_vm0, %v775_v58, %v779_v59  ;;  %v1090_v8 = vshrl.u32 %v2499_v56, 16  ;;  %v1094_v9 = vrot.slane %v1092_v63, 1  ;;  %v1097_v10 = vshll.u32 %v2501_v0, 16  ;;  %v2512_v58 = vld [vmem:[%s2674_s24 + $0xe4] sm:$0xff]  }
  0x25   : > { %v1181_v12 = vshrl.u32 %v2500_v61, 16  ;;  %v1179_v14 = vrot.slane %v1177_v5, 1  ;;  %v1185_v15 = vshll.u32 %v2502_v2, 16  ;;  %v1101_v16 = vshrl.u32 %v2501_v0, 16 }
  0x26   : > { %937 = vrot.lane.b32.xlu1 %v852_v53, %s2612_s27  ;;  %v1105_v17 = vshll.u32 %v2503_v3, 16  ;;  %v1175_v18 = vor.u32 %v1174_v7, %v1170_v4  ;;  %v1095_v19 = vor.u32 %v1094_v9, %v1090_v8  ;;  %v1099_v20 = vrot.slane %v1097_v10, 1  ;;  %v2514_v3 = vld [vmem:[%s2674_s24 + $0xec] ss:$0 sps:$4 sm:$0x11]  }
  0x27   : > { %921 = vrot.lane.b32.xlu0 %v772_v57, %s2612_s27  ;;  %v536_v21 = vshll.u32 %v2504_v6, 16  ;;  %v456_v24 = vshll.u32 %v2506_v11, 16  ;;  %v1187_v25 = vrot.slane %v1185_v15, 1  ;;  %v534_v27 = vshrl.u32 %v2504_v6, 16  ;;  %v2516_v15 = vld [vmem:[%s2674_s24 + $0xf0] sm:$0xff]  }
  0x28   : > { %v1107_v26 = vrot.slane %v1105_v17, 1  ;;  %v541_v28 = vshll.u32 %v2505_v13, 16  ;;  %v1180_v29 = vsel %vm432_vm0, %v1175_v18, %v1179_v14  ;;  %v1100_v30 = vsel %vm432_vm0, %v1095_v19, %v1099_v20  ;;  %v2515_v6 = vld [vmem:[%s2674_s24 + $0x4c] ss:$0 sps:$4 sm:$0x11]   ;;  %v2517_v19 = vld [vmem:[%s2674_s24 + $0x50] sm:$0xff]  }
  0x29   : > { %v1183_v31 = vor.u32 %v1181_v12, %v1179_v14  ;;  %v538_v32 = vrot.slane %v536_v21, 1  ;;  %v1103_v34 = vor.u32 %v1101_v16, %v1099_v20  ;;  %v454_v35 = vshrl.u32 %v2506_v11, 16 }
  0x2a   : > { %939 = vrot.lane.b32.xlu1 %v860_v62, %s2612_s27  ;;  %v458_v36 = vrot.slane %v456_v24, 1  ;;  %v461_v37 = vshll.u32 %v2507_v23, 16  ;;  %v543_v39 = vrot.slane %v541_v28, 1  ;;  %v545_v40 = vshrl.u32 %v2505_v13, 16  ;;  %v2518_v24 = vld [vmem:[%s2674_s24 + $0xf8] sm:$0xff]  }
  0x2b   : > { %923 = vrot.lane.b32.xlu0 %v780_v1, %s2612_s27  ;;  %v1188_v41 = vsel %vm432_vm0, %v1183_v31, %v1187_v25  ;;  %v539_v42 = vor.u32 %v538_v32, %v534_v27  ;;  %v549_v43 = vshll.u32 %v2508_v33, 16  ;;  %v465_v44 = vshrl.u32 %v2507_v23, 16  ;;  %v2520_v33 = vld [vmem:[%s2674_s24 + $0x100] ss:$0 sps:$4 sm:$0x11]  }
  0x2c   : > { %v1108_v45 = vsel %vm432_vm0, %v1103_v34, %v1107_v26  ;;  %v459_v46 = vor.u32 %v458_v36, %v454_v35  ;;  %v463_v47 = vrot.slane %v461_v37, 1  ;;  %v469_v48 = vshll.u32 %v2509_v38, 16  ;;  %v2521_v34 = vld [vmem:[%s2674_s24 + $0x60] ss:$0 sps:$4 sm:$0x11]   ;;  %v2769_v35 = vld [vmem:[%s2674_s24 + $0xf0] sm:$0xff]  }
  0x2d   : > { %v544_v50 = vsel %vm432_vm0, %v539_v42, %v543_v39  ;;  %v547_v51 = vor.u32 %v545_v40, %v543_v39  ;;  %v864_v57 = vshll.u32 %v2510_v49, 16  ;;  %v862_v63 = vshrl.u32 %v2510_v49, 16  ;;  %v2772_v40 = vld [vmem:[%s2674_s24 + $0xf8] sm:$0xff]  }
  0x2e   : > { %1049 = vrot.lane.b32.xlu1 %v2498_v52, %s2613_s28  ;;  %v551_v52 = vrot.slane %v549_v43, 1  ;;  %v464_v53 = vsel %vm432_vm0, %v459_v46, %v463_v47  ;;  %v467_v54 = vor.u32 %v465_v44, %v463_v47  ;;  %v471_v55 = vrot.slane %v469_v48, 1  ;;  %v2781_v48 = vld [vmem:[%s2674_s24 + $0x58] sm:$0xff]  }
  0x2f   : > { %1033 = vrot.lane.b32.xlu0 %v2499_v56, %s2613_s28  ;;  %v2511_v56 = vld [vmem:[%s2674_s24 + $0x3c] sm:$0xff]   ;;  %v869_v1 = vshll.u32 %v2512_v58, 16  ;;  %v789_v2 = vshll.u32 %v2513_v60, 16  ;;  %v873_v8 = vshrl.u32 %v2512_v58, 16  ;;  %v877_v11 = vshll.u32 %v2514_v3, 16 }
  0x30   : > { %v552_v59 = vsel %vm432_vm0, %v547_v51, %v551_v52  ;;  %v784_v62 = vshll.u32 %v2511_v56, 16  ;;  %v782_v4 = vshrl.u32 %v2511_v56, 16  ;;  %v793_v13 = vshrl.u32 %v2513_v60, 16 }
  0x31   : > { %v871_v7 = vrot.slane %v869_v1, 1  ;;  %v791_v10 = vrot.slane %v789_v2, 1  ;;  %v797_v14 = vshll.u32 %v2515_v6, 16  ;;  %v879_v18 = vrot.slane %v877_v11, 1 }
  0x32   : > { %1051 = vrot.lane.b32.xlu1 %v2500_v61, %s2613_s28  ;;  %v472_v61 = vsel %vm432_vm0, %v467_v54, %v471_v55  ;;  %v786_v5 = vrot.slane %v784_v62, 1  ;;  %v1192_v25 = vshll.u32 %v2516_v15, 16  ;;  %v1112_v27 = vshll.u32 %v2517_v19, 16  ;;  %v2527_v1 = vld [vmem:[%s2674_s24 + $0x60] ss:$0 sps:$4 sm:$0x11]  }
  0x33   : > { %1035 = vrot.lane.b32.xlu0 %v2501_v0, %s2613_s28  ;;  %v866_v0 = vrot.slane %v864_v57, 1  ;;  %v875_v17 = vor.u32 %v873_v8, %v871_v7  ;;  %v795_v21 = vor.u32 %v793_v13, %v791_v10  ;;  %v799_v23 = vrot.slane %v797_v14, 1  ;;  %v2526_v57 = vld [vmem:[%s2674_s24 + $0x100] ss:$0 sps:$4 sm:$0x11]   ;;  %v2551_v13 = vld [vmem:[%s3176_s1 + $0x8] sm:$0xff]  }
  0x34   : > { %v787_v12 = vor.u32 %v786_v5, %v782_v4  ;;  %v1190_v31 = vshrl.u32 %v2516_v15, 16  ;;  %v1194_v32 = vrot.slane %v1192_v25, 1  ;;  %v1110_v37 = vshrl.u32 %v2517_v19, 16  ;;  %v2548_v8 = vld [vmem:[%s3176_s1] sm:$0xff]  }
  0x35   : > { %v867_v9 = vor.u32 %v866_v0, %v862_v63  ;;  %v880_v26 = vsel %vm432_vm0, %v875_v17, %v879_v18  ;;  %v800_v28 = vsel %vm432_vm0, %v795_v21, %v799_v23  ;;  %v1114_v38 = vrot.slane %v1112_v27, 1  ;;  %2386 = vmatprep.subr.bf16.mxu0 %v2548_v8  ;;  %2428 = vmatprep.subr.bf16.mxu1 %v2548_v8  ;;  %v2528_v14 = vld [vmem:[%s2674_s24 + $0x104] sm:$0xff]   ;;  %v2552_v23 = vld [vmem:[%s3176_s1 + $0x10] sm:$0xff]  }
  0x36   : > { %1265 = vrot.lane.b32.xlu1 %v1180_v29, %s2614_s29  ;;  %v792_v20 = vsel %vm432_vm0, %v787_v12, %v791_v10  ;;  %v2519_v29 = vld [vmem:[%s2674_s24 + $0x58] sm:$0xff]   ;;  %v1195_v42 = vor.u32 %v1194_v32, %v1190_v31  ;;  %v1201_v43 = vshrl.u32 %v2518_v24, 16  ;;  %v1125_v46 = vshll.u32 %v2521_v34, 16  ;;  %2387 = vmatpush3.bf16.msra.mxu0 %v2548_v8  ;;  %v2529_v21 = vld [vmem:[%s2674_s24 + $0x64] sm:$0xff]  }
  0x37   : > { %1249 = vrot.lane.b32.xlu0 %v1100_v30, %s2614_s29  ;;  %v872_v16 = vsel %vm432_vm0, %v867_v9, %v871_v7  ;;  %v1197_v30 = vshll.u32 %v2518_v24, 16  ;;  %v1117_v39 = vshll.u32 %v2519_v29, 16  ;;  %v1121_v44 = vshrl.u32 %v2519_v29, 16  ;;  %2433 = vmatpush3.bf16.msra.mxu1 %v2548_v8  ;;  %v2555_v31 = vld [vmem:[%s3176_s1 + $0x18] sm:$0xff]  }
  0x38   : > { %v556_v47 = vshll.u32 %v2769_v35, 16  ;;  %v554_v55 = vshrl.u32 %v2769_v35, 16  ;;  %v565_v3 = vshrl.u32 %v2772_v40, 16  ;;  %v569_v4 = vshll.u32 %v2526_v57, 16  ;;  %2388 = vmatprep.subr.bf16.mxu0 %v2551_v13  ;;  %2429 = vmatprep.subr.bf16.mxu1 %v2551_v13  ;;  %v2850_v8 = vld [vmem:[%s2674_s24 + $0x118] sm:$0xff]  }
  0x39   : > { %v1199_v36 = vrot.slane %v1197_v30, 1  ;;  %v485_v7 = vshrl.u32 %v2781_v48, 16  ;;  %v489_v12 = vshll.u32 %v2527_v1, 16  ;;  %v882_v30 = vshrl.u32 %v2528_v14, 16 }
  0x3a   : > { %1267 = vrot.lane.b32.xlu1 %v1188_v41, %s2614_s29  ;;  %v2775_v41 = vld [vmem:[%s2674_s24 + $0x50] sm:$0xff]   ;;  %v571_v17 = vrot.slane %v569_v4, 1  ;;  %2389 = vmatpush3.bf16.msra.mxu0 %v2551_v13 }
  0x3b   : > { %1251 = vrot.lane.b32.xlu0 %v1108_v45, %s2614_s29  ;;  %v1205_v45 = vshll.u32 %v2520_v33, 16  ;;  %v476_v51 = vshll.u32 %v2775_v41, 16  ;;  %v1200_v52 = vsel %vm432_vm0, %v1195_v42, %v1199_v36  ;;  %2434 = vmatpush3.bf16.msra.mxu1 %v2551_v13  ;;  %v2532_v33 = vld [vmem:[%s2674_s24 + $0x114] ss:$0 sps:$4 sm:$0x11]  }
  0x3c   : > { %2390 = vmatprep.subr.bf16.mxu0 %v2552_v23  ;;  %2430 = vmatprep.subr.bf16.mxu1 %v2552_v23  ;;  %v2533_v42 = vld [vmem:[%s2674_s24 + $0x74] ss:$0 sps:$4 sm:$0x11]  }
  0x3d   : > { %v1207_v54 = vrot.slane %v1205_v45, 1  ;;  %v478_v0 = vrot.slane %v476_v51, 1 }
  0x3e   : > { %613 = vrot.lane.b32.xlu1 %v544_v50, %s2611_s26  ;;  %v1119_v50 = vrot.slane %v1117_v39, 1  ;;  %2391 = vmatpush3.bf16.msra.mxu0 %v2552_v23 }
  0x3f   : > { %597 = vrot.lane.b32.xlu0 %v464_v53, %s2611_s26  ;;  %v1203_v53 = vor.u32 %v1201_v43, %v1199_v36  ;;  %v802_v36 = vshrl.u32 %v2529_v21, 16  ;;  %2435 = vmatpush3.bf16.msra.mxu1 %v2552_v23 }
  0x40   : > { %v1123_v63 = vor.u32 %v1121_v44, %v1119_v50  ;;  %2392 = vmatprep.subr.bf16.mxu0 %v2555_v31  ;;  %2431 = vmatprep.subr.bf16.mxu1 %v2555_v31 }
  0x41   : > { %v1208_v5 = vsel %vm432_vm0, %v1203_v53, %v1207_v54  ;;  %v2534_v53 = vld [vmem:[%s2674_s24 + $0x118] sm:$0xff]  }
  0x42   : > { %615 = vrot.lane.b32.xlu1 %v552_v59, %s2611_s26  ;;  %v558_v59 = vrot.slane %v556_v47, 1  ;;  %2393 = vmatpush3.bf16.msra.mxu0 %v2555_v31 }
  0x43   : > { %599 = vrot.lane.b32.xlu0 %v472_v61, %s2611_s26  ;;  %v481_v61 = vshll.u32 %v2781_v48, 16  ;;  %2436 = vmatpush3.bf16.msra.mxu1 %v2555_v31 }
  0x44   : > { %v559_v6 = vor.u32 %v558_v59, %v554_v55 }
  0x45   : > { %v483_v11 = vrot.slane %v481_v61, 1  ;;  %v1212_v61 = vshll.u32 %v2534_v53, 16 }
  0x46   : > { %725 = vrot.lane.b32.xlu1 %v2510_v49, %s2610_s25  ;;  %v1115_v49 = vor.u32 %v1114_v38, %v1110_v37  ;;  %v2558_v37 = vld [vmem:[%s3176_s1 + $0x20] ss:$0 sps:$4 sm:$0xff]  }
  0x47   : > { %709 = vrot.lane.b32.xlu0 %v2511_v56, %s2610_s25  ;;  %v561_v56 = vshll.u32 %v2772_v40, 16  ;;  %v1558_v47 = vsel %vm1556_vm1, %v2558_v37, 0  ;;  %2438 = vmatprep.subr.msk.bf16.mxu0 %vm1556_vm1, %v2558_v37  ;;  %v1214_v4 = vrot.slane %v1212_v61, 1  ;;  %v2546_v61 = vld [vmem:[%s2674_s24 + $0x12c] sm:$0xff]  }
  0x48   : > { %v1120_v62 = vsel %vm432_vm0, %v1115_v49, %v1119_v50  ;;  %2439 = vmatprep.subr.msk.bf16.mxu1 %vm1556_vm1, %v2558_v37  ;;  %2395 = vmatpush3.bf16.msra.mxu0 %v1558_v47 }
  0x49   : > { %v563_v2 = vrot.slane %v561_v56, 1  ;;  %2437 = vmatpush3.bf16.msra.mxu1 %v1558_v47 }
  0x4a   : > { %727 = vrot.lane.b32.xlu1 %v2512_v58, %s2610_s25  ;;  %v1127_v58 = vrot.slane %v1125_v46, 1  ;;  %v897_v46 = vshll.u32 %v2532_v33, 16 }
  0x4b   : > { %711 = vrot.lane.b32.xlu0 %v2513_v60, %s2610_s25  ;;  %v474_v60 = vshrl.u32 %v2775_v41, 16 }
  0x4c   : > { %v1128_v9 = vsel %vm432_vm0, %v1123_v63, %v1127_v58  ;;  %v899_v56 = vrot.slane %v897_v46, 1  ;;  %v2536_v63 = vld [vmem:[%s2674_s24 + $0x120] sm:$0xff]  }
  0x4d   : > { %v479_v10 = vor.u32 %v478_v0, %v474_v60  ;;  %v2535_v60 = vld [vmem:[%s2674_s24 + $0x78] sm:$0xff]  }
  0x4e   : > { %941 = vrot.lane.b32.xlu1 %v872_v16, %s2612_s27  ;;  %v567_v16 = vor.u32 %v565_v3, %v563_v2  ;;  %v1132_v1 = vshll.u32 %v2535_v60, 16  ;;  %v1210_v3 = vshrl.u32 %v2534_v53, 16 }
  0x4f   : > { %925 = vrot.lane.b32.xlu0 %v792_v20, %s2612_s27  ;;  %v484_v18 = vsel %vm432_vm0, %v479_v10, %v483_v11  ;;  %v491_v20 = vrot.slane %v489_v12, 1  ;;  %v2853_v12 = vld [vmem:[%s2674_s24 + $0x78] sm:$0xff]  }
  0x50   : > { %v572_v25 = vsel %vm432_vm0, %v567_v16, %v571_v17  ;;  %v1134_v10 = vrot.slane %v1132_v1, 1  ;;  %v1215_v13 = vor.u32 %v1214_v4, %v1210_v3  ;;  %v2857_v16 = vld [vmem:[%s2674_s24 + $0x120] sm:$0xff]   ;;  %v2547_v1 = vld [vmem:[%s2674_s24 + $0x8c] sm:$0xff]   ;;  %v904_v3 = vshll.u32 %v2546_v61, 16  ;;  %v2549_v4 = vld [vmem:[%s2674_s24 + $0x134] sm:$0xff]  }
  0x52   : > { %943 = vrot.lane.b32.xlu1 %v880_v26, %s2612_s27  ;;  %v2530_v26 = vld [vmem:[%s2674_s24 + $0x10c] sm:$0xff]  }
  0x53   : > { %927 = vrot.lane.b32.xlu0 %v800_v28, %s2612_s27  ;;  %v804_v28 = vshll.u32 %v2529_v21, 16  ;;  %v889_v34 = vshll.u32 %v2530_v26, 16  ;;  %v893_v45 = vshrl.u32 %v2530_v26, 16 }
  0x55   : > { %v806_v38 = vrot.slane %v804_v28, 1  ;;  %v891_v44 = vrot.slane %v889_v34, 1  ;;  %v574_v28 = vshrl.u32 %v2850_v8, 16  ;;  %v2544_v34 = vld [vmem:[%s2674_s24 + $0x128] ss:$0 sps:$4 sm:$0x11]  }
  0x56   : > { %1053 = vrot.lane.b32.xlu1 %v2516_v15, %s2613_s28  ;;  %v564_v15 = vsel %vm432_vm0, %v559_v6, %v563_v2  ;;  %v2537_v2 = vld [vmem:[%s2674_s24 + $0x80] sm:$0xff]   ;;  %v1217_v6 = vshll.u32 %v2536_v63, 16 }
  0x57   : > { %1037 = vrot.lane.b32.xlu0 %v2517_v19, %s2613_s28  ;;  %v487_v19 = vor.u32 %v485_v7, %v483_v11  ;;  %v807_v49 = vor.u32 %v806_v38, %v802_v36  ;;  %v895_v55 = vor.u32 %v893_v45, %v891_v44  ;;  %v2539_v7 = vld [vmem:[%s2674_s24 + $0x88] ss:$0 sps:$4 sm:$0x11]   ;;  %v1137_v11 = vshll.u32 %v2537_v2, 16 }
  0x58   : > { %v1219_v17 = vrot.slane %v1217_v6, 1  ;;  %v494_v38 = vshrl.u32 %v2853_v12, 16 }
  0x59   : > { %v492_v27 = vsel %vm432_vm0, %v487_v19, %v491_v20  ;;  %v1145_v19 = vshll.u32 %v2539_v7, 16  ;;  %v576_v20 = vshll.u32 %v2850_v8, 16  ;;  %v1139_v23 = vrot.slane %v1137_v11, 1 }
  0x5a   : > { %1055 = vrot.lane.b32.xlu1 %v2518_v24, %s2613_s28  ;;  %v884_v24 = vshll.u32 %v2528_v14, 16  ;;  %v824_v7 = vshll.u32 %v2547_v1, 16  ;;  %v902_v11 = vshrl.u32 %v2546_v61, 16 }
  0x5b   : > { %1039 = vrot.lane.b32.xlu0 %v2519_v29, %s2613_s28  ;;  %v2531_v29 = vld [vmem:[%s2674_s24 + $0x6c] sm:$0xff]   ;;  %v578_v33 = vrot.slane %v576_v20, 1 }
  0x5c   : > { %v886_v32 = vrot.slane %v884_v24, 1  ;;  %v809_v39 = vshll.u32 %v2531_v29, 16  ;;  %v813_v51 = vshrl.u32 %v2531_v29, 16  ;;  %v2862_v24 = vld [vmem:[%s2674_s24 + $0x80] sm:$0xff]  }
  0x5e   : > { %1269 = vrot.lane.b32.xlu1 %v1200_v52, %s2614_s29  ;;  %v887_v43 = vor.u32 %v886_v32, %v882_v30  ;;  %v811_v50 = vrot.slane %v809_v39, 1  ;;  %v817_v52 = vshll.u32 %v2533_v42, 16  ;;  %v1220_v30 = vsel %vm432_vm0, %v1215_v13, %v1219_v17 }
  0x5f   : > { %1253 = vrot.lane.b32.xlu0 %v1120_v62, %s2614_s29  ;;  %v900_v62 = vsel %vm432_vm0, %v895_v55, %v899_v56  ;;  %v1147_v32 = vrot.slane %v1145_v19, 1  ;;  %v501_v42 = vshll.u32 %v2862_v24, 16  ;;  %v906_v13 = vrot.slane %v904_v3, 1 }
  0x60   : > { %v892_v54 = vsel %vm432_vm0, %v887_v43, %v891_v44  ;;  %v812_v57 = vsel %vm432_vm0, %v807_v49, %v811_v50  ;;  %v815_v58 = vor.u32 %v813_v51, %v811_v50  ;;  %v819_v59 = vrot.slane %v817_v52, 1  ;;  %v2545_v43 = vld [vmem:[%s2674_s24 + $0x88] ss:$0 sps:$4 sm:$0x11]  }
  0x61   : > { %v579_v49 = vor.u32 %v578_v33, %v574_v28  ;;  %v585_v50 = vshrl.u32 %v2857_v16, 16  ;;  %v589_v51 = vshll.u32 %v2544_v34, 16  ;;  %v509_v55 = vshll.u32 %v2545_v43, 16 }
  0x62   : > { %1271 = vrot.lane.b32.xlu1 %v1208_v5, %s2614_s29  ;;  %v820_v0 = vsel %vm432_vm0, %v815_v58, %v819_v59  ;;  %v2538_v5 = vld [vmem:[%s2674_s24 + $0x128] ss:$0 sps:$4 sm:$0x11]   ;;  %v826_v19 = vrot.slane %v824_v7, 1 }
  0x63   : > { %1255 = vrot.lane.b32.xlu0 %v1128_v9, %s2614_s29  ;;  %v1130_v9 = vshrl.u32 %v2535_v60, 16 }
  0x66   : > { %617 = vrot.lane.b32.xlu1 %v564_v15, %s2611_s26  ;;  %v1225_v15 = vshll.u32 %v2538_v5, 16 }
  0x67   : > { %601 = vrot.lane.b32.xlu0 %v484_v18, %s2611_s26  ;;  %v1141_v18 = vshrl.u32 %v2537_v2, 16 }
  0x69   : > { %v1143_v31 = vor.u32 %v1141_v18, %v1139_v23  ;;  %v822_v18 = vshrl.u32 %v2547_v1, 16 }
  0x6a   : > { %619 = vrot.lane.b32.xlu1 %v572_v25, %s2611_s26  ;;  %v496_v25 = vshll.u32 %v2853_v12, 16 }
  0x6b   : > { %603 = vrot.lane.b32.xlu0 %v492_v27, %s2611_s26  ;;  %v1227_v27 = vrot.slane %v1225_v15, 1  ;;  %v1148_v47 = vsel %vm432_vm0, %v1143_v31, %v1147_v32  ;;  %v2553_v15 = vld [vmem:[%s2674_s24 + $0x13c] ss:$0 sps:$4 sm:$0x11]  }
  0x6c   : > { %v498_v39 = vrot.slane %v496_v25, 1  ;;  %v907_v25 = vor.u32 %v906_v13, %v902_v11  ;;  %v917_v28 = vshll.u32 %v2553_v15, 16 }
  0x6e   : > { %729 = vrot.lane.b32.xlu1 %v2528_v14, %s2610_s25  ;;  %v1221_v14 = vshrl.u32 %v2536_v63, 16  ;;  %v499_v52 = vor.u32 %v498_v39, %v494_v38  ;;  %v919_v43 = vrot.slane %v917_v28, 1 }
  0x6f   : > { %713 = vrot.lane.b32.xlu0 %v2529_v21, %s2610_s25  ;;  %v1135_v21 = vor.u32 %v1134_v10, %v1130_v9  ;;  %v2550_v9 = vld [vmem:[%s2674_s24 + $0x94] sm:$0xff]  }
  0x70   : > { %v829_v20 = vshll.u32 %v2550_v9, 16  ;;  %v833_v32 = vshrl.u32 %v2550_v9, 16 }
  0x71   : > { %v1140_v36 = vsel %vm432_vm0, %v1135_v21, %v1139_v23  ;;  %v2554_v21 = vld [vmem:[%s2674_s24 + $0x9c] ss:$0 sps:$4 sm:$0x11]  }
  0x72   : > { %731 = vrot.lane.b32.xlu1 %v2530_v26, %s2610_s25  ;;  %v1223_v26 = vor.u32 %v1221_v14, %v1219_v17  ;;  %v909_v14 = vshll.u32 %v2549_v4, 16  ;;  %v831_v31 = vrot.slane %v829_v20, 1  ;;  %v837_v33 = vshll.u32 %v2554_v21, 16 }
  0x73   : > { %715 = vrot.lane.b32.xlu0 %v2531_v29, %s2610_s25  ;;  %v581_v29 = vshll.u32 %v2857_v16, 16 }
  0x74   : > { %v1228_v45 = vsel %vm432_vm0, %v1223_v26, %v1227_v27  ;;  %v911_v26 = vrot.slane %v909_v14, 1  ;;  %v913_v27 = vshrl.u32 %v2549_v4, 16 }
  0x75   : > { %v583_v46 = vrot.slane %v581_v29, 1 }
  0x76   : > { %945 = vrot.lane.b32.xlu1 %v892_v54, %s2612_s27  ;;  %v505_v54 = vshrl.u32 %v2862_v24, 16  ;;  %v912_v39 = vsel %vm432_vm0, %v907_v25, %v911_v26 }
  0x77   : > { %929 = vrot.lane.b32.xlu0 %v812_v57, %s2612_s27  ;;  %v584_v58 = vsel %vm432_vm0, %v579_v49, %v583_v46  ;;  %v587_v59 = vor.u32 %v585_v50, %v583_v46  ;;  %v835_v49 = vor.u32 %v833_v32, %v831_v31  ;;  %v839_v50 = vrot.slane %v837_v33, 1 }
  0x7a   : > { %947 = vrot.lane.b32.xlu1 %v900_v62, %s2612_s27 }
  0x7b   : > { %931 = vrot.lane.b32.xlu0 %v820_v0, %s2612_s27  ;;  %v511_v0 = vrot.slane %v509_v55, 1  ;;  %v2923_v55 = vld [vmem:[%s2674_s24 + $0x148] sm:$0xff]  }
  0x7e   : > { %1057 = vrot.lane.b32.xlu1 %v2534_v53, %s2613_s28  ;;  %v503_v53 = vrot.slane %v501_v42, 1  ;;  %v915_v42 = vor.u32 %v913_v27, %v911_v26  ;;  %v1241_v26 = vshrl.u32 %v2923_v55, 16 }
  0x7f   : > { %1041 = vrot.lane.b32.xlu0 %v2535_v60, %s2613_s28  ;;  %v591_v60 = vrot.slane %v589_v51, 1 }
  0x80   : > { %v504_v62 = vsel %vm432_vm0, %v499_v52, %v503_v53  ;;  %v2563_v52 = vld [vmem:[%s2674_s24] sm:$0xff]  }
  0x82   : > { %1059 = vrot.lane.b32.xlu1 %v2536_v63, %s2613_s28  ;;  %v507_v63 = vor.u32 %v505_v54, %v503_v53 }
  0x83   : > { %1043 = vrot.lane.b32.xlu0 %v2537_v2, %s2613_s28  ;;  %v592_v2 = vsel %vm432_vm0, %v587_v59, %v591_v60  ;;  %v2928_v60 = vld [vmem:[%s2674_s24 + $0xa8] sm:$0xff]  }
  0x84   : > { %v512_v6 = vsel %vm432_vm0, %v507_v63, %v511_v0  ;;  %v2564_v0 = vld [vmem:[%s2674_s24 + $0xa8] sm:$0xff]   ;;  %v1157_v14 = vshll.u32 %v2928_v60, 16 }
  0x86   : > { %1273 = vrot.lane.b32.xlu1 %v1220_v30, %s2614_s29  ;;  %v827_v30 = vor.u32 %v826_v19, %v822_v18  ;;  %v2562_v19 = vld [vmem:[%s2674_s24 + $0xb0] ss:$0 sps:$4 sm:$0x11]   ;;  %v1159_v32 = vrot.slane %v1157_v14, 1 }
  0x87   : > { %1257 = vrot.lane.b32.xlu0 %v1140_v36, %s2614_s29  ;;  %v2556_v36 = vld [vmem:[%s2674_s24 + $0x140] sm:$0xff]  }
  0x88   : > { %v2872_v37 = vpop.permute.xlu1 %721  ;;  %v1232_v54 = vshll.u32 %v2556_v36, 16  ;;  %v1230_v7 = vshrl.u32 %v2556_v36, 16 }
  0x89   : > { %v2877_v44 = vpop.permute.xlu0 %705 }
  0x8a   : > { %1275 = vrot.lane.b32.xlu1 %v1228_v45, %s2614_s29  ;;  %v2557_v45 = vld [vmem:[%s2674_s24 + $0xa0] sm:$0xff]  }
  0x8b   : > { %1259 = vrot.lane.b32.xlu0 %v1148_v47, %s2614_s29  ;;  %v832_v47 = vsel %vm432_vm0, %v827_v30, %v831_v31  ;;  %v1152_v59 = vshll.u32 %v2557_v45, 16  ;;  %v1150_v11 = vshrl.u32 %v2557_v45, 16 }
  0x8c   : > { %v2886_v56 = vpop.permute.xlu1 %723 }
  0x8d   : > { %v2889_v57 = vpop.permute.xlu0 %707  ;;  %v1154_v13 = vrot.slane %v1152_v59, 1 }
  0x8e   : > { %621 = vrot.lane.b32.xlu1 %v584_v58, %s2611_s26  ;;  %v920_v58 = vsel %vm432_vm0, %v915_v42, %v919_v43  ;;  %v1165_v42 = vshll.u32 %v2562_v19, 16 }
  0x8f   : > { %605 = vrot.lane.b32.xlu0 %v504_v62, %s2611_s26  ;;  %v840_v62 = vsel %vm432_vm0, %v835_v49, %v839_v50  ;;  %v1155_v31 = vor.u32 %v1154_v13, %v1150_v11 }
  0x90   : > { %v2899_v5 = vpop.permute.xlu1 %595 }
  0x91   : > { %v594_v10 = vpop.permute.xlu0 %593 }
  0x92   : > { %623 = vrot.lane.b32.xlu1 %v592_v2, %s2611_s26  ;;  %v1283_v53 = vsel %vm1281_vm2, %v2563_v52, %v594_v10  ;;  %v1237_v10 = vshll.u32 %v2923_v55, 16 }
  0x93   : > { %607 = vrot.lane.b32.xlu0 %v512_v6, %s2611_s26  ;;  %v1316_v63 = vsel %vm1314_vm3, %v1283_v53, %v2877_v44 }
  0x94   : > { %v612_v17 = vpop.permute.xlu1 %611 }
  0x95   : > { %v610_v23 = vpop.permute.xlu0 %609 }
  0x96   : > { %733 = vrot.lane.b32.xlu1 %v2546_v61, %s2610_s25  ;;  %v1299_v38 = vsel %vm1281_vm2, %v2690_v22, %v610_v23 }
  0x97   : > { %717 = vrot.lane.b32.xlu0 %v2547_v1, %s2610_s25  ;;  %v1332_v22 = vsel %vm1314_vm3, %v1299_v38, %v2872_v37  ;;  %v1301_v1 = vsel %vm1281_vm2, %v2564_v0, %v612_v17 }
  0x98   : > { %v938_v29 = vpop.permute.xlu1 %937  ;;  %v1356_v2 = vsel %vm1347_vm4, %v1332_v22, %v2872_v37  ;;  %v2561_v37 = vld [vmem:[%s2674_s24 + $0x150] ss:$0 sps:$4 sm:$0x11]   ;;  %v1334_v15 = vsel %vm1314_vm3, %v1301_v1, %v2886_v56 }
  0x99   : > { %v922_v34 = vpop.permute.xlu0 %921  ;;  %v1382_v17 = vsel %vm1364_vm5, %v1356_v2, %v938_v29  ;;  %v1239_v29 = vrot.slane %v1237_v10, 1  ;;  %v1357_v30 = vsel %vm1347_vm4, %v1334_v15, %v2886_v56  ;;  %v1245_v33 = vshll.u32 %v2561_v37, 16  ;;  %v2566_v15 = vld [vmem:[%s2674_s24 + $0xc8] sm:$0xff]  }
  0x9a   : > { %735 = vrot.lane.b32.xlu1 %v2549_v4, %s2610_s25  ;;  %v2565_v4 = vld [vmem:[%s2674_s24 + $0x8] sm:$0xff]  }
  0x9b   : > { %719 = vrot.lane.b32.xlu0 %v2550_v9, %s2610_s25  ;;  %v1285_v6 = vsel %vm1281_vm2, %v2565_v4, %v2899_v5  ;;  %v1234_v9 = vrot.slane %v1232_v54, 1  ;;  %v1348_v5 = vsel %vm1347_vm4, %v1316_v63, %v2877_v44  ;;  %v1161_v44 = vshrl.u32 %v2928_v60, 16  ;;  %s192_s25 = sadd.s32 %s2021_s22, %s2020_s21 }
  0x9c   : > { %v940_v46 = vpop.permute.xlu1 %939  ;;  %v1318_v20 = vsel %vm1314_vm3, %v1285_v6, %v2889_v57  ;;  %v1366_v21 = vsel %vm1364_vm5, %v1348_v5, %v922_v34  ;;  %v1247_v52 = vrot.slane %v1245_v33, 1  ;;  %v1160_v54 = vsel %vm432_vm0, %v1155_v31, %v1159_v32  ;;  %v2567_v5 = vld [vmem:[%s2674_s24 + $0x28] sm:$0xff]   ;;  %s2022_s12 = sshll.u32 %s192_s25, 2 }
  0x9d   : > { %v924_v51 = vpop.permute.xlu0 %923  ;;  %v1235_v28 = vor.u32 %v1234_v9, %v1230_v7  ;;  %v1384_v34 = vsel %vm1364_vm5, %v1357_v30, %v940_v46  ;;  %v1349_v38 = vsel %vm1347_vm4, %v1318_v20, %v2889_v57 }
  0x9e   : > { %949 = vrot.lane.b32.xlu1 %v912_v39, %s2612_s27  ;;  %v1368_v43 = vsel %vm1364_vm5, %v1349_v38, %v924_v51  ;;  %v1243_v51 = vor.u32 %v1241_v26, %v1239_v29 }
  0x9f   : > { %933 = vrot.lane.b32.xlu0 %v832_v47, %s2612_s27  ;;  %v1240_v46 = vsel %vm432_vm0, %v1235_v28, %v1239_v29  ;;  %v2569_v28 = vld [vmem:[%s2674_s24 + $0x30] sm:$0xff]  }
  0xa0   : > { %v1050_v61 = vpop.permute.xlu1 %1049  ;;  %v1248_v63 = vsel %vm432_vm0, %v1243_v51, %v1247_v52 }
  0xa1   : > { %v1034_v3 = vpop.permute.xlu0 %1033  ;;  %v1415_v23 = vsel %vm1397_vm6, %v1382_v17, %v1050_v61 }
  0xa2   : > { %951 = vrot.lane.b32.xlu1 %v920_v58, %s2612_s27  ;;  %v1399_v27 = vsel %vm1397_vm6, %v1366_v21, %v1034_v3  ;;  %v1439_v39 = vsel %vm1430_vm7, %v1415_v23, %v1050_v61  ;;  %v1163_v58 = vor.u32 %v1161_v44, %v1159_v32 }
  0xa3   : > { %935 = vrot.lane.b32.xlu0 %v840_v62, %s2612_s27  ;;  %v1431_v47 = vsel %vm1430_vm7, %v1399_v27, %v1034_v3  ;;  %s3118_s27 = scalar_lea.vmem %s3178_s3, %s2022_s12 }
  0xa4   : > { %v1052_v18 = vpop.permute.xlu1 %1051 }
  0xa5   : > { %v1036_v25 = vpop.permute.xlu0 %1035  ;;  %v1417_v56 = vsel %vm1397_vm6, %v1384_v34, %v1052_v18 }
  0xa6   : > { %1061 = vrot.lane.b32.xlu1 %v2556_v36, %s2613_s28  ;;  %v1401_v50 = vsel %vm1397_vm6, %v1368_v43, %v1036_v25  ;;  %v1440_v53 = vsel %vm1430_vm7, %v1417_v56, %v1052_v18 }
  0xa7   : > { %1045 = vrot.lane.b32.xlu0 %v2557_v45, %s2613_s28  ;;  %v1432_v59 = vsel %vm1430_vm7, %v1401_v50, %v1036_v25  ;;  %v2568_v25 = vld [vmem:[%s2674_s24 + $0xd0] sm:$0xff]  }
  0xa8   : > { %v1266_v36 = vpop.permute.xlu1 %1265 }
  0xa9   : > { %v1250_v49 = vpop.permute.xlu0 %1249  ;;  %v1465_v45 = vsel %vm1447_vm8, %v1439_v39, %v1266_v36 }
  0xaa   : > { %1063 = vrot.lane.b32.xlu1 %v2923_v55, %s2613_s28  ;;  %v1449_v57 = vsel %vm1447_vm8, %v1431_v47, %v1250_v49  ;;  %2412 = vmatprep.mubr.msk.bf16.mxu1 %vm1523_vm9, %v1465_v45  ;;  %v1167_v55 = vrot.slane %v1165_v42, 1 }
  0xab   : > { %1047 = vrot.lane.b32.xlu0 %v2928_v60, %s2613_s28  ;;  %2396 = vmatprep.mubr.msk.bf16.mxu0 %vm1523_vm9, %v1449_v57 }
  0xac   : > { %v1268_v22 = vpop.permute.xlu1 %1267  ;;  %v1168_v1 = vsel %vm432_vm0, %v1163_v58, %v1167_v55 }
  0xad   : > { %v1467_v61 = vsel %vm1447_vm8, %v1440_v53, %v1268_v22  ;;  %v1252_v62 = vpop.permute.xlu0 %1251 }
  0xae   : > { %v1451_v60 = vsel %vm1447_vm8, %v1432_v59, %v1252_v62  ;;  %1277 = vrot.lane.b32.xlu1 %v1240_v46, %s2614_s29  ;;  %2413 = vmatmul.mubr.msk.bf16.vlgmr.msra.gmra.mrb[0].mxu1 %vm1523_vm9, %v1467_v61 }
  0xaf   : > { %1261 = vrot.lane.b32.xlu0 %v1160_v54, %s2614_s29  ;;  %2397 = vmatmul.mubr.msk.bf16.vlgmr.msra.gmra.mrb[0].mxu0 %vm1523_vm9, %v1451_v60 }
  0xb0   : > { %v614_v0 = vpop.permute.xlu1 %613 }
  0xb1   : > { %v598_v2 = vpop.permute.xlu0 %597  ;;  %v1303_v17 = vsel %vm1281_vm2, %v2566_v15, %v614_v0 }
  0xb2   : > { %1279 = vrot.lane.b32.xlu1 %v1248_v63, %s2614_s29  ;;  %v1287_v18 = vsel %vm1281_vm2, %v2567_v5, %v598_v2 }
  0xb3   : > { %1263 = vrot.lane.b32.xlu0 %v1168_v1, %s2614_s29 }
  0xb4   : > { %v616_v3 = vpop.permute.xlu1 %615 }
  0xb5   : > { %v600_v4 = vpop.permute.xlu0 %599  ;;  %v1305_v26 = vsel %vm1281_vm2, %v2568_v25, %v616_v3 }
  0xb6   : > { %v1289_v29 = vsel %vm1281_vm2, %v2569_v28, %v600_v4 }
  0xb8   : > { %v726_v6 = vpop.permute.xlu1 %725 }
  0xb9   : > { %v710_v7 = vpop.permute.xlu0 %709  ;;  %v1336_v19 = vsel %vm1314_vm3, %v1303_v17, %v726_v6 }
  0xba   : > { %v1320_v21 = vsel %vm1314_vm3, %v1287_v18, %v710_v7  ;;  %v1358_v27 = vsel %vm1347_vm4, %v1336_v19, %v726_v6 }
  0xbb   : > { %v1350_v44 = vsel %vm1347_vm4, %v1320_v21, %v710_v7 }
  0xbc   : > { %v728_v9 = vpop.permute.xlu1 %727 }
  0xbd   : > { %v712_v10 = vpop.permute.xlu0 %711  ;;  %v1338_v30 = vsel %vm1314_vm3, %v1305_v26, %v728_v9 }
  0xbe   : > { %v1322_v33 = vsel %vm1314_vm3, %v1289_v29, %v712_v10  ;;  %v1359_v42 = vsel %vm1347_vm4, %v1338_v30, %v728_v9 }
  0xbf   : > { %v1351_v43 = vsel %vm1347_vm4, %v1322_v33, %v712_v10 }
  0xc0   : > { %v942_v11 = vpop.permute.xlu1 %941 }
  0xc1   : > { %v926_v13 = vpop.permute.xlu0 %925  ;;  %v1386_v31 = vsel %vm1364_vm5, %v1358_v27, %v942_v11 }
  0xc2   : > { %v1370_v34 = vsel %vm1364_vm5, %v1350_v44, %v926_v13 }
  0xc4   : > { %v944_v14 = vpop.permute.xlu1 %943 }
  0xc5   : > { %v928_v37 = vpop.permute.xlu0 %927  ;;  %v1388_v47 = vsel %vm1364_vm5, %v1359_v42, %v944_v14 }
  0xc6   : > { %v1372_v45 = vsel %vm1364_vm5, %v1351_v43, %v928_v37 }
  0xc8   : > { %v1054_v20 = vpop.permute.xlu1 %1053 }
  0xc9   : > { %v1038_v23 = vpop.permute.xlu0 %1037  ;;  %v1419_v38 = vsel %vm1397_vm6, %v1386_v31, %v1054_v20 }
  0xca   : > { %v1403_v36 = vsel %vm1397_vm6, %v1370_v34, %v1038_v23  ;;  %v1441_v56 = vsel %vm1430_vm7, %v1419_v38, %v1054_v20 }
  0xcb   : > { %v1433_v50 = vsel %vm1430_vm7, %v1403_v36, %v1038_v23 }
  0xcc   : > { %v1056_v32 = vpop.permute.xlu1 %1055 }
  0xcd   : > { %v1040_v39 = vpop.permute.xlu0 %1039  ;;  %v1421_v57 = vsel %vm1397_vm6, %v1388_v47, %v1056_v32 }
  0xce   : > { %v1405_v52 = vsel %vm1397_vm6, %v1372_v45, %v1040_v39  ;;  %v1442_v22 = vsel %vm1430_vm7, %v1421_v57, %v1056_v32 }
  0xcf   : > { %v1434_v58 = vsel %vm1430_vm7, %v1405_v52, %v1040_v39 }
  0xd0   : > { %v1270_v49 = vpop.permute.xlu1 %1269 }
  0xd1   : > { %v1469_v46 = vsel %vm1447_vm8, %v1441_v56, %v1270_v49  ;;  %v1254_v51 = vpop.permute.xlu0 %1253 }
  0xd2   : > { %v1453_v53 = vsel %vm1447_vm8, %v1433_v50, %v1254_v51  ;;  %2416 = vmatprep.mubr.msk.bf16.mxu1 %vm1523_vm9, %v1469_v46 }
  0xd3   : > { %2400 = vmatprep.mubr.msk.bf16.mxu0 %vm1523_vm9, %v1453_v53 }
  0xd4   : > { %v1272_v54 = vpop.permute.xlu1 %1271 }
  0xd5   : > { %v1471_v55 = vsel %vm1447_vm8, %v1442_v22, %v1272_v54  ;;  %v1256_v59 = vpop.permute.xlu0 %1255 }
  0xd6   : > { %v1455_v61 = vsel %vm1447_vm8, %v1434_v58, %v1256_v59  ;;  %2417 = vmatmul.mubr.msk.bf16.gmra.mrb[4].mxu1 %vm1523_vm9, %v1471_v55 }
  0xd7   : > { %2401 = vmatmul.mubr.msk.bf16.gmra.mrb[4].mxu0 %vm1523_vm9, %v1455_v61 }
  0xd8   : > { %v618_v62 = vpop.permute.xlu1 %617 }
  0xd9   : > { %v602_v60 = vpop.permute.xlu0 %601  ;;  %v1307_v11 = vsel %vm1281_vm2, %v2769_v35, %v618_v62 }
  0xda   : > { %v1291_v13 = vsel %vm1281_vm2, %v2775_v41, %v602_v60 }
  0xdc   : > { %v620_v63 = vpop.permute.xlu1 %619 }
  0xdd   : > { %v604_v0 = vpop.permute.xlu0 %603  ;;  %v1309_v5 = vsel %vm1281_vm2, %v2772_v40, %v620_v63 }
  0xde   : > { %v1293_v19 = vsel %vm1281_vm2, %v2781_v48, %v604_v0 }
  0xe0   : > { %v730_v1 = vpop.permute.xlu1 %729 }
  0xe1   : > { %v714_v2 = vpop.permute.xlu0 %713  ;;  %v1340_v14 = vsel %vm1314_vm3, %v1307_v11, %v730_v1 }
  0xe2   : > { %v1324_v15 = vsel %vm1314_vm3, %v1291_v13, %v714_v2  ;;  %v1360_v18 = vsel %vm1347_vm4, %v1340_v14, %v730_v1 }
  0xe3   : > { %v1352_v20 = vsel %vm1347_vm4, %v1324_v15, %v714_v2 }
  0xe4   : > { %v732_v3 = vpop.permute.xlu1 %731 }
  0xe5   : > { %v716_v4 = vpop.permute.xlu0 %715  ;;  %v1342_v35 = vsel %vm1314_vm3, %v1309_v5, %v732_v3 }
  0xe6   : > { %v1326_v23 = vsel %vm1314_vm3, %v1293_v19, %v716_v4  ;;  %v1361_v28 = vsel %vm1347_vm4, %v1342_v35, %v732_v3 }
  0xe7   : > { %v1353_v48 = vsel %vm1347_vm4, %v1326_v23, %v716_v4 }
  0xe8   : > { %v946_v6 = vpop.permute.xlu1 %945 }
  0xe9   : > { %v930_v7 = vpop.permute.xlu0 %929  ;;  %v1390_v41 = vsel %vm1364_vm5, %v1360_v18, %v946_v6 }
  0xea   : > { %v1374_v25 = vsel %vm1364_vm5, %v1352_v20, %v930_v7 }
  0xec   : > { %v948_v9 = vpop.permute.xlu1 %947 }
  0xed   : > { %v932_v10 = vpop.permute.xlu0 %931  ;;  %v1392_v29 = vsel %vm1364_vm5, %v1361_v28, %v948_v9 }
  0xee   : > { %v1376_v31 = vsel %vm1364_vm5, %v1353_v48, %v932_v10 }
  0xf0   : > { %v1058_v37 = vpop.permute.xlu1 %1057 }
  0xf1   : > { %v1042_v17 = vpop.permute.xlu0 %1041  ;;  %v1423_v26 = vsel %vm1397_vm6, %v1390_v41, %v1058_v37 }
  0xf2   : > { %v1407_v40 = vsel %vm1397_vm6, %v1374_v25, %v1042_v17  ;;  %v1443_v44 = vsel %vm1430_vm7, %v1423_v26, %v1058_v37 }
  0xf3   : > { %v1435_v32 = vsel %vm1430_vm7, %v1407_v40, %v1042_v17 }
  0xf4   : > { %v1060_v21 = vpop.permute.xlu1 %1059 }
  0xf5   : > { %v1044_v27 = vpop.permute.xlu0 %1043  ;;  %v1425_v33 = vsel %vm1397_vm6, %v1392_v29, %v1060_v21  ;;  %v3105_v29 = vld [vmem:[%s3177_s2] ss:$0 sm:$0xff] }
  0xf6   : > { %v1409_v39 = vsel %vm1397_vm6, %v1376_v31, %v1044_v27  ;;  %v1444_v42 = vsel %vm1430_vm7, %v1425_v33, %v1060_v21 }
  0xf7   : > { %v1436_v47 = vsel %vm1430_vm7, %v1409_v39, %v1044_v27 }
  0xf8   : > { %v1274_v30 = vpop.permute.xlu1 %1273 }
  0xf9   : > { %v1473_v34 = vsel %vm1447_vm8, %v1443_v44, %v1274_v30  ;;  %v1258_v38 = vpop.permute.xlu0 %1257 }
  0xfa   : > { %v1457_v36 = vsel %vm1447_vm8, %v1435_v32, %v1258_v38  ;;  %2420 = vmatprep.mubr.msk.bf16.mxu1 %vm1523_vm9, %v1473_v34 }
  0xfb   : > { %2404 = vmatprep.mubr.msk.bf16.mxu0 %vm1523_vm9, %v1457_v36 }
  0xfc   : > { %v1276_v43 = vpop.permute.xlu1 %1275 }
  0xfd   : > { %v1475_v56 = vsel %vm1447_vm8, %v1444_v42, %v1276_v43  ;;  %v1260_v49 = vpop.permute.xlu0 %1259 }
  0xfe   : > { %v1459_v45 = vsel %vm1447_vm8, %v1436_v47, %v1260_v49  ;;  %2421 = vmatmul.mubr.msk.bf16.gmra.mrb[8].mxu1 %vm1523_vm9, %v1475_v56 }
  0xff   : > { %2405 = vmatmul.mubr.msk.bf16.gmra.mrb[8].mxu0 %vm1523_vm9, %v1459_v45 }
 0x100   : > { %v622_v50 = vpop.permute.xlu1 %621 }
 0x101   : > { %v606_v57 = vpop.permute.xlu0 %605  ;;  %v1311_v62 = vsel %vm1281_vm2, %v2850_v8, %v622_v50 }
 0x102   : > { %v1295_v60 = vsel %vm1281_vm2, %v2853_v12, %v606_v57 }
 0x104   : > { %v624_v46 = vpop.permute.xlu1 %623 }
 0x105   : > { %v608_v51 = vpop.permute.xlu0 %607  ;;  %v1313_v3 = vsel %vm1281_vm2, %v2857_v16, %v624_v46 }
 0x106   : > { %v1297_v6 = vsel %vm1281_vm2, %v2862_v24, %v608_v51 }
 0x108   : > { %v734_v52 = vpop.permute.xlu1 %733 }
 0x109   : > { %v718_v53 = vpop.permute.xlu0 %717  ;;  %v1344_v63 = vsel %vm1314_vm3, %v1311_v62, %v734_v52 }
 0x10a   : > { %v1328_v1 = vsel %vm1314_vm3, %v1295_v60, %v718_v53  ;;  %v1362_v4 = vsel %vm1347_vm4, %v1344_v63, %v734_v52 }
 0x10b   : > { %v1354_v7 = vsel %vm1347_vm4, %v1328_v1, %v718_v53 }
 0x10c   : > { %v736_v22 = vpop.permute.xlu1 %735 }
 0x10d   : > { %v720_v54 = vpop.permute.xlu0 %719  ;;  %v1346_v8 = vsel %vm1314_vm3, %v1313_v3, %v736_v22 }
 0x10e   : > { %v1330_v10 = vsel %vm1314_vm3, %v1297_v6, %v720_v54  ;;  %v1363_v37 = vsel %vm1347_vm4, %v1346_v8, %v736_v22 }
 0x10f   : > { %v1355_v24 = vsel %vm1347_vm4, %v1330_v10, %v720_v54 }
 0x110   : > { %v950_v58 = vpop.permute.xlu1 %949 }
 0x111   : > { %v934_v55 = vpop.permute.xlu0 %933  ;;  %v1394_v12 = vsel %vm1364_vm5, %v1362_v4, %v950_v58 }
 0x112   : > { %v1378_v11 = vsel %vm1364_vm5, %v1354_v7, %v934_v55 }
 0x114   : > { %v952_v59 = vpop.permute.xlu1 %951 }
 0x115   : > { %v936_v61 = vpop.permute.xlu0 %935  ;;  %v1396_v15 = vsel %vm1364_vm5, %v1363_v37, %v952_v59 }
 0x116   : > { %v1380_v18 = vsel %vm1364_vm5, %v1355_v24, %v936_v61 }
 0x118   : > { %v1062_v0 = vpop.permute.xlu1 %1061 }
 0x119   : > { %v1046_v2 = vpop.permute.xlu0 %1045  ;;  %v1427_v13 = vsel %vm1397_vm6, %v1394_v12, %v1062_v0 }
 0x11a   : > { %v1411_v16 = vsel %vm1397_vm6, %v1378_v11, %v1046_v2  ;;  %v1445_v17 = vsel %vm1430_vm7, %v1427_v13, %v1062_v0 }
 0x11b   : > { %v1437_v19 = vsel %vm1430_vm7, %v1411_v16, %v1046_v2 }
 0x11c   : > { %v1064_v9 = vpop.permute.xlu1 %1063 }
 0x11d   : > { %v1048_v14 = vpop.permute.xlu0 %1047  ;;  %v1429_v20 = vsel %vm1397_vm6, %v1396_v15, %v1064_v9 }
 0x11e   : > { %v1413_v21 = vsel %vm1397_vm6, %v1380_v18, %v1048_v14  ;;  %v1446_v25 = vsel %vm1430_vm7, %v1429_v20, %v1064_v9 }
 0x11f   : > { %v1438_v27 = vsel %vm1430_vm7, %v1413_v21, %v1048_v14 }
 0x120   : > { %v1278_v5 = vpop.permute.xlu1 %1277 }
 0x121   : > { %v1477_v35 = vsel %vm1447_vm8, %v1445_v17, %v1278_v5  ;;  %v1262_v41 = vpop.permute.xlu0 %1261 }
 0x122   : > { %v1461_v23 = vsel %vm1447_vm8, %v1437_v19, %v1262_v41  ;;  %2424 = vmatprep.mubr.msk.bf16.mxu1 %vm1523_vm9, %v1477_v35 }
 0x123   : > { %2408 = vmatprep.mubr.msk.bf16.mxu0 %vm1523_vm9, %v1461_v23 }
 0x124   : > { %v1280_v26 = vpop.permute.xlu1 %1279 }
 0x125   : > { %v1479_v40 = vsel %vm1447_vm8, %v1446_v25, %v1280_v26  ;;  %v1264_v28 = vpop.permute.xlu0 %1263 }
 0x126   : > { %v1463_v48 = vsel %vm1447_vm8, %v1438_v27, %v1264_v28  ;;  %2425 = vmatmul.mubr.msk.bf16.gmra.mrb[12].mxu1 %vm1523_vm9, %v1479_v40 }
 0x127   : > { %2409 = vmatmul.mubr.msk.bf16.gmra.mrb[12].mxu0 %vm1523_vm9, %v1463_v48 }
 0x181   : > { %v2414_v44 = vpop.f32.mrb[0].mxu1 }
 0x182   : > { %v2398_v30 = vpop.f32.mrb[0].mxu0  ;;  %v1667_v31 = vadd.f32 %v2414_v44, %v3105_v29  ;;  %v1658_v32 = vpop.f32.mrb[1].mxu1 }
 0x183   : > { %v1603_v33 = vadd.f32 %v2398_v30, %v3105_v29  ;;  %v1594_v34 = vpop.f32.mrb[1].mxu0  ;;  %v1659_v38 = vadd.f32 %v3105_v29, %v1658_v32  ;;  %v2415_v39 = vpop.f32.mrb[2].mxu1 }
 0x184   : > { %v1595_v36 = vadd.f32 %v3105_v29, %v1594_v34  ;;  %v2399_v42 = vpop.f32.mrb[2].mxu0  ;;  %v1670_v43 = vadd.f32 %v2415_v39, %v3105_v29  ;;  %v1661_v47 = vpop.f32.mrb[3].mxu1  ;;  %v1739_v50 = vmax.f32 %v1667_v31, 0.0 }
 0x185   : > { %v1606_v56 = vadd.f32 %v2399_v42, %v3105_v29  ;;  %v1597_v49 = vpop.f32.mrb[3].mxu0  ;;  %v1662_v45 = vadd.f32 %v3105_v29, %v1661_v47  ;;  %v1723_v51 = vmax.f32 %v1603_v33, 0.0  ;;  %v1737_v52 = vmax.f32 %v1659_v38, 0.0 }
 0x186   : > { %v1740_v57 = vmax.f32 %v1670_v43, 0.0  ;;  %v1598_v46 = vadd.f32 %v3105_v29, %v1597_v49  ;;  %v1721_v54 = vmax.f32 %v1595_v36, 0.0 }
 0x187   : > { %v1724_v53 = vmax.f32 %v1606_v56, 0.0  ;;  %v1738_v22 = vmax.f32 %v1662_v45, 0.0 }
 0x188   : > { %v2318_v58 = vpack.c.bf16 %v1740_v57, %v1739_v50  ;;  %v1722_v55 = vmax.f32 %v1598_v46, 0.0 }
 0x189   : > { %v2278_v59 = vpack.c.bf16 %v1724_v53, %v1723_v51  ;;  %v2313_v61 = vpack.c.bf16 %v1738_v22, %v1737_v52 }
 0x18a   : > { %2358 = vst [vmem:[%s3118_s27 + $0x48] sm:$0xff] %v2318_v58   ;;  %v2273_v62 = vpack.c.bf16 %v1722_v55, %v1721_v54 }
 0x18b   : > { %2350 = vst [vmem:[%s3118_s27 + $0x8] sm:$0xff] %v2278_v59   ;;  %2357 = vst [vmem:[%s3118_s27 + $0x40] sm:$0xff] %v2313_v61  }
 0x18c   : > { %2274 = vst [vmem:[%s3118_s27] sm:$0xff] %v2273_v62  }
 0x1a9   : > { %v2418_v60 = vpop.f32.mrb[4].mxu1 }
 0x1aa   : > { %v2402_v63 = vpop.f32.mrb[4].mxu0  ;;  %v1683_v0 = vadd.f32 %v2418_v60, %v3105_v29  ;;  %v1674_v1 = vpop.f32.mrb[5].mxu1 }
 0x1ab   : > { %v1619_v2 = vadd.f32 %v2402_v63, %v3105_v29  ;;  %v1610_v3 = vpop.f32.mrb[5].mxu0  ;;  %v1675_v4 = vadd.f32 %v3105_v29, %v1674_v1  ;;  %v2419_v6 = vpop.f32.mrb[6].mxu1 }
 0x1ac   : > { %v1611_v7 = vadd.f32 %v3105_v29, %v1610_v3  ;;  %v2403_v8 = vpop.f32.mrb[6].mxu0  ;;  %v1686_v12 = vadd.f32 %v2419_v6, %v3105_v29  ;;  %v1677_v9 = vpop.f32.mrb[7].mxu1  ;;  %v1743_v14 = vmax.f32 %v1683_v0, 0.0 }
 0x1ad   : > { %v1622_v10 = vadd.f32 %v2403_v8, %v3105_v29  ;;  %v1613_v11 = vpop.f32.mrb[7].mxu0  ;;  %v1678_v13 = vadd.f32 %v3105_v29, %v1677_v9  ;;  %v1727_v24 = vmax.f32 %v1619_v2, 0.0  ;;  %v1741_v15 = vmax.f32 %v1675_v4, 0.0 }
 0x1ae   : > { %v1744_v16 = vmax.f32 %v1686_v12, 0.0  ;;  %v1614_v37 = vadd.f32 %v3105_v29, %v1613_v11  ;;  %v1725_v18 = vmax.f32 %v1611_v7, 0.0 }
 0x1af   : > { %v1728_v17 = vmax.f32 %v1622_v10, 0.0  ;;  %v1742_v5 = vmax.f32 %v1678_v13, 0.0 }
 0x1b0   : > { %v2328_v19 = vpack.c.bf16 %v1744_v16, %v1743_v14  ;;  %v1726_v20 = vmax.f32 %v1614_v37, 0.0 }
 0x1b1   : > { %v2288_v35 = vpack.c.bf16 %v1728_v17, %v1727_v24  ;;  %v2323_v41 = vpack.c.bf16 %v1742_v5, %v1741_v15 }
 0x1b2   : > { %2360 = vst [vmem:[%s3118_s27 + $0x58] sm:$0xff] %v2328_v19   ;;  %v2283_v21 = vpack.c.bf16 %v1726_v20, %v1725_v18 }
 0x1b3   : > { %2352 = vst [vmem:[%s3118_s27 + $0x18] sm:$0xff] %v2288_v35   ;;  %2359 = vst [vmem:[%s3118_s27 + $0x50] sm:$0xff] %v2323_v41  }
 0x1b4   : > { %2351 = vst [vmem:[%s3118_s27 + $0x10] sm:$0xff] %v2283_v21  }
 0x1d1   : > { %v2422_v23 = vpop.f32.mrb[8].mxu1 }
 0x1d2   : > { %v2406_v25 = vpop.f32.mrb[8].mxu0  ;;  %v1699_v26 = vadd.f32 %v2422_v23, %v3105_v29  ;;  %v1690_v27 = vpop.f32.mrb[9].mxu1 }
 0x1d3   : > { %v1635_v40 = vadd.f32 %v2406_v25, %v3105_v29  ;;  %v1626_v28 = vpop.f32.mrb[9].mxu0  ;;  %v1691_v48 = vadd.f32 %v3105_v29, %v1690_v27  ;;  %v2423_v44 = vpop.f32.mrb[10].mxu1 }
 0x1d4   : > { %v1627_v30 = vadd.f32 %v3105_v29, %v1626_v28  ;;  %v2407_v31 = vpop.f32.mrb[10].mxu0  ;;  %v1702_v32 = vadd.f32 %v2423_v44, %v3105_v29  ;;  %v1693_v33 = vpop.f32.mrb[11].mxu1  ;;  %v1747_v36 = vmax.f32 %v1699_v26, 0.0 }
 0x1d5   : > { %v1638_v34 = vadd.f32 %v2407_v31, %v3105_v29  ;;  %v1629_v38 = vpop.f32.mrb[11].mxu0  ;;  %v1694_v39 = vadd.f32 %v3105_v29, %v1693_v33  ;;  %v1731_v47 = vmax.f32 %v1635_v40, 0.0  ;;  %v1745_v56 = vmax.f32 %v1691_v48, 0.0 }
 0x1d6   : > { %v1748_v42 = vmax.f32 %v1702_v32, 0.0  ;;  %v1630_v43 = vadd.f32 %v3105_v29, %v1629_v38  ;;  %v1729_v50 = vmax.f32 %v1627_v30, 0.0 }
 0x1d7   : > { %v1732_v49 = vmax.f32 %v1638_v34, 0.0  ;;  %v1746_v45 = vmax.f32 %v1694_v39, 0.0 }
 0x1d8   : > { %v2338_v57 = vpack.c.bf16 %v1748_v42, %v1747_v36  ;;  %v1730_v46 = vmax.f32 %v1630_v43, 0.0 }
 0x1d9   : > { %v2298_v51 = vpack.c.bf16 %v1732_v49, %v1731_v47  ;;  %v2333_v52 = vpack.c.bf16 %v1746_v45, %v1745_v56 }
 0x1da   : > { %2362 = vst [vmem:[%s3118_s27 + $0x68] sm:$0xff] %v2338_v57   ;;  %v2293_v53 = vpack.c.bf16 %v1730_v46, %v1729_v50 }
 0x1db   : > { %2354 = vst [vmem:[%s3118_s27 + $0x28] sm:$0xff] %v2298_v51   ;;  %2361 = vst [vmem:[%s3118_s27 + $0x60] sm:$0xff] %v2333_v52  }
 0x1dc   : > { %2353 = vst [vmem:[%s3118_s27 + $0x20] sm:$0xff] %v2293_v53  }
 0x1f9   : > { %v2426_v22 = vpop.f32.mrb[12].mxu1 }
 0x1fa   : > { %v2410_v54 = vpop.f32.mrb[12].mxu0  ;;  %v1715_v58 = vadd.f32 %v2426_v22, %v3105_v29  ;;  %v1706_v55 = vpop.f32.mrb[13].mxu1 }
 0x1fb   : > { %v1651_v59 = vadd.f32 %v2410_v54, %v3105_v29  ;;  %v1642_v61 = vpop.f32.mrb[13].mxu0  ;;  %v1707_v62 = vadd.f32 %v3105_v29, %v1706_v55  ;;  %v2427_v60 = vpop.f32.mrb[14].mxu1 }
 0x1fc   : > { %v1643_v63 = vadd.f32 %v3105_v29, %v1642_v61  ;;  %v2411_v0 = vpop.f32.mrb[14].mxu0  ;;  %v1718_v1 = vadd.f32 %v2427_v60, %v3105_v29  ;;  %v1709_v2 = vpop.f32.mrb[15].mxu1  ;;  %v1751_v7 = vmax.f32 %v1715_v58, 0.0 }
 0x1fd   : > { %v1654_v3 = vadd.f32 %v2411_v0, %v3105_v29  ;;  %v1645_v4 = vpop.f32.mrb[15].mxu0  ;;  %v1710_v6 = vadd.f32 %v3105_v29, %v1709_v2  ;;  %v1735_v9 = vmax.f32 %v1651_v59, 0.0  ;;  %v1749_v10 = vmax.f32 %v1707_v62, 0.0 }
 0x1fe   : > { %v1752_v8 = vmax.f32 %v1718_v1, 0.0  ;;  %v1646_v12 = vadd.f32 %v3105_v29, %v1645_v4  ;;  %v1733_v14 = vmax.f32 %v1643_v63, 0.0 }
 0x1ff   : > { %v1736_v11 = vmax.f32 %v1654_v3, 0.0  ;;  %v1750_v13 = vmax.f32 %v1710_v6, 0.0 }
 0x200   : > { %v2348_v16 = vpack.c.bf16 %v1752_v8, %v1751_v7  ;;  %v1734_v37 = vmax.f32 %v1646_v12, 0.0 }
 0x201   : > { %v2308_v24 = vpack.c.bf16 %v1736_v11, %v1735_v9  ;;  %v2343_v15 = vpack.c.bf16 %v1750_v13, %v1749_v10 }
 0x202   : > { %2364 = vst [vmem:[%s3118_s27 + $0x78] sm:$0xff] %v2348_v16   ;;  %v2303_v17 = vpack.c.bf16 %v1734_v37, %v1733_v14 }
 0x203   : > { %2356 = vst [vmem:[%s3118_s27 + $0x38] sm:$0xff] %v2308_v24   ;;  %2363 = vst [vmem:[%s3118_s27 + $0x70] sm:$0xff] %v2343_v15  }
 0x204   : > { %2355 = vst [vmem:[%s3118_s27 + $0x30] sm:$0xff] %v2303_v17  }
 0x205 PF: > { %s13_s16 = sadd.s32 1, %s2608_s16   ;;  %s3179_s12 = smov %s2600_s14 }
 0x206   : > { %p10_p7 = scmp.ge.s32.totalorder %s13_s16, 10   ;;  %s3180_s13 = smov %s2604_s15 }
 0x207   : > { %s3181_s14 = smov %s3184_s17  ;;  %s3182_s15 = smov %s3188_s18 }
 0x208   :  { %12 = sbr.rel (!%p10_p7) target bundleno = 3 (0x3), region = 65 }

// kernel: person_search_query.6
= control target key start
LH: loop header
LB: loop body
LE: loop exit
PB: predicated region body
PF: predicated region fallthrough
CT: control target
= control target key end

     0   :  { %s3153_s12 = smov 0   ;;  %s3155_s13 = smov 0   ;;  %s3719_s0 = inlined_call_operand.vmem [shape: bf16[2,17,2,17,256], index: 0, kind: input, shape index: {}]   ;;  %s3720_s1 = inlined_call_operand.vmem [shape: bf16[1152,128], index: 1, kind: input, shape index: {}]   ;;  %s3721_s2 = inlined_call_operand.vmem [shape: f32[1,128], index: 2, kind: input, shape index: {}]   ;;  %s3722_s3 = inlined_call_operand.vmem [shape: bf16[2,16,16,128], index: 3, kind: output, shape index: {}]  }
   0x1   :  { %s3157_s14 = smov 0   ;;  %s3159_s15 = smov 0  }
   0x2   :  { %s3161_s16 = smov 0  }
   0x3 LB: > { %s22_s17 = sadd.s32 1, %s3123_s14  ;;  %s25_s18 = sadd.s32 1, %s3127_s15  ;;  %s3131_s16 = sphi %s3161_s16, %s13_s16   ;;  %s3127_s15 = sphi %s3159_s15, %s3726_s15   ;;  %s3123_s14 = sphi %s3157_s14, %s3725_s14   ;;  %s3119_s13 = sphi %s3155_s13, %s3724_s13   ;;  %s3115_s12 = sphi %s3153_s12, %s3723_s12  }
   0x4   : > { %p23_p0 = scmp.ge.s32.totalorder %s22_s17, 2  ;;  %p2269_p1 = scmp.ge.s32.totalorder %s3131_s16, 1 }
   0x5   : > { %p151_p2 = scmp.lt.s32.totalorder %s3131_s16, 5 }
   0x6   : > { %s3728_s17 = smov (%p23_p0, %s22_s17), 0  ;;  %s3730_s18 = smov (!%p23_p0, %s25_s18), %s3127_s15 }
   0x7   : > { %p152_p3 = pnand %p2269_p1, %p151_p2  ;;  %p27_p4 = scmp.ge.s32.totalorder %s3730_s18, 2 }
   0x8   : > { %v2949_v0 = vld [vmem:[%s3720_s1 + $0x40] sm:$0xff] (!%p152_p3)   ;;  %v2953_v4 = vld [vmem:[%s3720_s1 + $0x48] sm:$0xff] (!%p152_p3)   ;;  %v2957_v8 = vld [vmem:[%s3720_s1 + $0x50] sm:$0xff] (!%p152_p3)   ;;  %p180_p5 = scmp.lt.s32.totalorder (!%p152_p3), %s3119_s13, 1  ;;  %s2524_s9 = smul.u32 (!%p152_p3), 384, %s3115_s12 }
   0x9   : > { %s3732_s18 = smov (%p27_p4, %s3730_s18), 0  ;;  %155 = sbr.rel (%p152_p3) target bundleno = 403 (0x193), region = 32 }
   0xa   : > { %v2950_v1 = vld [vmem:[%s3720_s1 + $0xc0] sm:$0xff] (!%p152_p3)   ;;  %2588 = vmatprep.subr.bf16.mxu0 (!%p152_p3), %v2949_v0  ;;  %v2954_v5 = vld [vmem:[%s3720_s1 + $0xc8] sm:$0xff] (!%p152_p3)   ;;  %v2958_v9 = vld [vmem:[%s3720_s1 + $0xd0] sm:$0xff] (!%p152_p3)   ;;  %vm448_vm0 = vsmask.f32 (!%p152_p3), 7424  ;;  %s2271_s7 = sshll.u32 (!%p152_p3), %s3115_s12, 3 }
   0xb   : > { %v2951_v2 = vld [vmem:[%s3720_s1] sm:$0xff] (!%p152_p3)   ;;  %2652 = vmatprep.subr.bf16.mxu1 (!%p152_p3), %v2950_v1  ;;  %v2955_v6 = vld [vmem:[%s3720_s1 + $0x8] sm:$0xff] (!%p152_p3)   ;;  %v2959_v10 = vld [vmem:[%s3720_s1 + $0x10] sm:$0xff] (!%p152_p3)   ;;  %p188_p6 = scmp.lt.s32.totalorder (!%p152_p3), %s2271_s7, 15 }
   0xc   : > { %v2952_v3 = vld [vmem:[%s3720_s1 + $0x80] sm:$0xff] (!%p152_p3)   ;;  %2589 = vmatpush3.bf16.msra.mxu0 (!%p152_p3), %v2951_v2  ;;  %v2956_v7 = vld [vmem:[%s3720_s1 + $0x88] sm:$0xff] (!%p152_p3)   ;;  %v2960_v11 = vld [vmem:[%s3720_s1 + $0x90] sm:$0xff] (!%p152_p3)  }
   0xd   : > { %2653 = vmatpush3.bf16.msra.mxu1 (!%p152_p3), %v2952_v3  ;;  %2590 = vmatprep.subr.bf16.mxu0 (!%p152_p3), %v2953_v4  ;;  %v2961_v12 = vld [vmem:[%s3720_s1 + $0x58] sm:$0xff] (!%p152_p3)   ;;  %v2965_v16 = vld [vmem:[%s3720_s1 + $0x60] sm:$0xff] (!%p152_p3)   ;;  %v2969_v20 = vld [vmem:[%s3720_s1 + $0x68] sm:$0xff] (!%p152_p3)  }
   0xe   : > { %2654 = vmatprep.subr.bf16.mxu1 (!%p152_p3), %v2954_v5  ;;  %v2962_v13 = vld [vmem:[%s3720_s1 + $0xd8] sm:$0xff] (!%p152_p3)   ;;  %v2966_v17 = vld [vmem:[%s3720_s1 + $0xe0] sm:$0xff] (!%p152_p3)   ;;  %v2970_v21 = vld [vmem:[%s3720_s1 + $0xe8] sm:$0xff] (!%p152_p3)  }
   0xf   : > { %v2963_v14 = vld [vmem:[%s3720_s1 + $0x18] sm:$0xff] (!%p152_p3)   ;;  %v2967_v18 = vld [vmem:[%s3720_s1 + $0x20] sm:$0xff] (!%p152_p3)   ;;  %v2971_v22 = vld [vmem:[%s3720_s1 + $0x28] sm:$0xff] (!%p152_p3)  }
  0x10   : > { %2591 = vmatpush3.bf16.msra.mxu0 %v2955_v6  ;;  %v2964_v15 = vld [vmem:[%s3720_s1 + $0x98] sm:$0xff]   ;;  %v2968_v19 = vld [vmem:[%s3720_s1 + $0xa0] sm:$0xff]   ;;  %s3734_s13 = smov (!%p180_p5, %s3119_s13), 1  ;;  %v2972_v23 = vld [vmem:[%s3720_s1 + $0xa8] sm:$0xff]   ;;  %s3736_s7 = smov (!%p188_p6, %s2271_s7), 15 }
  0x11   : > { %2655 = vmatpush3.bf16.msra.mxu1 %v2956_v7  ;;  %2592 = vmatprep.subr.bf16.mxu0 %v2957_v8  ;;  %v2973_v24 = vld [vmem:[%s3720_s1 + $0x70] sm:$0xff]   ;;  %s2908_s29 = smul.u32 816, %s3734_s13  ;;  %v2977_v28 = vld [vmem:[%s3720_s1 + $0x78] sm:$0xff]   ;;  %v2985_v39 = vld [vmem:[%s3720_s1 + $0x140] sm:$0xff]   ;;  %s2272_s12 = sshll.u32 %s3736_s7, 1 }
  0x12   : > { %2656 = vmatprep.subr.bf16.mxu1 %v2958_v9  ;;  %v2974_v25 = vld [vmem:[%s3720_s1 + $0xf0] sm:$0xff]   ;;  %v2978_v29 = vld [vmem:[%s3720_s1 + $0xf8] sm:$0xff]   ;;  %v2986_v41 = vld [vmem:[%s3720_s1 + $0x1c0] sm:$0xff]   ;;  %s2273_s8 = sshll.u32 %s3734_s13, 5 }
  0x13   : > { %v2975_v26 = vld [vmem:[%s3720_s1 + $0x30] sm:$0xff]   ;;  %s184_s21 = scalar_lea.vmem %s3719_s0, %s2908_s29  ;;  %v2979_v30 = vld [vmem:[%s3720_s1 + $0x38] sm:$0xff]   ;;  %v2987_v43 = vld [vmem:[%s3720_s1 + $0x100] sm:$0xff]  }
  0x14   : > { %2593 = vmatpush3.bf16.msra.mxu0 %v2959_v10  ;;  %v2976_v27 = vld [vmem:[%s3720_s1 + $0xb0] sm:$0xff]   ;;  %v2980_v31 = vld [vmem:[%s3720_s1 + $0xb8] sm:$0xff]   ;;  %s3292_s28 = scalar_lea.vmem %s184_s21, %s2524_s9  ;;  %v2988_v45 = vld [vmem:[%s3720_s1 + $0x180] sm:$0xff]   ;;  %s192_s9 = sadd.s32 %s2273_s8, %s2272_s12 }
  0x15   : > { %2657 = vmatpush3.bf16.msra.mxu1 %v2960_v11  ;;  %2594 = vmatprep.subr.bf16.mxu0 %v2961_v12  ;;  %v2981_v32 = vld [vmem:[%s3292_s28 + $0x4] ss:$8 sps:$4 sm:$0xff]   ;;  %v3296_v33 = vld [vmem:[%s3292_s28 + $0x18] ss:$8 sps:$4 sm:$0xff]   ;;  %v2989_v46 = vld [vmem:[%s3292_s28 + $0x34] ss:$8 sps:$4 sm:$0xff]  }
  0x16   : > { %2658 = vmatprep.subr.bf16.mxu1 %v2962_v13  ;;  %1616 = vmatprep.mubr.bf16.mxu0 %v2981_v32  ;;  %v2983_v34 = vld [vmem:[%s3292_s28] ss:$8 sps:$4 sm:$0xff]   ;;  %v2984_v35 = vld [vmem:[%s3292_s28 + $0x10] ss:$0 sps:$4 sm:$0x11]   ;;  %s2274_s10 = sshll.u32 %s192_s9, 2 }
  0x17   : > { %1713 = vmatprep.mubr.bf16.mxu1 %v3296_v33  ;;  %v452_v36 = vshll.u32 %v2983_v34, 16  ;;  %v450_v37 = vshrl.u32 %v2983_v34, 16  ;;  %v457_v38 = vshll.u32 %v2984_v35, 16  ;;  %v3316_v48 = vld [vmem:[%s3292_s28 + $0x48] ss:$8 sps:$4 sm:$0xff]   ;;  %s3687_s19 = scalar_lea.vmem %s3722_s3, %s2274_s10 }
  0x18   : > { %2595 = vmatpush3.bf16.msra.mxu0 %v2963_v14  ;;  %v2991_v49 = vld [vmem:[%s3292_s28 + $0x30] ss:$8 sps:$4 sm:$0xff]   ;;  %v2992_v50 = vld [vmem:[%s3292_s28 + $0x40] ss:$0 sps:$4 sm:$0x11]   ;;  %v2993_v53 = vld [vmem:[%s3720_s1 + $0x148] sm:$0xff]  }
  0x19   : > { %2659 = vmatpush3.bf16.msra.mxu1 %v2964_v15  ;;  %2596 = vmatprep.subr.bf16.mxu0 %v2965_v16  ;;  %v454_v40 = vrot.slane %v452_v36, 1  ;;  %v459_v42 = vrot.slane %v457_v38, 1  ;;  %v464_v51 = vshll.u32 %v2991_v49, 16  ;;  %v462_v52 = vshrl.u32 %v2991_v49, 16  ;;  %v2994_v54 = vld [vmem:[%s3720_s1 + $0x1c8] sm:$0xff]   ;;  %v3001_v60 = vld [vmem:[%s3720_s1 + $0x150] sm:$0xff]  }
  0x1a   : > { %2660 = vmatprep.subr.bf16.mxu1 %v2966_v17  ;;  %v469_v55 = vshll.u32 %v2992_v50, 16  ;;  %v2995_v56 = vld [vmem:[%s3720_s1 + $0x108] sm:$0xff]   ;;  %v3338_v63 = vld [vmem:[%s3292_s28 + $0x78] ss:$8 sps:$4 sm:$0xff]   ;;  %v3002_v6 = vld [vmem:[%s3720_s1 + $0x1d0] sm:$0xff]  }
  0x1b   : > { %v455_v44 = vor.u32 %v454_v40, %v450_v37  ;;  %v466_v57 = vrot.slane %v464_v51, 1  ;;  %v2996_v58 = vld [vmem:[%s3720_s1 + $0x188] sm:$0xff]   ;;  %v3000_v2 = vld [vmem:[%s3292_s28 + $0x70] ss:$0 sps:$4 sm:$0x11]   ;;  %v3017_v36 = vld [vmem:[%s3720_s1 + $0x160] sm:$0xff]  }
  0x1c   : > { %2597 = vmatpush3.bf16.msra.mxu0 %v2967_v18  ;;  %v471_v59 = vrot.slane %v469_v55, 1  ;;  %v2997_v62 = vld [vmem:[%s3292_s28 + $0x64] ss:$8 sps:$4 sm:$0xff]   ;;  %v2999_v1 = vld [vmem:[%s3292_s28 + $0x60] ss:$8 sps:$4 sm:$0xff]   ;;  %v481_v5 = vshll.u32 %v3000_v2, 16 }
  0x1d   : > { %2661 = vmatpush3.bf16.msra.mxu1 %v2968_v19  ;;  %2598 = vmatprep.subr.bf16.mxu0 %v2969_v20  ;;  %v460_v47 = vsel %vm448_vm0, %v455_v44, %v459_v42  ;;  %v467_v61 = vor.u32 %v466_v57, %v462_v52  ;;  %v476_v3 = vshll.u32 %v2999_v1, 16  ;;  %v474_v4 = vshrl.u32 %v2999_v1, 16  ;;  %v3003_v8 = vld [vmem:[%s3720_s1 + $0x110] sm:$0xff]   ;;  %v3008_v16 = vld [vmem:[%s3292_s28 + $0xa0] ss:$0 sps:$4 sm:$0x11]  }
  0x1e   : > { %2662 = vmatprep.subr.bf16.mxu1 %v2970_v21  ;;  %v483_v9 = vrot.slane %v481_v5, 1  ;;  %v3004_v10 = vld [vmem:[%s3720_s1 + $0x190] sm:$0xff]   ;;  %v493_v19 = vshll.u32 %v3008_v16, 16  ;;  %v3009_v20 = vld [vmem:[%s3720_s1 + $0x158] sm:$0xff]   ;;  %v3018_v37 = vld [vmem:[%s3720_s1 + $0x1e0] sm:$0xff]   ;;  %v674_v51 = vshrl.u32 %v3296_v33, 16 }
  0x1f   : > { %v472_v0 = vsel %vm448_vm0, %v467_v61, %v471_v59  ;;  %v478_v7 = vrot.slane %v476_v3, 1  ;;  %v3005_v12 = vld [vmem:[%s3292_s28 + $0x94] ss:$8 sps:$4 sm:$0xff]   ;;  %v3355_v13 = vld [vmem:[%s3292_s28 + $0xa8] ss:$8 sps:$4 sm:$0xff]   ;;  %v688_v2 = vshll.u32 %v3316_v48, 16 }
  0x20   : > { %2599 = vmatpush3.bf16.msra.mxu0 %v2971_v22  ;;  %v3007_v15 = vld [vmem:[%s3292_s28 + $0x90] ss:$8 sps:$4 sm:$0xff]   ;;  %v3024_v50 = vld [vmem:[%s3292_s28 + $0x100] ss:$0 sps:$4 sm:$0x11]   ;;  %v3026_v55 = vld [vmem:[%s3720_s1 + $0x1e8] sm:$0xff]  }
  0x21   : > { %2663 = vmatpush3.bf16.msra.mxu1 %v2972_v23  ;;  %2600 = vmatprep.subr.bf16.mxu0 %v2973_v24  ;;  %v479_v11 = vor.u32 %v478_v7, %v474_v4  ;;  %v488_v17 = vshll.u32 %v3007_v15, 16  ;;  %v486_v18 = vshrl.u32 %v3007_v15, 16  ;;  %v3010_v22 = vld [vmem:[%s3720_s1 + $0x1d8] sm:$0xff]   ;;  %v495_v23 = vrot.slane %v493_v19, 1  ;;  %v3027_v57 = vld [vmem:[%s3720_s1 + $0x128] sm:$0xff]   ;;  %v3034_v7 = vld [vmem:[%s3720_s1 + $0x1f0] sm:$0xff]  }
  0x22   : > { %2664 = vmatprep.subr.bf16.mxu1 %v2974_v25  ;;  %v3011_v24 = vld [vmem:[%s3720_s1 + $0x118] sm:$0xff]   ;;  %v3016_v32 = vld [vmem:[%s3292_s28 + $0xd0] ss:$0 sps:$4 sm:$0x11]   ;;  %v3028_v59 = vld [vmem:[%s3720_s1 + $0x1a8] sm:$0xff]  }
  0x23   : > { %v484_v14 = vsel %vm448_vm0, %v479_v11, %v483_v9  ;;  %v490_v21 = vrot.slane %v488_v17, 1  ;;  %v505_v38 = vshll.u32 %v3016_v32, 16  ;;  %v3029_v61 = vld [vmem:[%s3292_s28 + $0x124] ss:$8 sps:$4 sm:$0xff]   ;;  %v3035_v9 = vld [vmem:[%s3720_s1 + $0x130] sm:$0xff]  }
  0x24   : > { %2601 = vmatpush3.bf16.msra.mxu0 %v2975_v26  ;;  %v3012_v26 = vld [vmem:[%s3720_s1 + $0x198] sm:$0xff]   ;;  %v3032_v3 = vld [vmem:[%s3292_s28 + $0x130] ss:$0 sps:$4 sm:$0x11]  }
  0x25   : > { %2665 = vmatpush3.bf16.msra.mxu1 %v2976_v27  ;;  %2602 = vmatprep.subr.bf16.mxu0 %v2977_v28  ;;  %v491_v25 = vor.u32 %v490_v21, %v486_v18  ;;  %v3013_v27 = vld [vmem:[%s3292_s28 + $0xc4] ss:$8 sps:$4 sm:$0xff]   ;;  %v507_v42 = vrot.slane %v505_v38, 1  ;;  %v3036_v11 = vld [vmem:[%s3720_s1 + $0x1b0] sm:$0xff]  }
  0x26   : > { %2666 = vmatprep.subr.bf16.mxu1 %v2978_v29  ;;  %v3376_v29 = vld [vmem:[%s3292_s28 + $0xd8] ss:$8 sps:$4 sm:$0xff]   ;;  %v3037_v16 = vld [vmem:[%s3292_s28 + $0x154] ss:$8 sps:$4 sm:$0xff]   ;;  %v3441_v17 = vld [vmem:[%s3292_s28 + $0x168] ss:$8 sps:$4 sm:$0xff]  }
  0x27   : > { %v496_v28 = vsel %vm448_vm0, %v491_v25, %v495_v23  ;;  %v3039_v19 = vld [vmem:[%s3292_s28 + $0x150] ss:$8 sps:$4 sm:$0xff]   ;;  %v3045_v32 = vld [vmem:[%s3292_s28 + $0x28] ss:$0 sps:$4 sm:$0x11]  }
  0x28   : > { %2603 = vmatpush3.bf16.msra.mxu0 %v2979_v30  ;;  %v3015_v30 = vld [vmem:[%s3292_s28 + $0xc0] ss:$8 sps:$4 sm:$0xff]   ;;  %v534_v23 = vshrl.u32 %v3039_v19, 16  ;;  %v3042_v25 = vld [vmem:[%s3720_s1 + $0x1f8] sm:$0xff]   ;;  %v681_v38 = vshll.u32 %v3045_v32, 16 }
  0x29   : > { %2667 = vmatpush3.bf16.msra.mxu1 %v2980_v31  ;;  %2716 = vmatprep.subr.bf16.mxu0 %v2985_v39  ;;  %v676_v31 = vshll.u32 %v3296_v33, 16  ;;  %v498_v35 = vshrl.u32 %v3015_v30, 16  ;;  %v3019_v39 = vld [vmem:[%s3720_s1 + $0x120] sm:$0xff]   ;;  %v3054_v33 = vld [vmem:[%s3720_s1 + $0x208] sm:$0xff]  }
  0x2a   : > { %2780 = vmatprep.subr.bf16.mxu1 %v2986_v41  ;;  %v3020_v41 = vld [vmem:[%s3720_s1 + $0x1a0] sm:$0xff]  }
  0x2b   : > { %1617 = vmatmul.mubr.bf16.vlgmr.msra.gmra.mrb[0].mxu0 %v2983_v34  ;;  %v500_v34 = vshll.u32 %v3015_v30, 16  ;;  %v678_v21 = vrot.slane %v676_v31, 1 }
  0x2c   : > { %2717 = vmatpush3.bf16.msra.mxu0 %v2987_v43  ;;  %1714 = vmatmul.mubr.bf16.vlgmr.msra.gmra.mrb[0].mxu1 %v460_v47  ;;  %v3025_v43 = vld [vmem:[%s3720_s1 + $0x168] sm:$0xff]  }
  0x2d   : > { %1624 = vmatprep.mubr.bf16.mxu0 %v2989_v46  ;;  %2781 = vmatpush3.bf16.msra.mxu1 %v2988_v45  ;;  %v502_v40 = vrot.slane %v500_v34, 1  ;;  %v3021_v45 = vld [vmem:[%s3292_s28 + $0xf4] ss:$8 sps:$4 sm:$0xff]   ;;  %v3399_v46 = vld [vmem:[%s3292_s28 + $0x108] ss:$8 sps:$4 sm:$0xff]   ;;  %v3049_v34 = vld [vmem:[%s3720_s1 + $0x200] sm:$0xff]  }
  0x2e   : > { %1721 = vmatprep.mubr.bf16.mxu1 %v3316_v48  ;;  %2718 = vmatprep.subr.bf16.mxu0 %v2993_v53 }
  0x2f   : > { %2782 = vmatprep.subr.bf16.mxu1 %v2994_v54  ;;  %v503_v44 = vor.u32 %v502_v40, %v498_v35  ;;  %v517_v54 = vshll.u32 %v3024_v50, 16  ;;  %v3046_v35 = vld [vmem:[%s3292_s28 + $0x34] ss:$8 sps:$4 sm:$0xff]   ;;  %v686_v40 = vshrl.u32 %v3316_v48, 16  ;;  %v3051_v48 = vld [vmem:[%s3292_s28 + $0x64] ss:$8 sps:$4 sm:$0xff]  }
  0x30   : > { %2719 = vmatpush3.bf16.msra.mxu0 %v2995_v56 }
  0x31   : > { %2783 = vmatpush3.bf16.msra.mxu1 %v2996_v58  ;;  %2720 = vmatprep.subr.bf16.mxu0 %v3001_v60  ;;  %v508_v47 = vsel %vm448_vm0, %v503_v44, %v507_v42  ;;  %v519_v58 = vrot.slane %v517_v54, 1  ;;  %v3047_v42 = vld [vmem:[%s3292_s28 + $0x1c] ss:$8 sps:$4 sm:$0xff]   ;;  %v712_v54 = vshll.u32 %v3355_v13, 16 }
  0x32   : > { %2784 = vmatprep.subr.bf16.mxu1 %v3002_v6  ;;  %v3033_v6 = vld [vmem:[%s3720_s1 + $0x170] sm:$0xff]  }
  0x33   : > { %1625 = vmatmul.mubr.bf16.gmra.mrb[4].mxu0 %v2991_v49  ;;  %v3023_v49 = vld [vmem:[%s3292_s28 + $0xf0] ss:$8 sps:$4 sm:$0xff]  }
  0x34   : > { %1632 = vmatprep.mubr.bf16.mxu0 %v2997_v62  ;;  %1722 = vmatmul.mubr.bf16.gmra.mrb[4].mxu1 %v472_v0  ;;  %v512_v52 = vshll.u32 %v3023_v49, 16  ;;  %v510_v53 = vshrl.u32 %v3023_v49, 16  ;;  %v3417_v62 = vld [vmem:[%s3292_s28 + $0x138] ss:$8 sps:$4 sm:$0xff]  }
  0x35   : > { %1729 = vmatprep.mubr.bf16.mxu1 %v3338_v63  ;;  %2721 = vmatpush3.bf16.msra.mxu0 %v3003_v8  ;;  %v529_v8 = vshll.u32 %v3032_v3, 16  ;;  %v3064_v3 = vld [vmem:[%s3720_s1 + $0x218] sm:$0xff]   ;;  %v748_v32 = vshll.u32 %v3417_v62, 16 }
  0x36   : > { %2785 = vmatpush3.bf16.msra.mxu1 %v3004_v10  ;;  %2722 = vmatprep.subr.bf16.mxu0 %v3009_v20  ;;  %v514_v56 = vrot.slane %v512_v52, 1  ;;  %v3040_v20 = vld [vmem:[%s3292_s28 + $0x160] ss:$0 sps:$4 sm:$0x11]  }
  0x37   : > { %2786 = vmatprep.subr.bf16.mxu1 %v3010_v22  ;;  %v536_v22 = vshll.u32 %v3039_v19, 16 }
  0x38   : > { %v515_v60 = vor.u32 %v514_v56, %v510_v53  ;;  %v3059_v56 = vld [vmem:[%s3720_s1 + $0x210] sm:$0xff]  }
  0x39   : > { %2723 = vmatpush3.bf16.msra.mxu0 %v3011_v24  ;;  %v541_v24 = vshll.u32 %v3040_v20, 16  ;;  %v736_v20 = vshll.u32 %v3399_v46, 16 }
  0x3a   : > { %2787 = vmatpush3.bf16.msra.mxu1 %v3012_v26  ;;  %2724 = vmatprep.subr.bf16.mxu0 %v3017_v36  ;;  %v520_v0 = vsel %vm448_vm0, %v515_v60, %v519_v58  ;;  %v538_v26 = vrot.slane %v536_v22, 1  ;;  %v3052_v58 = vld [vmem:[%s3292_s28 + $0x4c] ss:$8 sps:$4 sm:$0xff]   ;;  %v3488_v60 = vld [vmem:[%s3292_s28 + $0x60] ss:$8 sps:$4 sm:$0xff]  }
  0x3b   : > { %1633 = vmatmul.mubr.bf16.gmra.mrb[8].mxu0 %v2999_v1  ;;  %2788 = vmatprep.subr.bf16.mxu1 %v3018_v37  ;;  %v3031_v1 = vld [vmem:[%s3292_s28 + $0x120] ss:$8 sps:$4 sm:$0xff]   ;;  %v679_v37 = vor.u32 %v678_v21, %v674_v51  ;;  %v698_v51 = vshrl.u32 %v3338_v63, 16  ;;  %v3062_v21 = vld [vmem:[%s3292_s28 + $0xac] ss:$8 sps:$4 sm:$0xff]  }
  0x3c   : > { %1640 = vmatprep.mubr.bf16.mxu0 %v3005_v12  ;;  %1730 = vmatmul.mubr.bf16.gmra.mrb[8].mxu1 %v484_v14  ;;  %v524_v4 = vshll.u32 %v3031_v1, 16  ;;  %v522_v5 = vshrl.u32 %v3031_v1, 16  ;;  %v531_v12 = vrot.slane %v529_v8, 1  ;;  %v3041_v14 = vld [vmem:[%s3720_s1 + $0x178] sm:$0xff]   ;;  %v539_v31 = vor.u32 %v538_v26, %v534_v23  ;;  %v3074_v23 = vld [vmem:[%s3720_s1 + $0x228] sm:$0xff]  }
  0x3d   : > { %1737 = vmatprep.mubr.bf16.mxu1 %v3355_v13  ;;  %2725 = vmatpush3.bf16.msra.mxu0 %v3019_v39  ;;  %v700_v39 = vshll.u32 %v3338_v63, 16  ;;  %v3057_v8 = vld [vmem:[%s3292_s28 + $0x7c] ss:$8 sps:$4 sm:$0xff]   ;;  %v734_v26 = vshrl.u32 %v3399_v46, 16 }
  0x3e   : > { %2789 = vmatpush3.bf16.msra.mxu1 %v3020_v41  ;;  %2726 = vmatprep.subr.bf16.mxu0 %v3025_v43  ;;  %v526_v10 = vrot.slane %v524_v4, 1  ;;  %v683_v41 = vrot.slane %v681_v38, 1  ;;  %v690_v43 = vrot.slane %v688_v2, 1  ;;  %v714_v2 = vrot.slane %v712_v54, 1  ;;  %v3531_v38 = vld [vmem:[%s3292_s28 + $0xf0] ss:$8 sps:$4 sm:$0xff]  }
  0x3f   : > { %2790 = vmatprep.subr.bf16.mxu1 %v3026_v55  ;;  %v702_v53 = vrot.slane %v700_v39, 1  ;;  %v3055_v55 = vld [vmem:[%s3292_s28 + $0x88] ss:$0 sps:$4 sm:$0x11]   ;;  %v746_v39 = vshrl.u32 %v3417_v62, 16 }
  0x40   : > { %v684_v44 = vsel %vm448_vm0, %v679_v37, %v683_v41  ;;  %v3067_v37 = vld [vmem:[%s3292_s28 + $0xdc] ss:$8 sps:$4 sm:$0xff]   ;;  %v3546_v54 = vld [vmem:[%s3292_s28 + $0x120] ss:$8 sps:$4 sm:$0xff]  }
  0x41   : > { %2727 = vmatpush3.bf16.msra.mxu0 %v3027_v57  ;;  %v703_v63 = vor.u32 %v702_v53, %v698_v51 }
  0x42   : > { %2791 = vmatpush3.bf16.msra.mxu1 %v3028_v59  ;;  %2728 = vmatprep.subr.bf16.mxu0 %v3033_v6  ;;  %v705_v59 = vshll.u32 %v3055_v55, 16  ;;  %v724_v6 = vshll.u32 %v3376_v29, 16  ;;  %v3076_v55 = vld [vmem:[%s3292_s28 + $0x154] ss:$8 sps:$4 sm:$0xff]  }
  0x43   : > { %1641 = vmatmul.mubr.bf16.gmra.mrb[12].mxu0 %v3007_v15  ;;  %2792 = vmatprep.subr.bf16.mxu1 %v3034_v7  ;;  %v527_v15 = vor.u32 %v526_v10, %v522_v5  ;;  %v3060_v5 = vld [vmem:[%s3292_s28 + $0xb8] ss:$0 sps:$4 sm:$0x11]  }
  0x44   : > { %1738 = vmatmul.mubr.bf16.gmra.mrb[12].mxu1 %v496_v28  ;;  %1648 = vmatprep.mubr.bf16.mxu0 %v3013_v27  ;;  %v3043_v27 = vld [vmem:[%s3720_s1 + $0x138] sm:$0xff]   ;;  %v543_v28 = vrot.slane %v541_v24, 1  ;;  %v717_v7 = vshll.u32 %v3060_v5, 16 }
  0x45   : > { %1745 = vmatprep.mubr.bf16.mxu1 %v3376_v29  ;;  %2729 = vmatpush3.bf16.msra.mxu0 %v3035_v9  ;;  %v532_v18 = vsel %vm448_vm0, %v527_v15, %v531_v12  ;;  %v3501_v9 = vld [vmem:[%s3292_s28 + $0x90] ss:$8 sps:$4 sm:$0xff]   ;;  %v3065_v12 = vld [vmem:[%s3292_s28 + $0xe8] ss:$0 sps:$4 sm:$0x11]  }
  0x46   : > { %2793 = vmatpush3.bf16.msra.mxu1 %v3036_v11  ;;  %2730 = vmatprep.subr.bf16.mxu0 %v3041_v14  ;;  %v544_v36 = vsel %vm448_vm0, %v539_v31, %v543_v28  ;;  %v719_v10 = vrot.slane %v717_v7, 1  ;;  %v722_v11 = vshrl.u32 %v3376_v29, 16  ;;  %v726_v14 = vrot.slane %v724_v6, 1  ;;  %v3070_v24 = vld [vmem:[%s3292_s28 + $0x118] ss:$0 sps:$4 sm:$0x11]  }
  0x47   : > { %2794 = vmatprep.subr.bf16.mxu1 %v3042_v25  ;;  %v741_v28 = vshll.u32 %v3070_v24, 16  ;;  %v3066_v31 = vld [vmem:[%s3292_s28 + $0xf4] ss:$8 sps:$4 sm:$0xff]   ;;  %v3078_v5 = vld [vmem:[%s3292_s28 + $0x150] ss:$8 sps:$4 sm:$0xff]   ;;  %v946_v7 = vshrl.u32 %v3531_v38, 16 }
  0x48   : > { %v727_v22 = vor.u32 %v726_v14, %v722_v11  ;;  %v3081_v6 = vld [vmem:[%s3292_s28 + $0x184] ss:$8 sps:$4 sm:$0xff]   ;;  %v924_v11 = vshll.u32 %v3501_v9, 16  ;;  %v3089_v14 = vld [vmem:[%s3292_s28 + $0xa0] ss:$0 sps:$4 sm:$0x11]  }
  0x49   : > { %2731 = vmatpush3.bf16.msra.mxu0 %v3043_v27  ;;  %v738_v27 = vrot.slane %v736_v20, 1  ;;  %v3082_v20 = vld [vmem:[%s3292_s28 + $0x16c] ss:$8 sps:$4 sm:$0xff]   ;;  %v3090_v24 = vld [vmem:[%s3292_s28 + $0x160] ss:$0 sps:$4 sm:$0x11]  }
  0x4a   : > { %2860 = vmatprep.subr.bf16.mxu0 %v3049_v34 }
  0x4b   : > { %1649 = vmatmul.mubr.bf16.gmra.mrb[16].mxu0 %v3015_v30  ;;  %v3044_v30 = vld [vmem:[%s3720_s1 + $0x1b8] sm:$0xff]  }
  0x4c   : > { %1656 = vmatprep.mubr.bf16.mxu0 %v3021_v45  ;;  %1746 = vmatmul.mubr.bf16.gmra.mrb[16].mxu1 %v508_v47  ;;  %v3050_v45 = vld [vmem:[%s3292_s28 + $0x58] ss:$0 sps:$4 sm:$0x11]  }
  0x4d   : > { %1753 = vmatprep.mubr.bf16.mxu1 %v3399_v46  ;;  %2795 = vmatpush3.bf16.msra.mxu1 %v3044_v30  ;;  %v3475_v47 = vld [vmem:[%s3292_s28 + $0x30] ss:$8 sps:$4 sm:$0xff]   ;;  %v693_v50 = vshll.u32 %v3050_v45, 16  ;;  %v3520_v30 = vld [vmem:[%s3292_s28 + $0xc0] ss:$8 sps:$4 sm:$0xff]  }
  0x4e   : > { %2892 = vmatprep.subr.bf16.mxu1 %v3049_v34  ;;  %v3079_v46 = vld [vmem:[%s3720_s1 + $0x230] sm:$0xff]   ;;  %v3071_v45 = vld [vmem:[%s3292_s28 + $0x124] ss:$8 sps:$4 sm:$0xff]  }
  0x4f   : > { %v695_v52 = vrot.slane %v693_v50, 1  ;;  %v3072_v50 = vld [vmem:[%s3292_s28 + $0x10c] ss:$8 sps:$4 sm:$0xff]  }
  0x53   : > { %1657 = vmatmul.mubr.bf16.gmra.mrb[20].mxu0 %v3023_v49  ;;  %v691_v49 = vor.u32 %v690_v43, %v686_v40  ;;  %v750_v40 = vrot.slane %v748_v32, 1  ;;  %v3084_v43 = vld [vmem:[%s3720_s1 + $0x238] sm:$0xff]   ;;  %v3083_v32 = vld [vmem:[%s3292_s28 + $0x180] ss:$8 sps:$4 sm:$0xff]  }
  0x54   : > { %1664 = vmatprep.mubr.bf16.mxu0 %v3029_v61  ;;  %1754 = vmatmul.mubr.bf16.gmra.mrb[20].mxu1 %v520_v0  ;;  %v707_v61 = vrot.slane %v705_v59, 1  ;;  %v3056_v0 = vld [vmem:[%s3292_s28 + $0x94] ss:$8 sps:$4 sm:$0xff]  }
  0x55   : > { %1761 = vmatprep.mubr.bf16.mxu1 %v3417_v62  ;;  %v696_v57 = vsel %vm448_vm0, %v691_v49, %v695_v52  ;;  %v760_v62 = vshll.u32 %v3441_v17, 16  ;;  %v758_v52 = vshrl.u32 %v3441_v17, 16  ;;  %v3077_v59 = vld [vmem:[%s3292_s28 + $0x13c] ss:$8 sps:$4 sm:$0xff]  }
  0x56   : > { %v708_v4 = vsel %vm448_vm0, %v703_v63, %v707_v61  ;;  %v900_v63 = vshll.u32 %v3475_v47, 16  ;;  %v3086_v61 = vld [vmem:[%s3292_s28 + $0x100] ss:$0 sps:$4 sm:$0x11]  }
  0x57   : > { %v762_v53 = vrot.slane %v760_v62, 1 }
  0x5b   : > { %1665 = vmatmul.mubr.bf16.gmra.mrb[24].mxu0 %v3031_v1  ;;  %v710_v1 = vshrl.u32 %v3355_v13, 16 }
  0x5c   : > { %1672 = vmatprep.mubr.bf16.mxu0 %v3037_v16  ;;  %1762 = vmatmul.mubr.bf16.gmra.mrb[24].mxu1 %v532_v18  ;;  %v3061_v16 = vld [vmem:[%s3292_s28 + $0xc4] ss:$8 sps:$4 sm:$0xff]   ;;  %v729_v18 = vshll.u32 %v3065_v12, 16 }
  0x5d   : > { %1769 = vmatprep.mubr.bf16.mxu1 %v3441_v17  ;;  %v715_v13 = vor.u32 %v714_v2, %v710_v1  ;;  %v948_v17 = vshll.u32 %v3531_v38, 16  ;;  %v898_v1 = vshrl.u32 %v3475_v47, 16  ;;  %v902_v2 = vrot.slane %v900_v63, 1 }
  0x5e   : > { %v731_v29 = vrot.slane %v729_v18, 1  ;;  %v960_v18 = vshll.u32 %v3546_v54, 16 }
  0x5f   : > { %v720_v15 = vsel %vm448_vm0, %v715_v13, %v719_v10  ;;  %v3087_v13 = vld [vmem:[%s3292_s28 + $0x70] ss:$0 sps:$4 sm:$0x11]   ;;  %v953_v10 = vshll.u32 %v3086_v61, 16  ;;  %v903_v12 = vor.u32 %v902_v2, %v898_v1 }
  0x60   : > { %v732_v25 = vsel %vm448_vm0, %v727_v22, %v731_v29  ;;  %v3088_v22 = vld [vmem:[%s3292_s28 + $0x130] ss:$0 sps:$4 sm:$0x11]  }
  0x63   : > { %1673 = vmatmul.mubr.bf16.gmra.mrb[28].mxu0 %v3039_v19  ;;  %v3069_v19 = vld [vmem:[%s3720_s1 + $0x220] sm:$0xff]  }
  0x64   : > { %1770 = vmatmul.mubr.bf16.gmra.mrb[28].mxu1 %v544_v36  ;;  %1810 = vmatprep.mubr.bf16.mxu0 %v684_v44  ;;  %v3075_v36 = vld [vmem:[%s3292_s28 + $0x148] ss:$0 sps:$4 sm:$0x11]   ;;  %v3080_v44 = vld [vmem:[%s3292_s28 + $0x178] ss:$0 sps:$4 sm:$0x11]  }
  0x65   : > { %1907 = vmatprep.mubr.bf16.mxu1 %v3046_v35  ;;  %v739_v35 = vor.u32 %v738_v27, %v734_v26  ;;  %v922_v26 = vshrl.u32 %v3501_v9, 16  ;;  %v926_v27 = vrot.slane %v924_v11, 1 }
  0x6b   : > { %1811 = vmatmul.mubr.bf16.vlgmr.msra.gmra.mrb[32].mxu0 %v3047_v42  ;;  %v753_v42 = vshll.u32 %v3075_v36, 16  ;;  %v965_v36 = vshll.u32 %v3088_v22, 16 }
  0x6c   : > { %2861 = vmatpush3.bf16.msra.mxu0 %v3049_v34  ;;  %1908 = vmatmul.mubr.bf16.vlgmr.msra.gmra.mrb[32].mxu1 %v3475_v47 }
  0x6d   : > { %2862 = vmatprep.subr.bf16.mxu0 %v3054_v33  ;;  %2900 = vmatpush3.bf16.msra.mxu1 %v3049_v34  ;;  %v743_v34 = vrot.slane %v741_v28, 1  ;;  %v755_v49 = vrot.slane %v753_v42, 1  ;;  %v958_v28 = vshrl.u32 %v3546_v54, 16  ;;  %v967_v62 = vrot.slane %v965_v36, 1 }
  0x6e   : > { %1915 = vmatprep.mubr.bf16.mxu1 %v3051_v48  ;;  %1818 = vmatprep.mubr.bf16.mxu0 %v696_v57  ;;  %v765_v48 = vshll.u32 %v3080_v44, 16  ;;  %v763_v57 = vor.u32 %v762_v53, %v758_v52  ;;  %v984_v44 = vshll.u32 %v3083_v32, 16 }
  0x6f   : > { %2893 = vmatprep.subr.bf16.mxu1 %v3054_v33  ;;  %v744_v41 = vsel %vm448_vm0, %v739_v35, %v743_v34 }
  0x70   : > { %2863 = vmatpush3.bf16.msra.mxu0 %v3054_v33 }
  0x71   : > { %2864 = vmatprep.subr.bf16.mxu0 %v3059_v56  ;;  %2901 = vmatpush3.bf16.msra.mxu1 %v3054_v33  ;;  %v751_v33 = vor.u32 %v750_v40, %v746_v39  ;;  %v3091_v40 = vld [vmem:[%s3292_s28 + $0xd0] ss:$0 sps:$4 sm:$0x11]  }
  0x72   : > { %2894 = vmatprep.subr.bf16.mxu1 %v3059_v56  ;;  %v941_v52 = vshll.u32 %v3091_v40, 16 }
  0x73   : > { %1819 = vmatmul.mubr.bf16.gmra.mrb[36].mxu0 %v3052_v58  ;;  %v756_v51 = vsel %vm448_vm0, %v751_v33, %v755_v49  ;;  %v3085_v58 = vld [vmem:[%s3292_s28 + $0x40] ss:$0 sps:$4 sm:$0x11]   ;;  %v3092_v49 = vld [vmem:[%s3292_s28 + $0x190] ss:$0 sps:$4 sm:$0x11]  }
  0x74   : > { %1826 = vmatprep.mubr.bf16.mxu0 %v708_v4  ;;  %2865 = vmatpush3.bf16.msra.mxu0 %v3059_v56  ;;  %v912_v4 = vshll.u32 %v3488_v60, 16 }
  0x75   : > { %1916 = vmatmul.mubr.bf16.gmra.mrb[36].mxu1 %v3488_v60  ;;  %2866 = vmatprep.subr.bf16.mxu0 %v3064_v3 }
  0x76   : > { %1923 = vmatprep.mubr.bf16.mxu1 %v3056_v0  ;;  %2902 = vmatpush3.bf16.msra.mxu1 %v3059_v56  ;;  %v767_v56 = vrot.slane %v765_v48, 1  ;;  %v934_v48 = vshrl.u32 %v3520_v30, 16 }
  0x77   : > { %2895 = vmatprep.subr.bf16.mxu1 %v3064_v3 }
  0x78   : > { %2867 = vmatpush3.bf16.msra.mxu0 %v3064_v3  ;;  %v768_v0 = vsel %vm448_vm0, %v763_v57, %v767_v56  ;;  %v986_v56 = vrot.slane %v984_v44, 1  ;;  %v989_v57 = vshll.u32 %v3092_v49, 16 }
  0x79   : > { %2868 = vmatprep.subr.bf16.mxu0 %v3069_v19 }
  0x7a   : > { %2903 = vmatpush3.bf16.msra.mxu1 %v3064_v3  ;;  %v905_v3 = vshll.u32 %v3085_v58, 16  ;;  %v991_v61 = vrot.slane %v989_v57, 1 }
  0x7b   : > { %1827 = vmatmul.mubr.bf16.gmra.mrb[40].mxu0 %v3057_v8  ;;  %2896 = vmatprep.subr.bf16.mxu1 %v3069_v19  ;;  %v950_v8 = vrot.slane %v948_v17, 1 }
  0x7c   : > { %1834 = vmatprep.mubr.bf16.mxu0 %v720_v15  ;;  %2869 = vmatpush3.bf16.msra.mxu0 %v3069_v19  ;;  %v907_v47 = vrot.slane %v905_v3, 1  ;;  %v910_v15 = vshrl.u32 %v3488_v60, 16  ;;  %v929_v60 = vshll.u32 %v3089_v14, 16 }
  0x7d   : > { %1924 = vmatmul.mubr.bf16.gmra.mrb[40].mxu1 %v3501_v9  ;;  %2870 = vmatprep.subr.bf16.mxu0 %v3074_v23  ;;  %v951_v29 = vor.u32 %v950_v8, %v946_v7  ;;  %v977_v9 = vshll.u32 %v3090_v24, 16 }
  0x7e   : > { %1931 = vmatprep.mubr.bf16.mxu1 %v3061_v16  ;;  %2904 = vmatpush3.bf16.msra.mxu1 %v3069_v19  ;;  %v914_v16 = vrot.slane %v912_v4, 1  ;;  %v972_v19 = vshll.u32 %v3078_v5, 16  ;;  %v931_v42 = vrot.slane %v929_v60, 1 }
  0x7f   : > { %2897 = vmatprep.subr.bf16.mxu1 %v3074_v23 }
  0x80   : > { %2871 = vmatpush3.bf16.msra.mxu0 %v3074_v23  ;;  %v915_v34 = vor.u32 %v914_v16, %v910_v15 }
  0x81   : > { %2872 = vmatprep.subr.bf16.mxu0 %v3079_v46 }
  0x82   : > { %2905 = vmatpush3.bf16.msra.mxu1 %v3074_v23  ;;  %v955_v23 = vrot.slane %v953_v10, 1 }
  0x83   : > { %1835 = vmatmul.mubr.bf16.gmra.mrb[44].mxu0 %v3062_v21  ;;  %2898 = vmatprep.subr.bf16.mxu1 %v3079_v46  ;;  %v917_v21 = vshll.u32 %v3087_v13, 16 }
  0x84   : > { %1842 = vmatprep.mubr.bf16.mxu0 %v732_v25  ;;  %2873 = vmatpush3.bf16.msra.mxu0 %v3079_v46  ;;  %v908_v25 = vsel %vm448_vm0, %v903_v12, %v907_v47  ;;  %v956_v39 = vsel %vm448_vm0, %v951_v29, %v955_v23 }
  0x85   : > { %1932 = vmatmul.mubr.bf16.gmra.mrb[44].mxu1 %v3520_v30  ;;  %2874 = vmatprep.subr.bf16.mxu0 %v3084_v43  ;;  %v919_v35 = vrot.slane %v917_v21, 1 }
  0x86   : > { %1939 = vmatprep.mubr.bf16.mxu1 %v3066_v31  ;;  %2906 = vmatpush3.bf16.msra.mxu1 %v3079_v46  ;;  %v962_v31 = vrot.slane %v960_v18, 1  ;;  %v970_v46 = vshrl.u32 %v3078_v5, 16 }
  0x87   : > { %2899 = vmatprep.subr.bf16.mxu1 %v3084_v43 }
  0x88   : > { %2875 = vmatpush3.bf16.msra.mxu0 %v3084_v43 }
  0x8a   : > { %2907 = vmatpush3.bf16.msra.mxu1 %v3084_v43  ;;  %v963_v43 = vor.u32 %v962_v31, %v958_v28 }
  0x8b   : > { %1843 = vmatmul.mubr.bf16.gmra.mrb[48].mxu0 %v3067_v37  ;;  %v974_v37 = vrot.slane %v972_v19, 1 }
  0x8c   : > { %1850 = vmatprep.mubr.bf16.mxu0 %v744_v41  ;;  %v927_v41 = vor.u32 %v926_v27, %v922_v26 }
  0x8d   : > { %1940 = vmatmul.mubr.bf16.gmra.mrb[48].mxu1 %v3531_v38  ;;  %v936_v38 = vshll.u32 %v3520_v30, 16  ;;  %v975_v33 = vor.u32 %v974_v37, %v970_v46 }
  0x8e   : > { %1947 = vmatprep.mubr.bf16.mxu1 %v3071_v45  ;;  %v920_v45 = vsel %vm448_vm0, %v915_v34, %v919_v35  ;;  %v932_v53 = vsel %vm448_vm0, %v927_v41, %v931_v42 }
  0x93   : > { %1851 = vmatmul.mubr.bf16.gmra.mrb[52].mxu0 %v3072_v50  ;;  %v979_v50 = vrot.slane %v977_v9, 1 }
  0x94   : > { %1858 = vmatprep.mubr.bf16.mxu0 %v756_v51  ;;  %v938_v51 = vrot.slane %v936_v38, 1 }
  0x95   : > { %1948 = vmatmul.mubr.bf16.gmra.mrb[52].mxu1 %v3546_v54  ;;  %v968_v54 = vsel %vm448_vm0, %v963_v43, %v967_v62  ;;  %v980_v58 = vsel %vm448_vm0, %v975_v33, %v979_v50 }
  0x96   : > { %1955 = vmatprep.mubr.bf16.mxu1 %v3076_v55  ;;  %v982_v55 = vshrl.u32 %v3083_v32, 16  ;;  %v939_v63 = vor.u32 %v938_v51, %v934_v48 }
  0x98   : > { %v987_v17 = vor.u32 %v986_v56, %v982_v55 }
  0x9b   : > { %1859 = vmatmul.mubr.bf16.gmra.mrb[56].mxu0 %v3077_v59  ;;  %v943_v59 = vrot.slane %v941_v52, 1 }
  0x9c   : > { %1866 = vmatprep.mubr.bf16.mxu0 %v768_v0  ;;  %v992_v0 = vsel %vm448_vm0, %v987_v17, %v991_v61 }
  0x9d   : > { %1956 = vmatmul.mubr.bf16.gmra.mrb[56].mxu1 %v3078_v5  ;;  %v944_v30 = vsel %vm448_vm0, %v939_v63, %v943_v59 }
  0x9e   : > { %1963 = vmatprep.mubr.bf16.mxu1 %v3081_v6  ;;  %v3587_v6 = vld [vmem:[%s3721_s2] ss:$0 sm:$0xff] }
  0xa3   : > { %1867 = vmatmul.mubr.bf16.gmra.mrb[60].mxu0 %v3082_v20 }
  0xa4   : > { %2876 = vmatprep.mubr.bf16.mxu0 %v908_v25 }
  0xa5   : > { %1964 = vmatmul.mubr.bf16.gmra.mrb[60].mxu1 %v3083_v32 }
  0xa6   : > { %2884 = vmatprep.mubr.bf16.mxu1 %v956_v39 }
  0xab   : > { %2877 = vmatmul.mubr.bf16.vlgmr.msra.gmra.mrb[64].mxu0 %v920_v45 }
  0xac   : > { %2880 = vmatprep.mubr.bf16.mxu0 %v932_v53 }
  0xad   : > { %2885 = vmatmul.mubr.bf16.vlgmr.msra.gmra.mrb[64].mxu1 %v968_v54 }
  0xae   : > { %2888 = vmatprep.mubr.bf16.mxu1 %v980_v58 }
  0xb3   : > { %2881 = vmatmul.mubr.bf16.gmra.mrb[68].mxu0 %v944_v30 }
  0xb5   : > { %2889 = vmatmul.mubr.bf16.gmra.mrb[68].mxu1 %v992_v0 }
  0xfe   : > { %v2604_v1 = vpop.f32.mrb[0].mxu0 }
  0xff   : > { %v2605_v2 = vpop.f32.mrb[1].mxu0  ;;  %v2668_v7 = vpop.f32.mrb[0].mxu1 }
 0x100   : > { %v2606_v3 = vadd.f32 %v2605_v2, %v2604_v1  ;;  %v2607_v4 = vpop.f32.mrb[2].mxu0  ;;  %v2669_v10 = vpop.f32.mrb[1].mxu1 }
 0x101   : > { %v2608_v5 = vpop.f32.mrb[3].mxu0  ;;  %v2670_v11 = vadd.f32 %v2669_v10, %v2668_v7  ;;  %v2671_v12 = vpop.f32.mrb[2].mxu1 }
 0x102   : > { %v2609_v13 = vadd.f32 %v2608_v5, %v2607_v4  ;;  %v1619_v8 = vadd.f32 %v2606_v3, %v3587_v6  ;;  %v2672_v15 = vpop.f32.mrb[3].mxu1 }
 0x103   : > { %v2673_v19 = vadd.f32 %v2672_v15, %v2671_v12 }
 0x104   : > { %v1622_v47 = vadd.f32 %v2609_v13, %v3587_v6  ;;  %v3591_v18 = vadd.f32 %v2670_v11, %v1619_v8 }
 0x106   : > { %v2610_v14 = vpop.f32.mrb[4].mxu0  ;;  %v3593_v29 = vadd.f32 %v2673_v19, %v1622_v47 }
 0x107   : > { %v2611_v16 = vpop.f32.mrb[5].mxu0  ;;  %v2674_v24 = vpop.f32.mrb[4].mxu1 }
 0x108   : > { %v2612_v20 = vadd.f32 %v2611_v16, %v2610_v14  ;;  %v2613_v21 = vpop.f32.mrb[6].mxu0  ;;  %v2675_v26 = vpop.f32.mrb[5].mxu1 }
 0x109   : > { %v2614_v22 = vpop.f32.mrb[7].mxu0  ;;  %v2676_v60 = vadd.f32 %v2675_v26, %v2674_v24  ;;  %v2677_v28 = vpop.f32.mrb[6].mxu1 }
 0x10a   : > { %v2615_v23 = vadd.f32 %v2614_v22, %v2613_v21  ;;  %v1627_v25 = vadd.f32 %v2612_v20, %v3587_v6  ;;  %v2678_v34 = vpop.f32.mrb[7].mxu1 }
 0x10b   : > { %v2679_v37 = vadd.f32 %v2678_v34, %v2677_v28 }
 0x10c   : > { %v1630_v31 = vadd.f32 %v2615_v23, %v3587_v6  ;;  %v3597_v46 = vadd.f32 %v2676_v60, %v1627_v25 }
 0x10e   : > { %v2616_v27 = vpop.f32.mrb[8].mxu0  ;;  %v3599_v9 = vadd.f32 %v2679_v37, %v1630_v31 }
 0x10f   : > { %v2617_v32 = vpop.f32.mrb[9].mxu0  ;;  %v2680_v40 = vpop.f32.mrb[8].mxu1 }
 0x110   : > { %v2618_v35 = vadd.f32 %v2617_v32, %v2616_v27  ;;  %v2619_v36 = vpop.f32.mrb[10].mxu0  ;;  %v2681_v42 = vpop.f32.mrb[9].mxu1 }
 0x111   : > { %v2620_v38 = vpop.f32.mrb[11].mxu0  ;;  %v2682_v44 = vadd.f32 %v2681_v42, %v2680_v40  ;;  %v2683_v45 = vpop.f32.mrb[10].mxu1 }
 0x112   : > { %v2621_v39 = vadd.f32 %v2620_v38, %v2619_v36  ;;  %v1635_v41 = vadd.f32 %v2618_v35, %v3587_v6  ;;  %v2684_v49 = vpop.f32.mrb[11].mxu1 }
 0x113   : > { %v2685_v52 = vadd.f32 %v2684_v49, %v2683_v45 }
 0x114   : > { %v1638_v62 = vadd.f32 %v2621_v39, %v3587_v6  ;;  %v3603_v51 = vadd.f32 %v2682_v44, %v1635_v41 }
 0x116   : > { %v2622_v43 = vpop.f32.mrb[12].mxu0  ;;  %v3605_v55 = vadd.f32 %v2685_v52, %v1638_v62 }
 0x117   : > { %v2623_v33 = vpop.f32.mrb[13].mxu0  ;;  %v2686_v56 = vpop.f32.mrb[12].mxu1 }
 0x118   : > { %v2624_v50 = vadd.f32 %v2623_v33, %v2622_v43  ;;  %v2625_v48 = vpop.f32.mrb[14].mxu0  ;;  %v2687_v58 = vpop.f32.mrb[13].mxu1 }
 0x119   : > { %v2626_v53 = vpop.f32.mrb[15].mxu0  ;;  %v2688_v63 = vadd.f32 %v2687_v58, %v2686_v56  ;;  %v2689_v59 = vpop.f32.mrb[14].mxu1 }
 0x11a   : > { %v2627_v54 = vadd.f32 %v2626_v53, %v2625_v48  ;;  %v1643_v57 = vadd.f32 %v2624_v50, %v3587_v6  ;;  %v2690_v30 = vpop.f32.mrb[15].mxu1 }
 0x11b   : > { %v2691_v2 = vadd.f32 %v2690_v30, %v2689_v59 }
 0x11c   : > { %v1646_v17 = vadd.f32 %v2627_v54, %v3587_v6  ;;  %v3609_v1 = vadd.f32 %v2688_v63, %v1643_v57 }
 0x11e   : > { %v2628_v61 = vpop.f32.mrb[16].mxu0  ;;  %v3611_v13 = vadd.f32 %v2691_v2, %v1646_v17 }
 0x11f   : > { %v2629_v0 = vpop.f32.mrb[17].mxu0  ;;  %v2692_v8 = vpop.f32.mrb[16].mxu1 }
 0x120   : > { %v2630_v3 = vadd.f32 %v2629_v0, %v2628_v61  ;;  %v2631_v4 = vpop.f32.mrb[18].mxu0  ;;  %v2693_v11 = vpop.f32.mrb[17].mxu1 }
 0x121   : > { %v2632_v5 = vpop.f32.mrb[19].mxu0  ;;  %v2694_v47 = vadd.f32 %v2693_v11, %v2692_v8  ;;  %v2695_v14 = vpop.f32.mrb[18].mxu1 }
 0x122   : > { %v2633_v7 = vadd.f32 %v2632_v5, %v2631_v4  ;;  %v1651_v10 = vadd.f32 %v2630_v3, %v3587_v6  ;;  %v2696_v19 = vpop.f32.mrb[19].mxu1 }
 0x123   : > { %v2697_v23 = vadd.f32 %v2696_v19, %v2695_v14 }
 0x124   : > { %v1654_v15 = vadd.f32 %v2633_v7, %v3587_v6  ;;  %v3615_v22 = vadd.f32 %v2694_v47, %v1651_v10 }
 0x126   : > { %v2634_v12 = vpop.f32.mrb[20].mxu0  ;;  %v3617_v26 = vadd.f32 %v2697_v23, %v1654_v15 }
 0x127   : > { %v2635_v16 = vpop.f32.mrb[21].mxu0  ;;  %v2698_v27 = vpop.f32.mrb[20].mxu1 }
 0x128   : > { %v2636_v20 = vadd.f32 %v2635_v16, %v2634_v12  ;;  %v2637_v21 = vpop.f32.mrb[22].mxu0  ;;  %v2699_v28 = vpop.f32.mrb[21].mxu1 }
 0x129   : > { %v2638_v24 = vpop.f32.mrb[23].mxu0  ;;  %v2700_v32 = vadd.f32 %v2699_v28, %v2698_v27  ;;  %v2701_v34 = vpop.f32.mrb[22].mxu1 }
 0x12a   : > { %v2639_v25 = vadd.f32 %v2638_v24, %v2637_v21  ;;  %v1659_v60 = vadd.f32 %v2636_v20, %v3587_v6  ;;  %v2702_v37 = vpop.f32.mrb[23].mxu1 }
 0x12b   : > { %v2703_v41 = vadd.f32 %v2702_v37, %v2701_v34 }
 0x12c   : > { %v1662_v35 = vadd.f32 %v2639_v25, %v3587_v6  ;;  %v3621_v40 = vadd.f32 %v2700_v32, %v1659_v60 }
 0x12e   : > { %v2640_v31 = vpop.f32.mrb[24].mxu0  ;;  %v3623_v44 = vadd.f32 %v2703_v41, %v1662_v35 }
 0x12f   : > { %v2641_v36 = vpop.f32.mrb[25].mxu0  ;;  %v2704_v45 = vpop.f32.mrb[24].mxu1 }
 0x130   : > { %v2642_v38 = vadd.f32 %v2641_v36, %v2640_v31  ;;  %v2643_v39 = vpop.f32.mrb[26].mxu0  ;;  %v2705_v33 = vpop.f32.mrb[25].mxu1 }
 0x131   : > { %v2644_v42 = vpop.f32.mrb[27].mxu0  ;;  %v2706_v50 = vadd.f32 %v2705_v33, %v2704_v45  ;;  %v2707_v48 = vpop.f32.mrb[26].mxu1 }
 0x132   : > { %v2645_v43 = vadd.f32 %v2644_v42, %v2643_v39  ;;  %v1667_v62 = vadd.f32 %v2642_v38, %v3587_v6  ;;  %v2708_v54 = vpop.f32.mrb[27].mxu1 }
 0x133   : > { %v2709_v63 = vadd.f32 %v2708_v54, %v2707_v48 }
 0x134   : > { %v1670_v52 = vadd.f32 %v2645_v43, %v3587_v6  ;;  %v3627_v58 = vadd.f32 %v2706_v50, %v1667_v62 }
 0x136   : > { %v2646_v49 = vpop.f32.mrb[28].mxu0  ;;  %v3629_v61 = vadd.f32 %v2709_v63, %v1670_v52 }
 0x137   : > { %v2647_v53 = vpop.f32.mrb[29].mxu0  ;;  %v2710_v30 = vpop.f32.mrb[28].mxu1 }
 0x138   : > { %v2648_v56 = vadd.f32 %v2647_v53, %v2646_v49  ;;  %v2649_v57 = vpop.f32.mrb[30].mxu0  ;;  %v2711_v2 = vpop.f32.mrb[29].mxu1 }
 0x139   : > { %v2650_v59 = vpop.f32.mrb[31].mxu0  ;;  %v2712_v3 = vadd.f32 %v2711_v2, %v2710_v30  ;;  %v2713_v4 = vpop.f32.mrb[30].mxu1 }
 0x13a   : > { %v2651_v17 = vadd.f32 %v2650_v59, %v2649_v57  ;;  %v1675_v0 = vadd.f32 %v2648_v56, %v3587_v6  ;;  %v2714_v7 = vpop.f32.mrb[31].mxu1 }
 0x13b   : > { %v2715_v10 = vadd.f32 %v2714_v7, %v2713_v4 }
 0x13c   : > { %v1678_v5 = vadd.f32 %v2651_v17, %v3587_v6  ;;  %v3633_v8 = vadd.f32 %v2712_v3, %v1675_v0 }
 0x13e   : > { %v2732_v11 = vpop.f32.mrb[32].mxu0  ;;  %v3635_v12 = vadd.f32 %v2715_v10, %v1678_v5 }
 0x13f   : > { %v2733_v47 = vpop.f32.mrb[33].mxu0  ;;  %v2796_v16 = vpop.f32.mrb[32].mxu1 }
 0x140   : > { %v2734_v14 = vadd.f32 %v2733_v47, %v2732_v11  ;;  %v2735_v15 = vpop.f32.mrb[34].mxu0  ;;  %v2797_v21 = vpop.f32.mrb[33].mxu1 }
 0x141   : > { %v2736_v19 = vpop.f32.mrb[35].mxu0  ;;  %v2798_v24 = vadd.f32 %v2797_v21, %v2796_v16  ;;  %v2799_v25 = vpop.f32.mrb[34].mxu1 }
 0x142   : > { %v1813_v20 = vadd.f32 %v2734_v14, %v3591_v18  ;;  %v2737_v23 = vadd.f32 %v2736_v19, %v2735_v15  ;;  %v2800_v27 = vpop.f32.mrb[35].mxu1 }
 0x143   : > { %v2801_v60 = vadd.f32 %v2800_v27, %v2799_v25 }
 0x144   : > { %v1816_v6 = vadd.f32 %v2737_v23, %v3593_v29  ;;  %v3639_v28 = vadd.f32 %v2798_v24, %v1813_v20 }
 0x146   : > { %v2738_v31 = vpop.f32.mrb[36].mxu0  ;;  %v3641_v34 = vadd.f32 %v2801_v60, %v1816_v6 }
 0x147   : > { %v2739_v32 = vpop.f32.mrb[37].mxu0 }
 0x148   : > { %v2740_v35 = vadd.f32 %v2739_v32, %v2738_v31  ;;  %v2741_v36 = vpop.f32.mrb[38].mxu0  ;;  %v2802_v37 = vpop.f32.mrb[36].mxu1 }
 0x149   : > { %v2742_v38 = vpop.f32.mrb[39].mxu0  ;;  %v2803_v39 = vpop.f32.mrb[37].mxu1 }
 0x14a   : > { %v1821_v18 = vadd.f32 %v2740_v35, %v3597_v46  ;;  %v2743_v41 = vadd.f32 %v2742_v38, %v2741_v36  ;;  %v2804_v42 = vadd.f32 %v2803_v39, %v2802_v37  ;;  %v2805_v43 = vpop.f32.mrb[38].mxu1 }
 0x14b   : > { %v2806_v45 = vpop.f32.mrb[39].mxu1 }
 0x14c   : > { %v1824_v29 = vadd.f32 %v2743_v41, %v3599_v9  ;;  %v2807_v62 = vadd.f32 %v2806_v45, %v2805_v43  ;;  %v3645_v33 = vadd.f32 %v2804_v42, %v1821_v18 }
 0x14e   : > { %v2744_v49 = vpop.f32.mrb[40].mxu0  ;;  %v3647_v48 = vadd.f32 %v2807_v62, %v1824_v29 }
 0x14f   : > { %v2745_v50 = vpop.f32.mrb[41].mxu0 }
 0x150   : > { %v2746_v52 = vadd.f32 %v2745_v50, %v2744_v49  ;;  %v2747_v53 = vpop.f32.mrb[42].mxu0  ;;  %v2808_v54 = vpop.f32.mrb[40].mxu1 }
 0x151   : > { %v2748_v56 = vpop.f32.mrb[43].mxu0  ;;  %v2809_v57 = vpop.f32.mrb[41].mxu1 }
 0x152   : > { %v1829_v46 = vadd.f32 %v2746_v52, %v3603_v51  ;;  %v2749_v63 = vadd.f32 %v2748_v56, %v2747_v53  ;;  %v2810_v59 = vadd.f32 %v2809_v57, %v2808_v54  ;;  %v2811_v17 = vpop.f32.mrb[42].mxu1 }
 0x153   : > { %v2812_v30 = vpop.f32.mrb[43].mxu1 }
 0x154   : > { %v1832_v9 = vadd.f32 %v2749_v63, %v3605_v55  ;;  %v2813_v0 = vadd.f32 %v2812_v30, %v2811_v17  ;;  %v3651_v2 = vadd.f32 %v2810_v59, %v1829_v46 }
 0x156   : > { %v2750_v3 = vpop.f32.mrb[44].mxu0  ;;  %v3653_v5 = vadd.f32 %v2813_v0, %v1832_v9 }
 0x157   : > { %v2751_v4 = vpop.f32.mrb[45].mxu0 }
 0x158   : > { %v2752_v7 = vadd.f32 %v2751_v4, %v2750_v3  ;;  %v2753_v10 = vpop.f32.mrb[46].mxu0  ;;  %v2814_v11 = vpop.f32.mrb[44].mxu1 }
 0x159   : > { %v2754_v47 = vpop.f32.mrb[47].mxu0  ;;  %v2815_v14 = vpop.f32.mrb[45].mxu1 }
 0x15a   : > { %v1837_v51 = vadd.f32 %v2752_v7, %v3609_v1  ;;  %v2755_v15 = vadd.f32 %v2754_v47, %v2753_v10  ;;  %v2816_v16 = vadd.f32 %v2815_v14, %v2814_v11  ;;  %v2817_v19 = vpop.f32.mrb[46].mxu1 }
 0x15b   : > { %v2818_v20 = vpop.f32.mrb[47].mxu1 }
 0x15c   : > { %v1840_v55 = vadd.f32 %v2755_v15, %v3611_v13  ;;  %v2819_v21 = vadd.f32 %v2818_v20, %v2817_v19  ;;  %v3657_v23 = vadd.f32 %v2816_v16, %v1837_v51 }
 0x15e   : > { %v2756_v24 = vpop.f32.mrb[48].mxu0  ;;  %v3659_v6 = vadd.f32 %v2819_v21, %v1840_v55 }
 0x15f   : > { %v2757_v25 = vpop.f32.mrb[49].mxu0 }
 0x160   : > { %v2758_v27 = vadd.f32 %v2757_v25, %v2756_v24  ;;  %v2759_v60 = vpop.f32.mrb[50].mxu0  ;;  %v2820_v31 = vpop.f32.mrb[48].mxu1 }
 0x161   : > { %v2760_v32 = vpop.f32.mrb[51].mxu0  ;;  %v2821_v35 = vpop.f32.mrb[49].mxu1 }
 0x162   : > { %v1845_v1 = vadd.f32 %v2758_v27, %v3615_v22  ;;  %v2761_v36 = vadd.f32 %v2760_v32, %v2759_v60  ;;  %v2822_v37 = vadd.f32 %v2821_v35, %v2820_v31  ;;  %v2823_v38 = vpop.f32.mrb[50].mxu1 }
 0x163   : > { %v2824_v18 = vpop.f32.mrb[51].mxu1 }
 0x164   : > { %v1848_v13 = vadd.f32 %v2761_v36, %v3617_v26  ;;  %v2825_v39 = vadd.f32 %v2824_v18, %v2823_v38  ;;  %v3663_v41 = vadd.f32 %v2822_v37, %v1845_v1 }
 0x166   : > { %v2762_v42 = vpop.f32.mrb[52].mxu0  ;;  %v3665_v29 = vadd.f32 %v2825_v39, %v1848_v13 }
 0x167   : > { %v2763_v43 = vpop.f32.mrb[53].mxu0 }
 0x168   : > { %v2764_v45 = vadd.f32 %v2763_v43, %v2762_v42  ;;  %v2765_v62 = vpop.f32.mrb[54].mxu0  ;;  %v2826_v49 = vpop.f32.mrb[52].mxu1 }
 0x169   : > { %v2766_v50 = vpop.f32.mrb[55].mxu0  ;;  %v2827_v52 = vpop.f32.mrb[53].mxu1 }
 0x16a   : > { %v1853_v22 = vadd.f32 %v2764_v45, %v3621_v40  ;;  %v2767_v53 = vadd.f32 %v2766_v50, %v2765_v62  ;;  %v2828_v54 = vadd.f32 %v2827_v52, %v2826_v49  ;;  %v2829_v56 = vpop.f32.mrb[54].mxu1 }
 0x16b   : > { %v2830_v46 = vpop.f32.mrb[55].mxu1 }
 0x16c   : > { %v1856_v26 = vadd.f32 %v2767_v53, %v3623_v44  ;;  %v2831_v57 = vadd.f32 %v2830_v46, %v2829_v56  ;;  %v1950_v63 = vadd.f32 %v2828_v54, %v1853_v22 }
 0x16e   : > { %v2768_v59 = vpop.f32.mrb[56].mxu0  ;;  %v1953_v9 = vadd.f32 %v2831_v57, %v1856_v26 }
 0x16f   : > { %v2769_v17 = vpop.f32.mrb[57].mxu0 }
 0x170   : > { %v2770_v30 = vadd.f32 %v2769_v17, %v2768_v59  ;;  %v2771_v0 = vpop.f32.mrb[58].mxu0  ;;  %v2832_v3 = vpop.f32.mrb[56].mxu1 }
 0x171   : > { %v2772_v4 = vpop.f32.mrb[59].mxu0  ;;  %v2833_v40 = vpop.f32.mrb[57].mxu1 }
 0x172   : > { %v1861_v7 = vadd.f32 %v2770_v30, %v3627_v58  ;;  %v2773_v10 = vadd.f32 %v2772_v4, %v2771_v0  ;;  %v2834_v11 = vadd.f32 %v2833_v40, %v2832_v3  ;;  %v2835_v47 = vpop.f32.mrb[58].mxu1 }
 0x173   : > { %v2836_v51 = vpop.f32.mrb[59].mxu1 }
 0x174   : > { %v1864_v44 = vadd.f32 %v2773_v10, %v3629_v61  ;;  %v2837_v14 = vadd.f32 %v2836_v51, %v2835_v47  ;;  %v3672_v15 = vadd.f32 %v2834_v11, %v1861_v7 }
 0x176   : > { %v2774_v16 = vpop.f32.mrb[60].mxu0  ;;  %v3674_v55 = vadd.f32 %v2837_v14, %v1864_v44 }
 0x177   : > { %v2775_v19 = vpop.f32.mrb[61].mxu0 }
 0x178   : > { %v2776_v20 = vadd.f32 %v2775_v19, %v2774_v16  ;;  %v2777_v21 = vpop.f32.mrb[62].mxu0  ;;  %v2838_v58 = vpop.f32.mrb[60].mxu1 }
 0x179   : > { %v2778_v24 = vpop.f32.mrb[63].mxu0  ;;  %v2839_v27 = vpop.f32.mrb[61].mxu1 }
 0x17a   : > { %v1869_v25 = vadd.f32 %v2776_v20, %v3633_v8  ;;  %v2779_v60 = vadd.f32 %v2778_v24, %v2777_v21  ;;  %v2840_v31 = vadd.f32 %v2839_v27, %v2838_v58  ;;  %v2841_v61 = vpop.f32.mrb[62].mxu1 }
 0x17b   : > { %v2842_v1 = vpop.f32.mrb[63].mxu1 }
 0x17c   : > { %v1872_v32 = vadd.f32 %v2779_v60, %v3635_v12  ;;  %v2843_v35 = vadd.f32 %v2842_v1, %v2841_v61  ;;  %v1966_v36 = vadd.f32 %v2840_v31, %v1869_v25 }
 0x17e   : > { %v2878_v37 = vpop.f32.mrb[64].mxu0  ;;  %v1969_v18 = vadd.f32 %v2843_v35, %v1872_v32 }
 0x17f   : > { %v2015_v38 = vadd.f32 %v2878_v37, %v3645_v33  ;;  %v2006_v13 = vpop.f32.mrb[65].mxu0 }
 0x180   : > { %v2007_v39 = vadd.f32 %v2006_v13, %v3639_v28  ;;  %v2879_v8 = vpop.f32.mrb[66].mxu0  ;;  %v2886_v42 = vpop.f32.mrb[64].mxu1 }
 0x181   : > { %v2018_v43 = vadd.f32 %v2879_v8, %v3647_v48  ;;  %v2009_v45 = vpop.f32.mrb[67].mxu0  ;;  %v2047_v62 = vadd.f32 %v2886_v42, %v1950_v63  ;;  %v2038_v49 = vpop.f32.mrb[65].mxu1  ;;  %v2071_v50 = vmax.f32 %v2015_v38, 0.0 }
 0x182   : > { %v2010_v12 = vadd.f32 %v2009_v45, %v3641_v34  ;;  %v2039_v22 = vadd.f32 %v2038_v49, %v3663_v41  ;;  %v2887_v53 = vpop.f32.mrb[66].mxu1  ;;  %v2069_v33 = vmax.f32 %v2007_v39, 0.0 }
 0x183   : > { %v2072_v52 = vmax.f32 %v2018_v43, 0.0  ;;  %v2050_v28 = vadd.f32 %v2887_v53, %v1953_v9  ;;  %v2041_v54 = vpop.f32.mrb[67].mxu1  ;;  %v2079_v34 = vmax.f32 %v2047_v62, 0.0 }
 0x184   : > { %v2070_v48 = vmax.f32 %v2010_v12, 0.0  ;;  %v2042_v26 = vadd.f32 %v2041_v54, %v3665_v29  ;;  %v2077_v63 = vmax.f32 %v2039_v22, 0.0 }
 0x185   : > { %v2549_v56 = vpack.c.bf16 %v2072_v52, %v2071_v50  ;;  %v2080_v46 = vmax.f32 %v2050_v28, 0.0 }
 0x186   : > { %v2544_v41 = vpack.c.bf16 %v2070_v48, %v2069_v33  ;;  %v2882_v57 = vpop.f32.mrb[68].mxu0  ;;  %v2078_v59 = vmax.f32 %v2042_v26, 0.0 }
 0x187   : > { %2581 = vst [vmem:[%s3687_s19 + $0x8] sm:$0xff] %v2549_v56   ;;  %v2031_v17 = vadd.f32 %v2882_v57, %v3657_v23  ;;  %v2022_v30 = vpop.f32.mrb[69].mxu0  ;;  %v2569_v0 = vpack.c.bf16 %v2080_v46, %v2079_v34 }
 0x188   : > { %2545 = vst [vmem:[%s3687_s19] sm:$0xff] %v2544_v41   ;;  %v2023_v9 = vadd.f32 %v2022_v30, %v3651_v2  ;;  %v2883_v3 = vpop.f32.mrb[70].mxu0  ;;  %v2564_v4 = vpack.c.bf16 %v2078_v59, %v2077_v63  ;;  %v2890_v7 = vpop.f32.mrb[68].mxu1 }
 0x189   : > { %v2034_v29 = vadd.f32 %v2883_v3, %v3659_v6  ;;  %v2025_v40 = vpop.f32.mrb[71].mxu0  ;;  %2585 = vst [vmem:[%s3687_s19 + $0x28] sm:$0xff] %v2569_v0   ;;  %v2063_v10 = vadd.f32 %v2890_v7, %v1966_v36  ;;  %v2054_v11 = vpop.f32.mrb[69].mxu1  ;;  %v2075_v44 = vmax.f32 %v2031_v17, 0.0 }
 0x18a   : > { %v2026_v47 = vadd.f32 %v2025_v40, %v3653_v5  ;;  %2584 = vst [vmem:[%s3687_s19 + $0x20] sm:$0xff] %v2564_v4   ;;  %v2055_v23 = vadd.f32 %v2054_v11, %v3672_v15  ;;  %v2891_v14 = vpop.f32.mrb[70].mxu1  ;;  %v2073_v2 = vmax.f32 %v2023_v9, 0.0 }
 0x18b   : > { %v2076_v51 = vmax.f32 %v2034_v29, 0.0  ;;  %v2066_v16 = vadd.f32 %v2891_v14, %v1969_v18  ;;  %v2057_v6 = vpop.f32.mrb[71].mxu1  ;;  %v2083_v58 = vmax.f32 %v2063_v10, 0.0 }
 0x18c   : > { %v2074_v19 = vmax.f32 %v2026_v47, 0.0  ;;  %v2058_v21 = vadd.f32 %v2057_v6, %v3674_v55  ;;  %v2081_v25 = vmax.f32 %v2055_v23, 0.0 }
 0x18d   : > { %v2559_v20 = vpack.c.bf16 %v2076_v51, %v2075_v44  ;;  %v2084_v24 = vmax.f32 %v2066_v16, 0.0 }
 0x18e   : > { %v2554_v5 = vpack.c.bf16 %v2074_v19, %v2073_v2  ;;  %v2082_v27 = vmax.f32 %v2058_v21, 0.0 }
 0x18f   : > { %2583 = vst [vmem:[%s3687_s19 + $0x18] sm:$0xff] %v2559_v20   ;;  %v2579_v60 = vpack.c.bf16 %v2084_v24, %v2083_v58 }
 0x190   : > { %2582 = vst [vmem:[%s3687_s19 + $0x10] sm:$0xff] %v2554_v5   ;;  %v2574_v15 = vpack.c.bf16 %v2082_v27, %v2081_v25 }
 0x191   : > { %2587 = vst [vmem:[%s3687_s19 + $0x38] sm:$0xff] %v2579_v60  }
 0x192   : > { %2586 = vst [vmem:[%s3687_s19 + $0x30] sm:$0xff] %v2574_v15  }
 0x193 PF: > { %s13_s16 = sadd.s32 1, %s3131_s16   ;;  %s3723_s12 = smov %s3123_s14 }
 0x194   : > { %p10_p7 = scmp.ge.s32.totalorder %s13_s16, 6   ;;  %s3724_s13 = smov %s3127_s15 }
 0x195   : > { %s3725_s14 = smov %s3728_s17  ;;  %s3726_s15 = smov %s3732_s18 }
 0x196   :  { %12 = sbr.rel (!%p10_p7) target bundleno = 3 (0x3), region = 65 }

// kernel: person_search_query.7
= control target key start
LH: loop header
LB: loop body
LE: loop exit
PB: predicated region body
PF: predicated region fallthrough
CT: control target
= control target key end

     0   :  { %s2325_s12 = smov 0   ;;  %s2327_s13 = smov 0   ;;  %s2755_s0 = inlined_call_operand.vmem [shape: bf16[2,9,2,9,256], index: 0, kind: input, shape index: {}]   ;;  %s2756_s1 = inlined_call_operand.vmem [shape: bf16[1152,128], index: 1, kind: input, shape index: {}]   ;;  %s2757_s2 = inlined_call_operand.vmem [shape: f32[1,128], index: 2, kind: input, shape index: {}]   ;;  %s2758_s3 = inlined_call_operand.vmem [shape: bf16[2,8,8,128], index: 3, kind: output, shape index: {}]  }
   0x1   :  { %s2329_s14 = smov 0  }
   0x2 LB: > { %s25_s15 = sadd.s32 1, %s2299_s13  ;;  %p1737_p0 = scmp.ge.s32.totalorder %s2303_s14, 1  ;;  %s2303_s14 = sphi %s2329_s14, %s13_s14   ;;  %s2299_s13 = sphi %s2327_s13, %s2760_s13   ;;  %s2295_s12 = sphi %s2325_s12, %s2759_s12  }
   0x3   : > { %p27_p1 = scmp.ge.s32.totalorder %s25_s15, 2  ;;  %p151_p2 = scmp.lt.s32.totalorder %s2303_s14, 3 }
   0x5   : > { %s2762_s15 = smov (%p27_p1, %s25_s15), 0  ;;  %p152_p3 = pnand %p1737_p0, %p151_p2 }
   0x6   : > { %v2185_v0 = vld [vmem:[%s2756_s1 + $0x40] sm:$0xff] (!%p152_p3)   ;;  %v2189_v4 = vld [vmem:[%s2756_s1 + $0x48] sm:$0xff] (!%p152_p3)   ;;  %v2193_v8 = vld [vmem:[%s2756_s1 + $0x50] sm:$0xff] (!%p152_p3)   ;;  %p179_p4 = scmp.lt.s32.totalorder (!%p152_p3), %s2295_s12, 1 }
   0x7   : > { %155 = sbr.rel (%p152_p3) target bundleno = 329 (0x149), region = 32  ;;  %v2186_v1 = vld [vmem:[%s2756_s1 + $0xc0] sm:$0xff] (!%p152_p3)   ;;  %1948 = vmatprep.subr.bf16.mxu0 (!%p152_p3), %v2185_v0  ;;  %v2190_v5 = vld [vmem:[%s2756_s1 + $0xc8] sm:$0xff] (!%p152_p3)   ;;  %v2194_v9 = vld [vmem:[%s2756_s1 + $0xd0] sm:$0xff] (!%p152_p3)  }
   0x8   : > { %v2187_v2 = vld [vmem:[%s2756_s1] sm:$0xff] (!%p152_p3)   ;;  %1988 = vmatprep.subr.bf16.mxu1 (!%p152_p3), %v2186_v1  ;;  %v2191_v6 = vld [vmem:[%s2756_s1 + $0x8] sm:$0xff] (!%p152_p3)   ;;  %v2195_v10 = vld [vmem:[%s2756_s1 + $0x10] sm:$0xff] (!%p152_p3)  }
   0x9   : > { %v2188_v3 = vld [vmem:[%s2756_s1 + $0x80] sm:$0xff] (!%p152_p3)   ;;  %1949 = vmatpush3.bf16.msra.mxu0 (!%p152_p3), %v2187_v2  ;;  %v2192_v7 = vld [vmem:[%s2756_s1 + $0x88] sm:$0xff] (!%p152_p3)   ;;  %v2196_v11 = vld [vmem:[%s2756_s1 + $0x90] sm:$0xff] (!%p152_p3)  }
   0xa   : > { %1989 = vmatpush3.bf16.msra.mxu1 (!%p152_p3), %v2188_v3  ;;  %1950 = vmatprep.subr.bf16.mxu0 (!%p152_p3), %v2189_v4  ;;  %v2197_v12 = vld [vmem:[%s2756_s1 + $0x58] sm:$0xff] (!%p152_p3)   ;;  %v2201_v16 = vld [vmem:[%s2756_s1 + $0x60] sm:$0xff] (!%p152_p3)   ;;  %v2205_v20 = vld [vmem:[%s2756_s1 + $0x68] sm:$0xff] (!%p152_p3)  }
   0xb   : > { %1990 = vmatprep.subr.bf16.mxu1 (!%p152_p3), %v2190_v5  ;;  %v2198_v13 = vld [vmem:[%s2756_s1 + $0xd8] sm:$0xff] (!%p152_p3)   ;;  %v2202_v17 = vld [vmem:[%s2756_s1 + $0xe0] sm:$0xff] (!%p152_p3)   ;;  %v2206_v21 = vld [vmem:[%s2756_s1 + $0xe8] sm:$0xff] (!%p152_p3)  }
   0xc   : > { %v2199_v14 = vld [vmem:[%s2756_s1 + $0x18] sm:$0xff] (!%p152_p3)   ;;  %v2203_v18 = vld [vmem:[%s2756_s1 + $0x20] sm:$0xff] (!%p152_p3)   ;;  %v2207_v22 = vld [vmem:[%s2756_s1 + $0x28] sm:$0xff] (!%p152_p3)  }
   0xd   : > { %1951 = vmatpush3.bf16.msra.mxu0 (!%p152_p3), %v2191_v6  ;;  %v2200_v15 = vld [vmem:[%s2756_s1 + $0x98] sm:$0xff] (!%p152_p3)   ;;  %v2204_v19 = vld [vmem:[%s2756_s1 + $0xa0] sm:$0xff] (!%p152_p3)   ;;  %v2208_v23 = vld [vmem:[%s2756_s1 + $0xa8] sm:$0xff] (!%p152_p3)  }
   0xe   : > { %1991 = vmatpush3.bf16.msra.mxu1 %v2192_v7  ;;  %1952 = vmatprep.subr.bf16.mxu0 %v2193_v8  ;;  %s2764_s12 = smov (!%p179_p4, %s2295_s12), 1  ;;  %v2209_v24 = vld [vmem:[%s2756_s1 + $0x70] sm:$0xff]   ;;  %v2213_v28 = vld [vmem:[%s2756_s1 + $0x78] sm:$0xff]   ;;  %v2221_v44 = vld [vmem:[%s2756_s1 + $0x140] sm:$0xff]  }
   0xf   : > { %1992 = vmatprep.subr.bf16.mxu1 %v2194_v9  ;;  %v2210_v25 = vld [vmem:[%s2756_s1 + $0xf0] sm:$0xff]   ;;  %s2160_s26 = smul.u32 288, %s2764_s12  ;;  %v2214_v29 = vld [vmem:[%s2756_s1 + $0xf8] sm:$0xff]   ;;  %v2222_v45 = vld [vmem:[%s2756_s1 + $0x1c0] sm:$0xff]   ;;  %s1924_s30 = sshll.u32 %s2764_s12, 5 }
  0x10   : > { %v2211_v26 = vld [vmem:[%s2756_s1 + $0x30] sm:$0xff]   ;;  %v2215_v30 = vld [vmem:[%s2756_s1 + $0x38] sm:$0xff]   ;;  %v2223_v52 = vld [vmem:[%s2756_s1 + $0x100] sm:$0xff]   ;;  %s192_s6 = scalar_lea.vmem %s2758_s3, %s1924_s30 }
  0x11   : > { %1953 = vmatpush3.bf16.msra.mxu0 %v2195_v10  ;;  %v2212_v27 = vld [vmem:[%s2756_s1 + $0xb0] sm:$0xff]   ;;  %v2216_v31 = vld [vmem:[%s2756_s1 + $0xb8] sm:$0xff]   ;;  %s2449_s10 = scalar_lea.vmem %s2755_s0, %s2160_s26  ;;  %v2225_v55 = vld [vmem:[%s2756_s1 + $0x148] sm:$0xff]  }
  0x12   : > { %1993 = vmatpush3.bf16.msra.mxu1 %v2196_v11  ;;  %1954 = vmatprep.subr.bf16.mxu0 %v2197_v12  ;;  %v207_v32 = vld [vmem:[%s2449_s10 + $0x4] sm:$0xf]  ;;  %v2454_v34 = vld [vmem:[%s2449_s10 + $0x10] sm:$0xf]  ;;  %v199_v38 = vld [vmem:[%s2449_s10] sm:$0xf] }
  0x13   : > { %1994 = vmatprep.subr.bf16.mxu1 %v2198_v13  ;;  %v208_v33 = vld [vmem:[%s2449_s10 + $0x24] sm:$0xf]  ;;  %v2457_v36 = vld [vmem:[%s2449_s10 + $0x30] sm:$0xf]  ;;  %v200_v39 = vld [vmem:[%s2449_s10 + $0x20] sm:$0xf] }
  0x14   : > { %v1815_v35 = vcombine.low %v207_v32, %v208_v33  ;;  %v1817_v37 = vcombine.low %v2454_v34, %v2457_v36  ;;  %v215_v40 = vld [vmem:[%s2449_s10 + $0x8] sm:$0x1]  ;;  %v1814_v43 = vcombine.low %v199_v38, %v200_v39  ;;  %v2224_v56 = vld [vmem:[%s2756_s1 + $0x180] sm:$0xff]   ;;  %v1743_v63 = vld [vmem:[%s2449_s10 + $0x50] sm:$0xf] }
  0x15   : > { %1955 = vmatpush3.bf16.msra.mxu0 %v2199_v14  ;;  %v216_v41 = vld [vmem:[%s2449_s10 + $0x28] sm:$0x1]  ;;  %v1789_v42 = vcombine.low %v199_v38, %v215_v40  ;;  %v209_v60 = vld [vmem:[%s2449_s10 + $0x44] sm:$0xf]  ;;  %v2490_v0 = vld [vmem:[%s2449_s10 + $0x70] sm:$0xf] }
  0x16   : > { %1995 = vmatpush3.bf16.msra.mxu1 %v2200_v15  ;;  %1956 = vmatprep.subr.bf16.mxu0 %v2201_v16  ;;  %v1790_v46 = vcombine.low %v200_v39, %v216_v41  ;;  %v2227_v58 = vld [vmem:[%s2756_s1 + $0x108] sm:$0xff]   ;;  %v210_v62 = vld [vmem:[%s2449_s10 + $0x64] sm:$0xf]  ;;  %v1757_v1 = vld [vmem:[%s2449_s10 + $0x18] sm:$0x1]  ;;  %v1826_v4 = vcombine.low %v1743_v63, %v2490_v0 }
  0x17   : > { %1996 = vmatprep.subr.bf16.mxu1 %v2202_v17  ;;  %1325 = vmatprep.mubr.bf16.mxu0 %v1815_v35  ;;  %v321_v47 = vshll.u32 %v1789_v42, 16  ;;  %v319_v48 = vshrl.u32 %v1789_v42, 16  ;;  %v2226_v59 = vld [vmem:[%s2756_s1 + $0x1c8] sm:$0xff]   ;;  %v1824_v3 = vcombine.low %v209_v60, %v210_v62  ;;  %v201_v5 = vld [vmem:[%s2449_s10 + $0x40] sm:$0xf]  ;;  %v2233_v12 = vld [vmem:[%s2756_s1 + $0x150] sm:$0xff]  }
  0x18   : > { %1390 = vmatprep.mubr.bf16.mxu1 %v1817_v37  ;;  %v328_v49 = vshll.u32 %v1790_v46, 16  ;;  %v326_v51 = vshrl.u32 %v1790_v46, 16  ;;  %v2228_v2 = vld [vmem:[%s2756_s1 + $0x188] sm:$0xff]   ;;  %v202_v6 = vld [vmem:[%s2449_s10 + $0x60] sm:$0xf] }
  0x19   : > { %1957 = vmatpush3.bf16.msra.mxu0 %v2203_v18  ;;  %v323_v50 = vrot.slane %v321_v47, 1  ;;  %v217_v7 = vld [vmem:[%s2449_s10 + $0x48] sm:$0x1]  ;;  %v1823_v11 = vcombine.low %v201_v5, %v202_v6  ;;  %v1758_v13 = vld [vmem:[%s2449_s10 + $0x38] sm:$0x1]  ;;  %v2234_v18 = vld [vmem:[%s2756_s1 + $0x1d0] sm:$0xff]  }
  0x1a   : > { %1997 = vmatpush3.bf16.msra.mxu1 %v2204_v19  ;;  %1958 = vmatprep.subr.bf16.mxu0 %v2205_v20  ;;  %v330_v54 = vrot.slane %v328_v49, 1  ;;  %v218_v8 = vld [vmem:[%s2449_s10 + $0x68] sm:$0x1]  ;;  %v1791_v9 = vcombine.low %v201_v5, %v217_v7  ;;  %v2235_v19 = vld [vmem:[%s2756_s1 + $0x110] sm:$0xff]   ;;  %v2512_v20 = vcombine.low %v2454_v34, %v1757_v1  ;;  %v2240_v34 = vld [vmem:[%s2756_s1 + $0x198] sm:$0xff]  }
  0x1b   : > { %1998 = vmatprep.subr.bf16.mxu1 %v2206_v21  ;;  %v324_v53 = vor.u32 %v323_v50, %v319_v48  ;;  %v1792_v10 = vcombine.low %v202_v6, %v218_v8  ;;  %v2515_v21 = vcombine.low %v2457_v36, %v1758_v13  ;;  %v211_v35 = vld [vmem:[%s2449_s10 + $0x84] sm:$0xf]  ;;  %v1745_v38 = vld [vmem:[%s2449_s10 + $0x90] sm:$0xf]  ;;  %v1760_v42 = vld [vmem:[%s2449_s10 + $0x78] sm:$0x1] }
  0x1c   : > { %v331_v57 = vor.u32 %v330_v54, %v326_v51  ;;  %v335_v14 = vshll.u32 %v1791_v9, 16  ;;  %v333_v16 = vshrl.u32 %v1791_v9, 16  ;;  %v212_v37 = vld [vmem:[%s2449_s10 + $0xa4] sm:$0xf]  ;;  %v1746_v39 = vld [vmem:[%s2449_s10 + $0xb0] sm:$0xf] }
  0x1d   : > { %1959 = vmatpush3.bf16.msra.mxu0 %v2207_v22  ;;  %v342_v15 = vshll.u32 %v1792_v10, 16  ;;  %v340_v17 = vshrl.u32 %v1792_v10, 16  ;;  %v1759_v22 = vld [vmem:[%s2449_s10 + $0x58] sm:$0x1]  ;;  %v424_v32 = vshll.u32 %v2515_v21, 16  ;;  %v415_v40 = vshrl.u32 %v2512_v20, 16 }
  0x1e   : > { %1999 = vmatpush3.bf16.msra.mxu1 %v2208_v23  ;;  %1960 = vmatprep.subr.bf16.mxu0 %v2209_v24  ;;  %v1816_v61 = vcombine.low %v324_v53, %v331_v57  ;;  %v337_v23 = vrot.slane %v335_v14, 1  ;;  %v2536_v36 = vcombine.low %v1743_v63, %v1759_v22  ;;  %v422_v41 = vshrl.u32 %v2515_v21, 16  ;;  %v204_v46 = vld [vmem:[%s2449_s10 + $0xa0] sm:$0xf]  ;;  %v219_v47 = vld [vmem:[%s2449_s10 + $0x88] sm:$0x1] }
  0x1f   : > { %2000 = vmatprep.subr.bf16.mxu1 %v2210_v25  ;;  %v344_v24 = vrot.slane %v342_v15, 1  ;;  %v2236_v25 = vld [vmem:[%s2756_s1 + $0x190] sm:$0xff]   ;;  %v220_v48 = vld [vmem:[%s2449_s10 + $0xa8] sm:$0x1]  ;;  %v2245_v53 = vld [vmem:[%s2756_s1 + $0x160] sm:$0xff]   ;;  %v426_v54 = vrot.slane %v424_v32, 1 }
  0x20   : > { %v1794_v51 = vcombine.low %v204_v46, %v220_v48  ;;  %v2247_v62 = vld [vmem:[%s2756_s1 + $0x120] sm:$0xff]   ;;  %v1761_v63 = vld [vmem:[%s2449_s10 + $0x98] sm:$0x1]  ;;  %v2250_v8 = vld [vmem:[%s2756_s1 + $0x1e8] sm:$0xff]  }
  0x21   : > { %1961 = vmatpush3.bf16.msra.mxu0 %v2211_v26  ;;  %v2237_v26 = vld [vmem:[%s2756_s1 + $0x158] sm:$0xff]   ;;  %v2251_v9 = vld [vmem:[%s2756_s1 + $0x128] sm:$0xff]   ;;  %v2577_v13 = vcombine.low %v1745_v38, %v1761_v63  ;;  %v1748_v21 = vld [vmem:[%s2449_s10 + $0xf0] sm:$0xf] }
  0x22   : > { %2001 = vmatpush3.bf16.msra.mxu1 %v2212_v27  ;;  %1962 = vmatprep.subr.bf16.mxu0 %v2213_v28  ;;  %v338_v27 = vor.u32 %v337_v23, %v333_v16  ;;  %v345_v28 = vor.u32 %v344_v24, %v340_v17  ;;  %v354_v60 = vshrl.u32 %v1794_v51, 16  ;;  %v2252_v15 = vld [vmem:[%s2756_s1 + $0x1a8] sm:$0xff]   ;;  %v213_v16 = vld [vmem:[%s2449_s10 + $0xc4] sm:$0xf]  ;;  %v205_v24 = vld [vmem:[%s2449_s10 + $0xc0] sm:$0xf] }
  0x23   : > { %2002 = vmatprep.subr.bf16.mxu1 %v2214_v29  ;;  %v2238_v29 = vld [vmem:[%s2756_s1 + $0x1d8] sm:$0xff]   ;;  %v2260_v48 = vld [vmem:[%s2756_s1 + $0x1b0] sm:$0xff]  }
  0x24   : > { %v1825_v33 = vcombine.low %v338_v27, %v345_v28  ;;  %v206_v27 = vld [vmem:[%s2449_s10 + $0xe0] sm:$0xf]  ;;  %v221_v28 = vld [vmem:[%s2449_s10 + $0xc8] sm:$0x1] }
  0x25   : > { %1963 = vmatpush3.bf16.msra.mxu0 %v2215_v30  ;;  %v417_v30 = vshll.u32 %v2512_v20, 16  ;;  %v1747_v20 = vld [vmem:[%s2449_s10 + $0xd0] sm:$0xf]  ;;  %v1795_v32 = vcombine.low %v205_v24, %v221_v28 }
  0x26   : > { %2003 = vmatpush3.bf16.msra.mxu1 %v2216_v31  ;;  %2028 = vmatprep.subr.bf16.mxu0 %v2221_v44  ;;  %v2239_v31 = vld [vmem:[%s2756_s1 + $0x118] sm:$0xff]   ;;  %v1835_v44 = vcombine.low %v1745_v38, %v1746_v39  ;;  %v1844_v23 = vcombine.low %v1747_v20, %v1748_v21 }
  0x27   : > { %2068 = vmatprep.subr.bf16.mxu1 %v2222_v45  ;;  %v203_v45 = vld [vmem:[%s2449_s10 + $0x80] sm:$0xf]  ;;  %v419_v49 = vrot.slane %v417_v30, 1  ;;  %v1763_v38 = vld [vmem:[%s2449_s10 + $0xd8] sm:$0x1] }
  0x28   : > { %1326 = vmatmul.mubr.bf16.vlgmr.msra.gmra.mrb[0].mxu0 %v1814_v43  ;;  %v1833_v43 = vcombine.low %v211_v35, %v212_v37  ;;  %v1793_v50 = vcombine.low %v203_v45, %v219_v47  ;;  %v2257_v35 = vld [vmem:[%s2756_s1 + $0x170] sm:$0xff]   ;;  %v443_v37 = vshrl.u32 %v2577_v13, 16 }
  0x29   : > { %2029 = vmatpush3.bf16.msra.mxu0 %v2223_v52  ;;  %1391 = vmatmul.mubr.bf16.vlgmr.msra.gmra.mrb[0].mxu1 %v1816_v61  ;;  %v1832_v52 = vcombine.low %v203_v45, %v204_v46  ;;  %v2246_v61 = vld [vmem:[%s2756_s1 + $0x1e0] sm:$0xff]   ;;  %v420_v10 = vor.u32 %v419_v49, %v415_v40  ;;  %v1764_v45 = vld [vmem:[%s2449_s10 + $0xf8] sm:$0x1] }
  0x2a   : > { %2030 = vmatprep.subr.bf16.mxu0 %v2225_v55  ;;  %2069 = vmatpush3.bf16.msra.mxu1 %v2224_v56  ;;  %v2552_v55 = vcombine.low %v2490_v0, %v1760_v42  ;;  %v431_v56 = vshll.u32 %v2536_v36, 16  ;;  %v349_v57 = vshll.u32 %v1793_v50, 16  ;;  %v1762_v0 = vld [vmem:[%s2449_s10 + $0xb8] sm:$0x1] }
  0x2b   : > { %1333 = vmatprep.mubr.bf16.mxu0 %v1824_v3  ;;  %2070 = vmatprep.subr.bf16.mxu1 %v2226_v59  ;;  %v347_v59 = vshrl.u32 %v1793_v50, 16  ;;  %v2248_v3 = vld [vmem:[%s2756_s1 + $0x1a0] sm:$0xff]   ;;  %v2261_v49 = vld [vmem:[%s2756_s1 + $0x178] sm:$0xff]  }
  0x2c   : > { %1398 = vmatprep.mubr.bf16.mxu1 %v1826_v4  ;;  %v351_v1 = vrot.slane %v349_v57, 1  ;;  %v2249_v4 = vld [vmem:[%s2756_s1 + $0x168] sm:$0xff]   ;;  %v438_v5 = vshll.u32 %v2552_v55, 16  ;;  %v433_v17 = vrot.slane %v431_v56, 1  ;;  %v2616_v56 = vcombine.low %v1747_v20, %v1763_v38  ;;  %v2263_v57 = vld [vmem:[%s2756_s1 + $0x138] sm:$0xff]  }
  0x2d   : > { %2031 = vmatpush3.bf16.msra.mxu0 %v2227_v58  ;;  %v356_v58 = vshll.u32 %v1794_v51, 16  ;;  %v1785_v38 = vld [vmem:[%s2449_s10 + $0xa8] sm:$0x1] }
  0x2e   : > { %2032 = vmatprep.subr.bf16.mxu0 %v2233_v12  ;;  %2071 = vmatpush3.bf16.msra.mxu1 %v2228_v2  ;;  %v352_v6 = vor.u32 %v351_v1, %v347_v59  ;;  %v429_v12 = vshrl.u32 %v2536_v36, 16  ;;  %v2622_v59 = vcombine.low %v1748_v21, %v1764_v45  ;;  %v1749_v1 = vld [vmem:[%s2449_s10 + $0x14] sm:$0xf]  ;;  %v457_v20 = vshrl.u32 %v2616_v56, 16 }
  0x2f   : > { %2072 = vmatprep.subr.bf16.mxu1 %v2234_v18  ;;  %v358_v2 = vrot.slane %v356_v58, 1  ;;  %v2583_v18 = vcombine.low %v1746_v39, %v1762_v0  ;;  %v363_v39 = vshll.u32 %v1795_v32, 16  ;;  %v1774_v0 = vld [vmem:[%s2449_s10 + $0x44] sm:$0xf] }
  0x30   : > { %1334 = vmatmul.mubr.bf16.gmra.mrb[4].mxu0 %v1823_v11  ;;  %v427_v11 = vor.u32 %v426_v54, %v422_v41  ;;  %v361_v41 = vshrl.u32 %v1795_v32, 16  ;;  %v434_v50 = vor.u32 %v433_v17, %v429_v12  ;;  %v1775_v12 = vld [vmem:[%s2449_s10 + $0x64] sm:$0xf]  ;;  %v1784_v32 = vld [vmem:[%s2449_s10 + $0x88] sm:$0x1] }
  0x31   : > { %2033 = vmatpush3.bf16.msra.mxu0 %v2235_v19  ;;  %1399 = vmatmul.mubr.bf16.gmra.mrb[4].mxu1 %v1825_v33  ;;  %v359_v7 = vor.u32 %v358_v2, %v354_v60  ;;  %v214_v19 = vld [vmem:[%s2449_s10 + $0xe4] sm:$0xf]  ;;  %v452_v36 = vshll.u32 %v2583_v18, 16  ;;  %v365_v46 = vrot.slane %v363_v39, 1  ;;  %v450_v58 = vshrl.u32 %v2583_v18, 16 }
  0x32   : > { %2034 = vmatprep.subr.bf16.mxu0 %v2237_v26  ;;  %2073 = vmatpush3.bf16.msra.mxu1 %v2236_v25  ;;  %v1842_v22 = vcombine.low %v213_v16, %v214_v19  ;;  %v436_v25 = vshrl.u32 %v2552_v55, 16  ;;  %v440_v26 = vrot.slane %v438_v5, 1  ;;  %v1819_v30 = vcombine.low %v420_v10, %v427_v11  ;;  %v1750_v2 = vld [vmem:[%s2449_s10 + $0x34] sm:$0xf]  ;;  %v2632_v5 = vld [vmem:[%s2449_s10 + $0x20] sm:$0xf] }
  0x33   : > { %2074 = vmatprep.subr.bf16.mxu1 %v2238_v29  ;;  %1341 = vmatprep.mubr.bf16.mxu0 %v1833_v43  ;;  %v1834_v14 = vcombine.low %v352_v6, %v359_v7  ;;  %v222_v29 = vld [vmem:[%s2449_s10 + $0xe8] sm:$0x1]  ;;  %v2258_v43 = vld [vmem:[%s2756_s1 + $0x1f0] sm:$0xff]   ;;  %v366_v51 = vor.u32 %v365_v46, %v361_v41  ;;  %v454_v63 = vrot.slane %v452_v36, 1  ;;  %v2635_v6 = vld [vmem:[%s2449_s10 + $0x40] sm:$0xf] }
  0x34   : > { %1406 = vmatprep.mubr.bf16.mxu1 %v1835_v44  ;;  %v1796_v33 = vcombine.low %v206_v27, %v222_v29  ;;  %v2259_v44 = vld [vmem:[%s2756_s1 + $0x130] sm:$0xff]   ;;  %v441_v54 = vor.u32 %v440_v26, %v436_v25  ;;  %v466_v10 = vshll.u32 %v2622_v59, 16  ;;  %v2266_v11 = vld [vmem:[%s2756_s1 + $0x208] sm:$0xff]   ;;  %v1820_v18 = vcombine.low %v2632_v5, %v2635_v6  ;;  %v1768_v25 = vld [vmem:[%s2449_s10 + $0x80] sm:$0xf] }
  0x35   : > { %2035 = vmatpush3.bf16.msra.mxu0 %v2239_v31  ;;  %v445_v31 = vshll.u32 %v2577_v13, 16  ;;  %v1776_v13 = vld [vmem:[%s2449_s10 + $0x84] sm:$0xf]  ;;  %v455_v17 = vor.u32 %v454_v63, %v450_v58  ;;  %v2269_v26 = vld [vmem:[%s2756_s1 + $0x210] sm:$0xff]   ;;  %v1783_v29 = vld [vmem:[%s2449_s10 + $0x68] sm:$0x1] }
  0x36   : > { %2075 = vmatpush3.bf16.msra.mxu1 %v2240_v34  ;;  %2036 = vmatprep.subr.bf16.mxu0 %v2245_v53  ;;  %v1841_v34 = vcombine.low %v205_v24, %v206_v27  ;;  %v370_v40 = vshll.u32 %v1796_v33, 16  ;;  %v368_v42 = vshrl.u32 %v1796_v33, 16  ;;  %v2262_v53 = vld [vmem:[%s2756_s1 + $0x1f8] sm:$0xff]   ;;  %v1828_v7 = vcombine.low %v434_v50, %v441_v54  ;;  %v1767_v24 = vld [vmem:[%s2449_s10 + $0x60] sm:$0xf] }
  0x37   : > { %2076 = vmatprep.subr.bf16.mxu1 %v2246_v61  ;;  %v447_v55 = vrot.slane %v445_v31, 1  ;;  %v2264_v61 = vld [vmem:[%s2756_s1 + $0x1b8] sm:$0xff]   ;;  %v1830_v19 = vcombine.low %v1775_v12, %v1776_v13  ;;  %v468_v28 = vrot.slane %v466_v10, 1  ;;  %v1777_v31 = vld [vmem:[%s2449_s10 + $0xa4] sm:$0xf]  ;;  %v2683_v45 = vcombine.low %v1767_v24, %v1783_v29 }
  0x38   : > { %1342 = vmatmul.mubr.bf16.gmra.mrb[8].mxu0 %v1832_v52  ;;  %v372_v47 = vrot.slane %v370_v40, 1  ;;  %v1778_v33 = vld [vmem:[%s2449_s10 + $0xc4] sm:$0xf]  ;;  %v2670_v36 = vld [vmem:[%s2449_s10 + $0xa0] sm:$0xf] }
  0x39   : > { %2037 = vmatpush3.bf16.msra.mxu0 %v2247_v62  ;;  %1407 = vmatmul.mubr.bf16.gmra.mrb[8].mxu1 %v1834_v14  ;;  %v1773_v62 = vld [vmem:[%s2449_s10 + $0x24] sm:$0xf]  ;;  %v1751_v14 = vld [vmem:[%s2449_s10 + $0x54] sm:$0xf]  ;;  %v448_v16 = vor.u32 %v447_v55, %v443_v37  ;;  %v2673_v37 = vld [vmem:[%s2449_s10 + $0xc0] sm:$0xf]  ;;  %v2678_v40 = vcombine.low %v2670_v36, %v1785_v38  ;;  %v1839_v46 = vcombine.low %v1777_v31, %v1778_v33 }
  0x3a   : > { %2077 = vmatpush3.bf16.msra.mxu1 %v2248_v3  ;;  %2038 = vmatprep.subr.bf16.mxu0 %v2249_v4  ;;  %v373_v52 = vor.u32 %v372_v47, %v368_v42  ;;  %v1821_v3 = vcombine.low %v1773_v62, %v1774_v0  ;;  %v1818_v4 = vcombine.low %v1749_v1, %v1750_v2  ;;  %v1786_v39 = vld [vmem:[%s2449_s10 + $0xc8] sm:$0x1]  ;;  %v2273_v47 = vld [vmem:[%s2756_s1 + $0x220] sm:$0xff]   ;;  %v527_v62 = vshll.u32 %v2683_v45, 16  ;;  %v1755_v2 = vld [vmem:[%s2449_s10 + $0xd4] sm:$0xf] }
  0x3b   : > { %2078 = vmatprep.subr.bf16.mxu1 %v2250_v8  ;;  %1349 = vmatprep.mubr.bf16.mxu0 %v1842_v22  ;;  %v459_v8 = vshll.u32 %v2616_v56, 16  ;;  %v1837_v27 = vcombine.low %v448_v16, %v455_v17  ;;  %v2696_v54 = vld [vmem:[%s2449_s10 + $0xe0] sm:$0xf]  ;;  %v2701_v55 = vld [vmem:[%s2756_s1 + $0x228] sm:$0xff]   ;;  %v1838_v0 = vcombine.low %v2670_v36, %v2673_v37 }
  0x3c   : > { %1414 = vmatprep.mubr.bf16.mxu1 %v1844_v23  ;;  %v1843_v60 = vcombine.low %v366_v51, %v373_v52  ;;  %v464_v23 = vshrl.u32 %v2622_v59, 16  ;;  %v541_v51 = vshll.u32 %v2678_v40, 16  ;;  %v1787_v58 = vld [vmem:[%s2449_s10 + $0xe8] sm:$0x1] }
  0x3d   : > { %2039 = vmatpush3.bf16.msra.mxu0 %v2251_v9  ;;  %v2265_v9 = vld [vmem:[%s2756_s1 + $0x200] sm:$0xff]   ;;  %v461_v22 = vrot.slane %v459_v8, 1  ;;  %v1788_v59 = vld [vmem:[%s2449_s10 + $0x108] sm:$0x1] }
  0x3e   : > { %2079 = vmatpush3.bf16.msra.mxu1 %v2252_v15  ;;  %2040 = vmatprep.subr.bf16.mxu0 %v2257_v35  ;;  %v1752_v15 = vld [vmem:[%s2449_s10 + $0x74] sm:$0xf]  ;;  %v469_v42 = vor.u32 %v468_v28, %v464_v23 }
  0x3f   : > { %2080 = vmatprep.subr.bf16.mxu1 %v2258_v43  ;;  %v1827_v21 = vcombine.low %v1751_v14, %v1752_v15  ;;  %v1754_v35 = vld [vmem:[%s2449_s10 + $0xb4] sm:$0xf]  ;;  %v462_v41 = vor.u32 %v461_v22, %v457_v20  ;;  %v1829_v43 = vcombine.low %v1767_v24, %v1768_v25 }
  0x40   : > { %1350 = vmatmul.mubr.bf16.gmra.mrb[12].mxu0 %v1841_v34  ;;  %v1753_v34 = vld [vmem:[%s2449_s10 + $0x94] sm:$0xf] }
  0x41   : > { %1455 = vmatprep.mubr.bf16.mxu0 %v1819_v30  ;;  %2041 = vmatpush3.bf16.msra.mxu0 %v2259_v44  ;;  %v2662_v30 = vld [vmem:[%s2756_s1 + $0x218] sm:$0xff]   ;;  %v2681_v44 = vcombine.low %v2673_v37, %v1786_v39  ;;  %v1836_v50 = vcombine.low %v1753_v34, %v1754_v35  ;;  %v1846_v56 = vcombine.low %v462_v41, %v469_v42 }
  0x42   : > { %2081 = vmatpush3.bf16.msra.mxu1 %v2260_v48  ;;  %2042 = vmatprep.subr.bf16.mxu0 %v2261_v49  ;;  %v1779_v48 = vld [vmem:[%s2449_s10 + $0xe4] sm:$0xf]  ;;  %v2690_v49 = vcombine.low %v1768_v25, %v1784_v32 }
  0x43   : > { %2082 = vmatprep.subr.bf16.mxu1 %v2262_v53  ;;  %1415 = vmatmul.mubr.bf16.gmra.mrb[12].mxu1 %v1843_v60  ;;  %v548_v52 = vshll.u32 %v2681_v44, 16  ;;  %v1780_v53 = vld [vmem:[%s2449_s10 + $0x104] sm:$0xf]  ;;  %v1781_v60 = vld [vmem:[%s2449_s10 + $0x28] sm:$0x1]  ;;  %v546_v12 = vshrl.u32 %v2681_v44, 16 }
  0x44   : > { %1520 = vmatprep.mubr.bf16.mxu1 %v1821_v3  ;;  %v534_v63 = vshll.u32 %v2690_v49, 16  ;;  %v1848_v1 = vcombine.low %v1779_v48, %v1780_v53  ;;  %v1756_v3 = vld [vmem:[%s2449_s10 + $0xf4] sm:$0xf] }
  0x45   : > { %2043 = vmatpush3.bf16.msra.mxu0 %v2263_v57  ;;  %v2704_v57 = vld [vmem:[%s2449_s10 + $0x100] sm:$0xf]  ;;  %v550_v13 = vrot.slane %v548_v52, 1 }
  0x46   : > { %2083 = vmatpush3.bf16.msra.mxu1 %v2264_v61  ;;  %2120 = vmatprep.subr.bf16.mxu0 %v2265_v9  ;;  %v1782_v61 = vld [vmem:[%s2449_s10 + $0x48] sm:$0x1]  ;;  %v1812_v10 = vcombine.low %v2704_v57, %v1788_v59  ;;  %v536_v20 = vrot.slane %v534_v63, 1  ;;  %v1847_v33 = vcombine.low %v2696_v54, %v2704_v57 }
  0x47   : > { %2144 = vmatprep.subr.bf16.mxu1 %v2265_v9  ;;  %v1806_v8 = vcombine.low %v2635_v6, %v1782_v61  ;;  %v532_v6 = vshrl.u32 %v2690_v49, 16 }
  0x48   : > { %1456 = vmatmul.mubr.bf16.vlgmr.msra.gmra.mrb[16].mxu0 %v1818_v4  ;;  %v1811_v4 = vcombine.low %v2696_v54, %v1787_v58  ;;  %v562_v25 = vshll.u32 %v1812_v10, 16  ;;  %v560_v37 = vshrl.u32 %v1812_v10, 16 }
  0x49   : > { %2121 = vmatpush3.bf16.msra.mxu0 %v2265_v9  ;;  %1463 = vmatprep.mubr.bf16.mxu0 %v1828_v7  ;;  %v1805_v7 = vcombine.low %v2632_v5, %v1781_v60  ;;  %v518_v16 = vshrl.u32 %v1806_v8, 16  ;;  %v520_v17 = vshll.u32 %v1806_v8, 16  ;;  %v525_v5 = vshrl.u32 %v2683_v45, 16 }
  0x4a   : > { %2122 = vmatprep.subr.bf16.mxu0 %v2266_v11  ;;  %v555_v24 = vshll.u32 %v1811_v4, 16  ;;  %v537_v32 = vor.u32 %v536_v20, %v532_v6  ;;  %v553_v35 = vshrl.u32 %v1811_v4, 16  ;;  %v564_v38 = vrot.slane %v562_v25, 1 }
  0x4b   : > { %1521 = vmatmul.mubr.bf16.vlgmr.msra.gmra.mrb[16].mxu1 %v1820_v18  ;;  %v511_v14 = vshrl.u32 %v1805_v7, 16  ;;  %v513_v15 = vshll.u32 %v1805_v7, 16  ;;  %v1845_v18 = vcombine.low %v1755_v2, %v1756_v3  ;;  %v522_v23 = vrot.slane %v520_v17, 1 }
  0x4c   : > { %2152 = vmatpush3.bf16.msra.mxu1 %v2265_v9  ;;  %1528 = vmatprep.mubr.bf16.mxu1 %v1830_v19  ;;  %v539_v9 = vshrl.u32 %v2678_v40, 16  ;;  %v529_v19 = vrot.slane %v527_v62, 1  ;;  %v557_v36 = vrot.slane %v555_v24, 1  ;;  %v565_v42 = vor.u32 %v564_v38, %v560_v37 }
  0x4d   : > { %2123 = vmatpush3.bf16.msra.mxu0 %v2266_v11  ;;  %2145 = vmatprep.subr.bf16.mxu1 %v2266_v11  ;;  %v515_v22 = vrot.slane %v513_v15, 1  ;;  %v523_v29 = vor.u32 %v522_v23, %v518_v16 }
  0x4e   : > { %2124 = vmatprep.subr.bf16.mxu0 %v2269_v26  ;;  %v530_v31 = vor.u32 %v529_v19, %v525_v5  ;;  %v558_v41 = vor.u32 %v557_v36, %v553_v35 }
  0x4f   : > { %v516_v28 = vor.u32 %v515_v22, %v511_v14 }
  0x50   : > { %1464 = vmatmul.mubr.bf16.gmra.mrb[20].mxu0 %v1827_v21  ;;  %2153 = vmatpush3.bf16.msra.mxu1 %v2266_v11  ;;  %v543_v11 = vrot.slane %v541_v51, 1  ;;  %v2277_v21 = vld [vmem:[%s2756_s1 + $0x230] sm:$0xff]   ;;  %v1831_v40 = vcombine.low %v530_v31, %v537_v32 }
  0x51   : > { %1471 = vmatprep.mubr.bf16.mxu0 %v1837_v27  ;;  %2125 = vmatpush3.bf16.msra.mxu0 %v2269_v26  ;;  %v2278_v27 = vld [vmem:[%s2756_s1 + $0x238] sm:$0xff]   ;;  %v1822_v34 = vcombine.low %v516_v28, %v523_v29 }
  0x52   : > { %2126 = vmatprep.subr.bf16.mxu0 %v2662_v30  ;;  %2146 = vmatprep.subr.bf16.mxu1 %v2269_v26 }
  0x53   : > { %1529 = vmatmul.mubr.bf16.gmra.mrb[20].mxu1 %v1829_v43  ;;  %v1849_v43 = vcombine.low %v558_v41, %v565_v42 }
  0x54   : > { %2154 = vmatpush3.bf16.msra.mxu1 %v2269_v26  ;;  %1536 = vmatprep.mubr.bf16.mxu1 %v1839_v46  ;;  %v544_v26 = vor.u32 %v543_v11, %v539_v9 }
  0x55   : > { %2127 = vmatpush3.bf16.msra.mxu0 %v2662_v30  ;;  %2147 = vmatprep.subr.bf16.mxu1 %v2662_v30 }
  0x56   : > { %2128 = vmatprep.subr.bf16.mxu0 %v2273_v47 }
  0x58   : > { %1472 = vmatmul.mubr.bf16.gmra.mrb[24].mxu0 %v1836_v50  ;;  %2155 = vmatpush3.bf16.msra.mxu1 %v2662_v30  ;;  %v551_v30 = vor.u32 %v550_v13, %v546_v12  ;;  %v1813_v50 = vld [vmem:[%s2757_s2] ss:$0 sm:$0xff] }
  0x59   : > { %1479 = vmatprep.mubr.bf16.mxu0 %v1846_v56  ;;  %2129 = vmatpush3.bf16.msra.mxu0 %v2273_v47 }
  0x5a   : > { %2130 = vmatprep.subr.bf16.mxu0 %v2701_v55  ;;  %2148 = vmatprep.subr.bf16.mxu1 %v2273_v47  ;;  %v1840_v39 = vcombine.low %v544_v26, %v551_v30 }
  0x5b   : > { %1537 = vmatmul.mubr.bf16.gmra.mrb[24].mxu1 %v1838_v0 }
  0x5c   : > { %2156 = vmatpush3.bf16.msra.mxu1 %v2273_v47  ;;  %1544 = vmatprep.mubr.bf16.mxu1 %v1848_v1 }
  0x5d   : > { %2131 = vmatpush3.bf16.msra.mxu0 %v2701_v55  ;;  %2149 = vmatprep.subr.bf16.mxu1 %v2701_v55 }
  0x5e   : > { %2132 = vmatprep.subr.bf16.mxu0 %v2277_v21 }
  0x60   : > { %1480 = vmatmul.mubr.bf16.gmra.mrb[28].mxu0 %v1845_v18  ;;  %2157 = vmatpush3.bf16.msra.mxu1 %v2701_v55 }
  0x61   : > { %2133 = vmatpush3.bf16.msra.mxu0 %v2277_v21  ;;  %2150 = vmatprep.subr.bf16.mxu1 %v2277_v21 }
  0x62   : > { %2134 = vmatprep.subr.bf16.mxu0 %v2278_v27  ;;  %2136 = vmatprep.mubr.bf16.mxu0 %v1822_v34 }
  0x63   : > { %1545 = vmatmul.mubr.bf16.gmra.mrb[28].mxu1 %v1847_v33 }
  0x64   : > { %2158 = vmatpush3.bf16.msra.mxu1 %v2277_v21  ;;  %2140 = vmatprep.mubr.bf16.mxu1 %v1840_v39 }
  0x65   : > { %2135 = vmatpush3.bf16.msra.mxu0 %v2278_v27  ;;  %2151 = vmatprep.subr.bf16.mxu1 %v2278_v27 }
  0x68   : > { %2137 = vmatmul.mubr.bf16.vlgmr.msra.gmra.mrb[32].mxu0 %v1831_v40  ;;  %2159 = vmatpush3.bf16.msra.mxu1 %v2278_v27 }
  0x6b   : > { %2141 = vmatmul.mubr.bf16.vlgmr.msra.gmra.mrb[32].mxu1 %v1849_v43 }
  0xfb   : > { %v1964_v44 = vpop.f32.mrb[0].mxu0 }
  0xfc   : > { %v1965_v45 = vpop.f32.mrb[1].mxu0  ;;  %v2004_v51 = vpop.f32.mrb[0].mxu1 }
  0xfd   : > { %v1966_v46 = vadd.f32 %v1965_v45, %v1964_v44  ;;  %v1967_v47 = vpop.f32.mrb[2].mxu0  ;;  %v2005_v53 = vpop.f32.mrb[1].mxu1 }
  0xfe   : > { %v1968_v48 = vpop.f32.mrb[3].mxu0  ;;  %v2006_v54 = vadd.f32 %v2005_v53, %v2004_v51  ;;  %v2007_v55 = vpop.f32.mrb[2].mxu1 }
  0xff   : > { %v1969_v49 = vadd.f32 %v1968_v48, %v1967_v47  ;;  %v1328_v52 = vadd.f32 %v1966_v46, %v1813_v50  ;;  %v2008_v57 = vpop.f32.mrb[3].mxu1 }
 0x100   : > { %v2009_v60 = vadd.f32 %v2008_v57, %v2007_v55 }
 0x101   : > { %v1331_v56 = vadd.f32 %v1969_v49, %v1813_v50  ;;  %v1393_v59 = vadd.f32 %v2006_v54, %v1328_v52 }
 0x103   : > { %v1970_v58 = vpop.f32.mrb[4].mxu0  ;;  %v1396_v0 = vadd.f32 %v2009_v60, %v1331_v56 }
 0x104   : > { %v1971_v61 = vpop.f32.mrb[5].mxu0  ;;  %v2010_v3 = vpop.f32.mrb[4].mxu1 }
 0x105   : > { %v1972_v62 = vadd.f32 %v1971_v61, %v1970_v58  ;;  %v1973_v63 = vpop.f32.mrb[6].mxu0  ;;  %v2011_v7 = vpop.f32.mrb[5].mxu1 }
 0x106   : > { %v1974_v1 = vpop.f32.mrb[7].mxu0  ;;  %v2012_v8 = vadd.f32 %v2011_v7, %v2010_v3  ;;  %v2013_v9 = vpop.f32.mrb[6].mxu1 }
 0x107   : > { %v1975_v2 = vadd.f32 %v1974_v1, %v1973_v63  ;;  %v1336_v4 = vadd.f32 %v1972_v62, %v1813_v50  ;;  %v2014_v11 = vpop.f32.mrb[7].mxu1 }
 0x108   : > { %v2015_v13 = vadd.f32 %v2014_v11, %v2013_v9 }
 0x109   : > { %v1339_v10 = vadd.f32 %v1975_v2, %v1813_v50  ;;  %v1401_v12 = vadd.f32 %v2012_v8, %v1336_v4 }
 0x10b   : > { %v1976_v14 = vpop.f32.mrb[8].mxu0  ;;  %v1404_v16 = vadd.f32 %v2015_v13, %v1339_v10 }
 0x10c   : > { %v1977_v15 = vpop.f32.mrb[9].mxu0  ;;  %v2016_v19 = vpop.f32.mrb[8].mxu1 }
 0x10d   : > { %v1978_v17 = vadd.f32 %v1977_v15, %v1976_v14  ;;  %v1979_v5 = vpop.f32.mrb[10].mxu0  ;;  %v2017_v21 = vpop.f32.mrb[9].mxu1 }
 0x10e   : > { %v1980_v6 = vpop.f32.mrb[11].mxu0  ;;  %v2018_v22 = vadd.f32 %v2017_v21, %v2016_v19  ;;  %v2019_v23 = vpop.f32.mrb[10].mxu1 }
 0x10f   : > { %v1981_v18 = vadd.f32 %v1980_v6, %v1979_v5  ;;  %v1344_v20 = vadd.f32 %v1978_v17, %v1813_v50  ;;  %v2020_v25 = vpop.f32.mrb[11].mxu1 }
 0x110   : > { %v2021_v27 = vadd.f32 %v2020_v25, %v2019_v23 }
 0x111   : > { %v1347_v24 = vadd.f32 %v1981_v18, %v1813_v50  ;;  %v1409_v26 = vadd.f32 %v2018_v22, %v1344_v20 }
 0x113   : > { %v1982_v28 = vpop.f32.mrb[12].mxu0  ;;  %v1412_v30 = vadd.f32 %v2021_v27, %v1347_v24 }
 0x114   : > { %v1983_v29 = vpop.f32.mrb[13].mxu0 }
 0x115   : > { %v1984_v31 = vadd.f32 %v1983_v29, %v1982_v28  ;;  %v1985_v32 = vpop.f32.mrb[14].mxu0 }
 0x116   : > { %v1986_v33 = vpop.f32.mrb[15].mxu0  ;;  %v2022_v35 = vpop.f32.mrb[12].mxu1 }
 0x117   : > { %v1987_v34 = vadd.f32 %v1986_v33, %v1985_v32  ;;  %v1352_v36 = vadd.f32 %v1984_v31, %v1813_v50  ;;  %v2023_v37 = vpop.f32.mrb[13].mxu1 }
 0x118   : > { %v2024_v38 = vadd.f32 %v2023_v37, %v2022_v35  ;;  %v2025_v39 = vpop.f32.mrb[14].mxu1 }
 0x119   : > { %v1355_v40 = vadd.f32 %v1987_v34, %v1813_v50  ;;  %v2026_v42 = vpop.f32.mrb[15].mxu1 }
 0x11a   : > { %v1417_v44 = vadd.f32 %v2024_v38, %v1352_v36  ;;  %v2027_v45 = vadd.f32 %v2026_v42, %v2025_v39 }
 0x11b   : > { %v2044_v41 = vpop.f32.mrb[16].mxu0 }
 0x11c   : > { %v2045_v43 = vpop.f32.mrb[17].mxu0  ;;  %v1420_v49 = vadd.f32 %v2027_v45, %v1355_v40 }
 0x11d   : > { %v2046_v46 = vadd.f32 %v2045_v43, %v2044_v41  ;;  %v2047_v47 = vpop.f32.mrb[18].mxu0 }
 0x11e   : > { %v2048_v48 = vpop.f32.mrb[19].mxu0  ;;  %v2084_v53 = vpop.f32.mrb[16].mxu1 }
 0x11f   : > { %v1458_v51 = vadd.f32 %v2046_v46, %v1393_v59  ;;  %v2049_v52 = vadd.f32 %v2048_v48, %v2047_v47  ;;  %v2085_v55 = vpop.f32.mrb[17].mxu1 }
 0x120   : > { %v2086_v56 = vadd.f32 %v2085_v55, %v2084_v53  ;;  %v2087_v57 = vpop.f32.mrb[18].mxu1 }
 0x121   : > { %v1461_v54 = vadd.f32 %v2049_v52, %v1396_v0  ;;  %v2088_v60 = vpop.f32.mrb[19].mxu1 }
 0x122   : > { %v2089_v50 = vadd.f32 %v2088_v60, %v2087_v57  ;;  %v1523_v1 = vadd.f32 %v2086_v56, %v1458_v51 }
 0x123   : > { %v2050_v58 = vpop.f32.mrb[20].mxu0 }
 0x124   : > { %v2051_v61 = vpop.f32.mrb[21].mxu0  ;;  %v1526_v7 = vadd.f32 %v2089_v50, %v1461_v54 }
 0x125   : > { %v2052_v62 = vadd.f32 %v2051_v61, %v2050_v58  ;;  %v2053_v63 = vpop.f32.mrb[22].mxu0 }
 0x126   : > { %v2054_v2 = vpop.f32.mrb[23].mxu0  ;;  %v2090_v8 = vpop.f32.mrb[20].mxu1 }
 0x127   : > { %v1466_v3 = vadd.f32 %v2052_v62, %v1401_v12  ;;  %v2055_v4 = vadd.f32 %v2054_v2, %v2053_v63  ;;  %v2091_v59 = vpop.f32.mrb[21].mxu1 }
 0x128   : > { %v2092_v10 = vadd.f32 %v2091_v59, %v2090_v8  ;;  %v2093_v11 = vpop.f32.mrb[22].mxu1 }
 0x129   : > { %v1469_v9 = vadd.f32 %v2055_v4, %v1404_v16  ;;  %v2094_v13 = vpop.f32.mrb[23].mxu1 }
 0x12a   : > { %v2095_v15 = vadd.f32 %v2094_v13, %v2093_v11  ;;  %v1531_v6 = vadd.f32 %v2092_v10, %v1466_v3 }
 0x12b   : > { %v2056_v0 = vpop.f32.mrb[24].mxu0 }
 0x12c   : > { %v2057_v14 = vpop.f32.mrb[25].mxu0  ;;  %v1534_v21 = vadd.f32 %v2095_v15, %v1469_v9 }
 0x12d   : > { %v2058_v17 = vadd.f32 %v2057_v14, %v2056_v0  ;;  %v2059_v5 = vpop.f32.mrb[26].mxu0 }
 0x12e   : > { %v2060_v18 = vpop.f32.mrb[27].mxu0  ;;  %v2096_v22 = vpop.f32.mrb[24].mxu1 }
 0x12f   : > { %v1474_v19 = vadd.f32 %v2058_v17, %v1409_v26  ;;  %v2061_v20 = vadd.f32 %v2060_v18, %v2059_v5  ;;  %v2097_v23 = vpop.f32.mrb[25].mxu1 }
 0x130   : > { %v2098_v24 = vadd.f32 %v2097_v23, %v2096_v22  ;;  %v2099_v25 = vpop.f32.mrb[26].mxu1 }
 0x131   : > { %v1477_v12 = vadd.f32 %v2061_v20, %v1412_v30  ;;  %v2100_v27 = vpop.f32.mrb[27].mxu1 }
 0x132   : > { %v2101_v29 = vadd.f32 %v2100_v27, %v2099_v25  ;;  %v1539_v33 = vadd.f32 %v2098_v24, %v1474_v19 }
 0x133   : > { %v2062_v16 = vpop.f32.mrb[28].mxu0 }
 0x134   : > { %v2063_v28 = vpop.f32.mrb[29].mxu0  ;;  %v1542_v37 = vadd.f32 %v2101_v29, %v1477_v12 }
 0x135   : > { %v2064_v31 = vadd.f32 %v2063_v28, %v2062_v16  ;;  %v2065_v32 = vpop.f32.mrb[30].mxu0 }
 0x136   : > { %v2066_v34 = vpop.f32.mrb[31].mxu0  ;;  %v2102_v26 = vpop.f32.mrb[28].mxu1 }
 0x137   : > { %v1482_v35 = vadd.f32 %v2064_v31, %v1417_v44  ;;  %v2067_v36 = vadd.f32 %v2066_v34, %v2065_v32  ;;  %v2103_v39 = vpop.f32.mrb[29].mxu1 }
 0x138   : > { %v2104_v40 = vadd.f32 %v2103_v39, %v2102_v26  ;;  %v2105_v30 = vpop.f32.mrb[30].mxu1 }
 0x139   : > { %v1485_v38 = vadd.f32 %v2067_v36, %v1420_v49  ;;  %v2106_v41 = vpop.f32.mrb[31].mxu1 }
 0x13a   : > { %v2107_v43 = vadd.f32 %v2106_v41, %v2105_v30  ;;  %v1547_v46 = vadd.f32 %v2104_v40, %v1482_v35 }
 0x13b   : > { %v2138_v42 = vpop.f32.mrb[32].mxu0 }
 0x13c   : > { %v1596_v45 = vadd.f32 %v2138_v42, %v1531_v6  ;;  %v1587_v47 = vpop.f32.mrb[33].mxu0  ;;  %v1550_v53 = vadd.f32 %v2107_v43, %v1485_v38 }
 0x13d   : > { %v1588_v48 = vadd.f32 %v1587_v47, %v1523_v1  ;;  %v2139_v51 = vpop.f32.mrb[34].mxu0 }
 0x13e   : > { %v1599_v52 = vadd.f32 %v2139_v51, %v1534_v21  ;;  %v1590_v44 = vpop.f32.mrb[35].mxu0  ;;  %v1620_v55 = vmax.f32 %v1596_v45, 0.0  ;;  %v2142_v56 = vpop.f32.mrb[32].mxu1 }
 0x13f   : > { %v1591_v54 = vadd.f32 %v1590_v44, %v1526_v7  ;;  %v1612_v49 = vadd.f32 %v2142_v56, %v1547_v46  ;;  %v1618_v58 = vmax.f32 %v1588_v48, 0.0  ;;  %v1603_v60 = vpop.f32.mrb[33].mxu1 }
 0x140   : > { %v1621_v57 = vmax.f32 %v1599_v52, 0.0  ;;  %v1604_v50 = vadd.f32 %v1603_v60, %v1539_v33  ;;  %v2143_v63 = vpop.f32.mrb[34].mxu1 }
 0x141   : > { %v1619_v61 = vmax.f32 %v1591_v54, 0.0  ;;  %v1615_v1 = vadd.f32 %v2143_v63, %v1550_v53  ;;  %v1606_v3 = vpop.f32.mrb[35].mxu1  ;;  %v1624_v7 = vmax.f32 %v1612_v49, 0.0 }
 0x142   : > { %v1933_v62 = vpack.c.bf16 %v1621_v57, %v1620_v55  ;;  %v1607_v4 = vadd.f32 %v1606_v3, %v1542_v37  ;;  %v1622_v9 = vmax.f32 %v1604_v50, 0.0 }
 0x143   : > { %v1928_v2 = vpack.c.bf16 %v1619_v61, %v1618_v58  ;;  %v1625_v8 = vmax.f32 %v1615_v1, 0.0 }
 0x144   : > { %1945 = vst [vmem:[%s192_s6 + $0x8] sm:$0xff] %v1933_v62   ;;  %v1623_v59 = vmax.f32 %v1607_v4, 0.0 }
 0x145   : > { %1929 = vst [vmem:[%s192_s6] sm:$0xff] %v1928_v2   ;;  %v1943_v10 = vpack.c.bf16 %v1625_v8, %v1624_v7 }
 0x146   : > { %v1938_v11 = vpack.c.bf16 %v1623_v59, %v1622_v9 }
 0x147   : > { %1947 = vst [vmem:[%s192_s6 + $0x18] sm:$0xff] %v1943_v10  }
 0x148   : > { %1946 = vst [vmem:[%s192_s6 + $0x10] sm:$0xff] %v1938_v11  }
 0x149 PF: > { %s13_s14 = sadd.s32 1, %s2303_s14   ;;  %s2759_s12 = smov %s2299_s13 }
 0x14a   : > { %p10_p5 = scmp.ge.s32.totalorder %s13_s14, 4   ;;  %s2760_s13 = smov %s2762_s15 }
 0x14c   :  { %12 = sbr.rel (!%p10_p5) target bundleno = 2 (0x2), region = 65 }

// kernel: person_search_query.8
= control target key start
LH: loop header
LB: loop body
LE: loop exit
PB: predicated region body
PF: predicated region fallthrough
CT: control target
= control target key end

     0   :  { %s6992_s0 = inlined_call_operand.vmem [shape: s32[3], index: 0, kind: input, shape index: {}]   ;;  %s6993_s1 = inlined_call_operand.vmem [shape: f32[3,32,8], index: 1, kind: input, shape index: {}]   ;;  %s6994_s2 = inlined_call_operand.vmem [shape: f32[3,16,8], index: 2, kind: input, shape index: {}]   ;;  %s6995_s3 = inlined_call_operand.vmem [shape: bf16[2,8,1024], index: 3, kind: input, shape index: {}]   ;;  %s6996_s4 = inlined_call_operand.vmem [shape: bf16[3,32,16,128], index: 4, kind: output, shape index: {}]  }
   0x1   :  { %s9_s17 = sshll.u32 %s6992_s0, 4  ;;  %s10_s17 = int_to_ptr.vmem [resolvable:$true] %s9_s17 }
   0x2   :  { %s6375_s18 = scalar_lea.vmem %s10_s17, 16  ;;  %p6380_p1 = scmp.lt.s32.totalorder %s10_s17, %s10_s17 }
   0x3   :  { %p6376_p0 = scmp.ne.s32.totalorder %s10_s17, %s6375_s18  ;;  %p6381_p2 = scmp.lt.s32.totalorder %s6375_s18, %s6375_s18 }
   0x5   :  { %p6382_p3 = por %p6381_p2, %p6380_p1 }
   0x7   :  { %p6383_p4 = pnand %p6382_p3, %p6376_p0 }
   0x9   :  { %6386 = shalt.err (!%p6383_p4)  }
   0xa   :  { %s6397_s19 = smov [#allocation4]  }
   0xb   :  { %12 = dma.vmem_to_smem %s10_s17, 16, %s6397_s19, [#allocation3] }
   0xc   :  { %6391 = dma.done.wait [#allocation3], 16 }
   0xd   :  { %6392 = vsyncadd [#allocation3], 4294967280 }
   0xe   :  { %14 = sfence }
   0xf   :  { %s6428_s20 = smov 0  }
  0x10 LB: > { %s5561_s0 = sadd.s32 4294967295, %s6395_s20   ;;  %p5565_p5 = scmp.ge.s32.totalorder %s6395_s20, 1  ;;  %s6395_s20 = sphi %s6428_s20, %s20_s20  }
  0x11   : > { %p168_p6 = scmp.lt.s32.totalorder %s6395_s20, 4 }
  0x13   : > { %p169_p7 = pnand %p5565_p5, %p168_p6 }
  0x14   : > { %s213_s21 = sld [smem:[#allocation4 + %s5561_s0]] (!%p169_p7)  ;;  %p203_p8 = scmp.lt.s32.totalorder (!%p169_p7), %s5561_s0, 2  ;;  %v6398_v0 = vmov (!%p169_p7), 0.0   ;;  %vm241_vm0 = vcmask (!%p169_p7), 64512   ;;  %v6399_v18 = vmov (!%p169_p7), 1966171168   ;;  %v618_v20 = vlaneseq (!%p169_p7) }
  0x15   : > { %172 = sbr.rel (%p169_p7) target bundleno = 643 (0x283), region = 32  ;;  %318 = vmatprep.mubr.f32.mxu0 (!%p169_p7), %v6398_v0  ;;  %407 = vmatprep.mubr.f32.mxu1 (!%p169_p7), %v6398_v0  ;;  %v616_v19 = vunpack.c.l.s4 (!%p169_p7), %v6399_v18 }
  0x16   : > { %v619_v22 = vshrl.u32 (!%p169_p7), %v618_v20, 7 }
  0x17   : > { %v617_v21 = vunpack.c.0.s8 (!%p169_p7), %v616_v19 }
  0x19   : > { %v6476_v23 = vsub.s32 (!%p169_p7), %v617_v21, %v619_v22 }
  0x1a   : > { %p214_p9 = scmp.lt.s32.totalorder (!%p169_p7), %s213_s21, 1 }
  0x1c   : > { %s6998_s0 = smov (!%p203_p8, %s5561_s0), 2  ;;  %s7000_s21 = smov (!%p214_p9, %s213_s21), 1 }
  0x1d   : > { %s5848_s22 = sshll.u32 %s6998_s0, 5  ;;  %s5850_s23 = sshll.u32 %s7000_s21, 5 }
  0x1e   : > { %s218_s26 = scalar_lea.vmem %s6995_s3, %s5850_s23  ;;  %s6445_s29 = scalar_lea.vmem %s6993_s1, %s5848_s22 }
  0x1f   : > { %v225_v1 = vld [vmem:[%s218_s26] sm:$0xff]  ;;  %v226_v2 = vld [vmem:[%s218_s26 + $0x8] sm:$0xff]  ;;  %v227_v3 = vld [vmem:[%s218_s26 + $0x10] sm:$0xff]  ;;  %s5849_s30 = sshll.u32 %s6998_s0, 4  ;;  %s5851_s8 = sshll.u32 %s6998_s0, 8 }
  0x20   : > { %v230_v4 = vunpack.c.h.bf16 %v225_v1  ;;  %v232_v5 = vunpack.c.h.bf16 %v226_v2  ;;  %v229_v6 = vunpack.c.l.bf16 %v225_v1  ;;  %v231_v7 = vunpack.c.l.bf16 %v226_v2  ;;  %v228_v8 = vld [vmem:[%s218_s26 + $0x18] sm:$0xff]  ;;  %v237_v9 = vld [vmem:[%s6445_s29] sm:$0xff]  ;;  %v238_v14 = vld [vmem:[%s6445_s29 + $0x8] sm:$0xff]  ;;  %s6471_s7 = scalar_lea.vmem %s6994_s2, %s5849_s30  ;;  %s6955_s11 = scalar_lea.vmem %s6996_s4, %s5851_s8 }
  0x21   : > { %v234_v10 = vunpack.c.h.bf16 %v227_v3  ;;  %v236_v11 = vunpack.c.h.bf16 %v228_v8  ;;  %v233_v12 = vunpack.c.l.bf16 %v227_v3  ;;  %v235_v13 = vunpack.c.l.bf16 %v228_v8  ;;  %v239_v15 = vld [vmem:[%s6445_s29 + $0x10] sm:$0xff]  ;;  %v240_v16 = vld [vmem:[%s6445_s29 + $0x18] sm:$0xff]  ;;  %v2722_v17 = vld [vmem:[%s6471_s7] sm:$0xff] }
  0x22   : > { %254 = vmatprep.subr.mxu0 %v230_v4  ;;  %343 = vmatprep.subr.mxu1 %v232_v5 }
  0x23   : > { %255 = vmatpush1.msra.mxu0 %v229_v6  ;;  %344 = vmatpush1.msra.mxu1 %v231_v7 }
  0x24   : > { %5574 = vmatmul.mubr.msk.f32.vlgmr.msra.gmra.mrb[0].mxu0 %vm241_vm0, %v237_v9  ;;  %5578 = vmatmul.mubr.msk.f32.vlgmr.msra.gmra.mrb[0].mxu1 %vm241_vm0, %v237_v9 }
  0x25   : > { %324 = vmatprep.mubr.f32.mxu0 %v6398_v0  ;;  %413 = vmatprep.mubr.f32.mxu1 %v6398_v0 }
  0x26   : > { %432 = vmatprep.subr.mxu0 %v234_v10  ;;  %521 = vmatprep.subr.mxu1 %v236_v11 }
  0x27   : > { %433 = vmatpush1.msra.mxu0 %v233_v12  ;;  %522 = vmatpush1.msra.mxu1 %v235_v13 }
  0x28   : > { %5575 = vmatmul.mubr.msk.f32.gmra.mrb[2].mxu0 %vm241_vm0, %v238_v14  ;;  %5579 = vmatmul.mubr.msk.f32.gmra.mrb[2].mxu1 %vm241_vm0, %v238_v14 }
  0x29   : > { %330 = vmatprep.mubr.f32.mxu0 %v6398_v0  ;;  %419 = vmatprep.mubr.f32.mxu1 %v6398_v0 }
  0x2c   : > { %5576 = vmatmul.mubr.msk.f32.gmra.mrb[4].mxu0 %vm241_vm0, %v239_v15  ;;  %5580 = vmatmul.mubr.msk.f32.gmra.mrb[4].mxu1 %vm241_vm0, %v239_v15 }
  0x2d   : > { %336 = vmatprep.mubr.f32.mxu0 %v6398_v0  ;;  %425 = vmatprep.mubr.f32.mxu1 %v6398_v0 }
  0x30   : > { %5577 = vmatmul.mubr.msk.f32.gmra.mrb[6].mxu0 %vm241_vm0, %v240_v16  ;;  %5581 = vmatmul.mubr.msk.f32.gmra.mrb[6].mxu1 %vm241_vm0, %v240_v16 }
  0x31   : > { %496 = vmatprep.mubr.f32.mxu0 %v6398_v0  ;;  %585 = vmatprep.mubr.f32.mxu1 %v6398_v0 }
  0x34   : > { %5582 = vmatmul.mubr.msk.f32.vlgmr.msra.gmra.mrb[8].mxu0 %vm241_vm0, %v237_v9  ;;  %5586 = vmatmul.mubr.msk.f32.vlgmr.msra.gmra.mrb[8].mxu1 %vm241_vm0, %v237_v9 }
  0x35   : > { %502 = vmatprep.mubr.f32.mxu0 %v6398_v0  ;;  %591 = vmatprep.mubr.f32.mxu1 %v6398_v0 }
  0x38   : > { %5583 = vmatmul.mubr.msk.f32.gmra.mrb[10].mxu0 %vm241_vm0, %v238_v14  ;;  %5587 = vmatmul.mubr.msk.f32.gmra.mrb[10].mxu1 %vm241_vm0, %v238_v14 }
  0x39   : > { %508 = vmatprep.mubr.f32.mxu0 %v6398_v0  ;;  %597 = vmatprep.mubr.f32.mxu1 %v6398_v0 }
  0x3c   : > { %5584 = vmatmul.mubr.msk.f32.gmra.mrb[12].mxu0 %vm241_vm0, %v239_v15  ;;  %5588 = vmatmul.mubr.msk.f32.gmra.mrb[12].mxu1 %vm241_vm0, %v239_v15 }
  0x3d   : > { %514 = vmatprep.mubr.f32.mxu0 %v6398_v0  ;;  %603 = vmatprep.mubr.f32.mxu1 %v6398_v0 }
  0x40   : > { %5585 = vmatmul.mubr.msk.f32.gmra.mrb[14].mxu0 %vm241_vm0, %v240_v16  ;;  %5589 = vmatmul.mubr.msk.f32.gmra.mrb[14].mxu1 %vm241_vm0, %v240_v16 }
  0x41   : > { %6205 = vmatprep.mubr.msk.f32.mxu0 %vm241_vm0, %v2722_v17  ;;  %6210 = vmatprep.mubr.msk.f32.mxu1 %vm241_vm0, %v2722_v17 }
  0xf7   : > { %v320_v24 = vpop.f32.mrb[0].mxu0  ;;  %v409_v25 = vpop.f32.mrb[0].mxu1 }
  0xf8   : > { %v614_v26 = vcombine.high %v320_v24, %v320_v24  ;;  %v621_v27 = vrot.slane %v320_v24, %v6476_v23  ;;  %v1142_v28 = vcombine.high %v409_v25, %v409_v25  ;;  %v1149_v29 = vrot.slane %v409_v25, %v6476_v23  ;;  %v322_v30 = vpop.f32.mrb[1].mxu0  ;;  %v6480_v31 = vpop.f32.mrb[1].mxu1 }
  0xf9   : > { %v878_v32 = vcombine.high %v322_v30, %v322_v30  ;;  %v885_v33 = vrot.slane %v322_v30, %v6476_v23  ;;  %v1406_v34 = vcombine.high %v6480_v31, %v6480_v31  ;;  %v6487_v35 = vrot.slane %v6480_v31, %v6476_v23 }
  0xfa   : > { %v628_v36 = vrot.slane %v614_v26, %v6476_v23  ;;  %v629_v37 = vcombine.high %v621_v27, %v621_v27  ;;  %v637_v38 = vrot.slane %v621_v27, %v6476_v23  ;;  %5590 = vst.sshfl [vmem:[#allocation2] sm:$0x1 pattern:$0x73625140] %v621_v27  ;;  %v1156_v39 = vrot.slane %v1142_v28, %v6476_v23 }
  0xfb   : > { %5622 = vst.sshfl [vmem:[#allocation2 + $0x2] sm:$0x1 pattern:$0x73625140] %v1149_v29  ;;  %v1157_v40 = vcombine.high %v1149_v29, %v1149_v29  ;;  %v1165_v41 = vrot.slane %v1149_v29, %v6476_v23  ;;  %v892_v42 = vrot.slane %v878_v32, %v6476_v23  ;;  %v893_v43 = vcombine.high %v885_v33, %v885_v33  ;;  %v6495_v44 = vpop.f32.mrb[2].mxu0  ;;  %v6497_v45 = vpop.f32.mrb[2].mxu1 }
  0xfc   : > { %5606 = vst.sshfl [vmem:[#allocation2 + $0x1] sm:$0x1 pattern:$0x73625140] %v885_v33  ;;  %v630_v46 = vcombine.high %v628_v36, %v628_v36  ;;  %v644_v47 = vrot.slane %v628_v36, %v6476_v23  ;;  %v651_v48 = vrot.slane %v629_v37, %v6476_v23  ;;  %v659_v49 = vcombine.high %v637_v38, %v637_v38  ;;  %v6501_v50 = vpop.f32.mrb[3].mxu0  ;;  %v6503_v51 = vpop.f32.mrb[3].mxu1 }
  0xfd   : > { %5638 = vst.sshfl [vmem:[#allocation2 + $0x3] sm:$0x1 pattern:$0x73625140] %v6487_v35  ;;  %v1158_v52 = vcombine.high %v1156_v39, %v1156_v39  ;;  %v1172_v53 = vrot.slane %v1156_v39, %v6476_v23  ;;  %v1179_v54 = vrot.slane %v1157_v40, %v6476_v23  ;;  %v1187_v55 = vcombine.high %v1165_v41, %v1165_v41 }
  0xfe   : > { %5591 = vst.sshfl [vmem:[#allocation2 + $0x8] sm:$0x1 pattern:$0x73625140] %v629_v37  ;;  %v658_v56 = vrot.slane %v630_v46, %v6476_v23  ;;  %v660_v57 = vcombine.high %v644_v47, %v644_v47  ;;  %v661_v58 = vcombine.high %v651_v48, %v651_v48  ;;  %844 = vst [vmem:[#allocation2 + $0x10] sm:$0x1] %v659_v49 }
  0xff   : > { %5592 = vst.sshfl [vmem:[#allocation2 + $0x20] sm:$0x1 pattern:$0x73625140] %v628_v36  ;;  %v894_v59 = vcombine.high %v892_v42, %v892_v42  ;;  %v1186_v60 = vrot.slane %v1158_v52, %v6476_v23  ;;  %v1188_v61 = vcombine.high %v1172_v53, %v1172_v53  ;;  %v1189_v62 = vcombine.high %v1179_v54, %v1179_v54  ;;  %v6510_v0 = vpop.f32.mrb[4].mxu0  ;;  %v6512_v1 = vpop.f32.mrb[4].mxu1 }
 0x100   : > { %5624 = vst.sshfl [vmem:[#allocation2 + $0x22] sm:$0x1 pattern:$0x73625140] %v1156_v39  ;;  %1372 = vst [vmem:[#allocation2 + $0x12] sm:$0x1] %v1187_v55  ;;  %v901_v63 = vrot.slane %v885_v33, %v6476_v23  ;;  %v662_v2 = vcombine.high %v658_v56, %v658_v56  ;;  %v908_v3 = vrot.slane %v892_v42, %v6476_v23 }
 0x101   : > { %5623 = vst.sshfl [vmem:[#allocation2 + $0xa] sm:$0x1 pattern:$0x73625140] %v1157_v40  ;;  %845 = vst [vmem:[#allocation2 + $0x18] sm:$0x1] %v661_v58  ;;  %v915_v4 = vrot.slane %v893_v43, %v6476_v23  ;;  %v922_v5 = vrot.slane %v894_v59, %v6476_v23  ;;  %v1190_v8 = vcombine.high %v1186_v60, %v1186_v60 }
 0x102   : > { %5607 = vst.sshfl [vmem:[#allocation2 + $0x9] sm:$0x1 pattern:$0x73625140] %v893_v43  ;;  %848 = vst [vmem:[#allocation2 + $0x30] sm:$0x1] %v660_v57  ;;  %v923_v9 = vcombine.high %v901_v63, %v901_v63  ;;  %v1420_v10 = vrot.slane %v1406_v34, %v6476_v23  ;;  %v1421_v11 = vcombine.high %v6487_v35, %v6487_v35 }
 0x103   : > { %5608 = vst.sshfl [vmem:[#allocation2 + $0x21] sm:$0x1 pattern:$0x73625140] %v892_v42  ;;  %v6517_v6 = vpop.f32.mrb[5].mxu0  ;;  %v6519_v7 = vpop.f32.mrb[5].mxu1  ;;  %v924_v12 = vcombine.high %v908_v3, %v908_v3  ;;  %v925_v13 = vcombine.high %v915_v4, %v915_v4  ;;  %v926_v14 = vcombine.high %v922_v5, %v922_v5  ;;  %v1429_v15 = vrot.slane %v6487_v35, %v6476_v23 }
 0x104   : > { %5593 = vst.sshfl [vmem:[#allocation2 + $0x28] sm:$0x1 pattern:$0x73625140] %v630_v46  ;;  %1373 = vst [vmem:[#allocation2 + $0x1a] sm:$0x1] %v1189_v62  ;;  %v1422_v16 = vcombine.high %v1420_v10, %v1420_v10  ;;  %v1436_v17 = vrot.slane %v1420_v10, %v6476_v23  ;;  %v1443_v18 = vrot.slane %v1421_v11, %v6476_v23 }
 0x105   : > { %5625 = vst.sshfl [vmem:[#allocation2 + $0x2a] sm:$0x1 pattern:$0x73625140] %v1158_v52  ;;  %1376 = vst [vmem:[#allocation2 + $0x32] sm:$0x1] %v1188_v61  ;;  %v663_v19 = vcombine.high %v6495_v44, %v6495_v44  ;;  %v1451_v22 = vcombine.high %v1429_v15, %v1429_v15  ;;  %v670_v24 = vrot.slane %v6495_v44, %v6476_v23 }
 0x106   : > { %5609 = vst.sshfl [vmem:[#allocation2 + $0x29] sm:$0x1 pattern:$0x73625140] %v894_v59  ;;  %849 = vst [vmem:[#allocation2 + $0x38] sm:$0x1] %v662_v2  ;;  %v1191_v25 = vcombine.high %v6497_v45, %v6497_v45  ;;  %v1198_v26 = vrot.slane %v6497_v45, %v6476_v23  ;;  %v1450_v29 = vrot.slane %v1422_v16, %v6476_v23 }
 0x107   : > { %1377 = vst [vmem:[#allocation2 + $0x3a] sm:$0x1] %v1190_v8  ;;  %1108 = vst [vmem:[#allocation2 + $0x11] sm:$0x1] %v923_v9  ;;  %v6530_v20 = vpop.f32.mrb[6].mxu0  ;;  %v6532_v21 = vpop.f32.mrb[6].mxu1  ;;  %v1452_v30 = vcombine.high %v1436_v17, %v1436_v17  ;;  %v1453_v31 = vcombine.high %v1443_v18, %v1443_v18  ;;  %v677_v32 = vrot.slane %v663_v19, %v6476_v23 }
 0x108   : > { %5639 = vst.sshfl [vmem:[#allocation2 + $0xb] sm:$0x1 pattern:$0x73625140] %v1421_v11  ;;  %1109 = vst [vmem:[#allocation2 + $0x19] sm:$0x1] %v925_v13  ;;  %v678_v33 = vcombine.high %v670_v24, %v670_v24  ;;  %v686_v34 = vrot.slane %v670_v24, %v6476_v23  ;;  %v1205_v35 = vrot.slane %v1191_v25, %v6476_v23 }
 0x109   : > { %5640 = vst.sshfl [vmem:[#allocation2 + $0x23] sm:$0x1 pattern:$0x73625140] %v1420_v10  ;;  %1112 = vst [vmem:[#allocation2 + $0x31] sm:$0x1] %v924_v12  ;;  %v1206_v36 = vcombine.high %v1198_v26, %v1198_v26  ;;  %v1454_v37 = vcombine.high %v1450_v29, %v1450_v29  ;;  %v679_v38 = vcombine.high %v677_v32, %v677_v32 }
 0x10a   : > { %1113 = vst [vmem:[#allocation2 + $0x39] sm:$0x1] %v926_v14  ;;  %v6540_v27 = vpop.f32.mrb[7].mxu0  ;;  %v6542_v28 = vpop.f32.mrb[7].mxu1  ;;  %1636 = vst [vmem:[#allocation2 + $0x13] sm:$0x1] %v1451_v22  ;;  %v693_v39 = vrot.slane %v677_v32, %v6476_v23  ;;  %v1214_v40 = vrot.slane %v1198_v26, %v6476_v23  ;;  %v700_v43 = vrot.slane %v678_v33, %v6476_v23 }
 0x10b   : > { %5641 = vst.sshfl [vmem:[#allocation2 + $0x2b] sm:$0x1 pattern:$0x73625140] %v1422_v16  ;;  %1637 = vst [vmem:[#allocation2 + $0x1b] sm:$0x1] %v1453_v31  ;;  %v708_v44 = vcombine.high %v686_v34, %v686_v34  ;;  %v1207_v45 = vcombine.high %v1205_v35, %v1205_v35  ;;  %v1221_v46 = vrot.slane %v1205_v35, %v6476_v23 }
 0x10c   : > { %5594 = vst.sshfl [vmem:[#allocation2 + $0x40] sm:$0x1 pattern:$0x73625140] %v670_v24  ;;  %1640 = vst [vmem:[#allocation2 + $0x33] sm:$0x1] %v1452_v30  ;;  %v707_v49 = vrot.slane %v679_v38, %v6476_v23  ;;  %v709_v52 = vcombine.high %v693_v39, %v693_v39  ;;  %v1228_v53 = vrot.slane %v1206_v36, %v6476_v23 }
 0x10d   : > { %5626 = vst.sshfl [vmem:[#allocation2 + $0x42] sm:$0x1 pattern:$0x73625140] %v1198_v26  ;;  %v6550_v41 = vpop.f32.mrb[8].mxu0  ;;  %v6552_v42 = vpop.f32.mrb[8].mxu1  ;;  %v1236_v54 = vcombine.high %v1214_v40, %v1214_v40  ;;  %v710_v55 = vcombine.high %v700_v43, %v700_v43  ;;  %v1235_v56 = vrot.slane %v1207_v45, %v6476_v23  ;;  %v1237_v57 = vcombine.high %v1221_v46, %v1221_v46 }
 0x10e   : > { %5596 = vst.sshfl [vmem:[#allocation2 + $0x60] sm:$0x1 pattern:$0x73625140] %v677_v32  ;;  %v6556_v47 = vpop.f32.mrb[9].mxu0  ;;  %v6558_v48 = vpop.f32.mrb[9].mxu1  ;;  %v927_v58 = vcombine.high %v6501_v50, %v6501_v50  ;;  %v711_v59 = vcombine.high %v707_v49, %v707_v49  ;;  %v1238_v60 = vcombine.high %v1228_v53, %v1228_v53  ;;  %v934_v61 = vrot.slane %v6501_v50, %v6476_v23 }
 0x10f   : > { %5595 = vst.sshfl [vmem:[#allocation2 + $0x48] sm:$0x1 pattern:$0x73625140] %v678_v33  ;;  %1641 = vst [vmem:[#allocation2 + $0x3b] sm:$0x1] %v1454_v37  ;;  %v1455_v62 = vcombine.high %v6503_v51, %v6503_v51  ;;  %v1239_v3 = vcombine.high %v1235_v56, %v1235_v56  ;;  %v1462_v5 = vrot.slane %v6503_v51, %v6476_v23 }
 0x110   : > { %5627 = vst.sshfl [vmem:[#allocation2 + $0x4a] sm:$0x1 pattern:$0x73625140] %v1206_v36  ;;  %852 = vst [vmem:[#allocation2 + $0x50] sm:$0x1] %v708_v44  ;;  %v941_v4 = vrot.slane %v927_v58, %v6476_v23  ;;  %v712_v8 = vcombine.high %v6510_v0, %v6510_v0  ;;  %v942_v10 = vcombine.high %v934_v61, %v934_v61 }
 0x111   : > { %5628 = vst.sshfl [vmem:[#allocation2 + $0x62] sm:$0x1 pattern:$0x73625140] %v1205_v35  ;;  %856 = vst [vmem:[#allocation2 + $0x70] sm:$0x1] %v709_v52  ;;  %v950_v11 = vrot.slane %v934_v61, %v6476_v23  ;;  %v1469_v12 = vrot.slane %v1455_v62, %v6476_v23  ;;  %v719_v13 = vrot.slane %v6510_v0, %v6476_v23 }
 0x112   : > { %5597 = vst.sshfl [vmem:[#allocation2 + $0x68] sm:$0x1 pattern:$0x73625140] %v679_v38  ;;  %1380 = vst [vmem:[#allocation2 + $0x52] sm:$0x1] %v1236_v54  ;;  %v943_v51 = vcombine.high %v941_v4, %v941_v4  ;;  %v957_v14 = vrot.slane %v941_v4, %v6476_v23  ;;  %v1470_v15 = vcombine.high %v1462_v5, %v1462_v5 }
 0x113   : > { %5629 = vst.sshfl [vmem:[#allocation2 + $0x6a] sm:$0x1 pattern:$0x73625140] %v1207_v45  ;;  %v6569_v63 = vpop.f32.mrb[10].mxu0  ;;  %v6571_v2 = vpop.f32.mrb[10].mxu1  ;;  %v1478_v16 = vrot.slane %v1462_v5, %v6476_v23  ;;  %v964_v17 = vrot.slane %v942_v10, %v6476_v23  ;;  %v972_v18 = vcombine.high %v950_v11, %v950_v11  ;;  %v1471_v19 = vcombine.high %v1469_v12, %v1469_v12 }
 0x114   : > { %853 = vst [vmem:[#allocation2 + $0x58] sm:$0x1] %v710_v55  ;;  %1384 = vst [vmem:[#allocation2 + $0x72] sm:$0x1] %v1237_v57  ;;  %v6578_v9 = vpop.f32.mrb[11].mxu0  ;;  %v6580_v50 = vpop.f32.mrb[11].mxu1  ;;  %v1485_v22 = vrot.slane %v1469_v12, %v6476_v23  ;;  %v971_v25 = vrot.slane %v943_v51, %v6476_v23  ;;  %v973_v26 = vcombine.high %v957_v14, %v957_v14 }
 0x115   : > { %857 = vst [vmem:[#allocation2 + $0x78] sm:$0x1] %v711_v59  ;;  %1381 = vst [vmem:[#allocation2 + $0x5a] sm:$0x1] %v1238_v60  ;;  %v6590_v24 = vpop.f32.mrb[12].mxu0  ;;  %v6592_v0 = vpop.f32.mrb[12].mxu1  ;;  %v1492_v29 = vrot.slane %v1470_v15, %v6476_v23  ;;  %v1500_v30 = vcombine.high %v1478_v16, %v1478_v16  ;;  %v974_v33 = vcombine.high %v964_v17, %v964_v17 }
 0x116   : > { %5610 = vst.sshfl [vmem:[#allocation2 + $0x41] sm:$0x1 pattern:$0x73625140] %v934_v61  ;;  %1385 = vst [vmem:[#allocation2 + $0x7a] sm:$0x1] %v1239_v3  ;;  %v1499_v34 = vrot.slane %v1471_v19, %v6476_v23  ;;  %v1501_v35 = vcombine.high %v1485_v22, %v1485_v22  ;;  %v726_v36 = vrot.slane %v712_v8, %v6476_v23 }
 0x117   : > { %5612 = vst.sshfl [vmem:[#allocation2 + $0x61] sm:$0x1 pattern:$0x73625140] %v941_v4  ;;  %v6596_v31 = vpop.f32.mrb[13].mxu0  ;;  %v6598_v32 = vpop.f32.mrb[13].mxu1  ;;  %v975_v37 = vcombine.high %v971_v25, %v971_v25  ;;  %v1502_v38 = vcombine.high %v1492_v29, %v1492_v29  ;;  %v727_v39 = vcombine.high %v719_v13, %v719_v13  ;;  %v735_v40 = vrot.slane %v719_v13, %v6476_v23 }
 0x118   : > { %5642 = vst.sshfl [vmem:[#allocation2 + $0x43] sm:$0x1 pattern:$0x73625140] %v1462_v5  ;;  %1116 = vst [vmem:[#allocation2 + $0x51] sm:$0x1] %v972_v18  ;;  %v1503_v43 = vcombine.high %v1499_v34, %v1499_v34  ;;  %v728_v44 = vcombine.high %v726_v36, %v726_v36  ;;  %v742_v45 = vrot.slane %v726_v36, %v6476_v23 }
 0x119   : > { %5611 = vst.sshfl [vmem:[#allocation2 + $0x49] sm:$0x1 pattern:$0x73625140] %v942_v10  ;;  %1120 = vst [vmem:[#allocation2 + $0x71] sm:$0x1] %v973_v26  ;;  %v1240_v46 = vcombine.high %v6512_v1, %v6512_v1  ;;  %v749_v53 = vrot.slane %v727_v39, %v6476_v23  ;;  %v757_v54 = vcombine.high %v735_v40, %v735_v40 }
 0x11a   : > { %5644 = vst.sshfl [vmem:[#allocation2 + $0x63] sm:$0x1 pattern:$0x73625140] %v1469_v12  ;;  %1644 = vst [vmem:[#allocation2 + $0x53] sm:$0x1] %v1500_v30  ;;  %v1247_v55 = vrot.slane %v6512_v1, %v6476_v23  ;;  %v976_v56 = vcombine.high %v6517_v6, %v6517_v6  ;;  %v756_v59 = vrot.slane %v728_v44, %v6476_v23 }
 0x11b   : > { %5598 = vst.sshfl [vmem:[#allocation2 + $0x80] sm:$0x1 pattern:$0x73625140] %v719_v13  ;;  %1117 = vst [vmem:[#allocation2 + $0x59] sm:$0x1] %v974_v33  ;;  %v758_v60 = vcombine.high %v742_v45, %v742_v45  ;;  %v1254_v61 = vrot.slane %v1240_v46, %v6476_v23  ;;  %v983_v62 = vrot.slane %v6517_v6, %v6476_v23 }
 0x11c   : > { %5613 = vst.sshfl [vmem:[#allocation2 + $0x69] sm:$0x1 pattern:$0x73625140] %v943_v51  ;;  %1648 = vst [vmem:[#allocation2 + $0x73] sm:$0x1] %v1501_v35  ;;  %v759_v3 = vcombine.high %v749_v53, %v749_v53  ;;  %v1255_v1 = vcombine.high %v1247_v55, %v1247_v55  ;;  %v1263_v4 = vrot.slane %v1247_v55, %v6476_v23 }
 0x11d   : > { %5643 = vst.sshfl [vmem:[#allocation2 + $0x4b] sm:$0x1 pattern:$0x73625140] %v1470_v15  ;;  %v6606_v49 = vpop.f32.mrb[14].mxu0  ;;  %v6608_v52 = vpop.f32.mrb[14].mxu1  ;;  %v990_v5 = vrot.slane %v976_v56, %v6476_v23  ;;  %v760_v8 = vcombine.high %v756_v59, %v756_v59  ;;  %v1256_v10 = vcombine.high %v1254_v61, %v1254_v61  ;;  %v1270_v11 = vrot.slane %v1254_v61, %v6476_v23 }
 0x11e   : > { %5645 = vst.sshfl [vmem:[#allocation2 + $0x6b] sm:$0x1 pattern:$0x73625140] %v1471_v19  ;;  %1121 = vst [vmem:[#allocation2 + $0x79] sm:$0x1] %v975_v37  ;;  %v991_v12 = vcombine.high %v983_v62, %v983_v62  ;;  %v1277_v13 = vrot.slane %v1255_v1, %v6476_v23  ;;  %v1285_v6 = vcombine.high %v1263_v4, %v1263_v4 }
 0x11f   : > { %5600 = vst.sshfl [vmem:[#allocation2 + $0xa0] sm:$0x1 pattern:$0x73625140] %v726_v36  ;;  %1645 = vst [vmem:[#allocation2 + $0x5b] sm:$0x1] %v1502_v38  ;;  %v992_v51 = vcombine.high %v990_v5, %v990_v5  ;;  %v999_v14 = vrot.slane %v983_v62, %v6476_v23  ;;  %v1284_v15 = vrot.slane %v1256_v10, %v6476_v23 }
 0x120   : > { %5599 = vst.sshfl [vmem:[#allocation2 + $0x88] sm:$0x1 pattern:$0x73625140] %v727_v39  ;;  %v6615_v57 = vpop.f32.mrb[15].mxu0  ;;  %v6617_v58 = vpop.f32.mrb[15].mxu1  ;;  %v1286_v16 = vcombine.high %v1270_v11, %v1270_v11  ;;  %v1006_v17 = vrot.slane %v990_v5, %v6476_v23  ;;  %v1013_v18 = vrot.slane %v991_v12, %v6476_v23  ;;  %v1287_v19 = vcombine.high %v1277_v13, %v1277_v13 }
 0x121   : > { %1649 = vst [vmem:[#allocation2 + $0x7b] sm:$0x1] %v1503_v43  ;;  %5601 = vst.sshfl [vmem:[#allocation2 + $0xa8] sm:$0x1 pattern:$0x73625140] %v728_v44  ;;  %v1020_v22 = vrot.slane %v992_v51, %v6476_v23  ;;  %v1021_v25 = vcombine.high %v999_v14, %v999_v14  ;;  %v1504_v26 = vcombine.high %v6519_v7, %v6519_v7 }
 0x122   : > { %860 = vst [vmem:[#allocation2 + $0x90] sm:$0x1] %v757_v54  ;;  %5630 = vst.sshfl [vmem:[#allocation2 + $0x82] sm:$0x1 pattern:$0x73625140] %v1247_v55  ;;  %v1288_v29 = vcombine.high %v1284_v15, %v1284_v15  ;;  %v1022_v30 = vcombine.high %v1006_v17, %v1006_v17  ;;  %v1023_v33 = vcombine.high %v1013_v18, %v1013_v18 }
 0x123   : > { %864 = vst [vmem:[#allocation2 + $0xb0] sm:$0x1] %v758_v60  ;;  %5632 = vst.sshfl [vmem:[#allocation2 + $0xa2] sm:$0x1 pattern:$0x73625140] %v1254_v61  ;;  %v1511_v34 = vrot.slane %v6519_v7, %v6476_v23  ;;  %v1024_v35 = vcombine.high %v1020_v22, %v1020_v22  ;;  %v1518_v36 = vrot.slane %v1504_v26, %v6476_v23 }
 0x124   : > { %5614 = vst.sshfl [vmem:[#allocation2 + $0x81] sm:$0x1 pattern:$0x73625140] %v983_v62  ;;  %861 = vst [vmem:[#allocation2 + $0x98] sm:$0x1] %v759_v3  ;;  %v761_v37 = vcombine.high %v6530_v20, %v6530_v20  ;;  %v768_v38 = vrot.slane %v6530_v20, %v6476_v23  ;;  %v1289_v7 = vcombine.high %v6532_v21, %v6532_v21 }
 0x125   : > { %5631 = vst.sshfl [vmem:[#allocation2 + $0x8a] sm:$0x1 pattern:$0x73625140] %v1255_v1  ;;  %865 = vst [vmem:[#allocation2 + $0xb8] sm:$0x1] %v760_v8  ;;  %v1519_v39 = vcombine.high %v1511_v34, %v1511_v34  ;;  %v1527_v40 = vrot.slane %v1511_v34, %v6476_v23  ;;  %v1296_v43 = vrot.slane %v6532_v21, %v6476_v23 }
 0x126   : > { %5616 = vst.sshfl [vmem:[#allocation2 + $0xa1] sm:$0x1 pattern:$0x73625140] %v990_v5  ;;  %1388 = vst [vmem:[#allocation2 + $0x92] sm:$0x1] %v1285_v6  ;;  %v1520_v44 = vcombine.high %v1518_v36, %v1518_v36  ;;  %v1534_v45 = vrot.slane %v1518_v36, %v6476_v23  ;;  %v775_v20 = vrot.slane %v761_v37, %v6476_v23 }
 0x127   : > { %5633 = vst.sshfl [vmem:[#allocation2 + $0xaa] sm:$0x1 pattern:$0x73625140] %v1256_v10  ;;  %1392 = vst [vmem:[#allocation2 + $0xb2] sm:$0x1] %v1286_v16  ;;  %v776_v46 = vcombine.high %v768_v38, %v768_v38  ;;  %v1541_v53 = vrot.slane %v1519_v39, %v6476_v23  ;;  %v1549_v54 = vcombine.high %v1527_v40, %v1527_v40 }
 0x128   : > { %5615 = vst.sshfl [vmem:[#allocation2 + $0x89] sm:$0x1 pattern:$0x73625140] %v991_v12  ;;  %1389 = vst [vmem:[#allocation2 + $0x9a] sm:$0x1] %v1287_v19  ;;  %v784_v55 = vrot.slane %v768_v38, %v6476_v23  ;;  %v1303_v56 = vrot.slane %v1289_v7, %v6476_v23  ;;  %v1548_v21 = vrot.slane %v1520_v44, %v6476_v23 }
 0x129   : > { %5617 = vst.sshfl [vmem:[#allocation2 + $0xa9] sm:$0x1 pattern:$0x73625140] %v992_v51  ;;  %1124 = vst [vmem:[#allocation2 + $0x91] sm:$0x1] %v1021_v25  ;;  %v1550_v59 = vcombine.high %v1534_v45, %v1534_v45  ;;  %v777_v60 = vcombine.high %v775_v20, %v775_v20  ;;  %v791_v61 = vrot.slane %v775_v20, %v6476_v23 }
 0x12a   : > { %1393 = vst [vmem:[#allocation2 + $0xba] sm:$0x1] %v1288_v29  ;;  %1125 = vst [vmem:[#allocation2 + $0x99] sm:$0x1] %v1023_v33  ;;  %v1551_v62 = vcombine.high %v1541_v53, %v1541_v53  ;;  %v798_v3 = vrot.slane %v776_v46, %v6476_v23  ;;  %v806_v1 = vcombine.high %v784_v55, %v784_v55 }
 0x12b   : > { %1128 = vst [vmem:[#allocation2 + $0xb1] sm:$0x1] %v1022_v30  ;;  %5646 = vst.sshfl [vmem:[#allocation2 + $0x83] sm:$0x1 pattern:$0x73625140] %v1511_v34  ;;  %v1304_v4 = vcombine.high %v1296_v43, %v1296_v43  ;;  %v1552_v5 = vcombine.high %v1548_v21, %v1548_v21  ;;  %v805_v8 = vrot.slane %v777_v60, %v6476_v23 }
 0x12c   : > { %1129 = vst [vmem:[#allocation2 + $0xb9] sm:$0x1] %v1024_v35  ;;  %5648 = vst.sshfl [vmem:[#allocation2 + $0xa3] sm:$0x1 pattern:$0x73625140] %v1518_v36  ;;  %v807_v10 = vcombine.high %v791_v61, %v791_v61  ;;  %v1305_v11 = vcombine.high %v1303_v56, %v1303_v56  ;;  %v808_v12 = vcombine.high %v798_v3, %v798_v3 }
 0x12d   : > { %5602 = vst.sshfl [vmem:[#allocation2 + $0xc0] sm:$0x1 pattern:$0x73625140] %v768_v38  ;;  %1652 = vst [vmem:[#allocation2 + $0x93] sm:$0x1] %v1549_v54  ;;  %v1312_v13 = vrot.slane %v1296_v43, %v6476_v23  ;;  %v1319_v6 = vrot.slane %v1303_v56, %v6476_v23  ;;  %v1326_v51 = vrot.slane %v1304_v4, %v6476_v23 }
 0x12e   : > { %5647 = vst.sshfl [vmem:[#allocation2 + $0x8b] sm:$0x1 pattern:$0x73625140] %v1519_v39  ;;  %1656 = vst [vmem:[#allocation2 + $0xb3] sm:$0x1] %v1550_v59  ;;  %v809_v14 = vcombine.high %v805_v8, %v805_v8  ;;  %v1333_v15 = vrot.slane %v1305_v11, %v6476_v23  ;;  %v1025_v16 = vcombine.high %v6540_v27, %v6540_v27 }
 0x12f   : > { %5634 = vst.sshfl [vmem:[#allocation2 + $0xc2] sm:$0x1 pattern:$0x73625140] %v1296_v43  ;;  %1653 = vst [vmem:[#allocation2 + $0x9b] sm:$0x1] %v1551_v62  ;;  %v1032_v17 = vrot.slane %v6540_v27, %v6476_v23  ;;  %v1334_v18 = vcombine.high %v1312_v13, %v1312_v13  ;;  %v1335_v19 = vcombine.high %v1319_v6, %v1319_v6 }
 0x130   : > { %5649 = vst.sshfl [vmem:[#allocation2 + $0xab] sm:$0x1 pattern:$0x73625140] %v1520_v44  ;;  %868 = vst [vmem:[#allocation2 + $0xd0] sm:$0x1] %v806_v1  ;;  %v1336_v22 = vcombine.high %v1326_v51, %v1326_v51  ;;  %v1553_v25 = vcombine.high %v6542_v28, %v6542_v28  ;;  %v1337_v26 = vcombine.high %v1333_v15, %v1333_v15 }
 0x131   : > { %5603 = vst.sshfl [vmem:[#allocation2 + $0xc8] sm:$0x1 pattern:$0x73625140] %v776_v46  ;;  %1657 = vst [vmem:[#allocation2 + $0xbb] sm:$0x1] %v1552_v5  ;;  %v1039_v29 = vrot.slane %v1025_v16, %v6476_v23  ;;  %v1040_v30 = vcombine.high %v1032_v17, %v1032_v17  ;;  %v1048_v33 = vrot.slane %v1032_v17, %v6476_v23 }
 0x132   : > { %5604 = vst.sshfl [vmem:[#allocation2 + $0xe0] sm:$0x1 pattern:$0x73625140] %v775_v20  ;;  %872 = vst [vmem:[#allocation2 + $0xf0] sm:$0x1] %v807_v10  ;;  %v1560_v27 = vrot.slane %v6542_v28, %v6476_v23  ;;  %v1567_v34 = vrot.slane %v1553_v25, %v6476_v23  ;;  %v1670_v35 = vcombine.high %v6550_v41, %v6550_v41 }
 0x133   : > { %5636 = vst.sshfl [vmem:[#allocation2 + $0xe2] sm:$0x1 pattern:$0x73625140] %v1303_v56  ;;  %869 = vst [vmem:[#allocation2 + $0xd8] sm:$0x1] %v808_v12  ;;  %v1677_v36 = vrot.slane %v6550_v41, %v6476_v23  ;;  %v1041_v37 = vcombine.high %v1039_v29, %v1039_v29  ;;  %v1055_v38 = vrot.slane %v1039_v29, %v6476_v23 }
 0x134   : > { %5605 = vst.sshfl [vmem:[#allocation2 + $0xe8] sm:$0x1 pattern:$0x73625140] %v777_v60  ;;  %873 = vst [vmem:[#allocation2 + $0xf8] sm:$0x1] %v809_v14  ;;  %v1062_v39 = vrot.slane %v1040_v30, %v6476_v23  ;;  %v1070_v40 = vcombine.high %v1048_v33, %v1048_v33  ;;  %v1568_v7 = vcombine.high %v1560_v27, %v1560_v27 }
 0x135   : > { %5635 = vst.sshfl [vmem:[#allocation2 + $0xca] sm:$0x1 pattern:$0x73625140] %v1304_v4  ;;  %1396 = vst [vmem:[#allocation2 + $0xd2] sm:$0x1] %v1334_v18  ;;  %v1569_v43 = vcombine.high %v1567_v34, %v1567_v34  ;;  %v1576_v28 = vrot.slane %v1560_v27, %v6476_v23  ;;  %v1583_v44 = vrot.slane %v1567_v34, %v6476_v23 }
 0x136   : > { %5637 = vst.sshfl [vmem:[#allocation2 + $0xea] sm:$0x1 pattern:$0x73625140] %v1305_v11  ;;  %1397 = vst [vmem:[#allocation2 + $0xda] sm:$0x1] %v1336_v22  ;;  %v1069_v41 = vrot.slane %v1041_v37, %v6476_v23  ;;  %v1071_v45 = vcombine.high %v1055_v38, %v1055_v38  ;;  %v1072_v20 = vcombine.high %v1062_v39, %v1062_v39 }
 0x137   : > { %5618 = vst.sshfl [vmem:[#allocation2 + $0xc1] sm:$0x1 pattern:$0x73625140] %v1032_v17  ;;  %1400 = vst [vmem:[#allocation2 + $0xf2] sm:$0x1] %v1335_v19  ;;  %v1684_v46 = vrot.slane %v1670_v35, %v6476_v23  ;;  %v1590_v53 = vrot.slane %v1568_v7, %v6476_v23  ;;  %v1597_v54 = vrot.slane %v1569_v43, %v6476_v23 }
 0x138   : > { %1401 = vst [vmem:[#allocation2 + $0xfa] sm:$0x1] %v1337_v26  ;;  %5619 = vst.sshfl [vmem:[#allocation2 + $0xc9] sm:$0x1 pattern:$0x73625140] %v1040_v30  ;;  %v1598_v55 = vcombine.high %v1576_v28, %v1576_v28  ;;  %v1599_v56 = vcombine.high %v1583_v44, %v1583_v44  ;;  %v1073_v21 = vcombine.high %v1069_v41, %v1069_v41 }
 0x139   : > { %5620 = vst.sshfl [vmem:[#allocation2 + $0xe1] sm:$0x1 pattern:$0x73625140] %v1039_v29  ;;  %1132 = vst [vmem:[#allocation2 + $0xd1] sm:$0x1] %v1070_v40  ;;  %v1685_v59 = vcombine.high %v1677_v36, %v1677_v36  ;;  %v1686_v60 = vcombine.high %v1684_v46, %v1684_v46  ;;  %v1693_v61 = vrot.slane %v1677_v36, %v6476_v23 }
 0x13a   : > { %5650 = vst.sshfl [vmem:[#allocation2 + $0xc3] sm:$0x1 pattern:$0x73625140] %v1560_v27  ;;  %1133 = vst [vmem:[#allocation2 + $0xd9] sm:$0x1] %v1072_v20  ;;  %v1600_v62 = vcombine.high %v1590_v53, %v1590_v53  ;;  %v1601_v3 = vcombine.high %v1597_v54, %v1597_v54  ;;  %v1700_v1 = vrot.slane %v1684_v46, %v6476_v23 }
 0x13b   : > { %5652 = vst.sshfl [vmem:[#allocation2 + $0xe3] sm:$0x1 pattern:$0x73625140] %v1567_v34  ;;  %1136 = vst [vmem:[#allocation2 + $0xf1] sm:$0x1] %v1071_v45  ;;  %v2198_v4 = vcombine.high %v6552_v42, %v6552_v42  ;;  %v1707_v5 = vrot.slane %v1685_v59, %v6476_v23  ;;  %v1714_v8 = vrot.slane %v1686_v60, %v6476_v23 }
 0x13c   : > { %5654 = vst.sshfl [vmem:[#allocation2 + $0x4] sm:$0x1 pattern:$0x73625140] %v1677_v36  ;;  %1660 = vst [vmem:[#allocation2 + $0xd3] sm:$0x1] %v1598_v55  ;;  %v1715_v10 = vcombine.high %v1693_v61, %v1693_v61  ;;  %v2205_v11 = vrot.slane %v6552_v42, %v6476_v23  ;;  %v1716_v12 = vcombine.high %v1700_v1, %v1700_v1 }
 0x13d   : > { %5621 = vst.sshfl [vmem:[#allocation2 + $0xe9] sm:$0x1 pattern:$0x73625140] %v1041_v37  ;;  %1664 = vst [vmem:[#allocation2 + $0xf3] sm:$0x1] %v1599_v56  ;;  %v2212_v13 = vrot.slane %v2198_v4, %v6476_v23  ;;  %v1934_v6 = vcombine.high %v6556_v47, %v6556_v47  ;;  %v1941_v51 = vrot.slane %v6556_v47, %v6476_v23 }
 0x13e   : > { %5651 = vst.sshfl [vmem:[#allocation2 + $0xcb] sm:$0x1 pattern:$0x73625140] %v1568_v7  ;;  %1137 = vst [vmem:[#allocation2 + $0xf9] sm:$0x1] %v1073_v21  ;;  %v1717_v14 = vcombine.high %v1707_v5, %v1707_v5  ;;  %v1718_v15 = vcombine.high %v1714_v8, %v1714_v8  ;;  %v2213_v16 = vcombine.high %v2205_v11, %v2205_v11 }
 0x13f   : > { %5653 = vst.sshfl [vmem:[#allocation2 + $0xeb] sm:$0x1 pattern:$0x73625140] %v1569_v43  ;;  %1661 = vst [vmem:[#allocation2 + $0xdb] sm:$0x1] %v1600_v62  ;;  %v2221_v17 = vrot.slane %v2205_v11, %v6476_v23  ;;  %v2214_v42 = vcombine.high %v2212_v13, %v2212_v13  ;;  %v2228_v18 = vrot.slane %v2212_v13, %v6476_v23 }
 0x140   : > { %5656 = vst.sshfl [vmem:[#allocation2 + $0x24] sm:$0x1 pattern:$0x73625140] %v1684_v46  ;;  %1665 = vst [vmem:[#allocation2 + $0xfb] sm:$0x1] %v1601_v3  ;;  %v1948_v19 = vrot.slane %v1934_v6, %v6476_v23  ;;  %v1949_v22 = vcombine.high %v1941_v51, %v1941_v51  ;;  %v2235_v47 = vrot.slane %v2213_v16, %v6476_v23 }
 0x141   : > { %5655 = vst.sshfl [vmem:[#allocation2 + $0xc] sm:$0x1 pattern:$0x73625140] %v1685_v59  ;;  %1900 = vst [vmem:[#allocation2 + $0x14] sm:$0x1] %v1715_v10  ;;  %v2243_v25 = vcombine.high %v2221_v17, %v2221_v17  ;;  %v1957_v26 = vrot.slane %v1941_v51, %v6476_v23  ;;  %v2462_v29 = vcombine.high %v6558_v48, %v6558_v48 }
 0x142   : > { %5657 = vst.sshfl [vmem:[#allocation2 + $0x2c] sm:$0x1 pattern:$0x73625140] %v1686_v60  ;;  %1904 = vst [vmem:[#allocation2 + $0x34] sm:$0x1] %v1716_v12  ;;  %v2242_v30 = vrot.slane %v2214_v42, %v6476_v23  ;;  %v2244_v33 = vcombine.high %v2228_v18, %v2228_v18  ;;  %v1950_v27 = vcombine.high %v1948_v19, %v1948_v19 }
 0x143   : > { %5686 = vst.sshfl [vmem:[#allocation2 + $0x6] sm:$0x1 pattern:$0x73625140] %v2205_v11  ;;  %1901 = vst [vmem:[#allocation2 + $0x1c] sm:$0x1] %v1717_v14  ;;  %v1964_v34 = vrot.slane %v1948_v19, %v6476_v23  ;;  %v2245_v35 = vcombine.high %v2235_v47, %v2235_v47  ;;  %v1971_v36 = vrot.slane %v1949_v22, %v6476_v23 }
 0x144   : > { %5688 = vst.sshfl [vmem:[#allocation2 + $0x26] sm:$0x1 pattern:$0x73625140] %v2212_v13  ;;  %1905 = vst [vmem:[#allocation2 + $0x3c] sm:$0x1] %v1718_v15  ;;  %v1979_v37 = vcombine.high %v1957_v26, %v1957_v26  ;;  %v2469_v38 = vrot.slane %v6558_v48, %v6476_v23  ;;  %v2246_v39 = vcombine.high %v2242_v30, %v2242_v30 }
 0x145   : > { %5670 = vst.sshfl [vmem:[#allocation2 + $0x5] sm:$0x1 pattern:$0x73625140] %v1941_v51  ;;  %2428 = vst [vmem:[#allocation2 + $0x16] sm:$0x1] %v2243_v25  ;;  %v1978_v40 = vrot.slane %v1950_v27, %v6476_v23  ;;  %v1980_v7 = vcombine.high %v1964_v34, %v1964_v34  ;;  %v2476_v43 = vrot.slane %v2462_v29, %v6476_v23 }
 0x146   : > { %5687 = vst.sshfl [vmem:[#allocation2 + $0xe] sm:$0x1 pattern:$0x73625140] %v2213_v16  ;;  %2432 = vst [vmem:[#allocation2 + $0x36] sm:$0x1] %v2244_v33  ;;  %v1981_v28 = vcombine.high %v1971_v36, %v1971_v36  ;;  %v2477_v44 = vcombine.high %v2469_v38, %v2469_v38  ;;  %v2485_v41 = vrot.slane %v2469_v38, %v6476_v23 }
 0x147   : > { %5689 = vst.sshfl [vmem:[#allocation2 + $0x2e] sm:$0x1 pattern:$0x73625140] %v2214_v42  ;;  %2429 = vst [vmem:[#allocation2 + $0x1e] sm:$0x1] %v2245_v35  ;;  %v1719_v45 = vcombine.high %v6569_v63, %v6569_v63  ;;  %v1982_v48 = vcombine.high %v1978_v40, %v1978_v40  ;;  %v2478_v20 = vcombine.high %v2476_v43, %v2476_v43 }
 0x148   : > { %5671 = vst.sshfl [vmem:[#allocation2 + $0xd] sm:$0x1 pattern:$0x73625140] %v1949_v22  ;;  %2164 = vst [vmem:[#allocation2 + $0x15] sm:$0x1] %v1979_v37  ;;  %v2492_v46 = vrot.slane %v2476_v43, %v6476_v23  ;;  %v1726_v53 = vrot.slane %v6569_v63, %v6476_v23  ;;  %v2499_v54 = vrot.slane %v2477_v44, %v6476_v23 }
 0x149   : > { %5672 = vst.sshfl [vmem:[#allocation2 + $0x25] sm:$0x1 pattern:$0x73625140] %v1948_v19  ;;  %2433 = vst [vmem:[#allocation2 + $0x3e] sm:$0x1] %v2246_v39  ;;  %v2507_v55 = vcombine.high %v2485_v41, %v2485_v41  ;;  %v1733_v56 = vrot.slane %v1719_v45, %v6476_v23  ;;  %v2247_v21 = vcombine.high %v6571_v2, %v6571_v2 }
 0x14a   : > { %5673 = vst.sshfl [vmem:[#allocation2 + $0x2d] sm:$0x1 pattern:$0x73625140] %v1950_v27  ;;  %2168 = vst [vmem:[#allocation2 + $0x35] sm:$0x1] %v1980_v7  ;;  %v2506_v59 = vrot.slane %v2478_v20, %v6476_v23  ;;  %v2508_v60 = vcombine.high %v2492_v46, %v2492_v46  ;;  %v1734_v61 = vcombine.high %v1726_v53, %v1726_v53 }
 0x14b   : > { %5702 = vst.sshfl [vmem:[#allocation2 + $0x7] sm:$0x1 pattern:$0x73625140] %v2469_v38  ;;  %2165 = vst [vmem:[#allocation2 + $0x1d] sm:$0x1] %v1981_v28  ;;  %v1742_v62 = vrot.slane %v1726_v53, %v6476_v23  ;;  %v2509_v63 = vcombine.high %v2499_v54, %v2499_v54  ;;  %v1735_v3 = vcombine.high %v1733_v56, %v1733_v56 }
 0x14c   : > { %5704 = vst.sshfl [vmem:[#allocation2 + $0x27] sm:$0x1 pattern:$0x73625140] %v2476_v43  ;;  %2169 = vst [vmem:[#allocation2 + $0x3d] sm:$0x1] %v1982_v48  ;;  %v1749_v1 = vrot.slane %v1733_v56, %v6476_v23  ;;  %v2254_v4 = vrot.slane %v6571_v2, %v6476_v23  ;;  %v2510_v5 = vcombine.high %v2506_v59, %v2506_v59 }
 0x14d   : > { %5703 = vst.sshfl [vmem:[#allocation2 + $0xf] sm:$0x1 pattern:$0x73625140] %v2477_v44  ;;  %2692 = vst [vmem:[#allocation2 + $0x17] sm:$0x1] %v2507_v55  ;;  %v1756_v8 = vrot.slane %v1734_v61, %v6476_v23  ;;  %v1764_v10 = vcombine.high %v1742_v62, %v1742_v62  ;;  %v2261_v11 = vrot.slane %v2247_v21, %v6476_v23 }
 0x14e   : > { %5705 = vst.sshfl [vmem:[#allocation2 + $0x2f] sm:$0x1 pattern:$0x73625140] %v2478_v20  ;;  %2696 = vst [vmem:[#allocation2 + $0x37] sm:$0x1] %v2508_v60  ;;  %v1763_v12 = vrot.slane %v1735_v3, %v6476_v23  ;;  %v1765_v13 = vcombine.high %v1749_v1, %v1749_v1  ;;  %v2262_v6 = vcombine.high %v2254_v4, %v2254_v4 }
 0x14f   : > { %5658 = vst.sshfl [vmem:[#allocation2 + $0x44] sm:$0x1 pattern:$0x73625140] %v1726_v53  ;;  %2693 = vst [vmem:[#allocation2 + $0x1f] sm:$0x1] %v2509_v63  ;;  %v2270_v51 = vrot.slane %v2254_v4, %v6476_v23  ;;  %v1766_v2 = vcombine.high %v1756_v8, %v1756_v8  ;;  %v2263_v14 = vcombine.high %v2261_v11, %v2261_v11 }
 0x150   : > { %5660 = vst.sshfl [vmem:[#allocation2 + $0x64] sm:$0x1 pattern:$0x73625140] %v1733_v56  ;;  %2697 = vst [vmem:[#allocation2 + $0x3f] sm:$0x1] %v2510_v5  ;;  %v2277_v15 = vrot.slane %v2261_v11, %v6476_v23  ;;  %v1983_v16 = vcombine.high %v6578_v9, %v6578_v9  ;;  %v1767_v18 = vcombine.high %v1763_v12, %v1763_v12 }
 0x151   : > { %5659 = vst.sshfl [vmem:[#allocation2 + $0x4c] sm:$0x1 pattern:$0x73625140] %v1734_v61  ;;  %1908 = vst [vmem:[#allocation2 + $0x54] sm:$0x1] %v1764_v10  ;;  %v2284_v19 = vrot.slane %v2262_v6, %v6476_v23  ;;  %v2292_v22 = vcombine.high %v2270_v51, %v2270_v51  ;;  %v1990_v47 = vrot.slane %v6578_v9, %v6476_v23 }
 0x152   : > { %5661 = vst.sshfl [vmem:[#allocation2 + $0x6c] sm:$0x1 pattern:$0x73625140] %v1735_v3  ;;  %v2724_v17 = vld [vmem:[#allocation2] sm:$0xff]  ;;  %v6732_v42 = vld [vmem:[%s6471_s7 + $0x8] sm:$0xff]  ;;  %v2291_v25 = vrot.slane %v2263_v14, %v6476_v23  ;;  %v2293_v26 = vcombine.high %v2277_v15, %v2277_v15  ;;  %v1997_v29 = vrot.slane %v1983_v16, %v6476_v23  ;;  %v2511_v30 = vcombine.high %v6580_v50, %v6580_v50 }
 0x153   : > { %5690 = vst.sshfl [vmem:[#allocation2 + $0x46] sm:$0x1 pattern:$0x73625140] %v2254_v4  ;;  %1912 = vst [vmem:[#allocation2 + $0x74] sm:$0x1] %v1765_v13  ;;  %6203 = vmatprep.subr.mxu0 %v2724_v17  ;;  %v2294_v27 = vcombine.high %v2284_v19, %v2284_v19  ;;  %v1998_v34 = vcombine.high %v1990_v47, %v1990_v47  ;;  %v2006_v35 = vrot.slane %v1990_v47, %v6476_v23 }
 0x154   : > { %5692 = vst.sshfl [vmem:[#allocation2 + $0x66] sm:$0x1 pattern:$0x73625140] %v2261_v11  ;;  %1909 = vst [vmem:[#allocation2 + $0x5c] sm:$0x1] %v1766_v2  ;;  %6204 = vmatpush3.msra.mxu0 %v2724_v17  ;;  %v2518_v9 = vrot.slane %v6580_v50, %v6476_v23  ;;  %v2295_v36 = vcombine.high %v2291_v25, %v2291_v25  ;;  %v1999_v37 = vcombine.high %v1997_v29, %v1997_v29 }
 0x155   : > { %5691 = vst.sshfl [vmem:[#allocation2 + $0x4e] sm:$0x1 pattern:$0x73625140] %v2262_v6  ;;  %v2725_v33 = vld [vmem:[#allocation2 + $0x8] sm:$0xff]  ;;  %6206 = vmatmul.mubr.msk.f32.vlgmr.msra.gmra.mrb[16].mxu0 %vm241_vm0, %v6732_v42  ;;  %v2013_v38 = vrot.slane %v1997_v29, %v6476_v23  ;;  %v2525_v39 = vrot.slane %v2511_v30, %v6476_v23  ;;  %v2726_v40 = vld [vmem:[#allocation2 + $0x10] sm:$0xff]  ;;  %v2020_v7 = vrot.slane %v1998_v34, %v6476_v23 }
 0x156   : > { %5693 = vst.sshfl [vmem:[#allocation2 + $0x6e] sm:$0x1 pattern:$0x73625140] %v2263_v14  ;;  %1913 = vst [vmem:[#allocation2 + $0x7c] sm:$0x1] %v1767_v18  ;;  %6208 = vmatprep.subr.mxu1 %v2725_v33  ;;  %v2028_v43 = vcombine.high %v2006_v35, %v2006_v35  ;;  %v2526_v28 = vcombine.high %v2518_v9, %v2518_v9  ;;  %v2534_v50 = vrot.slane %v2518_v9, %v6476_v23 }
 0x157   : > { %2436 = vst [vmem:[#allocation2 + $0x56] sm:$0x1] %v2292_v22  ;;  %5674 = vst.sshfl [vmem:[#allocation2 + $0x45] sm:$0x1 pattern:$0x73625140] %v1990_v47  ;;  %6209 = vmatpush3.msra.mxu1 %v2725_v33  ;;  %v2027_v44 = vrot.slane %v1999_v37, %v6476_v23  ;;  %v2029_v41 = vcombine.high %v2013_v38, %v2013_v38  ;;  %v2527_v45 = vcombine.high %v2525_v39, %v2525_v39 }
 0x158   : > { %2440 = vst [vmem:[#allocation2 + $0x76] sm:$0x1] %v2293_v26  ;;  %5676 = vst.sshfl [vmem:[#allocation2 + $0x65] sm:$0x1 pattern:$0x73625140] %v1997_v29  ;;  %v2541_v48 = vrot.slane %v2525_v39, %v6476_v23  ;;  %6211 = vmatmul.mubr.msk.f32.vlgmr.msra.gmra.mrb[16].mxu1 %vm241_vm0, %v6732_v42  ;;  %v2030_v20 = vcombine.high %v2020_v7, %v2020_v7  ;;  %v2548_v46 = vrot.slane %v2526_v28, %v6476_v23 }
 0x159   : > { %2437 = vst [vmem:[#allocation2 + $0x5e] sm:$0x1] %v2294_v27  ;;  %5675 = vst.sshfl [vmem:[#allocation2 + $0x4d] sm:$0x1 pattern:$0x73625140] %v1998_v34  ;;  %v2556_v53 = vcombine.high %v2534_v50, %v2534_v50  ;;  %v1768_v54 = vcombine.high %v6590_v24, %v6590_v24  ;;  %6213 = vmatprep.subr.mxu0 %v2726_v40  ;;  %v2031_v55 = vcombine.high %v2027_v44, %v2027_v44 }
 0x15a   : > { %5706 = vst.sshfl [vmem:[#allocation2 + $0x47] sm:$0x1 pattern:$0x73625140] %v2518_v9  ;;  %2441 = vst [vmem:[#allocation2 + $0x7e] sm:$0x1] %v2295_v36  ;;  %v2555_v56 = vrot.slane %v2527_v45, %v6476_v23  ;;  %v2557_v21 = vcombine.high %v2541_v48, %v2541_v48  ;;  %v1775_v59 = vrot.slane %v6590_v24, %v6476_v23  ;;  %6214 = vmatpush3.msra.mxu0 %v2726_v40 }
 0x15b   : > { %5677 = vst.sshfl [vmem:[#allocation2 + $0x6d] sm:$0x1 pattern:$0x73625140] %v1999_v37  ;;  %2172 = vst [vmem:[#allocation2 + $0x55] sm:$0x1] %v2028_v43  ;;  %v2558_v61 = vcombine.high %v2548_v46, %v2548_v46  ;;  %v1782_v62 = vrot.slane %v1768_v54, %v6476_v23  ;;  %v2296_v63 = vcombine.high %v6592_v0, %v6592_v0 }
 0x15c   : > { %5708 = vst.sshfl [vmem:[#allocation2 + $0x67] sm:$0x1 pattern:$0x73625140] %v2525_v39  ;;  %2176 = vst [vmem:[#allocation2 + $0x75] sm:$0x1] %v2029_v41  ;;  %v2303_v3 = vrot.slane %v6592_v0, %v6476_v23  ;;  %v2559_v24 = vcombine.high %v2555_v56, %v2555_v56  ;;  %v1783_v4 = vcombine.high %v1775_v59, %v1775_v59 }
 0x15d   : > { %5707 = vst.sshfl [vmem:[#allocation2 + $0x4f] sm:$0x1 pattern:$0x73625140] %v2526_v28  ;;  %v2727_v60 = vld [vmem:[#allocation2 + $0x18] sm:$0xff]  ;;  %v6766_v1 = vld [vmem:[%s6471_s7] sm:$0xff]  ;;  %v1791_v5 = vrot.slane %v1775_v59, %v6476_v23  ;;  %v2032_v8 = vcombine.high %v6596_v31, %v6596_v31  ;;  %v1784_v0 = vcombine.high %v1782_v62, %v1782_v62  ;;  %v1798_v10 = vrot.slane %v1782_v62, %v6476_v23 }
 0x15e   : > { %5709 = vst.sshfl [vmem:[#allocation2 + $0x6f] sm:$0x1 pattern:$0x73625140] %v2527_v45  ;;  %2173 = vst [vmem:[#allocation2 + $0x5d] sm:$0x1] %v2030_v20  ;;  %6215 = vmatprep.mubr.msk.f32.mxu0 %vm241_vm0, %v6766_v1  ;;  %v2310_v11 = vrot.slane %v2296_v63, %v6476_v23  ;;  %v2311_v12 = vcombine.high %v2303_v3, %v2303_v3  ;;  %6218 = vmatprep.subr.mxu1 %v2727_v60 }
 0x15f   : > { %2700 = vst [vmem:[#allocation2 + $0x57] sm:$0x1] %v2556_v53  ;;  %2177 = vst [vmem:[#allocation2 + $0x7d] sm:$0x1] %v2031_v55  ;;  %6216 = vmatmul.mubr.msk.f32.vlgmr.msra.gmra.mrb[18].mxu0 %vm241_vm0, %v6732_v42  ;;  %v2728_v13 = vld [vmem:[#allocation2 + $0x20] sm:$0xff]  ;;  %v1805_v6 = vrot.slane %v1783_v4, %v6476_v23  ;;  %v1813_v51 = vcombine.high %v1791_v5, %v1791_v5  ;;  %v2319_v2 = vrot.slane %v2303_v3, %v6476_v23  ;;  %v2729_v9 = vld [vmem:[#allocation2 + $0x28] sm:$0xff] }
 0x160   : > { %2704 = vst [vmem:[#allocation2 + $0x77] sm:$0x1] %v2557_v21  ;;  %5662 = vst.sshfl [vmem:[#allocation2 + $0x84] sm:$0x1 pattern:$0x73625140] %v1775_v59  ;;  %v2039_v14 = vrot.slane %v6596_v31, %v6476_v23  ;;  %6223 = vmatprep.subr.mxu0 %v2728_v13  ;;  %v1812_v15 = vrot.slane %v1784_v0, %v6476_v23  ;;  %v1814_v16 = vcombine.high %v1798_v10, %v1798_v10 }
 0x161   : > { %2701 = vst [vmem:[#allocation2 + $0x5f] sm:$0x1] %v2558_v61  ;;  %5664 = vst.sshfl [vmem:[#allocation2 + $0xa4] sm:$0x1 pattern:$0x73625140] %v1782_v62  ;;  %v2312_v17 = vcombine.high %v2310_v11, %v2310_v11  ;;  %v2326_v18 = vrot.slane %v2310_v11, %v6476_v23  ;;  %6219 = vmatpush3.msra.mxu1 %v2727_v60  ;;  %v1815_v19 = vcombine.high %v1805_v6, %v1805_v6 }
 0x162   : > { %5694 = vst.sshfl [vmem:[#allocation2 + $0x86] sm:$0x1 pattern:$0x73625140] %v2303_v3  ;;  %2705 = vst [vmem:[#allocation2 + $0x7f] sm:$0x1] %v2559_v24  ;;  %v2333_v22 = vrot.slane %v2311_v12, %v6476_v23  ;;  %v2341_v47 = vcombine.high %v2319_v2, %v2319_v2  ;;  %v2046_v25 = vrot.slane %v2032_v8, %v6476_v23  ;;  %6220 = vmatprep.mubr.msk.f32.mxu1 %vm241_vm0, %v6766_v1 }
 0x163   : > { %5663 = vst.sshfl [vmem:[#allocation2 + $0x8c] sm:$0x1 pattern:$0x73625140] %v1783_v4  ;;  %1916 = vst [vmem:[#allocation2 + $0x94] sm:$0x1] %v1813_v51  ;;  %v1816_v31 = vcombine.high %v1812_v15, %v1812_v15  ;;  %v2340_v26 = vrot.slane %v2312_v17, %v6476_v23  ;;  %v2342_v29 = vcombine.high %v2326_v18, %v2326_v18  ;;  %6224 = vmatpush3.msra.mxu0 %v2728_v13 }
 0x164   : > { %5665 = vst.sshfl [vmem:[#allocation2 + $0xac] sm:$0x1 pattern:$0x73625140] %v1784_v0  ;;  %1920 = vst [vmem:[#allocation2 + $0xb4] sm:$0x1] %v1814_v16  ;;  %v2047_v30 = vcombine.high %v2039_v14, %v2039_v14  ;;  %v2343_v33 = vcombine.high %v2333_v22, %v2333_v22  ;;  %v2048_v27 = vcombine.high %v2046_v25, %v2046_v25  ;;  %6221 = vmatmul.mubr.msk.f32.vlgmr.msra.gmra.mrb[18].mxu1 %vm241_vm0, %v6732_v42 }
 0x165   : > { %5695 = vst.sshfl [vmem:[#allocation2 + $0x8e] sm:$0x1 pattern:$0x73625140] %v2311_v12  ;;  %1917 = vst [vmem:[#allocation2 + $0x9c] sm:$0x1] %v1815_v19  ;;  %v2055_v34 = vrot.slane %v2039_v14, %v6476_v23  ;;  %v2062_v35 = vrot.slane %v2046_v25, %v6476_v23  ;;  %v2344_v36 = vcombine.high %v2340_v26, %v2340_v26  ;;  %6228 = vmatprep.subr.mxu1 %v2729_v9 }
 0x166   : > { %5696 = vst.sshfl [vmem:[#allocation2 + $0xa6] sm:$0x1 pattern:$0x73625140] %v2310_v11  ;;  %2444 = vst [vmem:[#allocation2 + $0x96] sm:$0x1] %v2341_v47  ;;  %v2069_v37 = vrot.slane %v2047_v30, %v6476_v23  ;;  %v2560_v38 = vcombine.high %v6598_v32, %v6598_v32  ;;  %v2567_v39 = vrot.slane %v6598_v32, %v6476_v23  ;;  %6225 = vmatprep.mubr.msk.f32.mxu0 %vm241_vm0, %v6766_v1 }
 0x167   : > { %5678 = vst.sshfl [vmem:[#allocation2 + $0x85] sm:$0x1 pattern:$0x73625140] %v2039_v14  ;;  %1921 = vst [vmem:[#allocation2 + $0xbc] sm:$0x1] %v1816_v31  ;;  %v2076_v7 = vrot.slane %v2048_v27, %v6476_v23  ;;  %v2077_v43 = vcombine.high %v2055_v34, %v2055_v34  ;;  %v2078_v28 = vcombine.high %v2062_v35, %v2062_v35  ;;  %6229 = vmatpush3.msra.mxu1 %v2729_v9 }
 0x168   : > { %5697 = vst.sshfl [vmem:[#allocation2 + $0xae] sm:$0x1 pattern:$0x73625140] %v2312_v17  ;;  %2448 = vst [vmem:[#allocation2 + $0xb6] sm:$0x1] %v2342_v29  ;;  %v1817_v50 = vcombine.high %v6606_v49, %v6606_v49  ;;  %v2079_v44 = vcombine.high %v2069_v37, %v2069_v37  ;;  %v2574_v41 = vrot.slane %v2560_v38, %v6476_v23  ;;  %6226 = vmatmul.mubr.msk.f32.vlgmr.msra.gmra.mrb[20].mxu0 %vm241_vm0, %v6732_v42 }
 0x169   : > { %5680 = vst.sshfl [vmem:[#allocation2 + $0xa5] sm:$0x1 pattern:$0x73625140] %v2046_v25  ;;  %v2730_v40 = vld [vmem:[#allocation2 + $0x30] sm:$0xff]  ;;  %v2575_v45 = vcombine.high %v2567_v39, %v2567_v39  ;;  %v2583_v48 = vrot.slane %v2567_v39, %v6476_v23  ;;  %v2080_v32 = vcombine.high %v2076_v7, %v2076_v7  ;;  %v1824_v20 = vrot.slane %v6606_v49, %v6476_v23  ;;  %v2731_v62 = vld [vmem:[#allocation2 + $0x38] sm:$0xff] }
 0x16a   : > { %5679 = vst.sshfl [vmem:[#allocation2 + $0x8d] sm:$0x1 pattern:$0x73625140] %v2047_v30  ;;  %2445 = vst [vmem:[#allocation2 + $0x9e] sm:$0x1] %v2343_v33  ;;  %6233 = vmatprep.subr.mxu0 %v2730_v40  ;;  %v1831_v46 = vrot.slane %v1817_v50, %v6476_v23  ;;  %v2345_v53 = vcombine.high %v6608_v52, %v6608_v52  ;;  %v2576_v54 = vcombine.high %v2574_v41, %v2574_v41 }
 0x16b   : > { %5681 = vst.sshfl [vmem:[#allocation2 + $0xad] sm:$0x1 pattern:$0x73625140] %v2048_v27  ;;  %2449 = vst [vmem:[#allocation2 + $0xbe] sm:$0x1] %v2344_v36  ;;  %v2590_v55 = vrot.slane %v2574_v41, %v6476_v23  ;;  %v2597_v56 = vrot.slane %v2575_v45, %v6476_v23  ;;  %v2605_v21 = vcombine.high %v2583_v48, %v2583_v48  ;;  %6234 = vmatpush3.msra.mxu0 %v2730_v40 }
 0x16c   : > { %5710 = vst.sshfl [vmem:[#allocation2 + $0x87] sm:$0x1 pattern:$0x73625140] %v2567_v39  ;;  %2180 = vst [vmem:[#allocation2 + $0x95] sm:$0x1] %v2077_v43  ;;  %v1832_v49 = vcombine.high %v1824_v20, %v1824_v20  ;;  %v1833_v59 = vcombine.high %v1831_v46, %v1831_v46  ;;  %v1840_v60 = vrot.slane %v1824_v20, %v6476_v23  ;;  %6238 = vmatprep.subr.mxu1 %v2731_v62 }
 0x16d   : > { %2184 = vst [vmem:[#allocation2 + $0xb5] sm:$0x1] %v2078_v28  ;;  %2181 = vst [vmem:[#allocation2 + $0x9d] sm:$0x1] %v2079_v44  ;;  %v1847_v61 = vrot.slane %v1831_v46, %v6476_v23  ;;  %v2604_v63 = vrot.slane %v2576_v54, %v6476_v23  ;;  %v2606_v3 = vcombine.high %v2590_v55, %v2590_v55  ;;  %6230 = vmatprep.mubr.msk.f32.mxu1 %vm241_vm0, %v6766_v1  ;;  %v2732_v11 = vld [vmem:[#allocation2 + $0x40] sm:$0xff]  ;;  %v2733_v31 = vld [vmem:[#allocation2 + $0x48] sm:$0xff] }
 0x16e   : > { %5711 = vst.sshfl [vmem:[#allocation2 + $0x8f] sm:$0x1 pattern:$0x73625140] %v2575_v45  ;;  %2185 = vst [vmem:[#allocation2 + $0xbd] sm:$0x1] %v2080_v32  ;;  %v2607_v24 = vcombine.high %v2597_v56, %v2597_v56  ;;  %v2352_v4 = vrot.slane %v6608_v52, %v6476_v23  ;;  %v1854_v5 = vrot.slane %v1832_v49, %v6476_v23  ;;  %6243 = vmatprep.subr.mxu0 %v2732_v11 }
 0x16f   : > { %5712 = vst.sshfl [vmem:[#allocation2 + $0xa7] sm:$0x1 pattern:$0x73625140] %v2574_v41  ;;  %2708 = vst [vmem:[#allocation2 + $0x97] sm:$0x1] %v2605_v21  ;;  %v1861_v8 = vrot.slane %v1833_v59, %v6476_v23  ;;  %v1862_v0 = vcombine.high %v1840_v60, %v1840_v60  ;;  %v1863_v10 = vcombine.high %v1847_v61, %v1847_v61  ;;  %6231 = vmatmul.mubr.msk.f32.vlgmr.msra.gmra.mrb[20].mxu1 %vm241_vm0, %v6732_v42 }
 0x170   : > { %5666 = vst.sshfl [vmem:[#allocation2 + $0xc4] sm:$0x1 pattern:$0x73625140] %v1824_v20  ;;  %v2608_v12 = vcombine.high %v2604_v63, %v2604_v63  ;;  %2709 = vst [vmem:[#allocation2 + $0x9f] sm:$0x1] %v2607_v24  ;;  %v2359_v13 = vrot.slane %v2345_v53, %v6476_v23  ;;  %v2360_v6 = vcombine.high %v2352_v4, %v2352_v4  ;;  %6239 = vmatpush3.msra.mxu1 %v2731_v62 }
 0x171   : > { %5668 = vst.sshfl [vmem:[#allocation2 + $0xe4] sm:$0x1 pattern:$0x73625140] %v1831_v46  ;;  %2712 = vst [vmem:[#allocation2 + $0xb7] sm:$0x1] %v2606_v3  ;;  %v2368_v52 = vrot.slane %v2352_v4, %v6476_v23  ;;  %v1864_v51 = vcombine.high %v1854_v5, %v1854_v5  ;;  %v1865_v2 = vcombine.high %v1861_v8, %v1861_v8  ;;  %6235 = vmatprep.mubr.msk.f32.mxu0 %vm241_vm0, %v6766_v1 }
 0x172   : > { %5713 = vst.sshfl [vmem:[#allocation2 + $0xaf] sm:$0x1 pattern:$0x73625140] %v2576_v54  ;;  %1924 = vst [vmem:[#allocation2 + $0xd4] sm:$0x1] %v1862_v0  ;;  %v2081_v14 = vcombine.high %v6615_v57, %v6615_v57  ;;  %v2088_v15 = vrot.slane %v6615_v57, %v6476_v23  ;;  %v2361_v16 = vcombine.high %v2359_v13, %v2359_v13  ;;  %6248 = vmatprep.subr.mxu1 %v2733_v31 }
 0x173   : > { %5667 = vst.sshfl [vmem:[#allocation2 + $0xcc] sm:$0x1 pattern:$0x73625140] %v1832_v49  ;;  %1928 = vst [vmem:[#allocation2 + $0xf4] sm:$0x1] %v1863_v10  ;;  %v2375_v17 = vrot.slane %v2359_v13, %v6476_v23  ;;  %v2382_v18 = vrot.slane %v2360_v6, %v6476_v23  ;;  %v2390_v19 = vcombine.high %v2368_v52, %v2368_v52  ;;  %6236 = vmatmul.mubr.msk.f32.vlgmr.msra.gmra.mrb[22].mxu0 %vm241_vm0, %v6732_v42 }
 0x174   : > { %5669 = vst.sshfl [vmem:[#allocation2 + $0xec] sm:$0x1 pattern:$0x73625140] %v1833_v59  ;;  %2713 = vst [vmem:[#allocation2 + $0xbf] sm:$0x1] %v2608_v12  ;;  %v2095_v22 = vrot.slane %v2081_v14, %v6476_v23  ;;  %v2096_v47 = vcombine.high %v2088_v15, %v2088_v15  ;;  %v2104_v57 = vrot.slane %v2088_v15, %v6476_v23  ;;  %6244 = vmatpush3.msra.mxu0 %v2732_v11 }
 0x175   : > { %5698 = vst.sshfl [vmem:[#allocation2 + $0xc6] sm:$0x1 pattern:$0x73625140] %v2352_v4  ;;  %1925 = vst [vmem:[#allocation2 + $0xdc] sm:$0x1] %v1864_v51  ;;  %v2609_v25 = vcombine.high %v6617_v58, %v6617_v58  ;;  %v2389_v26 = vrot.slane %v2361_v16, %v6476_v23  ;;  %v2391_v29 = vcombine.high %v2375_v17, %v2375_v17  ;;  %6240 = vmatprep.mubr.msk.f32.mxu1 %vm241_vm0, %v6766_v1 }
 0x176   : > { %5699 = vst.sshfl [vmem:[#allocation2 + $0xce] sm:$0x1 pattern:$0x73625140] %v2360_v6  ;;  %1929 = vst [vmem:[#allocation2 + $0xfc] sm:$0x1] %v1865_v2  ;;  %v2392_v30 = vcombine.high %v2382_v18, %v2382_v18  ;;  %v2616_v33 = vrot.slane %v6617_v58, %v6476_v23  ;;  %v2097_v27 = vcombine.high %v2095_v22, %v2095_v22  ;;  %6241 = vmatmul.mubr.msk.f32.vlgmr.msra.gmra.mrb[22].mxu1 %vm241_vm0, %v6732_v42 }
 0x177   : > { %5700 = vst.sshfl [vmem:[#allocation2 + $0xe6] sm:$0x1 pattern:$0x73625140] %v2359_v13  ;;  %2452 = vst [vmem:[#allocation2 + $0xd6] sm:$0x1] %v2390_v19  ;;  %v2111_v34 = vrot.slane %v2095_v22, %v6476_v23  ;;  %v2118_v35 = vrot.slane %v2096_v47, %v6476_v23  ;;  %v2126_v9 = vcombine.high %v2104_v57, %v2104_v57  ;;  %6249 = vmatpush3.msra.mxu1 %v2733_v31 }
 0x178   : > { %5682 = vst.sshfl [vmem:[#allocation2 + $0xc5] sm:$0x1 pattern:$0x73625140] %v2088_v15  ;;  %v2393_v36 = vcombine.high %v2389_v26, %v2389_v26  ;;  %2453 = vst [vmem:[#allocation2 + $0xde] sm:$0x1] %v2392_v30  ;;  %v2623_v37 = vrot.slane %v2609_v25, %v6476_v23  ;;  %v2624_v38 = vcombine.high %v2616_v33, %v2616_v33  ;;  %6245 = vmatprep.mubr.msk.f32.mxu0 %vm241_vm0, %v6766_v1 }
 0x179   : > { %5701 = vst.sshfl [vmem:[#allocation2 + $0xee] sm:$0x1 pattern:$0x73625140] %v2361_v16  ;;  %2456 = vst [vmem:[#allocation2 + $0xf6] sm:$0x1] %v2391_v29  ;;  %v2632_v58 = vrot.slane %v2616_v33, %v6476_v23  ;;  %v2125_v40 = vrot.slane %v2097_v27, %v6476_v23  ;;  %v2127_v7 = vcombine.high %v2111_v34, %v2111_v34  ;;  %6246 = vmatmul.mubr.msk.f32.vlgmr.msra.gmra.mrb[24].mxu0 %vm241_vm0, %v6732_v42 }
 0x17a   : > { %5683 = vst.sshfl [vmem:[#allocation2 + $0xcd] sm:$0x1 pattern:$0x73625140] %v2096_v47  ;;  %v2734_v39 = vld [vmem:[#allocation2 + $0x50] sm:$0xff]  ;;  %v2128_v43 = vcombine.high %v2118_v35, %v2118_v35  ;;  %v2625_v28 = vcombine.high %v2623_v37, %v2623_v37  ;;  %v2639_v50 = vrot.slane %v2623_v37, %v6476_v23  ;;  %v2646_v44 = vrot.slane %v2624_v38, %v6476_v23  ;;  %v2735_v48 = vld [vmem:[#allocation2 + $0x58] sm:$0xff] }
 0x17b   : > { %5684 = vst.sshfl [vmem:[#allocation2 + $0xe5] sm:$0x1 pattern:$0x73625140] %v2095_v22  ;;  %2188 = vst [vmem:[#allocation2 + $0xd5] sm:$0x1] %v2126_v9  ;;  %6253 = vmatprep.subr.mxu0 %v2734_v39  ;;  %v2654_v41 = vcombine.high %v2632_v58, %v2632_v58  ;;  %v2129_v45 = vcombine.high %v2125_v40, %v2125_v40  ;;  %6258 = vmatprep.subr.mxu1 %v2735_v48 }
 0x17c   : > { %5714 = vst.sshfl [vmem:[#allocation2 + $0xc7] sm:$0x1 pattern:$0x73625140] %v2616_v33  ;;  %2457 = vst [vmem:[#allocation2 + $0xfe] sm:$0x1] %v2393_v36  ;;  %v2653_v32 = vrot.slane %v2625_v28, %v6476_v23  ;;  %v2655_v20 = vcombine.high %v2639_v50, %v2639_v50  ;;  %v2656_v46 = vcombine.high %v2646_v44, %v2646_v44  ;;  %6254 = vmatpush3.msra.mxu0 %v2734_v39 }
 0x17d   : > { %5685 = vst.sshfl [vmem:[#allocation2 + $0xed] sm:$0x1 pattern:$0x73625140] %v2097_v27  ;;  %2189 = vst [vmem:[#allocation2 + $0xdd] sm:$0x1] %v2128_v43  ;;  %6250 = vmatprep.mubr.msk.f32.mxu1 %vm241_vm0, %v6766_v1  ;;  %6255 = vmatprep.mubr.msk.f32.mxu0 %vm241_vm0, %v6766_v1 }
 0x17e   : > { %5715 = vst.sshfl [vmem:[#allocation2 + $0xcf] sm:$0x1 pattern:$0x73625140] %v2624_v38  ;;  %2192 = vst [vmem:[#allocation2 + $0xf5] sm:$0x1] %v2127_v7  ;;  %v2657_v54 = vcombine.high %v2653_v32, %v2653_v32  ;;  %6251 = vmatmul.mubr.msk.f32.vlgmr.msra.gmra.mrb[24].mxu1 %vm241_vm0, %v6732_v42  ;;  %6256 = vmatmul.mubr.msk.f32.vlgmr.msra.gmra.mrb[26].mxu0 %vm241_vm0, %v6732_v42 }
 0x17f   : > { %5716 = vst.sshfl [vmem:[#allocation2 + $0xe7] sm:$0x1 pattern:$0x73625140] %v2623_v37  ;;  %2716 = vst [vmem:[#allocation2 + $0xd7] sm:$0x1] %v2654_v41  ;;  %6259 = vmatpush3.msra.mxu1 %v2735_v48  ;;  %6260 = vmatprep.mubr.msk.f32.mxu1 %vm241_vm0, %v6766_v1 }
 0x180   : > { %5717 = vst.sshfl [vmem:[#allocation2 + $0xef] sm:$0x1 pattern:$0x73625140] %v2625_v28  ;;  %2193 = vst [vmem:[#allocation2 + $0xfd] sm:$0x1] %v2129_v45  ;;  %6265 = vmatprep.mubr.msk.f32.mxu0 %vm241_vm0, %v6766_v1 }
 0x181   : > { %v2736_v53 = vld [vmem:[#allocation2 + $0x60] sm:$0xff]  ;;  %2717 = vst [vmem:[#allocation2 + $0xdf] sm:$0x1] %v2656_v46  ;;  %2720 = vst [vmem:[#allocation2 + $0xf7] sm:$0x1] %v2655_v20  ;;  %v2737_v23 = vld [vmem:[#allocation2 + $0x68] sm:$0xff] }
 0x182   : > { %6263 = vmatprep.subr.mxu0 %v2736_v53  ;;  %2721 = vst [vmem:[#allocation2 + $0xff] sm:$0x1] %v2657_v54  ;;  %6268 = vmatprep.subr.mxu1 %v2737_v23  ;;  %v2738_v55 = vld [vmem:[#allocation2 + $0x70] sm:$0xff]  ;;  %v2739_v56 = vld [vmem:[#allocation2 + $0x78] sm:$0xff]  ;;  %v2740_v21 = vld [vmem:[#allocation2 + $0x80] sm:$0xff] }
 0x183   : > { %6264 = vmatpush3.msra.mxu0 %v2736_v53  ;;  %6261 = vmatmul.mubr.msk.f32.vlgmr.msra.gmra.mrb[26].mxu1 %vm241_vm0, %v6732_v42  ;;  %v2741_v49 = vld [vmem:[#allocation2 + $0x88] sm:$0xff]  ;;  %v2742_v59 = vld [vmem:[#allocation2 + $0x90] sm:$0xff]  ;;  %v2743_v60 = vld [vmem:[#allocation2 + $0x98] sm:$0xff] }
 0x184   : > { %6273 = vmatprep.subr.mxu0 %v2738_v55  ;;  %6269 = vmatpush3.msra.mxu1 %v2737_v23  ;;  %v2744_v61 = vld [vmem:[#allocation2 + $0xa0] sm:$0xff]  ;;  %v2745_v62 = vld [vmem:[#allocation2 + $0xa8] sm:$0xff]  ;;  %v2746_v63 = vld [vmem:[#allocation2 + $0xb0] sm:$0xff] }
 0x185   : > { %6278 = vmatprep.subr.mxu1 %v2739_v56  ;;  %6266 = vmatmul.mubr.msk.f32.vlgmr.msra.gmra.mrb[28].mxu0 %vm241_vm0, %v6732_v42  ;;  %v2747_v3 = vld [vmem:[#allocation2 + $0xb8] sm:$0xff]  ;;  %v2748_v24 = vld [vmem:[#allocation2 + $0xc0] sm:$0xff]  ;;  %v2749_v4 = vld [vmem:[#allocation2 + $0xc8] sm:$0xff] }
 0x186   : > { %6274 = vmatpush3.msra.mxu0 %v2738_v55  ;;  %6270 = vmatprep.mubr.msk.f32.mxu1 %vm241_vm0, %v6766_v1  ;;  %v2750_v5 = vld [vmem:[#allocation2 + $0xd0] sm:$0xff]  ;;  %v2752_v0 = vld [vmem:[#allocation2 + $0xe0] sm:$0xff] }
 0x187   : > { %6283 = vmatprep.subr.mxu0 %v2740_v21  ;;  %6271 = vmatmul.mubr.msk.f32.vlgmr.msra.gmra.mrb[28].mxu1 %vm241_vm0, %v6732_v42  ;;  %v2753_v10 = vld [vmem:[#allocation2 + $0xe8] sm:$0xff] }
 0x188   : > { %6279 = vmatpush3.msra.mxu1 %v2739_v56  ;;  %6275 = vmatprep.mubr.msk.f32.mxu0 %vm241_vm0, %v6766_v1  ;;  %v2751_v8 = vld [vmem:[#allocation2 + $0xd8] sm:$0xff]  ;;  %v2754_v11 = vld [vmem:[#allocation2 + $0xf0] sm:$0xff] }
 0x189   : > { %6288 = vmatprep.subr.mxu1 %v2741_v49  ;;  %6276 = vmatmul.mubr.msk.f32.vlgmr.msra.gmra.mrb[30].mxu0 %vm241_vm0, %v6732_v42  ;;  %v2755_v12 = vld [vmem:[#allocation2 + $0xf8] sm:$0xff] }
 0x18a   : > { %6284 = vmatpush3.msra.mxu0 %v2740_v21  ;;  %6280 = vmatprep.mubr.msk.f32.mxu1 %vm241_vm0, %v6766_v1 }
 0x18b   : > { %6293 = vmatprep.subr.mxu0 %v2742_v59  ;;  %6281 = vmatmul.mubr.msk.f32.vlgmr.msra.gmra.mrb[30].mxu1 %vm241_vm0, %v6732_v42 }
 0x18c   : > { %6289 = vmatpush3.msra.mxu1 %v2741_v49  ;;  %6285 = vmatprep.mubr.msk.f32.mxu0 %vm241_vm0, %v6766_v1 }
 0x18d   : > { %6298 = vmatprep.subr.mxu1 %v2743_v60  ;;  %6286 = vmatmul.mubr.msk.f32.vlgmr.msra.gmra.mrb[32].mxu0 %vm241_vm0, %v6732_v42 }
 0x18e   : > { %6294 = vmatpush3.msra.mxu0 %v2742_v59  ;;  %6290 = vmatprep.mubr.msk.f32.mxu1 %vm241_vm0, %v6766_v1 }
 0x18f   : > { %6303 = vmatprep.subr.mxu0 %v2744_v61  ;;  %6291 = vmatmul.mubr.msk.f32.vlgmr.msra.gmra.mrb[32].mxu1 %vm241_vm0, %v6732_v42 }
 0x190   : > { %6299 = vmatpush3.msra.mxu1 %v2743_v60  ;;  %6295 = vmatprep.mubr.msk.f32.mxu0 %vm241_vm0, %v6766_v1 }
 0x191   : > { %6308 = vmatprep.subr.mxu1 %v2745_v62  ;;  %6296 = vmatmul.mubr.msk.f32.vlgmr.msra.gmra.mrb[34].mxu0 %vm241_vm0, %v6732_v42 }
 0x192   : > { %6304 = vmatpush3.msra.mxu0 %v2744_v61  ;;  %6300 = vmatprep.mubr.msk.f32.mxu1 %vm241_vm0, %v6766_v1 }
 0x193   : > { %6313 = vmatprep.subr.mxu0 %v2746_v63  ;;  %6301 = vmatmul.mubr.msk.f32.vlgmr.msra.gmra.mrb[34].mxu1 %vm241_vm0, %v6732_v42 }
 0x194   : > { %6309 = vmatpush3.msra.mxu1 %v2745_v62  ;;  %6305 = vmatprep.mubr.msk.f32.mxu0 %vm241_vm0, %v6766_v1 }
 0x195   : > { %6318 = vmatprep.subr.mxu1 %v2747_v3  ;;  %6306 = vmatmul.mubr.msk.f32.vlgmr.msra.gmra.mrb[36].mxu0 %vm241_vm0, %v6732_v42 }
 0x196   : > { %6314 = vmatpush3.msra.mxu0 %v2746_v63  ;;  %6310 = vmatprep.mubr.msk.f32.mxu1 %vm241_vm0, %v6766_v1 }
 0x197   : > { %6323 = vmatprep.subr.mxu0 %v2748_v24  ;;  %6311 = vmatmul.mubr.msk.f32.vlgmr.msra.gmra.mrb[36].mxu1 %vm241_vm0, %v6732_v42 }
 0x198   : > { %6319 = vmatpush3.msra.mxu1 %v2747_v3  ;;  %6315 = vmatprep.mubr.msk.f32.mxu0 %vm241_vm0, %v6766_v1 }
 0x199   : > { %6328 = vmatprep.subr.mxu1 %v2749_v4  ;;  %6316 = vmatmul.mubr.msk.f32.vlgmr.msra.gmra.mrb[38].mxu0 %vm241_vm0, %v6732_v42 }
 0x19a   : > { %6324 = vmatpush3.msra.mxu0 %v2748_v24  ;;  %6320 = vmatprep.mubr.msk.f32.mxu1 %vm241_vm0, %v6766_v1 }
 0x19b   : > { %6333 = vmatprep.subr.mxu0 %v2750_v5  ;;  %6321 = vmatmul.mubr.msk.f32.vlgmr.msra.gmra.mrb[38].mxu1 %vm241_vm0, %v6732_v42 }
 0x19c   : > { %6329 = vmatpush3.msra.mxu1 %v2749_v4  ;;  %6325 = vmatprep.mubr.msk.f32.mxu0 %vm241_vm0, %v6766_v1 }
 0x19d   : > { %6338 = vmatprep.subr.mxu1 %v2751_v8  ;;  %6326 = vmatmul.mubr.msk.f32.vlgmr.msra.gmra.mrb[40].mxu0 %vm241_vm0, %v6732_v42 }
 0x19e   : > { %6334 = vmatpush3.msra.mxu0 %v2750_v5  ;;  %6330 = vmatprep.mubr.msk.f32.mxu1 %vm241_vm0, %v6766_v1 }
 0x19f   : > { %6343 = vmatprep.subr.mxu0 %v2752_v0  ;;  %6331 = vmatmul.mubr.msk.f32.vlgmr.msra.gmra.mrb[40].mxu1 %vm241_vm0, %v6732_v42 }
 0x1a0   : > { %6339 = vmatpush3.msra.mxu1 %v2751_v8  ;;  %6335 = vmatprep.mubr.msk.f32.mxu0 %vm241_vm0, %v6766_v1 }
 0x1a1   : > { %6348 = vmatprep.subr.mxu1 %v2753_v10  ;;  %6336 = vmatmul.mubr.msk.f32.vlgmr.msra.gmra.mrb[42].mxu0 %vm241_vm0, %v6732_v42 }
 0x1a2   : > { %6344 = vmatpush3.msra.mxu0 %v2752_v0  ;;  %6340 = vmatprep.mubr.msk.f32.mxu1 %vm241_vm0, %v6766_v1 }
 0x1a3   : > { %6353 = vmatprep.subr.mxu0 %v2754_v11  ;;  %6341 = vmatmul.mubr.msk.f32.vlgmr.msra.gmra.mrb[42].mxu1 %vm241_vm0, %v6732_v42 }
 0x1a4   : > { %6349 = vmatpush3.msra.mxu1 %v2753_v10  ;;  %6345 = vmatprep.mubr.msk.f32.mxu0 %vm241_vm0, %v6766_v1 }
 0x1a5   : > { %6358 = vmatprep.subr.mxu1 %v2755_v12  ;;  %6346 = vmatmul.mubr.msk.f32.vlgmr.msra.gmra.mrb[44].mxu0 %vm241_vm0, %v6732_v42 }
 0x1a6   : > { %6354 = vmatpush3.msra.mxu0 %v2754_v11  ;;  %6350 = vmatprep.mubr.msk.f32.mxu1 %vm241_vm0, %v6766_v1 }
 0x1a7   : > { %6351 = vmatmul.mubr.msk.f32.vlgmr.msra.gmra.mrb[44].mxu1 %vm241_vm0, %v6732_v42  ;;  %6355 = vmatprep.mubr.msk.f32.mxu0 %vm241_vm0, %v6766_v1 }
 0x1a8   : > { %6359 = vmatpush3.msra.mxu1 %v2755_v12  ;;  %6360 = vmatprep.mubr.msk.f32.mxu1 %vm241_vm0, %v6766_v1 }
 0x1a9   : > { %6356 = vmatmul.mubr.msk.f32.vlgmr.msra.gmra.mrb[46].mxu0 %vm241_vm0, %v6732_v42 }
 0x1ab   : > { %6361 = vmatmul.mubr.msk.f32.vlgmr.msra.gmra.mrb[46].mxu1 %vm241_vm0, %v6732_v42 }
 0x228   : > { %v6207_v13 = vpop.f32.mrb[16].mxu0 }
 0x229   : > { %v2828_v6 = vpop.f32.mrb[17].mxu0 }
 0x22a   : > { %v5919_v52 = vpack.c.bf16 %v6207_v13, %v2828_v6 }
 0x22b   : > { %v6212_v1 = vpop.f32.mrb[16].mxu1 }
 0x22c   : > { %5920 = vst [vmem:[%s6955_s11] sm:$0xff] %v5919_v52   ;;  %v2903_v51 = vpop.f32.mrb[17].mxu1 }
 0x22d   : > { %v5924_v2 = vpack.c.bf16 %v6212_v1, %v2903_v51 }
 0x22f   : > { %6076 = vst [vmem:[%s6955_s11 + $0x8] sm:$0xff] %v5924_v2  }
 0x232   : > { %v6217_v42 = vpop.f32.mrb[18].mxu0 }
 0x233   : > { %v2978_v14 = vpop.f32.mrb[19].mxu0 }
 0x234   : > { %v5929_v15 = vpack.c.bf16 %v6217_v42, %v2978_v14 }
 0x236   : > { %6077 = vst [vmem:[%s6955_s11 + $0x10] sm:$0xff] %v5929_v15  }
 0x237   : > { %v6222_v16 = vpop.f32.mrb[18].mxu1 }
 0x238   : > { %v3053_v17 = vpop.f32.mrb[19].mxu1 }
 0x239   : > { %v5934_v18 = vpack.c.bf16 %v6222_v16, %v3053_v17 }
 0x23b   : > { %6078 = vst [vmem:[%s6955_s11 + $0x18] sm:$0xff] %v5934_v18   ;;  %v6227_v19 = vpop.f32.mrb[20].mxu0 }
 0x23c   : > { %v3128_v22 = vpop.f32.mrb[21].mxu0 }
 0x23d   : > { %v5939_v47 = vpack.c.bf16 %v6227_v19, %v3128_v22 }
 0x23f   : > { %6079 = vst [vmem:[%s6955_s11 + $0x20] sm:$0xff] %v5939_v47  }
 0x242   : > { %v6232_v57 = vpop.f32.mrb[20].mxu1 }
 0x243   : > { %v3203_v25 = vpop.f32.mrb[21].mxu1 }
 0x244   : > { %v5944_v31 = vpack.c.bf16 %v6232_v57, %v3203_v25 }
 0x246   : > { %6080 = vst [vmem:[%s6955_s11 + $0x28] sm:$0xff] %v5944_v31   ;;  %v6237_v26 = vpop.f32.mrb[22].mxu0 }
 0x247   : > { %v3278_v29 = vpop.f32.mrb[23].mxu0 }
 0x248   : > { %v5949_v30 = vpack.c.bf16 %v6237_v26, %v3278_v29 }
 0x249   : > { %v6242_v33 = vpop.f32.mrb[22].mxu1 }
 0x24a   : > { %6081 = vst [vmem:[%s6955_s11 + $0x30] sm:$0xff] %v5949_v30   ;;  %v3353_v27 = vpop.f32.mrb[23].mxu1 }
 0x24b   : > { %v5954_v34 = vpack.c.bf16 %v6242_v33, %v3353_v27 }
 0x24c   : > { %v6247_v35 = vpop.f32.mrb[24].mxu0 }
 0x24d   : > { %v3428_v9 = vpop.f32.mrb[25].mxu0  ;;  %6082 = vst [vmem:[%s6955_s11 + $0x38] sm:$0xff] %v5954_v34  }
 0x24e   : > { %v5959_v37 = vpack.c.bf16 %v6247_v35, %v3428_v9 }
 0x250   : > { %6083 = vst [vmem:[%s6955_s11 + $0x40] sm:$0xff] %v5959_v37  }
 0x251   : > { %v6252_v36 = vpop.f32.mrb[24].mxu1  ;;  %v6257_v39 = vpop.f32.mrb[26].mxu0 }
 0x252   : > { %v3503_v38 = vpop.f32.mrb[25].mxu1  ;;  %v3578_v40 = vpop.f32.mrb[27].mxu0 }
 0x253   : > { %v5964_v58 = vpack.c.bf16 %v6252_v36, %v3503_v38  ;;  %v5969_v43 = vpack.c.bf16 %v6257_v39, %v3578_v40 }
 0x255   : > { %6084 = vst [vmem:[%s6955_s11 + $0x48] sm:$0xff] %v5964_v58   ;;  %6085 = vst [vmem:[%s6955_s11 + $0x50] sm:$0xff] %v5969_v43  }
 0x256   : > { %v6262_v7 = vpop.f32.mrb[26].mxu1 }
 0x257   : > { %v3653_v28 = vpop.f32.mrb[27].mxu1 }
 0x258   : > { %v5974_v50 = vpack.c.bf16 %v6262_v7, %v3653_v28  ;;  %v6267_v44 = vpop.f32.mrb[28].mxu0 }
 0x259   : > { %v3728_v41 = vpop.f32.mrb[29].mxu0 }
 0x25a   : > { %6086 = vst [vmem:[%s6955_s11 + $0x58] sm:$0xff] %v5974_v50   ;;  %v6272_v45 = vpop.f32.mrb[28].mxu1  ;;  %v5979_v48 = vpack.c.bf16 %v6267_v44, %v3728_v41 }
 0x25b   : > { %v3803_v32 = vpop.f32.mrb[29].mxu1 }
 0x25c   : > { %6087 = vst [vmem:[%s6955_s11 + $0x60] sm:$0xff] %v5979_v48   ;;  %v5984_v20 = vpack.c.bf16 %v6272_v45, %v3803_v32  ;;  %v6277_v46 = vpop.f32.mrb[30].mxu0 }
 0x25d   : > { %v3878_v53 = vpop.f32.mrb[31].mxu0 }
 0x25e   : > { %6088 = vst [vmem:[%s6955_s11 + $0x68] sm:$0xff] %v5984_v20   ;;  %v6282_v54 = vpop.f32.mrb[30].mxu1  ;;  %v5989_v23 = vpack.c.bf16 %v6277_v46, %v3878_v53 }
 0x25f   : > { %v3953_v55 = vpop.f32.mrb[31].mxu1 }
 0x260   : > { %6089 = vst [vmem:[%s6955_s11 + $0x70] sm:$0xff] %v5989_v23   ;;  %v5994_v56 = vpack.c.bf16 %v6282_v54, %v3953_v55  ;;  %v6287_v21 = vpop.f32.mrb[32].mxu0 }
 0x261   : > { %v4028_v49 = vpop.f32.mrb[33].mxu0 }
 0x262   : > { %6090 = vst [vmem:[%s6955_s11 + $0x78] sm:$0xff] %v5994_v56   ;;  %v6292_v59 = vpop.f32.mrb[32].mxu1  ;;  %v5999_v60 = vpack.c.bf16 %v6287_v21, %v4028_v49 }
 0x263   : > { %v4103_v61 = vpop.f32.mrb[33].mxu1 }
 0x264   : > { %6091 = vst [vmem:[%s6955_s11 + $0x80] sm:$0xff] %v5999_v60   ;;  %v6004_v62 = vpack.c.bf16 %v6292_v59, %v4103_v61  ;;  %v6297_v63 = vpop.f32.mrb[34].mxu0 }
 0x265   : > { %v4178_v3 = vpop.f32.mrb[35].mxu0 }
 0x266   : > { %6092 = vst [vmem:[%s6955_s11 + $0x88] sm:$0xff] %v6004_v62   ;;  %v6302_v24 = vpop.f32.mrb[34].mxu1  ;;  %v6009_v4 = vpack.c.bf16 %v6297_v63, %v4178_v3 }
 0x267   : > { %v4253_v5 = vpop.f32.mrb[35].mxu1 }
 0x268   : > { %6093 = vst [vmem:[%s6955_s11 + $0x90] sm:$0xff] %v6009_v4   ;;  %v6014_v8 = vpack.c.bf16 %v6302_v24, %v4253_v5  ;;  %v6307_v0 = vpop.f32.mrb[36].mxu0 }
 0x269   : > { %v4328_v10 = vpop.f32.mrb[37].mxu0 }
 0x26a   : > { %6094 = vst [vmem:[%s6955_s11 + $0x98] sm:$0xff] %v6014_v8   ;;  %v6312_v11 = vpop.f32.mrb[36].mxu1  ;;  %v6019_v12 = vpack.c.bf16 %v6307_v0, %v4328_v10 }
 0x26b   : > { %v4403_v13 = vpop.f32.mrb[37].mxu1 }
 0x26c   : > { %6095 = vst [vmem:[%s6955_s11 + $0xa0] sm:$0xff] %v6019_v12   ;;  %v6024_v6 = vpack.c.bf16 %v6312_v11, %v4403_v13  ;;  %v6317_v52 = vpop.f32.mrb[38].mxu0 }
 0x26d   : > { %v4478_v1 = vpop.f32.mrb[39].mxu0 }
 0x26e   : > { %6096 = vst [vmem:[%s6955_s11 + $0xa8] sm:$0xff] %v6024_v6   ;;  %v6322_v51 = vpop.f32.mrb[38].mxu1  ;;  %v6029_v2 = vpack.c.bf16 %v6317_v52, %v4478_v1 }
 0x26f   : > { %v4553_v42 = vpop.f32.mrb[39].mxu1 }
 0x270   : > { %6097 = vst [vmem:[%s6955_s11 + $0xb0] sm:$0xff] %v6029_v2   ;;  %v6034_v14 = vpack.c.bf16 %v6322_v51, %v4553_v42  ;;  %v6327_v15 = vpop.f32.mrb[40].mxu0 }
 0x271   : > { %v4628_v16 = vpop.f32.mrb[41].mxu0 }
 0x272   : > { %6098 = vst [vmem:[%s6955_s11 + $0xb8] sm:$0xff] %v6034_v14   ;;  %v6332_v17 = vpop.f32.mrb[40].mxu1  ;;  %v6039_v18 = vpack.c.bf16 %v6327_v15, %v4628_v16 }
 0x273   : > { %v4703_v19 = vpop.f32.mrb[41].mxu1 }
 0x274   : > { %6099 = vst [vmem:[%s6955_s11 + $0xc0] sm:$0xff] %v6039_v18   ;;  %v6044_v22 = vpack.c.bf16 %v6332_v17, %v4703_v19  ;;  %v6337_v47 = vpop.f32.mrb[42].mxu0 }
 0x275   : > { %v4778_v57 = vpop.f32.mrb[43].mxu0 }
 0x276   : > { %6100 = vst [vmem:[%s6955_s11 + $0xc8] sm:$0xff] %v6044_v22   ;;  %v6342_v25 = vpop.f32.mrb[42].mxu1  ;;  %v6049_v31 = vpack.c.bf16 %v6337_v47, %v4778_v57 }
 0x277   : > { %v4853_v26 = vpop.f32.mrb[43].mxu1 }
 0x278   : > { %6101 = vst [vmem:[%s6955_s11 + $0xd0] sm:$0xff] %v6049_v31   ;;  %v6054_v29 = vpack.c.bf16 %v6342_v25, %v4853_v26  ;;  %v6347_v30 = vpop.f32.mrb[44].mxu0 }
 0x279   : > { %v4928_v33 = vpop.f32.mrb[45].mxu0 }
 0x27a   : > { %6102 = vst [vmem:[%s6955_s11 + $0xd8] sm:$0xff] %v6054_v29   ;;  %v6352_v27 = vpop.f32.mrb[44].mxu1  ;;  %v6059_v34 = vpack.c.bf16 %v6347_v30, %v4928_v33 }
 0x27b   : > { %v5003_v35 = vpop.f32.mrb[45].mxu1 }
 0x27c   : > { %6103 = vst [vmem:[%s6955_s11 + $0xe0] sm:$0xff] %v6059_v34   ;;  %v6064_v9 = vpack.c.bf16 %v6352_v27, %v5003_v35  ;;  %v6357_v36 = vpop.f32.mrb[46].mxu0 }
 0x27d   : > { %v5078_v37 = vpop.f32.mrb[47].mxu0 }
 0x27e   : > { %6104 = vst [vmem:[%s6955_s11 + $0xe8] sm:$0xff] %v6064_v9   ;;  %v6362_v38 = vpop.f32.mrb[46].mxu1  ;;  %v6069_v58 = vpack.c.bf16 %v6357_v36, %v5078_v37 }
 0x27f   : > { %v5153_v39 = vpop.f32.mrb[47].mxu1 }
 0x280   : > { %6105 = vst [vmem:[%s6955_s11 + $0xf0] sm:$0xff] %v6069_v58   ;;  %v6074_v40 = vpack.c.bf16 %v6362_v38, %v5153_v39 }
 0x282   : > { %6106 = vst [vmem:[%s6955_s11 + $0xf8] sm:$0xff] %v6074_v40  }
 0x283 PF: > { %s20_s20 = sadd.s32 1, %s6395_s20  }
 0x284   : > { %p17_p10 = scmp.ge.s32.totalorder %s20_s20, 5  }
 0x286   :  { %19 = sbr.rel (!%p17_p10) target bundleno = 16 (0x10), region = 68 }

// kernel: person_search_query.9
= control target key start
LH: loop header
LB: loop body
LE: loop exit
PB: predicated region body
PF: predicated region fallthrough
CT: control target
= control target key end

     0   :  { %s2978_s12 = smov 0   ;;  %s2980_s13 = smov 0   ;;  %s3686_s0 = inlined_call_operand.vmem [shape: bf16[3,34,18,128], index: 0, kind: input, shape index: {}]   ;;  %s3687_s1 = inlined_call_operand.vmem [shape: bf16[1152,128], index: 1, kind: input, shape index: {}]   ;;  %s3688_s2 = inlined_call_operand.vmem [shape: f32[1,128], index: 2, kind: input, shape index: {}]   ;;  %s3689_s3 = inlined_call_operand.vmem [shape: f32[3,1,128], index: 3, kind: output, shape index: {}]  }
   0x1   :  { %s2982_s14 = smov 0   ;;  %s2984_s15 = smov 0  }
   0x2   :  { %s2986_s16 = smov 0  }
   0x3 LB: > { %s22_s17 = sadd.s32 1, %s2947_s14  ;;  %s25_s18 = sadd.s32 1, %s2951_s15  ;;  %s2955_s16 = sphi %s2986_s16, %s13_s16   ;;  %s2951_s15 = sphi %s2984_s15, %s3693_s15   ;;  %s2947_s14 = sphi %s2982_s14, %s3692_s14   ;;  %s2943_s13 = sphi %s2980_s13, %s3691_s13   ;;  %s2939_s12 = sphi %s2978_s12, %s3690_s12  }
   0x4   : > { %p23_p0 = scmp.ge.s32.totalorder %s22_s17, 4  ;;  %p2186_p1 = scmp.ge.s32.totalorder %s2955_s16, 1 }
   0x5   : > { %p149_p2 = scmp.lt.s32.totalorder %s2955_s16, 13 }
   0x6   : > { %s3695_s17 = smov (%p23_p0, %s22_s17), 0  ;;  %s3697_s18 = smov (!%p23_p0, %s25_s18), %s2951_s15 }
   0x7   : > { %p150_p3 = pnand %p2186_p1, %p149_p2  ;;  %p27_p4 = scmp.ge.s32.totalorder %s3697_s18, 3 }
   0x8   : > { %p171_p5 = scmp.lt.s32.totalorder (!%p150_p3), %s2943_s13, 2  ;;  %p2188_p6 = scmp.ne.s32.totalorder (!%p150_p3), %s2939_s12, 0 }
   0x9   : > { %s3699_s18 = smov (%p27_p4, %s3697_s18), 0  ;;  %153 = sbr.rel (%p150_p3) target bundleno = 619 (0x26b), region = 32 }
  0x10   : > { %s3701_s13 = smov (!%p171_p5, %s2943_s13), 2  ;;  %183 = sbr.rel (%p2188_p6) target bundleno = 23 (0x17), region = 36 }
  0x11   : > { %s2729_s19 = smul.u32 408, %s3701_s13  ;;  %s178_s22 = scalar_lea.vmem %s3689_s3, %s3701_s13  ;;  %v2957_v0 = vmov (!%p2188_p6), 0.0  }
  0x12   : > { %184 = vst [vmem:[#allocation2] sm:$0x1] (!%p2188_p6), %v2957_v0 }
  0x13   : > { %s3020_s25 = scalar_lea.vmem %s3686_s0, %s2729_s19 }
  0x17 PF: > { %v2771_v1 = vld [vmem:[%s3687_s1 + $0x40] sm:$0xff]   ;;  %v2775_v5 = vld [vmem:[%s3687_s1 + $0x48] sm:$0xff]   ;;  %v2779_v9 = vld [vmem:[%s3687_s1 + $0x50] sm:$0xff]   ;;  %s2408_s23 = smul.u32 96, %s2939_s12  ;;  %vm494_vm0 = vcmask 1046528   ;;  %p2405_p7 = scmp.ne.s32.totalorder %s2939_s12, 3 }
  0x18   : > { %v2772_v2 = vld [vmem:[%s3687_s1 + $0xc0] sm:$0xff]   ;;  %2409 = vmatprep.subr.bf16.mxu0 %v2771_v1  ;;  %v2776_v6 = vld [vmem:[%s3687_s1 + $0xc8] sm:$0xff]   ;;  %v2780_v10 = vld [vmem:[%s3687_s1 + $0xd0] sm:$0xff]   ;;  %vm365_vm1 = vsmask.f32 7424  ;;  %vm2106_vm2 = vcmask (!%p2405_p7), 1040384  }
  0x19   : > { %v2773_v3 = vld [vmem:[%s3687_s1] sm:$0xff]   ;;  %2473 = vmatprep.subr.bf16.mxu1 %v2772_v2  ;;  %v2777_v7 = vld [vmem:[%s3687_s1 + $0x8] sm:$0xff]   ;;  %v2781_v11 = vld [vmem:[%s3687_s1 + $0x10] sm:$0xff]   ;;  %s3115_s6 = scalar_lea.vmem %s3020_s25, %s2408_s23 }
  0x1a   : > { %v2774_v4 = vld [vmem:[%s3687_s1 + $0x80] sm:$0xff]   ;;  %2410 = vmatpush3.bf16.msra.mxu0 %v2773_v3  ;;  %v2778_v8 = vld [vmem:[%s3687_s1 + $0x88] sm:$0xff]   ;;  %v2782_v12 = vld [vmem:[%s3687_s1 + $0x90] sm:$0xff]  }
  0x1b   : > { %2474 = vmatpush3.bf16.msra.mxu1 %v2774_v4  ;;  %2411 = vmatprep.subr.bf16.mxu0 %v2775_v5  ;;  %v2783_v13 = vld [vmem:[%s3687_s1 + $0x58] sm:$0xff]   ;;  %v2787_v17 = vld [vmem:[%s3687_s1 + $0x60] sm:$0xff]   ;;  %v2791_v21 = vld [vmem:[%s3687_s1 + $0x68] sm:$0xff]  }
  0x1c   : > { %2475 = vmatprep.subr.bf16.mxu1 %v2776_v6  ;;  %v2784_v14 = vld [vmem:[%s3687_s1 + $0xd8] sm:$0xff]   ;;  %v2788_v18 = vld [vmem:[%s3687_s1 + $0xe0] sm:$0xff]   ;;  %v2792_v22 = vld [vmem:[%s3687_s1 + $0xe8] sm:$0xff]  }
  0x1d   : > { %v2785_v15 = vld [vmem:[%s3687_s1 + $0x18] sm:$0xff]   ;;  %v2789_v19 = vld [vmem:[%s3687_s1 + $0x20] sm:$0xff]   ;;  %v2793_v23 = vld [vmem:[%s3687_s1 + $0x28] sm:$0xff]  }
  0x1e   : > { %2412 = vmatpush3.bf16.msra.mxu0 %v2777_v7  ;;  %v2786_v16 = vld [vmem:[%s3687_s1 + $0x98] sm:$0xff]   ;;  %v2790_v20 = vld [vmem:[%s3687_s1 + $0xa0] sm:$0xff]   ;;  %v2794_v24 = vld [vmem:[%s3687_s1 + $0xa8] sm:$0xff]  }
  0x1f   : > { %2476 = vmatpush3.bf16.msra.mxu1 %v2778_v8  ;;  %2413 = vmatprep.subr.bf16.mxu0 %v2779_v9  ;;  %v2795_v25 = vld [vmem:[%s3687_s1 + $0x70] sm:$0xff]   ;;  %v2799_v29 = vld [vmem:[%s3687_s1 + $0x78] sm:$0xff]   ;;  %v189_v33 = vld [vmem:[%s3115_s6] sm:$0xf] }
  0x20   : > { %2477 = vmatprep.subr.bf16.mxu1 %v2780_v10  ;;  %v2796_v26 = vld [vmem:[%s3687_s1 + $0xf0] sm:$0xff]   ;;  %v2800_v30 = vld [vmem:[%s3687_s1 + $0xf8] sm:$0xff]   ;;  %v190_v34 = vld [vmem:[%s3115_s6 + $0x4] sm:$0xf] }
  0x21   : > { %v2797_v27 = vld [vmem:[%s3687_s1 + $0x30] sm:$0xff]   ;;  %v2801_v31 = vld [vmem:[%s3687_s1 + $0x38] sm:$0xff]   ;;  %v2260_v35 = vcombine.low %v189_v33, %v190_v34  ;;  %v2804_v36 = vld [vmem:[%s3115_s6 + $0x8] ss:$0 sps:$4 sm:$0x11]  }
  0x22   : > { %2414 = vmatpush3.bf16.msra.mxu0 %v2781_v11  ;;  %v2798_v28 = vld [vmem:[%s3687_s1 + $0xb0] sm:$0xff]   ;;  %v2802_v32 = vld [vmem:[%s3687_s1 + $0xb8] sm:$0xff]   ;;  %v2808_v37 = vld [vmem:[%s3687_s1 + $0x140] sm:$0xff]   ;;  %v374_v42 = vshll.u32 %v2804_v36, 16  ;;  %v496_v46 = vrot.slane %v2804_v36, 1 }
  0x23   : > { %2478 = vmatpush3.bf16.msra.mxu1 %v2782_v12  ;;  %2415 = vmatprep.subr.bf16.mxu0 %v2783_v13  ;;  %v2194_v38 = vld [vmem:[%s3115_s6 + $0xc] sm:$0xf]  ;;  %v3131_v39 = vld [vmem:[%s3115_s6 + $0x10] sm:$0xf]  ;;  %v367_v40 = vshrl.u32 %v2260_v35, 16  ;;  %v369_v41 = vshll.u32 %v2260_v35, 16 }
  0x24   : > { %2479 = vmatprep.subr.bf16.mxu1 %v2784_v14  ;;  %v3134_v43 = vcombine.low %v2194_v38, %v3131_v39  ;;  %v213_v44 = vld [vmem:[%s3115_s6] sm:$0xe]  ;;  %v376_v48 = vrot.slane %v374_v42, 1  ;;  %v191_v50 = vld [vmem:[%s3115_s6 + $0xc] sm:$0xf]  ;;  %v2833_v33 = vld [vmem:[%s3687_s1 + $0x118] sm:$0xff]  }
  0x25   : > { %v2276_v45 = vcombine.low %v213_v44, %v190_v34  ;;  %v371_v47 = vrot.slane %v369_v41, 1  ;;  %v2809_v52 = vld [vmem:[%s3687_s1 + $0x100] sm:$0xff]   ;;  %v192_v53 = vld [vmem:[%s3115_s6 + $0x10] sm:$0xf]  ;;  %v2196_v57 = vld [vmem:[%s3115_s6 + $0x18] sm:$0xf] }
  0x26   : > { %2416 = vmatpush3.bf16.msra.mxu0 %v2785_v15  ;;  %1703 = vmatprep.mubr.bf16.mxu1 %v3134_v43  ;;  %v2261_v55 = vcombine.low %v191_v50, %v192_v53  ;;  %v2811_v56 = vld [vmem:[%s3115_s6 + $0x14] ss:$0 sps:$4 sm:$0x11]   ;;  %v2823_v58 = vld [vmem:[%s3687_s1 + $0x1c0] sm:$0xff]   ;;  %v3151_v60 = vld [vmem:[%s3115_s6 + $0x1c] sm:$0xf] }
  0x27   : > { %2480 = vmatpush3.bf16.msra.mxu1 %v2786_v16  ;;  %2417 = vmatprep.subr.bf16.mxu0 %v2787_v17  ;;  %v495_v49 = vrot.slane %v2276_v45, 1  ;;  %v372_v51 = vor.u32 %v371_v47, %v367_v40  ;;  %v214_v61 = vld [vmem:[%s3115_s6 + $0xc] sm:$0xe]  ;;  %v386_v1 = vshll.u32 %v2811_v56, 16  ;;  %v3158_v2 = vcombine.low %v2196_v57, %v3151_v60  ;;  %v2825_v5 = vld [vmem:[%s3687_s1 + $0x180] sm:$0xff]   ;;  %v2822_v16 = vld [vmem:[%s3687_s1 + $0x150] sm:$0xff]  }
  0x28   : > { %2481 = vmatprep.subr.bf16.mxu1 %v2788_v18  ;;  %v2815_v62 = vld [vmem:[%s3687_s1 + $0x148] sm:$0xff]   ;;  %v379_v63 = vshrl.u32 %v2261_v55, 16  ;;  %v381_v0 = vshll.u32 %v2261_v55, 16  ;;  %v2277_v3 = vcombine.low %v214_v61, %v192_v53  ;;  %v499_v4 = vrot.slane %v2811_v56, 1  ;;  %v193_v10 = vld [vmem:[%s3115_s6 + $0x18] sm:$0xf] }
  0x29   : > { %v497_v54 = vsel %vm494_vm0, %v495_v49, %v496_v46  ;;  %v377_v59 = vsel %vm365_vm1, %v372_v51, %v376_v48  ;;  %v388_v7 = vrot.slane %v386_v1, 1  ;;  %v2816_v8 = vld [vmem:[%s3687_s1 + $0x108] sm:$0xff]   ;;  %v194_v11 = vld [vmem:[%s3115_s6 + $0x1c] sm:$0xf]  ;;  %v2198_v18 = vld [vmem:[%s3115_s6 + $0x24] sm:$0xf] }
  0x2a   : > { %2418 = vmatpush3.bf16.msra.mxu0 %v2789_v19  ;;  %1606 = vmatprep.mubr.bf16.mxu0 %v377_v59  ;;  %v383_v6 = vrot.slane %v381_v0, 1  ;;  %v498_v9 = vrot.slane %v2277_v3, 1  ;;  %v2832_v12 = vld [vmem:[%s3687_s1 + $0x1c8] sm:$0xff]   ;;  %v2262_v14 = vcombine.low %v193_v10, %v194_v11  ;;  %v2818_v15 = vld [vmem:[%s3115_s6 + $0x20] ss:$0 sps:$4 sm:$0x11]  }
  0x2b   : > { %2482 = vmatpush3.bf16.msra.mxu1 %v2790_v20  ;;  %2419 = vmatprep.subr.bf16.mxu0 %v2791_v21  ;;  %v3179_v19 = vld [vmem:[%s3115_s6 + $0x28] sm:$0xf]  ;;  %v2824_v20 = vld [vmem:[%s3687_s1 + $0x110] sm:$0xff]   ;;  %v2827_v45 = vld [vmem:[%s3115_s6 + $0x2c] ss:$0 sps:$4 sm:$0x11]  }
  0x2c   : > { %2483 = vmatprep.subr.bf16.mxu1 %v2792_v22  ;;  %v384_v13 = vor.u32 %v383_v6, %v379_v63  ;;  %v500_v17 = vsel %vm494_vm0, %v498_v9, %v499_v4  ;;  %v391_v22 = vshrl.u32 %v2262_v14, 16  ;;  %v196_v38 = vld [vmem:[%s3115_s6 + $0x28] sm:$0xf]  ;;  %v2200_v40 = vld [vmem:[%s3115_s6 + $0x30] sm:$0xf]  ;;  %v2842_v53 = vld [vmem:[%s3687_s1 + $0x120] sm:$0xff]  }
  0x2d   : > { %v3209_v46 = vld [vmem:[%s3115_s6 + $0x34] sm:$0xf]  ;;  %v216_v49 = vld [vmem:[%s3115_s6 + $0x24] sm:$0xe]  ;;  %v2202_v3 = vld [vmem:[%s3115_s6 + $0x3c] sm:$0xf] }
  0x2e   : > { %2420 = vmatpush3.bf16.msra.mxu0 %v2793_v23  ;;  %v389_v21 = vsel %vm365_vm1, %v384_v13, %v388_v7  ;;  %v393_v23 = vshll.u32 %v2262_v14, 16  ;;  %v2841_v47 = vld [vmem:[%s3687_s1 + $0x1d0] sm:$0xff]   ;;  %v3215_v48 = vcombine.low %v2200_v40, %v3209_v46  ;;  %v2836_v1 = vld [vmem:[%s3115_s6 + $0x38] ss:$0 sps:$4 sm:$0x11]   ;;  %v2849_v4 = vld [vmem:[%s3687_s1 + $0x168] sm:$0xff]  }
  0x2f   : > { %2484 = vmatpush3.bf16.msra.mxu1 %v2794_v24  ;;  %2421 = vmatprep.subr.bf16.mxu0 %v2795_v25  ;;  %v398_v24 = vshll.u32 %v2818_v15, 16  ;;  %v215_v25 = vld [vmem:[%s3115_s6 + $0x18] sm:$0xe]  ;;  %v2843_v59 = vld [vmem:[%s3687_s1 + $0x190] sm:$0xff]   ;;  %v3235_v7 = vld [vmem:[%s3115_s6 + $0x40] sm:$0xf] }
  0x30   : > { %2485 = vmatprep.subr.bf16.mxu1 %v2796_v26  ;;  %v2834_v26 = vld [vmem:[%s3687_s1 + $0x188] sm:$0xff]   ;;  %v198_v63 = vld [vmem:[%s3115_s6 + $0x34] sm:$0xf]  ;;  %v2850_v13 = vld [vmem:[%s3687_s1 + $0x1d8] sm:$0xff]  }
  0x31   : > { %v2860_v40 = vld [vmem:[%s3687_s1 + $0x130] sm:$0xff]  }
  0x32   : > { %2422 = vmatpush3.bf16.msra.mxu0 %v2797_v27  ;;  %v3190_v27 = vcombine.low %v2198_v18, %v3179_v19  ;;  %v508_v18 = vrot.slane %v2836_v1, 1 }
  0x33   : > { %2486 = vmatpush3.bf16.msra.mxu1 %v2798_v28  ;;  %2423 = vmatprep.subr.bf16.mxu0 %v2799_v29  ;;  %v2278_v28 = vcombine.low %v215_v25, %v194_v11  ;;  %v502_v29 = vrot.slane %v2818_v15, 1  ;;  %v422_v11 = vshll.u32 %v2836_v1, 16  ;;  %v2851_v15 = vld [vmem:[%s3687_s1 + $0x128] sm:$0xff]   ;;  %v200_v25 = vld [vmem:[%s3115_s6 + $0x40] sm:$0xf] }
  0x34   : > { %2487 = vmatprep.subr.bf16.mxu1 %v2800_v30  ;;  %v2831_v30 = vld [vmem:[%s3687_s1 + $0x158] sm:$0xff]  }
  0x35   : > { %v501_v34 = vrot.slane %v2278_v28, 1 }
  0x36   : > { %2424 = vmatpush3.bf16.msra.mxu0 %v2801_v31  ;;  %v395_v31 = vrot.slane %v393_v23, 1 }
  0x37   : > { %2488 = vmatpush3.bf16.msra.mxu1 %v2802_v32  ;;  %2537 = vmatprep.subr.bf16.mxu0 %v2808_v37  ;;  %v400_v32 = vrot.slane %v398_v24, 1  ;;  %v195_v37 = vld [vmem:[%s3115_s6 + $0x24] sm:$0xf]  ;;  %v503_v42 = vsel %vm494_vm0, %v501_v34, %v502_v29  ;;  %v199_v24 = vld [vmem:[%s3115_s6 + $0x3c] sm:$0xf] }
  0x38   : > { %2601 = vmatprep.subr.bf16.mxu1 %v2823_v58  ;;  %v396_v36 = vor.u32 %v395_v31, %v391_v22  ;;  %v2263_v44 = vcombine.low %v195_v37, %v196_v38  ;;  %v2858_v22 = vld [vmem:[%s3687_s1 + $0x170] sm:$0xff]   ;;  %v2265_v29 = vcombine.low %v199_v24, %v200_v25  ;;  %v3260_v31 = vld [vmem:[%s3115_s6 + $0x4c] sm:$0xf] }
  0x39   : > { %1607 = vmatmul.mubr.bf16.vlgmr.msra.gmra.mrb[0].mxu0 %v2260_v35  ;;  %v2840_v35 = vld [vmem:[%s3687_s1 + $0x160] sm:$0xff]  }
  0x3a   : > { %1704 = vmatmul.mubr.bf16.vlgmr.msra.gmra.mrb[0].mxu1 %v497_v54  ;;  %2538 = vmatpush3.bf16.msra.mxu0 %v2809_v52  ;;  %v401_v41 = vsel %vm365_vm1, %v396_v36, %v400_v32  ;;  %v403_v50 = vshrl.u32 %v2263_v44, 16  ;;  %v405_v51 = vshll.u32 %v2263_v44, 16  ;;  %v410_v52 = vshll.u32 %v2827_v45, 16  ;;  %v2859_v32 = vld [vmem:[%s3687_s1 + $0x1e0] sm:$0xff]  }
  0x3b   : > { %1711 = vmatprep.mubr.bf16.mxu1 %v3158_v2  ;;  %2539 = vmatprep.subr.bf16.mxu0 %v2815_v62  ;;  %v2279_v54 = vcombine.low %v216_v49, %v196_v38  ;;  %v197_v62 = vld [vmem:[%s3115_s6 + $0x30] sm:$0xf]  ;;  %v427_v36 = vshrl.u32 %v2265_v29, 16  ;;  %v429_v37 = vshll.u32 %v2265_v29, 16  ;;  %v2861_v49 = vld [vmem:[%s3687_s1 + $0x1a0] sm:$0xff]  }
  0x3c   : > { %2602 = vmatpush3.bf16.msra.mxu1 %v2825_v5  ;;  %1614 = vmatprep.mubr.bf16.mxu0 %v389_v21  ;;  %v407_v56 = vrot.slane %v405_v51, 1  ;;  %v412_v57 = vrot.slane %v410_v52, 1  ;;  %v2264_v0 = vcombine.low %v197_v62, %v198_v63  ;;  %v201_v51 = vld [vmem:[%s3115_s6 + $0x48] sm:$0xf]  ;;  %v202_v52 = vld [vmem:[%s3115_s6 + $0x4c] sm:$0xf] }
  0x3d   : > { %2603 = vmatprep.subr.bf16.mxu1 %v2832_v12  ;;  %v504_v58 = vrot.slane %v2279_v54, 1  ;;  %v3239_v12 = vcombine.low %v2202_v3, %v3235_v7  ;;  %v2854_v54 = vld [vmem:[%s3115_s6 + $0x50] ss:$0 sps:$4 sm:$0x11]   ;;  %v2863_v3 = vld [vmem:[%s3687_s1 + $0x1a8] sm:$0xff]  }
  0x3e   : > { %2540 = vmatpush3.bf16.msra.mxu0 %v2816_v8  ;;  %v408_v61 = vor.u32 %v407_v56, %v403_v50  ;;  %v217_v8 = vld [vmem:[%s3115_s6 + $0x30] sm:$0xe]  ;;  %v415_v9 = vshrl.u32 %v2264_v0, 16  ;;  %v417_v10 = vshll.u32 %v2264_v0, 16  ;;  %v2862_v56 = vld [vmem:[%s3687_s1 + $0x1e8] sm:$0xff]  }
  0x3f   : > { %2541 = vmatprep.subr.bf16.mxu0 %v2822_v16 }
  0x40   : > { %2604 = vmatpush3.bf16.msra.mxu1 %v2834_v26  ;;  %v413_v5 = vsel %vm365_vm1, %v408_v61, %v412_v57  ;;  %v419_v16 = vrot.slane %v417_v10, 1  ;;  %v2204_v26 = vld [vmem:[%s3115_s6 + $0x48] sm:$0xf]  ;;  %v2870_v10 = vld [vmem:[%s3687_s1 + $0x1f0] sm:$0xff]  }
  0x41   : > { %1615 = vmatmul.mubr.bf16.gmra.mrb[4].mxu0 %v2261_v55  ;;  %2605 = vmatprep.subr.bf16.mxu1 %v2841_v47  ;;  %v505_v55 = vrot.slane %v2827_v45, 1  ;;  %v3267_v34 = vcombine.low %v2204_v26, %v3260_v31  ;;  %v219_v61 = vld [vmem:[%s3115_s6 + $0x48] sm:$0xe]  ;;  %v220_v26 = vld [vmem:[%s3115_s6 + $0x54] sm:$0xe] }
  0x42   : > { %1712 = vmatmul.mubr.bf16.gmra.mrb[4].mxu1 %v500_v17  ;;  %2542 = vmatpush3.bf16.msra.mxu0 %v2824_v20  ;;  %v424_v17 = vrot.slane %v422_v11, 1  ;;  %v2852_v20 = vld [vmem:[%s3687_s1 + $0x198] sm:$0xff]   ;;  %v420_v23 = vor.u32 %v419_v16, %v415_v9  ;;  %v514_v9 = vrot.slane %v2854_v54, 1 }
  0x43   : > { %1719 = vmatprep.mubr.bf16.mxu1 %v3190_v27  ;;  %2543 = vmatprep.subr.bf16.mxu0 %v2831_v30  ;;  %v506_v6 = vsel %vm494_vm0, %v504_v58, %v505_v55  ;;  %v2845_v30 = vld [vmem:[%s3115_s6 + $0x44] ss:$0 sps:$4 sm:$0x11]   ;;  %v2206_v55 = vld [vmem:[%s3115_s6 + $0x54] sm:$0xf] }
  0x44   : > { %1622 = vmatprep.mubr.bf16.mxu0 %v401_v41  ;;  %2606 = vmatpush3.bf16.msra.mxu1 %v2843_v59  ;;  %v425_v28 = vsel %vm365_vm1, %v420_v23, %v424_v17  ;;  %v434_v38 = vshll.u32 %v2845_v30, 16  ;;  %v3289_v59 = vld [vmem:[%s3115_s6 + $0x58] sm:$0xf]  ;;  %v203_v17 = vld [vmem:[%s3115_s6 + $0x54] sm:$0xf] }
  0x45   : > { %2607 = vmatprep.subr.bf16.mxu1 %v2850_v13  ;;  %v3295_v1 = vcombine.low %v2206_v55, %v3289_v59  ;;  %v2871_v13 = vld [vmem:[%s3687_s1 + $0x138] sm:$0xff]   ;;  %v2872_v23 = vld [vmem:[%s3687_s1 + $0x1b0] sm:$0xff]  }
  0x46   : > { %2544 = vmatpush3.bf16.msra.mxu0 %v2833_v33  ;;  %v436_v45 = vrot.slane %v434_v38, 1  ;;  %v2874_v38 = vld [vmem:[%s3687_s1 + $0x1b8] sm:$0xff]  }
  0x47   : > { %2545 = vmatprep.subr.bf16.mxu0 %v2840_v35  ;;  %v218_v35 = vld [vmem:[%s3115_s6 + $0x3c] sm:$0xe]  ;;  %v2228_v55 = vld [vmem:[%s3115_s6 + $0x18] sm:$0xf] }
  0x48   : > { %2608 = vmatpush3.bf16.msra.mxu1 %v2852_v20  ;;  %v2281_v41 = vcombine.low %v218_v35, %v200_v25  ;;  %v3321_v25 = vld [vmem:[%s3115_s6 + $0x64] sm:$0xf]  ;;  %v600_v35 = vshrl.u32 %v3134_v43, 16 }
  0x49   : > { %1623 = vmatmul.mubr.bf16.gmra.mrb[8].mxu0 %v2262_v14  ;;  %v2280_v14 = vcombine.low %v217_v8, %v198_v63  ;;  %2609 = vmatprep.subr.bf16.mxu1 %v2859_v32 }
  0x4a   : > { %1720 = vmatmul.mubr.bf16.gmra.mrb[8].mxu1 %v503_v42  ;;  %2546 = vmatpush3.bf16.msra.mxu0 %v2842_v53  ;;  %v511_v42 = vrot.slane %v2845_v30, 1  ;;  %v510_v47 = vrot.slane %v2281_v41, 1  ;;  %v3279_v53 = vcombine.low %v201_v51, %v202_v52  ;;  %v2219_v41 = vld [vmem:[%s3115_s6 + $0x18] sm:$0xe] }
  0x4b   : > { %1727 = vmatprep.mubr.bf16.mxu1 %v3215_v48  ;;  %1630 = vmatprep.mubr.bf16.mxu0 %v413_v5  ;;  %v507_v21 = vrot.slane %v2280_v14, 1  ;;  %v2869_v5 = vld [vmem:[%s3687_s1 + $0x178] sm:$0xff]  }
  0x4c   : > { %2547 = vmatprep.subr.bf16.mxu0 %v2849_v4  ;;  %2610 = vmatpush3.bf16.msra.mxu1 %v2861_v49  ;;  %v512_v58 = vsel %vm494_vm0, %v510_v47, %v511_v42  ;;  %v439_v62 = vshrl.u32 %v3279_v53, 16  ;;  %v441_v63 = vshll.u32 %v3279_v53, 16  ;;  %v2282_v4 = vcombine.low %v219_v61, %v202_v52 }
  0x4d   : > { %v509_v33 = vsel %vm494_vm0, %v507_v21, %v508_v18  ;;  %2611 = vmatprep.subr.bf16.mxu1 %v2862_v56  ;;  %v204_v18 = vld [vmem:[%s3115_s6 + $0x58] sm:$0xf]  ;;  %v2865_v21 = vld [vmem:[%s3115_s6 + $0x5c] ss:$0 sps:$4 sm:$0x11]   ;;  %v2301_v52 = vcombine.low %v2219_v41, %v3151_v60 }
  0x4e   : > { %2548 = vmatpush3.bf16.msra.mxu0 %v2851_v15  ;;  %v513_v11 = vrot.slane %v2282_v4, 1  ;;  %v2218_v15 = vld [vmem:[%s3115_s6 + $0xc] sm:$0xe]  ;;  %v2267_v20 = vcombine.low %v203_v17, %v204_v18  ;;  %v458_v30 = vshll.u32 %v2865_v21, 16 }
  0x4f   : > { %2549 = vmatprep.subr.bf16.mxu0 %v2858_v22  ;;  %v2208_v22 = vld [vmem:[%s3115_s6 + $0x60] sm:$0xf] }
  0x50   : > { %2612 = vmatpush3.bf16.msra.mxu1 %v2863_v3  ;;  %v515_v24 = vsel %vm494_vm0, %v513_v11, %v514_v9  ;;  %v3325_v32 = vcombine.low %v2208_v22, %v3321_v25  ;;  %v2879_v4 = vld [vmem:[%s3115_s6 + $0x20] ss:$0 sps:$4 sm:$0x11]   ;;  %v2230_v9 = vld [vmem:[%s3115_s6 + $0x24] sm:$0xf] }
  0x51   : > { %1631 = vmatmul.mubr.bf16.gmra.mrb[12].mxu0 %v2263_v44  ;;  %v431_v44 = vrot.slane %v429_v37, 1  ;;  %2613 = vmatprep.subr.bf16.mxu1 %v2870_v10  ;;  %v2283_v37 = vcombine.low %v220_v26, %v204_v18  ;;  %v3365_v10 = vld [vmem:[%s3115_s6 + $0x28] sm:$0xf]  ;;  %v731_v17 = vrot.slane %v2879_v4, 1 }
  0x52   : > { %1728 = vmatmul.mubr.bf16.gmra.mrb[12].mxu1 %v506_v6  ;;  %1638 = vmatprep.mubr.bf16.mxu0 %v425_v28  ;;  %v443_v6 = vrot.slane %v441_v63, 1  ;;  %v451_v28 = vshrl.u32 %v2267_v20, 16  ;;  %v3371_v18 = vld [vmem:[%s3115_s6 + $0x2c] ss:$0 sps:$4 sm:$0x11]  }
  0x53   : > { %1735 = vmatprep.mubr.bf16.mxu1 %v3239_v12  ;;  %2550 = vmatpush3.bf16.msra.mxu0 %v2860_v40  ;;  %v432_v50 = vor.u32 %v431_v44, %v427_v36  ;;  %v2300_v36 = vcombine.low %v2218_v15, %v3131_v39  ;;  %v602_v40 = vshll.u32 %v3134_v43, 16  ;;  %v460_v44 = vrot.slane %v458_v30, 1  ;;  %v3341_v39 = vld [vmem:[%s3687_s1 + $0x200] sm:$0xff]  }
  0x54   : > { %2551 = vmatprep.subr.bf16.mxu0 %v2869_v5  ;;  %v444_v14 = vor.u32 %v443_v6, %v439_v62  ;;  %2614 = vmatpush3.bf16.msra.mxu1 %v2872_v23  ;;  %v516_v47 = vrot.slane %v2283_v37, 1  ;;  %v3356_v62 = vld [vmem:[%s3115_s6 + $0x20] ss:$0 sps:$4 sm:$0x11]   ;;  %v614_v5 = vshll.u32 %v3158_v2, 16  ;;  %v3368_v15 = vcombine.low %v2230_v9, %v3365_v10 }
  0x55   : > { %v437_v57 = vsel %vm365_vm1, %v432_v50, %v436_v45  ;;  %v517_v45 = vrot.slane %v2865_v21, 1  ;;  %v2875_v50 = vld [vmem:[%s3115_s6 + $0x14] ss:$0 sps:$4 sm:$0x11]   ;;  %v727_v51 = vrot.slane %v2300_v36, 1  ;;  %v604_v56 = vrot.slane %v602_v40, 1 }
  0x56   : > { %v839_v3 = vshll.u32 %v3356_v62, 16  ;;  %v2220_v6 = vld [vmem:[%s3115_s6 + $0x24] sm:$0xe]  ;;  %v844_v22 = vshrl.u32 %v3368_v15, 16  ;;  %v846_v23 = vshll.u32 %v3368_v15, 16  ;;  %v616_v26 = vrot.slane %v614_v5, 1 }
  0x57   : > { %2552 = vmatpush3.bf16.msra.mxu0 %v2871_v13  ;;  %v2232_v36 = vld [vmem:[%s3115_s6 + $0x30] sm:$0xf]  ;;  %v3384_v37 = vld [vmem:[%s3115_s6 + $0x34] sm:$0xf] }
  0x58   : > { %2681 = vmatprep.subr.bf16.mxu0 %v3341_v39  ;;  %v841_v13 = vrot.slane %v839_v3, 1  ;;  %v3389_v41 = vcombine.low %v2232_v36, %v3384_v37  ;;  %v3415_v5 = vld [vmem:[%s3115_s6 + $0x44] ss:$0 sps:$4 sm:$0x11]  }
  0x59   : > { %1639 = vmatmul.mubr.bf16.gmra.mrb[16].mxu0 %v2264_v0  ;;  %v446_v0 = vshll.u32 %v2854_v54, 16  ;;  %v518_v54 = vsel %vm494_vm0, %v516_v47, %v517_v45  ;;  %v3394_v45 = vld [vmem:[%s3115_s6 + $0x38] ss:$0 sps:$4 sm:$0x11]  }
  0x5a   : > { %1736 = vmatmul.mubr.bf16.gmra.mrb[16].mxu1 %v509_v33  ;;  %1646 = vmatprep.mubr.bf16.mxu0 %v437_v57  ;;  %v2873_v33 = vld [vmem:[%s3687_s1 + $0x1f8] sm:$0xff]   ;;  %v607_v57 = vshll.u32 %v2875_v50, 16  ;;  %v856_v47 = vshrl.u32 %v3389_v41, 16 }
  0x5b   : > { %1743 = vmatprep.mubr.bf16.mxu1 %v3267_v34  ;;  %v448_v8 = vrot.slane %v446_v0, 1  ;;  %2615 = vmatprep.subr.bf16.mxu1 %v2873_v33  ;;  %v848_v33 = vrot.slane %v846_v23, 1  ;;  %v2236_v23 = vld [vmem:[%s3115_s6 + $0x48] sm:$0xf] }
  0x5c   : > { %2616 = vmatpush3.bf16.msra.mxu1 %v2874_v38  ;;  %v626_v38 = vshll.u32 %v3190_v27, 16 }
  0x5d   : > { %v449_v16 = vsel %vm365_vm1, %v444_v14, %v448_v8  ;;  %2713 = vmatprep.subr.bf16.mxu1 %v3341_v39  ;;  %v730_v8 = vrot.slane %v2301_v52, 1  ;;  %v609_v14 = vrot.slane %v607_v57, 1  ;;  %v863_v52 = vshll.u32 %v3394_v45, 16 }
  0x61   : > { %1647 = vmatmul.mubr.bf16.gmra.mrb[20].mxu0 %v2265_v29  ;;  %v453_v29 = vshll.u32 %v2267_v20, 16 }
  0x62   : > { %1744 = vmatmul.mubr.bf16.gmra.mrb[20].mxu1 %v512_v58  ;;  %1654 = vmatprep.mubr.bf16.mxu0 %v449_v16  ;;  %v728_v58 = vrot.slane %v2875_v50, 1  ;;  %v605_v16 = vor.u32 %v604_v56, %v600_v35  ;;  %v619_v35 = vshll.u32 %v2879_v4, 16  ;;  %v624_v4 = vshrl.u32 %v3190_v27, 16 }
  0x63   : > { %1751 = vmatprep.mubr.bf16.mxu1 %v3295_v1  ;;  %v455_v42 = vrot.slane %v453_v29, 1  ;;  %v2302_v29 = vcombine.low %v2220_v6, %v3179_v19  ;;  %v732_v19 = vsel %vm494_vm0, %v730_v8, %v731_v17 }
  0x64   : > { %v729_v63 = vsel %vm494_vm0, %v727_v51, %v728_v58  ;;  %v621_v51 = vrot.slane %v619_v35, 1  ;;  %v2234_v58 = vld [vmem:[%s3115_s6 + $0x3c] sm:$0xf] }
  0x65   : > { %v456_v43 = vor.u32 %v455_v42, %v451_v28  ;;  %v2882_v28 = vld [vmem:[%s3687_s1 + $0x208] sm:$0xff]   ;;  %v849_v42 = vor.u32 %v848_v33, %v844_v22  ;;  %v733_v56 = vrot.slane %v2302_v29, 1 }
  0x67   : > { %v461_v49 = vsel %vm365_vm1, %v456_v43, %v460_v44  ;;  %v2883_v44 = vld [vmem:[%s3115_s6 + $0x2c] ss:$0 sps:$4 sm:$0x11]   ;;  %v858_v43 = vshll.u32 %v3389_v41, 16 }
  0x69   : > { %1655 = vmatmul.mubr.bf16.gmra.mrb[24].mxu0 %v3279_v53  ;;  %v3352_v53 = vld [vmem:[%s3115_s6 + $0x1c] sm:$0xf]  ;;  %v860_v57 = vrot.slane %v858_v43, 1  ;;  %v3450_v43 = vld [vmem:[%s3115_s6 + $0x58] sm:$0xf] }
  0x6a   : > { %1752 = vmatmul.mubr.bf16.gmra.mrb[24].mxu1 %v515_v24  ;;  %1662 = vmatprep.mubr.bf16.mxu0 %v461_v49  ;;  %v2308_v61 = vcombine.low %v2228_v55, %v3352_v53  ;;  %v612_v24 = vshrl.u32 %v3158_v2, 16  ;;  %v610_v2 = vsel %vm365_vm1, %v605_v16, %v609_v14  ;;  %v2221_v55 = vld [vmem:[%s3115_s6 + $0x30] sm:$0xe]  ;;  %v2887_v14 = vld [vmem:[%s3115_s6 + $0x38] ss:$0 sps:$4 sm:$0x11]  }
  0x6b   : > { %1759 = vmatprep.mubr.bf16.mxu1 %v3325_v32  ;;  %v861_v3 = vor.u32 %v860_v57, %v856_v47  ;;  %v875_v16 = vshll.u32 %v3415_v5, 16  ;;  %v2303_v17 = vcombine.low %v2221_v55, %v3209_v46  ;;  %v2238_v47 = vld [vmem:[%s3115_s6 + $0x54] sm:$0xf] }
  0x6c   : > { %v832_v60 = vshrl.u32 %v2308_v61, 16  ;;  %v834_v0 = vshll.u32 %v2308_v61, 16  ;;  %v617_v50 = vor.u32 %v616_v26, %v612_v24  ;;  %v2222_v24 = vld [vmem:[%s3115_s6 + $0x3c] sm:$0xe] }
  0x6d   : > { %v877_v29 = vrot.slane %v875_v16, 1 }
  0x6e   : > { %v836_v11 = vrot.slane %v834_v0, 1  ;;  %v622_v6 = vsel %vm365_vm1, %v617_v50, %v621_v51 }
  0x70   : > { %v837_v21 = vor.u32 %v836_v11, %v832_v60  ;;  %v865_v60 = vrot.slane %v863_v52, 1  ;;  %v628_v11 = vrot.slane %v626_v38, 1  ;;  %v736_v38 = vrot.slane %v2303_v17, 1 }
  0x71   : > { %1663 = vmatmul.mubr.bf16.gmra.mrb[28].mxu0 %v2267_v20  ;;  %v851_v20 = vshll.u32 %v3371_v18, 16  ;;  %v3455_v52 = vcombine.low %v2238_v47, %v3450_v43 }
  0x72   : > { %1760 = vmatmul.mubr.bf16.gmra.mrb[28].mxu1 %v518_v54  ;;  %1800 = vmatprep.mubr.bf16.mxu0 %v729_v63  ;;  %v842_v30 = vsel %vm365_vm1, %v837_v21, %v841_v13  ;;  %v2886_v54 = vld [vmem:[%s3687_s1 + $0x210] sm:$0xff]   ;;  %v734_v63 = vrot.slane %v2883_v44, 1  ;;  %v866_v27 = vsel %vm365_vm1, %v861_v3, %v865_v60  ;;  %v631_v13 = vshll.u32 %v2883_v44, 16  ;;  %v3466_v60 = vld [vmem:[%s3115_s6 + $0x5c] ss:$0 sps:$4 sm:$0x11]  }
  0x73   : > { %1897 = vmatprep.mubr.bf16.mxu1 %v842_v30  ;;  %v853_v40 = vrot.slane %v851_v20, 1  ;;  %v3431_v20 = vld [vmem:[%s3115_s6 + $0x4c] sm:$0xf]  ;;  %v2894_v30 = vld [vmem:[%s3687_s1 + $0x220] sm:$0xff]   ;;  %v629_v33 = vor.u32 %v628_v11, %v624_v4  ;;  %v894_v3 = vshll.u32 %v3455_v52, 16  ;;  %v892_v17 = vshrl.u32 %v3455_v52, 16 }
  0x74   : > { %v735_v21 = vsel %vm494_vm0, %v733_v56, %v734_v63  ;;  %v3435_v26 = vcombine.low %v2236_v23, %v3431_v20  ;;  %v633_v35 = vrot.slane %v631_v13, 1  ;;  %v636_v56 = vshrl.u32 %v3215_v48, 16  ;;  %v2223_v11 = vld [vmem:[%s3115_s6 + $0x48] sm:$0xe] }
  0x75   : > { %v854_v49 = vsel %vm365_vm1, %v849_v42, %v853_v40  ;;  %v643_v40 = vshll.u32 %v2887_v14, 16  ;;  %v648_v13 = vshrl.u32 %v3239_v12, 16 }
  0x76   : > { %v882_v36 = vshll.u32 %v3435_v26, 16  ;;  %v880_v42 = vshrl.u32 %v3435_v26, 16  ;;  %v634_v55 = vsel %vm365_vm1, %v629_v33, %v633_v35 }
  0x77   : > { %v645_v63 = vrot.slane %v643_v40, 1  ;;  %v3494_v40 = vld [vmem:[%s3115_s6 + $0x68] ss:$0 sps:$4 sm:$0x11]  }
  0x78   : > { %v884_v51 = vrot.slane %v882_v36, 1 }
  0x79   : > { %1801 = vmatmul.mubr.bf16.vlgmr.msra.gmra.mrb[32].mxu0 %v610_v2  ;;  %v737_v2 = vrot.slane %v2887_v14, 1 }
  0x7a   : > { %1898 = vmatmul.mubr.bf16.vlgmr.msra.gmra.mrb[32].mxu1 %v2308_v61  ;;  %2682 = vmatpush3.bf16.msra.mxu0 %v3341_v39  ;;  %v3408_v61 = vld [vmem:[%s3115_s6 + $0x40] sm:$0xf] }
  0x7b   : > { %2721 = vmatpush3.bf16.msra.mxu1 %v3341_v39  ;;  %1808 = vmatprep.mubr.bf16.mxu0 %v732_v19  ;;  %v3411_v0 = vcombine.low %v2234_v58, %v3408_v61  ;;  %v2890_v39 = vld [vmem:[%s3687_s1 + $0x218] sm:$0xff]   ;;  %v2891_v19 = vld [vmem:[%s3115_s6 + $0x44] ss:$0 sps:$4 sm:$0x11]   ;;  %v738_v58 = vsel %vm494_vm0, %v736_v38, %v737_v2 }
  0x7c   : > { %2714 = vmatprep.subr.bf16.mxu1 %v2882_v28  ;;  %1905 = vmatprep.mubr.bf16.mxu1 %v854_v49  ;;  %v2304_v49 = vcombine.low %v2222_v24, %v3235_v7  ;;  %v650_v7 = vshll.u32 %v3239_v12, 16  ;;  %v740_v4 = vrot.slane %v2891_v19, 1  ;;  %v655_v16 = vshll.u32 %v2891_v19, 16  ;;  %v3499_v19 = vld [vmem:[%s3115_s6 + $0x70] sm:$0xf] }
  0x7d   : > { %2683 = vmatprep.subr.bf16.mxu0 %v2882_v28  ;;  %v868_v8 = vshrl.u32 %v3411_v0, 16  ;;  %v870_v9 = vshll.u32 %v3411_v0, 16 }
  0x7e   : > { %2684 = vmatpush3.bf16.msra.mxu0 %v2882_v28  ;;  %v652_v14 = vrot.slane %v650_v7, 1  ;;  %v657_v36 = vrot.slane %v655_v16, 1  ;;  %v2225_v16 = vld [vmem:[%s3115_s6 + $0x60] sm:$0xe] }
  0x7f   : > { %2722 = vmatpush3.bf16.msra.mxu1 %v2882_v28  ;;  %2685 = vmatprep.subr.bf16.mxu0 %v2886_v54  ;;  %v872_v22 = vrot.slane %v870_v9, 1  ;;  %v638_v28 = vshll.u32 %v3215_v48, 16  ;;  %v739_v48 = vrot.slane %v2304_v49, 1  ;;  %v2224_v49 = vld [vmem:[%s3115_s6 + $0x54] sm:$0xe] }
  0x80   : > { %2715 = vmatprep.subr.bf16.mxu1 %v2886_v54  ;;  %v653_v35 = vor.u32 %v652_v14, %v648_v13 }
  0x81   : > { %1809 = vmatmul.mubr.bf16.gmra.mrb[36].mxu0 %v622_v6  ;;  %v873_v46 = vor.u32 %v872_v22, %v868_v8  ;;  %v640_v57 = vrot.slane %v638_v28, 1  ;;  %v2240_v8 = vld [vmem:[%s3115_s6 + $0x60] sm:$0xf]  ;;  %v899_v22 = vshll.u32 %v3466_v60, 16  ;;  %v2906_v28 = vld [vmem:[%s3687_s1 + $0x238] sm:$0xff]   ;;  %v741_v33 = vsel %vm494_vm0, %v739_v48, %v740_v4 }
  0x82   : > { %1906 = vmatmul.mubr.bf16.gmra.mrb[36].mxu1 %v3368_v15  ;;  %v3439_v15 = vld [vmem:[%s3115_s6 + $0x50] ss:$0 sps:$4 sm:$0x11]   ;;  %1816 = vmatprep.mubr.bf16.mxu0 %v735_v21  ;;  %v896_v21 = vrot.slane %v894_v3, 1 }
  0x83   : > { %1913 = vmatprep.mubr.bf16.mxu1 %v866_v27  ;;  %2723 = vmatpush3.bf16.msra.mxu1 %v2886_v54  ;;  %v887_v44 = vshll.u32 %v3439_v15, 16  ;;  %v878_v50 = vsel %vm365_vm1, %v873_v46, %v877_v29  ;;  %v641_v9 = vor.u32 %v640_v57, %v636_v56  ;;  %v3474_v27 = vld [vmem:[%s3115_s6 + $0x64] sm:$0xf]  ;;  %v2895_v46 = vld [vmem:[%s3115_s6 + $0x50] ss:$0 sps:$4 sm:$0x11]  }
  0x84   : > { %2716 = vmatprep.subr.bf16.mxu1 %v2890_v39  ;;  %2686 = vmatpush3.bf16.msra.mxu0 %v2886_v54  ;;  %v2898_v54 = vld [vmem:[%s3687_s1 + $0x228] sm:$0xff]   ;;  %v3482_v24 = vcombine.low %v2240_v8, %v3474_v27  ;;  %v662_v29 = vshll.u32 %v3267_v34, 16  ;;  %v897_v38 = vor.u32 %v896_v21, %v892_v17  ;;  %v901_v2 = vrot.slane %v899_v22, 1 }
  0x85   : > { %2687 = vmatprep.subr.bf16.mxu0 %v2890_v39  ;;  %v889_v6 = vrot.slane %v887_v44, 1  ;;  %v646_v12 = vsel %vm365_vm1, %v641_v9, %v645_v63  ;;  %v743_v47 = vrot.slane %v2895_v46, 1  ;;  %v911_v57 = vshll.u32 %v3494_v40, 16 }
  0x86   : > { %v660_v63 = vshrl.u32 %v3267_v34, 16  ;;  %v664_v3 = vrot.slane %v662_v29, 1  ;;  %v667_v48 = vshll.u32 %v2895_v46, 16  ;;  %v3521_v34 = vld [vmem:[%s3115_s6 + $0x74] ss:$0 sps:$4 sm:$0x11]  }
  0x87   : > { %2724 = vmatpush3.bf16.msra.mxu1 %v2890_v39 }
  0x88   : > { %2717 = vmatprep.subr.bf16.mxu1 %v2894_v30  ;;  %2688 = vmatpush3.bf16.msra.mxu0 %v2890_v39  ;;  %v885_v39 = vor.u32 %v884_v51, %v880_v42  ;;  %v2253_v42 = vld [vmem:[%s3115_s6 + $0x24] sm:$0xe]  ;;  %v902_v51 = vsel %vm365_vm1, %v897_v38, %v901_v2  ;;  %v686_v2 = vshll.u32 %v3325_v32, 16 }
  0x89   : > { %2689 = vmatprep.subr.bf16.mxu0 %v2894_v30  ;;  %1817 = vmatmul.mubr.bf16.gmra.mrb[40].mxu0 %v634_v55  ;;  %v2325_v55 = vcombine.low %v2253_v42, %v3365_v10 }
  0x8a   : > { %1914 = vmatmul.mubr.bf16.gmra.mrb[40].mxu1 %v3389_v41  ;;  %v2902_v41 = vld [vmem:[%s3687_s1 + $0x230] sm:$0xff]   ;;  %1824 = vmatprep.mubr.bf16.mxu0 %v738_v58  ;;  %v890_v23 = vsel %vm365_vm1, %v885_v39, %v889_v6  ;;  %v963_v58 = vrot.slane %v3371_v18, 1  ;;  %v2306_v39 = vcombine.low %v2224_v49, %v3289_v59  ;;  %v2899_v6 = vld [vmem:[%s3115_s6 + $0x5c] ss:$0 sps:$4 sm:$0x11]   ;;  %v665_v59 = vor.u32 %v664_v3, %v660_v63 }
  0x8b   : > { %1921 = vmatprep.mubr.bf16.mxu1 %v878_v50  ;;  %2725 = vmatpush3.bf16.msra.mxu1 %v2894_v30  ;;  %v658_v50 = vsel %vm365_vm1, %v653_v35, %v657_v36  ;;  %v962_v4 = vrot.slane %v2325_v55, 1  ;;  %v746_v14 = vrot.slane %v2899_v6, 1  ;;  %v679_v29 = vshll.u32 %v2899_v6, 16  ;;  %v2903_v35 = vld [vmem:[%s3115_s6 + $0x68] ss:$0 sps:$4 sm:$0x11]  }
  0x8c   : > { %2718 = vmatprep.subr.bf16.mxu1 %v2898_v54  ;;  %2690 = vmatpush3.bf16.msra.mxu0 %v2894_v30  ;;  %v2305_v30 = vcombine.low %v2223_v11, %v3260_v31  ;;  %v906_v31 = vshll.u32 %v3482_v24, 16  ;;  %v674_v11 = vshll.u32 %v3295_v1, 16  ;;  %v745_v13 = vrot.slane %v2306_v39, 1  ;;  %v2254_v39 = vld [vmem:[%s3115_s6 + $0x30] sm:$0xe] }
  0x8d   : > { %2691 = vmatprep.subr.bf16.mxu0 %v2898_v54  ;;  %v3518_v8 = vsel %vm494_vm0, %v962_v4, %v963_v58  ;;  %v972_v58 = vrot.slane %v3439_v15, 1  ;;  %v960_v4 = vrot.slane %v3356_v62, 1  ;;  %v975_v62 = vrot.slane %v3466_v60, 1 }
  0x8e   : > { %v742_v44 = vrot.slane %v2305_v30, 1  ;;  %v908_v56 = vrot.slane %v906_v31, 1  ;;  %v676_v46 = vrot.slane %v674_v11, 1  ;;  %v2307_v30 = vcombine.low %v2225_v16, %v3321_v25  ;;  %v2259_v11 = vld [vmem:[%s3115_s6 + $0x6c] sm:$0xe] }
  0x8f   : > { %2726 = vmatpush3.bf16.msra.mxu1 %v2898_v54 }
  0x90   : > { %2719 = vmatprep.subr.bf16.mxu1 %v2902_v41  ;;  %2692 = vmatpush3.bf16.msra.mxu0 %v2898_v54  ;;  %v904_v54 = vshrl.u32 %v3482_v24, 16  ;;  %v744_v10 = vsel %vm494_vm0, %v742_v44, %v743_v47  ;;  %v748_v42 = vrot.slane %v2307_v30, 1  ;;  %v749_v44 = vrot.slane %v2903_v35, 1  ;;  %v2252_v47 = vld [vmem:[%s3115_s6 + $0x18] sm:$0xe] }
  0x91   : > { %2693 = vmatprep.subr.bf16.mxu0 %v2902_v41  ;;  %1825 = vmatmul.mubr.bf16.gmra.mrb[44].mxu0 %v646_v12  ;;  %v672_v12 = vshrl.u32 %v3295_v1, 16  ;;  %v2256_v1 = vld [vmem:[%s3115_s6 + $0x48] sm:$0xe] }
  0x92   : > { %1922 = vmatmul.mubr.bf16.gmra.mrb[44].mxu1 %v3411_v0  ;;  %1832 = vmatprep.mubr.bf16.mxu0 %v741_v33  ;;  %v2242_v0 = vld [vmem:[%s3115_s6 + $0x6c] sm:$0xf]  ;;  %v909_v18 = vor.u32 %v908_v56, %v904_v54  ;;  %v747_v33 = vsel %vm494_vm0, %v745_v13, %v746_v14  ;;  %v691_v54 = vshll.u32 %v2903_v35, 16  ;;  %v750_v55 = vsel %vm494_vm0, %v748_v42, %v749_v44 }
  0x93   : > { %1929 = vmatprep.mubr.bf16.mxu1 %v890_v23  ;;  %2727 = vmatpush3.bf16.msra.mxu1 %v2902_v41  ;;  %v3509_v7 = vcombine.low %v2242_v0, %v3499_v19  ;;  %v923_v23 = vshll.u32 %v3521_v34, 16  ;;  %v677_v31 = vor.u32 %v676_v46, %v672_v12  ;;  %v681_v0 = vrot.slane %v679_v29, 1 }
  0x94   : > { %2720 = vmatprep.subr.bf16.mxu1 %v2906_v28  ;;  %2694 = vmatpush3.bf16.msra.mxu0 %v2902_v41  ;;  %v913_v41 = vrot.slane %v911_v57, 1  ;;  %v2324_v56 = vcombine.low %v2252_v47, %v3352_v53  ;;  %v693_v3 = vrot.slane %v691_v54, 1  ;;  %v2331_v13 = vcombine.low %v2259_v11, %v3499_v19 }
  0x95   : > { %2695 = vmatprep.subr.bf16.mxu0 %v2906_v28  ;;  %v918_v9 = vshll.u32 %v3509_v7, 16  ;;  %v916_v21 = vshrl.u32 %v3509_v7, 16  ;;  %v925_v38 = vrot.slane %v923_v23, 1  ;;  %v682_v49 = vsel %vm365_vm1, %v677_v31, %v681_v0 }
  0x96   : > { %v914_v17 = vsel %vm365_vm1, %v909_v18, %v913_v41  ;;  %v2326_v18 = vcombine.low %v2254_v39, %v3384_v37  ;;  %v980_v16 = vrot.slane %v2331_v13, 1 }
  0x97   : > { %2728 = vmatpush3.bf16.msra.mxu1 %v2906_v28  ;;  %v920_v22 = vrot.slane %v918_v9, 1  ;;  %v978_v9 = vrot.slane %v3494_v40, 1  ;;  %v981_v40 = vrot.slane %v3521_v34, 1  ;;  %v3575_v34 = vld [vmem:[%s3688_s2] ss:$0 sm:$0xff] }
  0x98   : > { %2696 = vmatpush3.bf16.msra.mxu0 %v2906_v28 }
  0x99   : > { %1833 = vmatmul.mubr.bf16.gmra.mrb[48].mxu0 %v658_v50  ;;  %v921_v36 = vor.u32 %v920_v22, %v916_v21  ;;  %v684_v50 = vshrl.u32 %v3325_v32, 16  ;;  %v959_v32 = vrot.slane %v2324_v56, 1  ;;  %v982_v21 = vsel %vm494_vm0, %v980_v16, %v981_v40 }
  0x9a   : > { %1930 = vmatmul.mubr.bf16.gmra.mrb[48].mxu1 %v3435_v26  ;;  %1840 = vmatprep.mubr.bf16.mxu0 %v744_v10  ;;  %v669_v26 = vrot.slane %v667_v48, 1  ;;  %v2258_v48 = vld [vmem:[%s3115_s6 + $0x60] sm:$0xe] }
  0x9b   : > { %1937 = vmatprep.mubr.bf16.mxu1 %v902_v51  ;;  %v926_v25 = vsel %vm365_vm1, %v921_v36, %v925_v38  ;;  %v688_v51 = vrot.slane %v686_v2, 1  ;;  %v2330_v53 = vcombine.low %v2258_v48, %v3474_v27  ;;  %v961_v15 = vsel %vm494_vm0, %v959_v32, %v960_v4 }
  0x9c   : > { %v670_v28 = vsel %vm365_vm1, %v665_v59, %v669_v26  ;;  %v965_v59 = vrot.slane %v2326_v18, 1  ;;  %v966_v27 = vrot.slane %v3394_v45, 1  ;;  %v2255_v26 = vld [vmem:[%s3115_s6 + $0x3c] sm:$0xe] }
  0x9d   : > { %v689_v63 = vor.u32 %v688_v51, %v684_v50  ;;  %v2327_v14 = vcombine.low %v2255_v26, %v3408_v61 }
  0x9e   : > { %v967_v60 = vsel %vm494_vm0, %v965_v59, %v966_v27 }
  0x9f   : > { %v694_v6 = vsel %vm365_vm1, %v689_v63, %v693_v3  ;;  %v968_v45 = vrot.slane %v2327_v14, 1 }
  0xa1   : > { %1841 = vmatmul.mubr.bf16.gmra.mrb[52].mxu0 %v670_v28 }
  0xa2   : > { %1938 = vmatmul.mubr.bf16.gmra.mrb[52].mxu1 %v3455_v52  ;;  %1848 = vmatprep.mubr.bf16.mxu0 %v747_v33  ;;  %v2328_v52 = vcombine.low %v2256_v1, %v3431_v20  ;;  %v2257_v20 = vld [vmem:[%s3115_s6 + $0x54] sm:$0xe] }
  0xa3   : > { %1945 = vmatprep.mubr.bf16.mxu1 %v914_v17  ;;  %v969_v17 = vrot.slane %v3415_v5, 1 }
  0xa4   : > { %v971_v57 = vrot.slane %v2328_v52, 1 }
  0xa5   : > { %v970_v19 = vsel %vm494_vm0, %v968_v45, %v969_v17 }
  0xa6   : > { %v973_v10 = vsel %vm494_vm0, %v971_v57, %v972_v58 }
  0xa9   : > { %1849 = vmatmul.mubr.bf16.gmra.mrb[56].mxu0 %v682_v49 }
  0xaa   : > { %1946 = vmatmul.mubr.bf16.gmra.mrb[56].mxu1 %v3482_v24  ;;  %1856 = vmatprep.mubr.bf16.mxu0 %v750_v55  ;;  %v2329_v24 = vcombine.low %v2257_v20, %v3450_v43  ;;  %v977_v43 = vrot.slane %v2330_v53, 1 }
  0xab   : > { %1953 = vmatprep.mubr.bf16.mxu1 %v926_v25 }
  0xac   : > { %v974_v41 = vrot.slane %v2329_v24, 1  ;;  %v979_v37 = vsel %vm494_vm0, %v977_v43, %v978_v9 }
  0xb1   : > { %1857 = vmatmul.mubr.bf16.gmra.mrb[60].mxu0 %v694_v6 }
  0xb2   : > { %1954 = vmatmul.mubr.bf16.gmra.mrb[60].mxu1 %v3509_v7  ;;  %2697 = vmatprep.mubr.bf16.mxu0 %v961_v15  ;;  %v976_v7 = vsel %vm494_vm0, %v974_v41, %v975_v62 }
  0xb3   : > { %2705 = vmatprep.mubr.bf16.mxu1 %v973_v10 }
  0xb9   : > { %2698 = vmatmul.mubr.bf16.vlgmr.msra.gmra.mrb[64].mxu0 %v3518_v8 }
  0xba   : > { %2706 = vmatmul.mubr.bf16.vlgmr.msra.gmra.mrb[64].mxu1 %v976_v7  ;;  %2701 = vmatprep.mubr.bf16.mxu0 %v967_v60 }
  0xbb   : > { %2709 = vmatprep.mubr.bf16.mxu1 %v979_v37 }
  0xc1   : > { %2702 = vmatmul.mubr.bf16.gmra.mrb[68].mxu0 %v970_v19 }
  0xc2   : > { %2710 = vmatmul.mubr.bf16.gmra.mrb[68].mxu1 %v982_v21 }
 0x10c   : > { %v2425_v23 = vpop.f32.mrb[0].mxu0 }
 0x10d   : > { %v2489_v61 = vpop.f32.mrb[0].mxu1  ;;  %v2426_v8 = vpop.f32.mrb[1].mxu0 }
 0x10e   : > { %v2490_v22 = vpop.f32.mrb[1].mxu1  ;;  %v2427_v29 = vadd.f32 %v2426_v8, %v2425_v23  ;;  %v2428_v5 = vpop.f32.mrb[2].mxu0 }
 0x10f   : > { %v2491_v28 = vadd.f32 %v2490_v22, %v2489_v61  ;;  %v2492_v12 = vpop.f32.mrb[2].mxu1  ;;  %v2429_v33 = vpop.f32.mrb[3].mxu0 }
 0x110   : > { %v2493_v46 = vpop.f32.mrb[3].mxu1  ;;  %v1609_v35 = vadd.f32 %v2427_v29, %v3575_v34  ;;  %v2430_v36 = vadd.f32 %v2429_v33, %v2428_v5 }
 0x111   : > { %v2494_v30 = vadd.f32 %v2493_v46, %v2492_v12 }
 0x112   : > { %v1612_v38 = vadd.f32 %v2430_v36, %v3575_v34  ;;  %v3579_v2 = vadd.f32 %v2491_v28, %v1609_v35 }
 0x114   : > { %v3581_v1 = vadd.f32 %v2494_v30, %v1612_v38  ;;  %v2431_v42 = vpop.f32.mrb[4].mxu0 }
 0x115   : > { %v2495_v31 = vpop.f32.mrb[4].mxu1  ;;  %v2432_v25 = vpop.f32.mrb[5].mxu0 }
 0x116   : > { %v2496_v0 = vpop.f32.mrb[5].mxu1  ;;  %v2433_v49 = vadd.f32 %v2432_v25, %v2431_v42  ;;  %v2434_v50 = vpop.f32.mrb[6].mxu0 }
 0x117   : > { %v2497_v44 = vadd.f32 %v2496_v0, %v2495_v31  ;;  %v2498_v47 = vpop.f32.mrb[6].mxu1  ;;  %v2435_v54 = vpop.f32.mrb[7].mxu0 }
 0x118   : > { %v2499_v52 = vpop.f32.mrb[7].mxu1  ;;  %v1617_v55 = vadd.f32 %v2433_v49, %v3575_v34  ;;  %v2436_v56 = vadd.f32 %v2435_v54, %v2434_v50 }
 0x119   : > { %v2500_v51 = vadd.f32 %v2499_v52, %v2498_v47 }
 0x11a   : > { %v1620_v57 = vadd.f32 %v2436_v56, %v3575_v34  ;;  %v3585_v58 = vadd.f32 %v2497_v44, %v1617_v55 }
 0x11c   : > { %v3587_v3 = vadd.f32 %v2500_v51, %v1620_v57  ;;  %v2437_v48 = vpop.f32.mrb[8].mxu0 }
 0x11d   : > { %v2501_v20 = vpop.f32.mrb[8].mxu1  ;;  %v2438_v24 = vpop.f32.mrb[9].mxu0 }
 0x11e   : > { %v2502_v63 = vpop.f32.mrb[9].mxu1  ;;  %v2439_v10 = vadd.f32 %v2438_v24, %v2437_v48  ;;  %v2440_v53 = vpop.f32.mrb[10].mxu0 }
 0x11f   : > { %v2503_v32 = vadd.f32 %v2502_v63, %v2501_v20  ;;  %v2504_v4 = vpop.f32.mrb[10].mxu1  ;;  %v2441_v15 = vpop.f32.mrb[11].mxu0 }
 0x120   : > { %v2505_v39 = vpop.f32.mrb[11].mxu1  ;;  %v1625_v18 = vadd.f32 %v2439_v10, %v3575_v34  ;;  %v2442_v41 = vadd.f32 %v2441_v15, %v2440_v53 }
 0x121   : > { %v2506_v6 = vadd.f32 %v2505_v39, %v2504_v4 }
 0x122   : > { %v1628_v62 = vadd.f32 %v2442_v41, %v3575_v34  ;;  %v3591_v43 = vadd.f32 %v2503_v32, %v1625_v18 }
 0x124   : > { %v3593_v59 = vadd.f32 %v2506_v6, %v1628_v62  ;;  %v2443_v27 = vpop.f32.mrb[12].mxu0 }
 0x125   : > { %v2507_v9 = vpop.f32.mrb[12].mxu1  ;;  %v2444_v13 = vpop.f32.mrb[13].mxu0 }
 0x126   : > { %v2508_v11 = vpop.f32.mrb[13].mxu1  ;;  %v2445_v14 = vadd.f32 %v2444_v13, %v2443_v27  ;;  %v2446_v60 = vpop.f32.mrb[14].mxu0 }
 0x127   : > { %v2509_v26 = vadd.f32 %v2508_v11, %v2507_v9  ;;  %v2510_v7 = vpop.f32.mrb[14].mxu1  ;;  %v2447_v40 = vpop.f32.mrb[15].mxu0 }
 0x128   : > { %v2511_v37 = vpop.f32.mrb[15].mxu1  ;;  %v1633_v45 = vadd.f32 %v2445_v14, %v3575_v34  ;;  %v2448_v17 = vadd.f32 %v2447_v40, %v2446_v60 }
 0x129   : > { %v2512_v16 = vadd.f32 %v2511_v37, %v2510_v7 }
 0x12a   : > { %v1636_v21 = vadd.f32 %v2448_v17, %v3575_v34  ;;  %v3597_v19 = vadd.f32 %v2509_v26, %v1633_v45 }
 0x12c   : > { %v3599_v23 = vadd.f32 %v2512_v16, %v1636_v21  ;;  %v2449_v28 = vpop.f32.mrb[16].mxu0 }
 0x12d   : > { %v2513_v61 = vpop.f32.mrb[16].mxu1  ;;  %v2450_v46 = vpop.f32.mrb[17].mxu0 }
 0x12e   : > { %v2514_v22 = vpop.f32.mrb[17].mxu1  ;;  %v2451_v5 = vadd.f32 %v2450_v46, %v2449_v28  ;;  %v2452_v30 = vpop.f32.mrb[18].mxu0 }
 0x12f   : > { %v2515_v12 = vadd.f32 %v2514_v22, %v2513_v61  ;;  %v2516_v8 = vpop.f32.mrb[18].mxu1  ;;  %v2453_v35 = vpop.f32.mrb[19].mxu0 }
 0x130   : > { %v2517_v29 = vpop.f32.mrb[19].mxu1  ;;  %v1641_v36 = vadd.f32 %v2451_v5, %v3575_v34  ;;  %v2454_v38 = vadd.f32 %v2453_v35, %v2452_v30 }
 0x131   : > { %v2518_v33 = vadd.f32 %v2517_v29, %v2516_v8 }
 0x132   : > { %v1644_v31 = vadd.f32 %v2454_v38, %v3575_v34  ;;  %v3603_v0 = vadd.f32 %v2515_v12, %v1641_v36 }
 0x134   : > { %v3605_v47 = vadd.f32 %v2518_v33, %v1644_v31  ;;  %v2455_v25 = vpop.f32.mrb[20].mxu0 }
 0x135   : > { %v2519_v42 = vpop.f32.mrb[20].mxu1  ;;  %v2456_v50 = vpop.f32.mrb[21].mxu0 }
 0x136   : > { %v2520_v44 = vpop.f32.mrb[21].mxu1  ;;  %v2457_v54 = vadd.f32 %v2456_v50, %v2455_v25  ;;  %v2458_v55 = vpop.f32.mrb[22].mxu0 }
 0x137   : > { %v2521_v52 = vadd.f32 %v2520_v44, %v2519_v42  ;;  %v2522_v49 = vpop.f32.mrb[22].mxu1  ;;  %v2459_v57 = vpop.f32.mrb[23].mxu0 }
 0x138   : > { %v2523_v51 = vpop.f32.mrb[23].mxu1  ;;  %v1649_v20 = vadd.f32 %v2457_v54, %v3575_v34  ;;  %v2460_v63 = vadd.f32 %v2459_v57, %v2458_v55 }
 0x139   : > { %v2524_v56 = vadd.f32 %v2523_v51, %v2522_v49 }
 0x13a   : > { %v1652_v48 = vadd.f32 %v2460_v63, %v3575_v34  ;;  %v3609_v32 = vadd.f32 %v2521_v52, %v1649_v20 }
 0x13c   : > { %v3611_v39 = vadd.f32 %v2524_v56, %v1652_v48  ;;  %v2461_v10 = vpop.f32.mrb[24].mxu0 }
 0x13d   : > { %v2525_v4 = vpop.f32.mrb[24].mxu1  ;;  %v2462_v15 = vpop.f32.mrb[25].mxu0 }
 0x13e   : > { %v2526_v24 = vpop.f32.mrb[25].mxu1  ;;  %v2463_v41 = vadd.f32 %v2462_v15, %v2461_v10  ;;  %v2464_v62 = vpop.f32.mrb[26].mxu0 }
 0x13f   : > { %v2527_v53 = vadd.f32 %v2526_v24, %v2525_v4  ;;  %v2528_v6 = vpop.f32.mrb[26].mxu1  ;;  %v2465_v11 = vpop.f32.mrb[27].mxu0 }
 0x140   : > { %v2529_v18 = vpop.f32.mrb[27].mxu1  ;;  %v1657_v27 = vadd.f32 %v2463_v41, %v3575_v34  ;;  %v2466_v26 = vadd.f32 %v2465_v11, %v2464_v62 }
 0x141   : > { %v2530_v9 = vadd.f32 %v2529_v18, %v2528_v6 }
 0x142   : > { %v1660_v7 = vadd.f32 %v2466_v26, %v3575_v34  ;;  %v3615_v13 = vadd.f32 %v2527_v53, %v1657_v27 }
 0x144   : > { %v3617_v60 = vadd.f32 %v2530_v9, %v1660_v7  ;;  %v2467_v16 = vpop.f32.mrb[28].mxu0 }
 0x145   : > { %v2531_v37 = vpop.f32.mrb[28].mxu1  ;;  %v2468_v17 = vpop.f32.mrb[29].mxu0 }
 0x146   : > { %v2532_v14 = vpop.f32.mrb[29].mxu1  ;;  %v2469_v61 = vadd.f32 %v2468_v17, %v2467_v16  ;;  %v2470_v22 = vpop.f32.mrb[30].mxu0 }
 0x147   : > { %v2533_v40 = vadd.f32 %v2532_v14, %v2531_v37  ;;  %v2534_v45 = vpop.f32.mrb[30].mxu1  ;;  %v2471_v12 = vpop.f32.mrb[31].mxu0 }
 0x148   : > { %v2535_v21 = vpop.f32.mrb[31].mxu1  ;;  %v1665_v8 = vadd.f32 %v2469_v61, %v3575_v34  ;;  %v2472_v46 = vadd.f32 %v2471_v12, %v2470_v22 }
 0x149   : > { %v2536_v28 = vadd.f32 %v2535_v21, %v2534_v45 }
 0x14a   : > { %v1668_v29 = vadd.f32 %v2472_v46, %v3575_v34  ;;  %v3621_v5 = vadd.f32 %v2533_v40, %v1665_v8 }
 0x14c   : > { %v3623_v35 = vadd.f32 %v2536_v28, %v1668_v29  ;;  %v2553_v36 = vpop.f32.mrb[32].mxu0 }
 0x14d   : > { %v2617_v30 = vpop.f32.mrb[32].mxu1  ;;  %v2554_v42 = vpop.f32.mrb[33].mxu0 }
 0x14e   : > { %v2618_v33 = vpop.f32.mrb[33].mxu1  ;;  %v2555_v25 = vadd.f32 %v2554_v42, %v2553_v36  ;;  %v2556_v52 = vpop.f32.mrb[34].mxu0 }
 0x14f   : > { %v2619_v38 = vadd.f32 %v2618_v33, %v2617_v30  ;;  %v2620_v31 = vpop.f32.mrb[34].mxu1  ;;  %v2557_v50 = vpop.f32.mrb[35].mxu0 }
 0x150   : > { %v2621_v44 = vpop.f32.mrb[35].mxu1  ;;  %v1803_v51 = vadd.f32 %v2555_v25, %v3579_v2  ;;  %v2558_v54 = vadd.f32 %v2557_v50, %v2556_v52 }
 0x151   : > { %v2622_v49 = vadd.f32 %v2621_v44, %v2620_v31 }
 0x152   : > { %v1806_v34 = vadd.f32 %v2558_v54, %v3581_v1  ;;  %v3627_v56 = vadd.f32 %v2619_v38, %v1803_v51 }
 0x154   : > { %v2559_v20 = vpop.f32.mrb[36].mxu0  ;;  %v3629_v4 = vadd.f32 %v2622_v49, %v1806_v34 }
 0x155   : > { %v2623_v55 = vpop.f32.mrb[36].mxu1  ;;  %v2560_v24 = vpop.f32.mrb[37].mxu0 }
 0x156   : > { %v2624_v57 = vpop.f32.mrb[37].mxu1  ;;  %v2561_v53 = vadd.f32 %v2560_v24, %v2559_v20  ;;  %v2562_v6 = vpop.f32.mrb[38].mxu0 }
 0x157   : > { %v2625_v63 = vadd.f32 %v2624_v57, %v2623_v55  ;;  %v2626_v48 = vpop.f32.mrb[38].mxu1  ;;  %v2563_v18 = vpop.f32.mrb[39].mxu0 }
 0x158   : > { %v2627_v10 = vpop.f32.mrb[39].mxu1  ;;  %v1811_v2 = vadd.f32 %v2561_v53, %v3585_v58  ;;  %v2564_v41 = vadd.f32 %v2563_v18, %v2562_v6 }
 0x159   : > { %v2628_v15 = vadd.f32 %v2627_v10, %v2626_v48 }
 0x15a   : > { %v1814_v1 = vadd.f32 %v2564_v41, %v3587_v3  ;;  %v3633_v9 = vadd.f32 %v2625_v63, %v1811_v2 }
 0x15c   : > { %v2565_v27 = vpop.f32.mrb[40].mxu0  ;;  %v3635_v37 = vadd.f32 %v2628_v15, %v1814_v1 }
 0x15d   : > { %v2629_v62 = vpop.f32.mrb[40].mxu1  ;;  %v2566_v14 = vpop.f32.mrb[41].mxu0 }
 0x15e   : > { %v2630_v11 = vpop.f32.mrb[41].mxu1  ;;  %v2567_v40 = vadd.f32 %v2566_v14, %v2565_v27  ;;  %v2568_v45 = vpop.f32.mrb[42].mxu0 }
 0x15f   : > { %v2631_v26 = vadd.f32 %v2630_v11, %v2629_v62  ;;  %v2632_v7 = vpop.f32.mrb[42].mxu1  ;;  %v2569_v21 = vpop.f32.mrb[43].mxu0 }
 0x160   : > { %v2633_v16 = vpop.f32.mrb[43].mxu1  ;;  %v1819_v58 = vadd.f32 %v2567_v40, %v3591_v43  ;;  %v2570_v61 = vadd.f32 %v2569_v21, %v2568_v45 }
 0x161   : > { %v2634_v17 = vadd.f32 %v2633_v16, %v2632_v7 }
 0x162   : > { %v1822_v3 = vadd.f32 %v2570_v61, %v3593_v59  ;;  %v3639_v28 = vadd.f32 %v2631_v26, %v1819_v58 }
 0x164   : > { %v2571_v8 = vpop.f32.mrb[44].mxu0  ;;  %v3641_v30 = vadd.f32 %v2634_v17, %v1822_v3 }
 0x165   : > { %v2635_v22 = vpop.f32.mrb[44].mxu1  ;;  %v2572_v33 = vpop.f32.mrb[45].mxu0 }
 0x166   : > { %v2636_v12 = vpop.f32.mrb[45].mxu1  ;;  %v2573_v38 = vadd.f32 %v2572_v33, %v2571_v8  ;;  %v2574_v31 = vpop.f32.mrb[46].mxu0 }
 0x167   : > { %v2637_v46 = vadd.f32 %v2636_v12, %v2635_v22  ;;  %v2638_v29 = vpop.f32.mrb[46].mxu1  ;;  %v2575_v44 = vpop.f32.mrb[47].mxu0 }
 0x168   : > { %v2639_v36 = vpop.f32.mrb[47].mxu1  ;;  %v1827_v43 = vadd.f32 %v2573_v38, %v3597_v19  ;;  %v2576_v25 = vadd.f32 %v2575_v44, %v2574_v31 }
 0x169   : > { %v2640_v42 = vadd.f32 %v2639_v36, %v2638_v29 }
 0x16a   : > { %v1830_v59 = vadd.f32 %v2576_v25, %v3599_v23  ;;  %v3645_v49 = vadd.f32 %v2637_v46, %v1827_v43 }
 0x16c   : > { %v2577_v51 = vpop.f32.mrb[48].mxu0  ;;  %v3647_v55 = vadd.f32 %v2640_v42, %v1830_v59 }
 0x16d   : > { %v2641_v52 = vpop.f32.mrb[48].mxu1  ;;  %v2578_v57 = vpop.f32.mrb[49].mxu0 }
 0x16e   : > { %v2642_v50 = vpop.f32.mrb[49].mxu1  ;;  %v2579_v63 = vadd.f32 %v2578_v57, %v2577_v51  ;;  %v2580_v48 = vpop.f32.mrb[50].mxu0 }
 0x16f   : > { %v2643_v54 = vadd.f32 %v2642_v50, %v2641_v52  ;;  %v2644_v34 = vpop.f32.mrb[50].mxu1  ;;  %v2581_v10 = vpop.f32.mrb[51].mxu0 }
 0x170   : > { %v2645_v20 = vpop.f32.mrb[51].mxu1  ;;  %v1835_v19 = vadd.f32 %v2579_v63, %v3603_v0  ;;  %v2582_v53 = vadd.f32 %v2581_v10, %v2580_v48 }
 0x171   : > { %v2646_v24 = vadd.f32 %v2645_v20, %v2644_v34 }
 0x172   : > { %v1838_v23 = vadd.f32 %v2582_v53, %v3605_v47  ;;  %v1932_v15 = vadd.f32 %v2643_v54, %v1835_v19 }
 0x174   : > { %v2583_v2 = vpop.f32.mrb[52].mxu0  ;;  %v1935_v62 = vadd.f32 %v2646_v24, %v1838_v23 }
 0x175   : > { %v2647_v6 = vpop.f32.mrb[52].mxu1  ;;  %v2584_v11 = vpop.f32.mrb[53].mxu0 }
 0x176   : > { %v2648_v18 = vpop.f32.mrb[53].mxu1  ;;  %v2585_v26 = vadd.f32 %v2584_v11, %v2583_v2  ;;  %v2586_v7 = vpop.f32.mrb[54].mxu0 }
 0x177   : > { %v2649_v41 = vadd.f32 %v2648_v18, %v2647_v6  ;;  %v2650_v1 = vpop.f32.mrb[54].mxu1  ;;  %v2587_v16 = vpop.f32.mrb[55].mxu0 }
 0x178   : > { %v2651_v27 = vpop.f32.mrb[55].mxu1  ;;  %v1843_v40 = vadd.f32 %v2585_v26, %v3609_v32  ;;  %v2588_v45 = vadd.f32 %v2587_v16, %v2586_v7 }
 0x179   : > { %v2652_v14 = vadd.f32 %v2651_v27, %v2650_v1 }
 0x17a   : > { %v1846_v0 = vadd.f32 %v2588_v45, %v3611_v39  ;;  %v1940_v47 = vadd.f32 %v2649_v41, %v1843_v40 }
 0x17c   : > { %v2589_v58 = vpop.f32.mrb[56].mxu0  ;;  %v1943_v22 = vadd.f32 %v2652_v14, %v1846_v0 }
 0x17d   : > { %v2653_v17 = vpop.f32.mrb[56].mxu1  ;;  %v2590_v12 = vpop.f32.mrb[57].mxu0 }
 0x17e   : > { %v2654_v21 = vpop.f32.mrb[57].mxu1  ;;  %v2591_v46 = vadd.f32 %v2590_v12, %v2589_v58  ;;  %v2592_v29 = vpop.f32.mrb[58].mxu0 }
 0x17f   : > { %v2655_v61 = vadd.f32 %v2654_v21, %v2653_v17  ;;  %v2656_v3 = vpop.f32.mrb[58].mxu1  ;;  %v2593_v36 = vpop.f32.mrb[59].mxu0 }
 0x180   : > { %v2657_v8 = vpop.f32.mrb[59].mxu1  ;;  %v1851_v38 = vadd.f32 %v2591_v46, %v3615_v13  ;;  %v2594_v31 = vadd.f32 %v2593_v36, %v2592_v29 }
 0x181   : > { %v2658_v33 = vadd.f32 %v2657_v8, %v2656_v3 }
 0x182   : > { %v1854_v32 = vadd.f32 %v2594_v31, %v3617_v60  ;;  %v1948_v39 = vadd.f32 %v2655_v61, %v1851_v38 }
 0x184   : > { %v2595_v43 = vpop.f32.mrb[60].mxu0  ;;  %v1951_v52 = vadd.f32 %v2658_v33, %v1854_v32 }
 0x185   : > { %v2659_v42 = vpop.f32.mrb[60].mxu1  ;;  %v2596_v50 = vpop.f32.mrb[61].mxu0 }
 0x186   : > { %v2660_v44 = vpop.f32.mrb[61].mxu1  ;;  %v2597_v54 = vadd.f32 %v2596_v50, %v2595_v43  ;;  %v2598_v34 = vpop.f32.mrb[62].mxu0 }
 0x187   : > { %v2661_v25 = vadd.f32 %v2660_v44, %v2659_v42  ;;  %v2662_v59 = vpop.f32.mrb[62].mxu1  ;;  %v2599_v20 = vpop.f32.mrb[63].mxu0 }
 0x188   : > { %v2663_v51 = vpop.f32.mrb[63].mxu1  ;;  %v1859_v63 = vadd.f32 %v2597_v54, %v3621_v5  ;;  %v2600_v48 = vadd.f32 %v2599_v20, %v2598_v34 }
 0x189   : > { %v2664_v57 = vadd.f32 %v2663_v51, %v2662_v59 }
 0x18a   : > { %v1862_v13 = vadd.f32 %v2600_v48, %v3623_v35  ;;  %v1956_v60 = vadd.f32 %v2661_v25, %v1859_v63 }
 0x18c   : > { %v2699_v53 = vpop.f32.mrb[64].mxu0  ;;  %v1959_v18 = vadd.f32 %v2664_v57, %v1862_v13 }
 0x18d   : > { %v2707_v24 = vpop.f32.mrb[64].mxu1  ;;  %v2005_v2 = vadd.f32 %v2699_v53, %v3633_v9  ;;  %v1996_v41 = vpop.f32.mrb[65].mxu0 }
 0x18e   : > { %v2037_v10 = vadd.f32 %v2707_v24, %v1940_v47  ;;  %v2028_v19 = vpop.f32.mrb[65].mxu1  ;;  %v1997_v27 = vadd.f32 %v1996_v41, %v3627_v56  ;;  %v2700_v26 = vpop.f32.mrb[66].mxu0 }
 0x18f   : > { %v2029_v23 = vadd.f32 %v2028_v19, %v1932_v15  ;;  %v2708_v6 = vpop.f32.mrb[66].mxu1  ;;  %v2008_v7 = vadd.f32 %v2700_v26, %v3635_v37  ;;  %v1999_v35 = vpop.f32.mrb[67].mxu0  ;;  %v2061_v17 = vmax.f32 %v2005_v2, 0.0 }
 0x190   : > { %v2040_v1 = vadd.f32 %v2708_v6, %v1943_v22  ;;  %v2031_v11 = vpop.f32.mrb[67].mxu1  ;;  %v2000_v14 = vadd.f32 %v1999_v35, %v3629_v4  ;;  %v2059_v16 = vmax.f32 %v1997_v27, 0.0 }
 0x191   : > { %v2032_v5 = vadd.f32 %v2031_v11, %v1935_v62  ;;  %v2062_v22 = vmax.f32 %v2008_v7, 0.0  ;;  %v2067_v43 = vmax.f32 %v2029_v23, 0.0 }
 0x192   : > { %v2060_v40 = vmax.f32 %v2000_v14, 0.0 }
 0x193   : > { %v2068_v59 = vmax.f32 %v2032_v5, 0.0 }
 0x194   : > { %v2076_v47 = vadd.f32 %v2060_v40, %v2059_v16  ;;  %v2703_v9 = vpop.f32.mrb[68].mxu0 }
 0x195   : > { %v2711_v45 = vpop.f32.mrb[68].mxu1  ;;  %v2021_v61 = vadd.f32 %v2703_v9, %v3645_v49  ;;  %v2012_v56 = vpop.f32.mrb[69].mxu0 }
 0x196   : > { %v2053_v15 = vadd.f32 %v2711_v45, %v1956_v60  ;;  %v2044_v0 = vpop.f32.mrb[69].mxu1  ;;  %v2077_v37 = vadd.f32 %v2076_v47, %v2061_v17  ;;  %v2013_v12 = vadd.f32 %v2012_v56, %v3639_v28  ;;  %v2704_v4 = vpop.f32.mrb[70].mxu0  ;;  %v2069_v28 = vmax.f32 %v2037_v10, 0.0 }
 0x197   : > { %v2045_v21 = vadd.f32 %v2044_v0, %v1948_v39  ;;  %v2712_v58 = vpop.f32.mrb[70].mxu1  ;;  %v2024_v46 = vadd.f32 %v2704_v4, %v3647_v55  ;;  %v2015_v29 = vpop.f32.mrb[71].mxu0  ;;  %v2065_v42 = vmax.f32 %v2021_v61, 0.0 }
 0x198   : > { %v2056_v3 = vadd.f32 %v2712_v58, %v1959_v18  ;;  %v2047_v62 = vpop.f32.mrb[71].mxu1  ;;  %v2063_v33 = vmax.f32 %v2013_v12, 0.0  ;;  %v2078_v36 = vadd.f32 %v2077_v37, %v2062_v22  ;;  %v2016_v38 = vadd.f32 %v2015_v29, %v3641_v30  ;;  %v2075_v18 = vld [vmem:[#allocation2] sm:$0x1] }
 0x199   : > { %v2048_v8 = vadd.f32 %v2047_v62, %v1951_v52  ;;  %v2066_v39 = vmax.f32 %v2024_v46, 0.0  ;;  %v2070_v52 = vmax.f32 %v2040_v1, 0.0  ;;  %v2071_v55 = vmax.f32 %v2045_v21, 0.0 }
 0x19a   : > { %v2079_v31 = vadd.f32 %v2078_v36, %v2063_v33  ;;  %v2064_v32 = vmax.f32 %v2016_v38, 0.0  ;;  %v2073_v63 = vmax.f32 %v2053_v15, 0.0  ;;  %v2074_v48 = vmax.f32 %v2056_v3, 0.0 }
 0x19b   : > { %v2072_v57 = vmax.f32 %v2048_v8, 0.0 }
 0x19c   : > { %v2080_v49 = vadd.f32 %v2079_v31, %v2064_v32 }
 0x19e   : > { %v2081_v44 = vadd.f32 %v2080_v49, %v2065_v42 }
 0x1a0   : > { %v2082_v25 = vadd.f32 %v2081_v44, %v2066_v39 }
 0x1a2   : > { %v2083_v50 = vadd.f32 %v2082_v25, %v2067_v43 }
 0x1a4   : > { %v2084_v51 = vadd.f32 %v2083_v50, %v2068_v59 }
 0x1a6   : > { %v2085_v54 = vadd.f32 %v2084_v51, %v2069_v28 }
 0x1a8   : > { %v2086_v34 = vadd.f32 %v2085_v54, %v2070_v52 }
 0x1aa   : > { %v2087_v20 = vadd.f32 %v2086_v34, %v2071_v55 }
 0x1ac   : > { %v2088_v30 = vadd.f32 %v2087_v20, %v2072_v57 }
 0x1ae   : > { %v2089_v13 = vadd.f32 %v2088_v30, %v2073_v63 }
 0x1b0   : > { %v2090_v24 = vadd.f32 %v2089_v13, %v2074_v48 }
 0x1b2   : > { %v2091_v60 = vrot.slane %v2090_v24, 4 }
 0x1b4   : > { %v2092_v19 = vadd.f32 %v2091_v60, %v2090_v24 }
 0x1b6   : > { %v2093_v53 = vrot.slane %v2092_v19, 2 }
 0x1b8   : > { %v2094_v23 = vadd.f32 %v2093_v53, %v2092_v19 }
 0x1ba   : > { %v2095_v6 = vrot.slane %v2094_v23, 1  ;;  %2102 = sbr.rel (%p2405_p7) target bundleno = 619 (0x26b), region = 40 }
 0x1bc   : > { %v2096_v2 = vadd.f32 %v2095_v6, %v2094_v23 }
 0x1be   : > { %v2097_v10 = vadd.f32 %v2096_v2, %v2075_v18 }
 0x1c0   : > { %2098 = vst [vmem:[#allocation2] sm:$0x1] %v2097_v10 }
 0x1c7   : > { %v2103_v41 = vld [vmem:[#allocation2] sm:$0x1] }
 0x1c8   : > { %v2104_v1 = vmul.f32 0.001953125, %v2103_v41 }
 0x1ca   : > { %v2105_v11 = vmul.f32 %v2104_v1, %v2104_v1 }
 0x1cc   : > { %v2107_v27 = vsel %vm2106_vm2, %v2105_v11, 0.0 }
 0x1cd   : > { %2108 = vadd.xlane.f32.xlu0 %v2107_v27 }
 0x25a   : > { %v2109_v26 = vpop.xlane.xlu0 %2108 }
 0x25b   : > { %v2110_v5 = vmax.f32 %v2109_v26, 1e-24 }
 0x25d   : > { %2915 = vrsqrt.f32 %v2110_v5 }
 0x267   : > { %v2916_v7 = vpop.eup %2915 }
 0x268   : > { %v2112_v35 = vmul.f32 %v2916_v7, %v2104_v1 }
 0x26a   : > { %2113 = vst [vmem:[%s178_s22] sm:$0x1] %v2112_v35 }
 0x26b PF: > { %s13_s16 = sadd.s32 1, %s2955_s16   ;;  %s3690_s12 = smov %s2947_s14 }
 0x26c   : > { %p10_p8 = scmp.ge.s32.totalorder %s13_s16, 14   ;;  %s3691_s13 = smov %s2951_s15 }
 0x26d   : > { %s3692_s14 = smov %s3695_s17  ;;  %s3693_s15 = smov %s3699_s18 }
 0x26e   :  { %12 = sbr.rel (!%p10_p8) target bundleno = 3 (0x3), region = 73 }

</bundles_post_ra>
